<compile_context>
chip_gen: v6e
topology: v6e:2x2x1
jax: 0.10.0
libtpu: 0.0.40
codegen_flags: <defaults>
</compile_context>

<pallas_src>
import functools

import jax
import jax.numpy as jnp
from jax import lax
from jax.experimental import pallas as pl
from jax.experimental.pallas import tpu as pltpu


def _round_up(x, m):
    return ((x + m - 1) // m) * m


def _pad_to(x, shape):
    pads = [(0, t - s) for s, t in zip(x.shape, shape)]
    if all(p == (0, 0) for p in pads):
        return x
    return jnp.pad(x, pads)


def _alignment_attention_kernel(y_ref, my_ref, hs_ref, mh_ref,
                                wy_ref, wstep_ref, wpx_ref, w_ref,
                                out_ref, *, unroll=True):
    f32 = jnp.float32
    Y = y_ref[...]                        # (TB, S, H)  compute dtype
    mask_Y = my_ref[...]                  # (TB, S)     f32
    W_y = wy_ref[...]                     # (H, H)
    W_step = wstep_ref[...]               # (2H, 2H) = [[W_h, 0], [W_r, W_t]]
    W_px = wpx_ref[...]                   # (2H, H)  = [W_p ; W_x]
    w_vec = w_ref[...]                    # (1, H)      f32

    TB, S, H = Y.shape
    T = hs_ref.shape[0]
    cdt = Y.dtype

    # ---------------- loop-invariant work, hoisted out of the recurrence ------
    # Y @ W_y is time-invariant; reshape only collapses leading dims (S is a
    # multiple of 8) so it is layout-free.
    Wy = jnp.dot(Y.reshape(TB * S, H), W_y,
                 preferred_element_type=f32).reshape(TB, S, H).astype(cdt)
    neg_mask = -1000.0 * (1.0 - mask_Y)                                # (TB, S)
    # Materialize the w broadcast once (JAX does not CSE broadcast_in_dim).
    w_full = jnp.broadcast_to(w_vec.reshape(1, 1, H).astype(f32), (TB, S, H))

    def step(t, r):                                                    # r: (TB, H) f32
        h_t = hs_ref[t]                                                # (TB, H)
        # Single fused MXU launch per step:
        #   [h_t | r] @ [[W_h, 0], [W_r, W_t]] = [h_t@W_h + r@W_r | r@W_t]
        hr = jnp.concatenate([h_t, r.astype(cdt)], axis=-1)            # (TB, 2H)
        HW = jnp.dot(hr, W_step, preferred_element_type=f32)           # (TB, 2H)
        Wh = HW[:, :H]                                                 # h@W_h + r@W_r
        t_wt = jnp.tanh(HW[:, H:])                                     # tanh(r @ W_t)

        M = jnp.tanh(Wy + Wh[:, None, :])                              # (TB, S, H) f32
        wM = jnp.sum(M * w_full, axis=-1)                              # (TB, S)

        logits = wM + neg_mask
        logits = logits - jnp.max(logits, axis=1, keepdims=True)
        e = jnp.exp(logits)
        denom = jnp.sum(e, axis=1, keepdims=True)                      # (TB, 1)
        inv = pl.reciprocal(denom, approx=True)                        # EUP vrcp
        inv = inv * (2.0 - denom * inv)                                # Newton refine
        alpha = e * inv                                                # (TB, S)

        r_attn = jnp.sum(alpha[:, :, None] * Y, axis=1)                # (TB, H) f32
        r_t = r_attn + t_wt
        mask_t = mh_ref[:, pl.ds(t, 1)]                                # (TB, 1)
        return jnp.where(mask_t > 0.0, r_t, r)

    r0 = jnp.zeros((TB, H), f32)
    # T is static; full unroll gives the scheduler cross-iteration visibility.
    # For very long sequences pass unroll=2/4 from the wrapper instead.
    r_final = lax.fori_loop(0, T, step, r0, unroll=unroll)

    # Fused epilogue: tanh([r | h_last] @ [W_p ; W_x]) = tanh(r@W_p + h_last@W_x)
    h_last = hs_ref[T - 1]
    rh = jnp.concatenate([r_final.astype(cdt), h_last], axis=-1)
    h_star = jnp.tanh(jnp.dot(rh, W_px, preferred_element_type=f32))
    out_ref[...] = h_star.astype(out_ref.dtype)


def alignment_attention(Y, mask_Y, hidden_states, mask_H, params, *,
                        batch_tile=8, compute_dtype=jnp.float32, unroll=True):
    """Pallas wrapper reproducing Alignment_Attention_Layer.forward."""
    f32 = jnp.float32
    B, S, H = Y.shape
    T = hidden_states.shape[1]

    H_pad = _round_up(H, 128)                 # lane dim / MXU K,N
    S_pad = _round_up(S, 8)                   # sublane dim
    TB = _round_up(max(batch_tile, 8), 8)     # batch tile (MXU M); raise for big B
    B_pad = _round_up(B, TB)

    # ---- pad + cast inputs.  Padding is exactly neutral: padded H lanes stay 0,
    # padded S rows are -1000-masked, padded batch rows are sliced off. ----------
    Y_p = _pad_to(Y.astype(compute_dtype), (B_pad, S_pad, H_pad))
    mY_p = _pad_to(mask_Y.astype(f32), (B_pad, S_pad))
    # Time-major hidden states (one fused pad+transpose copy).
    # TODO(synk): callers that already hold hidden_states time-major should pass it
    # directly to skip this HBM round trip.
    hs_p = _pad_to(jnp.transpose(hidden_states, (1, 0, 2)).astype(compute_dtype),
                   (T, B_pad, H_pad))
    mH_p = _pad_to(mask_H.astype(f32), (B_pad, T))

    # ---- fold the per-step / epilogue weight pairs into single matmuls ---------
    def pad_w(w):
        return _pad_to(w.astype(f32), (H_pad, H_pad))

    W_y = pad_w(params["W_y"])
    W_h, W_r, W_t = pad_w(params["W_h"]), pad_w(params["W_r"]), pad_w(params["W_t"])
    W_p, W_x = pad_w(params["W_p"]), pad_w(params["W_x"])
    zero = jnp.zeros((H_pad, H_pad), f32)
    W_step = jnp.concatenate(
        [jnp.concatenate([W_h, zero], axis=1),
         jnp.concatenate([W_r, W_t], axis=1)], axis=0)                 # (2H, 2H)
    W_px = jnp.concatenate([W_p, W_x], axis=0)                         # (2H, H)
    w_vec = _pad_to(params["w"].astype(f32).reshape(1, H), (1, H_pad))

    W_y = W_y.astype(compute_dtype)
    W_step = W_step.astype(compute_dtype)
    W_px = W_px.astype(compute_dtype)

    # ---- VMEM budget: double-buffered input blocks + weights + live temporaries.
    ib = jnp.dtype(compute_dtype).itemsize
    blocks = (TB * S_pad * H_pad + T * TB * H_pad) * ib
    weights = (H_pad * H_pad + 4 * H_pad * H_pad + 2 * H_pad * H_pad + H_pad) * ib
    temps = 3 * TB * S_pad * H_pad * 4                                 # Wy, M, w_full
    need = 2 * blocks + weights + temps + (4 << 20)
    # NOTE: v7x has only 64 MiB physical VMEM -- shrink batch_tile if `need`
    # approaches that on a real workload.
    vmem_limit = int(min(max(need, 32 << 20), 96 << 20))

    grid = (B_pad // TB,)
    kernel = functools.partial(_alignment_attention_kernel, unroll=unroll)
    out = pl.pallas_call(
        kernel,
        out_shape=jax.ShapeDtypeStruct((B_pad, H_pad), f32),
        grid=grid,
        in_specs=[
            pl.BlockSpec((TB, S_pad, H_pad), lambda i: (i, 0, 0)),     # Y
            pl.BlockSpec((TB, S_pad), lambda i: (i, 0)),               # mask_Y
            pl.BlockSpec((T, TB, H_pad), lambda i: (0, i, 0)),         # hidden (T-major)
            pl.BlockSpec((TB, T), lambda i: (i, 0)),                   # mask_H
            pl.BlockSpec((H_pad, H_pad), lambda i: (0, 0)),            # W_y
            pl.BlockSpec((2 * H_pad, 2 * H_pad), lambda i: (0, 0)),    # [[W_h,0],[W_r,W_t]]
            pl.BlockSpec((2 * H_pad, H_pad), lambda i: (0, 0)),        # [W_p ; W_x]
            pl.BlockSpec((1, H_pad), lambda i: (0, 0)),                # w
        ],
        out_specs=pl.BlockSpec((TB, H_pad), lambda i: (i, 0)),
        compiler_params=pltpu.CompilerParams(
            dimension_semantics=("parallel",),
            vmem_limit_bytes=vmem_limit,
        ),
    )(Y_p, mY_p, hs_p, mH_p, W_y, W_step, W_px, w_vec)
    return out[:B, :H]


def reference_forward(Y, mask_Y, hidden_states, mask_H, params):
    """Pure-JAX reference mirroring the PyTorch semantics (for validation)."""
    B, S, H = Y.shape
    T = hidden_states.shape[1]
    r = jnp.zeros((B, H), jnp.float32)
    Wy = jnp.einsum("bsh,hk->bsk", Y, params["W_y"])
    for t in range(T):
        h_t = hidden_states[:, t, :]
        m_t = mask_H[:, t:t + 1]
        Wh = h_t @ params["W_h"] + r @ params["W_r"]
        M = jnp.tanh(Wy + Wh[:, None, :])
        wM = jnp.sum(M * params["w"][None, None, :], axis=-1)
        alpha = jax.nn.softmax(wM + -1000.0 * (1.0 - mask_Y), axis=1)
        r_t = jnp.einsum("bs,bsh->bh", alpha, Y) + jnp.tanh(r @ params["W_t"])
        r = r_t * m_t + r * (1.0 - m_t)
    return jnp.tanh(r @ params["W_p"] + hidden_states[:, -1, :] @ params["W_x"])


def init_params(key, hidden_size):
    """Deterministic init mirroring the module: torch.rand -> U[0,1); W_t orthogonal."""
    ks = jax.random.split(key, 7)
    p = {
        "W_y": jax.random.uniform(ks[0], (hidden_size, hidden_size), jnp.float32),
        "W_h": jax.random.uniform(ks[1], (hidden_size, hidden_size), jnp.float32),
        "W_r": jax.random.uniform(ks[2], (hidden_size, hidden_size), jnp.float32),
        "w":   jax.random.uniform(ks[3], (hidden_size,), jnp.float32),
        "W_p": jax.random.uniform(ks[4], (hidden_size, hidden_size), jnp.float32),
        "W_x": jax.random.uniform(ks[5], (hidden_size, hidden_size), jnp.float32),
    }
    q, _ = jnp.linalg.qr(jax.random.normal(ks[6], (hidden_size, hidden_size), jnp.float32))
    p["W_t"] = q.astype(jnp.float32)
    return p


if __name__ == "__main__":
    B, S, T, H = 2, 8, 8, 32   # batch, Y seq len, hidden_states seq len, hidden size

    key = jax.random.PRNGKey(0)
    k_y, k_hs, k_my, k_mh, k_p = jax.random.split(key, 5)

    Y = jax.random.normal(k_y, (B, S, H), jnp.float32)
    hidden_states = jax.random.normal(k_hs, (B, T, H), jnp.float32)

    mask_Y = (jax.random.uniform(k_my, (B, S)) > 0.25).astype(jnp.float32)
    mask_Y = mask_Y.at[:, 0].set(1.0)     # every row has >= 1 valid token
    mask_H = (jax.random.uniform(k_mh, (B, T)) > 0.25).astype(jnp.float32)
    mask_H = mask_H.at[:, 0].set(1.0)

    params = init_params(k_p, H)

    out = jax.block_until_ready(
        alignment_attention(Y, mask_Y, hidden_states, mask_H, params))
    ref = jax.block_until_ready(
        reference_forward(Y, mask_Y, hidden_states, mask_H, params))

    assert out.shape == (B, H)
    err = float(jnp.max(jnp.abs(out - ref)))
    assert jnp.allclose(out, ref, atol=1e-3, rtol=1e-3), f"max abs err {err}"

    print("KERNEL_OK")
</pallas_src>

<mosaic_0001>
module attributes {stable_mosaic.version = 11 : i64} {
  func.func @_alignment_attention_kernel(%arg0: i32, %arg1: memref<8x8x128xf32, #tpu.memory_space<vmem>>, %arg2: memref<8x8xf32, #tpu.memory_space<vmem>>, %arg3: memref<8x8x128xf32, #tpu.memory_space<vmem>>, %arg4: memref<8x8xf32, #tpu.memory_space<vmem>>, %arg5: memref<128x128xf32, #tpu.memory_space<vmem>>, %arg6: memref<256x256xf32, #tpu.memory_space<vmem>>, %arg7: memref<256x128xf32, #tpu.memory_space<vmem>>, %arg8: memref<1x128xf32, #tpu.memory_space<vmem>>, %arg9: memref<8x128xf32, #tpu.memory_space<vmem>>) attributes {dimension_semantics = [#tpu.dimension_semantics<parallel>], iteration_bounds = array<i64: 1>, scalar_prefetch = 0 : i64, scratch_operands = 0 : i64, tpu.core_type = #tpu.core_type<tc>, window_params = [{transform_indices = @transform_0, window_bounds = array<i64: 8, 8, 128>}, {transform_indices = @transform_1, window_bounds = array<i64: 8, 8>}, {transform_indices = @transform_2, window_bounds = array<i64: 8, 8, 128>}, {transform_indices = @transform_3, window_bounds = array<i64: 8, 8>}, {pipeline_mode = #tpu.pipeline_mode<synchronous>, transform_indices = @transform_4, window_bounds = array<i64: 128, 128>}, {pipeline_mode = #tpu.pipeline_mode<synchronous>, transform_indices = @transform_5, window_bounds = array<i64: 256, 256>}, {pipeline_mode = #tpu.pipeline_mode<synchronous>, transform_indices = @transform_6, window_bounds = array<i64: 256, 128>}, {pipeline_mode = #tpu.pipeline_mode<synchronous>, transform_indices = @transform_7, window_bounds = array<i64: 1, 128>}, {transform_indices = @transform_8, window_bounds = array<i64: 8, 128>}]} {
    %c0 = arith.constant 0 : index
    %c0_0 = arith.constant 0 : index
    %c0_1 = arith.constant 0 : index
    %0 = vector.load %arg1[%c0, %c0_0, %c0_1] : memref<8x8x128xf32, #tpu.memory_space<vmem>>, vector<8x8x128xf32>
    %c0_2 = arith.constant 0 : index
    %c0_3 = arith.constant 0 : index
    %1 = vector.load %arg2[%c0_2, %c0_3] : memref<8x8xf32, #tpu.memory_space<vmem>>, vector<8x8xf32>
    %c0_4 = arith.constant 0 : index
    %c0_5 = arith.constant 0 : index
    %2 = vector.load %arg5[%c0_4, %c0_5] : memref<128x128xf32, #tpu.memory_space<vmem>>, vector<128x128xf32>
    %c0_6 = arith.constant 0 : index
    %c0_7 = arith.constant 0 : index
    %3 = vector.load %arg6[%c0_6, %c0_7] : memref<256x256xf32, #tpu.memory_space<vmem>>, vector<256x256xf32>
    %c0_8 = arith.constant 0 : index
    %c0_9 = arith.constant 0 : index
    %4 = vector.load %arg7[%c0_8, %c0_9] : memref<256x128xf32, #tpu.memory_space<vmem>>, vector<256x128xf32>
    %c0_10 = arith.constant 0 : index
    %c0_11 = arith.constant 0 : index
    %5 = vector.load %arg8[%c0_10, %c0_11] : memref<1x128xf32, #tpu.memory_space<vmem>>, vector<1x128xf32>
    %6 = vector.shape_cast %0 : vector<8x8x128xf32> to vector<64x128xf32>
    %cst = arith.constant dense<0.000000e+00> : vector<64x128xf32>
    %7 = tpu.matmul %6, %2, %cst {dimension_numbers = #tpu.dot_dimension_numbers<[1], [0], [0], [1], [0, 0, 1, 1], [], []>} : vector<64x128xf32>, vector<128x128xf32>, vector<64x128xf32> -> vector<64x128xf32>
    %8 = vector.shape_cast %7 : vector<64x128xf32> to vector<8x8x128xf32>
    %cst_12 = arith.constant 1.000000e+00 : f32
    %9 = vector.broadcast %cst_12 : f32 to vector<8x8xf32>
    %10 = arith.subf %9, %1 : vector<8x8xf32>
    %cst_13 = arith.constant -1.000000e+03 : f32
    %11 = vector.broadcast %cst_13 : f32 to vector<8x8xf32>
    %12 = arith.mulf %11, %10 : vector<8x8xf32>
    %13 = vector.shape_cast %5 : vector<1x128xf32> to vector<1x1x128xf32>
    %14 = vector.shape_cast %13 : vector<1x1x128xf32> to vector<1x1x128xf32>
    %15 = vector.broadcast %14 : vector<1x1x128xf32> to vector<8x8x128xf32>
    %cst_14 = arith.constant 0.000000e+00 : f32
    %16 = vector.broadcast %cst_14 : f32 to vector<8x128xf32>
    %c0_i32 = arith.constant 0 : i32
    %17 = arith.index_cast %c0_i32 : i32 to index
    %c0_15 = arith.constant 0 : index
    %c0_16 = arith.constant 0 : index
    %18 = vector.load %arg3[%17, %c0_15, %c0_16] : memref<8x8x128xf32, #tpu.memory_space<vmem>>, vector<1x8x128xf32>
    %19 = vector.shape_cast %18 : vector<1x8x128xf32> to vector<8x128xf32>
    %20 = tpu.concatenate %19, %16 in 1 : vector<8x128xf32>, vector<8x128xf32> -> vector<8x256xf32>
    %cst_17 = arith.constant dense<0.000000e+00> : vector<8x256xf32>
    %21 = tpu.matmul %20, %3, %cst_17 {dimension_numbers = #tpu.dot_dimension_numbers<[1], [0], [0], [1], [0, 0, 1, 1], [], []>} : vector<8x256xf32>, vector<256x256xf32>, vector<8x256xf32> -> vector<8x256xf32>
    %22 = vector.extract_strided_slice %21 {offsets = [0, 0], sizes = [8, 128], strides = [1, 1]} : vector<8x256xf32> to vector<8x128xf32>
    %23 = vector.extract_strided_slice %21 {offsets = [0, 128], sizes = [8, 128], strides = [1, 1]} : vector<8x256xf32> to vector<8x128xf32>
    %24 = math.tanh %23 : vector<8x128xf32>
    %25 = vector.shape_cast %22 : vector<8x128xf32> to vector<8x1x128xf32>
    %26 = vector.broadcast %25 : vector<8x1x128xf32> to vector<8x8x128xf32>
    %27 = arith.addf %8, %26 : vector<8x8x128xf32>
    %28 = math.tanh %27 : vector<8x8x128xf32>
    %29 = arith.mulf %28, %15 : vector<8x8x128xf32>
    %cst_18 = arith.constant dense<0.000000e+00> : vector<8x8xf32>
    %30 = vector.multi_reduction <add>, %29, %cst_18 [2] : vector<8x8x128xf32> to vector<8x8xf32>
    %31 = arith.addf %30, %12 : vector<8x8xf32>
    %cst_19 = arith.constant dense<0xFF800000> : vector<8xf32>
    %32 = vector.multi_reduction <maximumf>, %31, %cst_19 [1] : vector<8x8xf32> to vector<8xf32>
    %33 = vector.shape_cast %32 : vector<8xf32> to vector<8x1xf32>
    %34 = vector.broadcast %33 : vector<8x1xf32> to vector<8x8xf32>
    %35 = arith.subf %31, %34 : vector<8x8xf32>
    %36 = math.exp %35 : vector<8x8xf32>
    %cst_20 = arith.constant dense<0.000000e+00> : vector<8xf32>
    %37 = vector.multi_reduction <add>, %36, %cst_20 [1] : vector<8x8xf32> to vector<8xf32>
    %38 = vector.shape_cast %37 : vector<8xf32> to vector<8x1xf32>
    %39 = tpu.reciprocal %38 {approx = true} : vector<8x1xf32> -> vector<8x1xf32>
    %40 = arith.mulf %38, %39 : vector<8x1xf32>
    %cst_21 = arith.constant 2.000000e+00 : f32
    %41 = vector.broadcast %cst_21 : f32 to vector<8x1xf32>
    %42 = arith.subf %41, %40 : vector<8x1xf32>
    %43 = arith.mulf %39, %42 : vector<8x1xf32>
    %44 = vector.broadcast %43 : vector<8x1xf32> to vector<8x8xf32>
    %45 = arith.mulf %36, %44 : vector<8x8xf32>
    %46 = vector.shape_cast %45 : vector<8x8xf32> to vector<8x8x1xf32>
    %47 = vector.broadcast %46 : vector<8x8x1xf32> to vector<8x8x128xf32>
    %48 = arith.mulf %47, %0 : vector<8x8x128xf32>
    %cst_22 = arith.constant dense<0.000000e+00> : vector<8x128xf32>
    %49 = vector.multi_reduction <add>, %48, %cst_22 [1] : vector<8x8x128xf32> to vector<8x128xf32>
    %50 = arith.addf %49, %24 : vector<8x128xf32>
    %c0_23 = arith.constant 0 : index
    %51 = arith.index_cast %c0_i32 : i32 to index
    %52 = vector.load %arg4[%c0_23, %51] : memref<8x8xf32, #tpu.memory_space<vmem>>, vector<8x1xf32>
    %cst_24 = arith.constant 0.000000e+00 : f32
    %53 = vector.broadcast %cst_24 : f32 to vector<8x1xf32>
    %54 = arith.cmpf ogt, %52, %53 : vector<8x1xf32>
    %55 = vector.shape_cast %54 : vector<8x1xi1> to vector<8x1xi1>
    %56 = vector.broadcast %55 : vector<8x1xi1> to vector<8x128xi1>
    %57 = arith.select %56, %50, %16 : vector<8x128xi1>, vector<8x128xf32>
    %c1_i32 = arith.constant 1 : i32
    %58 = arith.index_cast %c1_i32 : i32 to index
    %c0_25 = arith.constant 0 : index
    %c0_26 = arith.constant 0 : index
    %59 = vector.load %arg3[%58, %c0_25, %c0_26] : memref<8x8x128xf32, #tpu.memory_space<vmem>>, vector<1x8x128xf32>
    %60 = vector.shape_cast %59 : vector<1x8x128xf32> to vector<8x128xf32>
    %61 = tpu.concatenate %60, %57 in 1 : vector<8x128xf32>, vector<8x128xf32> -> vector<8x256xf32>
    %cst_27 = arith.constant dense<0.000000e+00> : vector<8x256xf32>
    %62 = tpu.matmul %61, %3, %cst_27 {dimension_numbers = #tpu.dot_dimension_numbers<[1], [0], [0], [1], [0, 0, 1, 1], [], []>} : vector<8x256xf32>, vector<256x256xf32>, vector<8x256xf32> -> vector<8x256xf32>
    %63 = vector.extract_strided_slice %62 {offsets = [0, 0], sizes = [8, 128], strides = [1, 1]} : vector<8x256xf32> to vector<8x128xf32>
    %64 = vector.extract_strided_slice %62 {offsets = [0, 128], sizes = [8, 128], strides = [1, 1]} : vector<8x256xf32> to vector<8x128xf32>
    %65 = math.tanh %64 : vector<8x128xf32>
    %66 = vector.shape_cast %63 : vector<8x128xf32> to vector<8x1x128xf32>
    %67 = vector.broadcast %66 : vector<8x1x128xf32> to vector<8x8x128xf32>
    %68 = arith.addf %8, %67 : vector<8x8x128xf32>
    %69 = math.tanh %68 : vector<8x8x128xf32>
    %70 = arith.mulf %69, %15 : vector<8x8x128xf32>
    %cst_28 = arith.constant dense<0.000000e+00> : vector<8x8xf32>
    %71 = vector.multi_reduction <add>, %70, %cst_28 [2] : vector<8x8x128xf32> to vector<8x8xf32>
    %72 = arith.addf %71, %12 : vector<8x8xf32>
    %cst_29 = arith.constant dense<0xFF800000> : vector<8xf32>
    %73 = vector.multi_reduction <maximumf>, %72, %cst_29 [1] : vector<8x8xf32> to vector<8xf32>
    %74 = vector.shape_cast %73 : vector<8xf32> to vector<8x1xf32>
    %75 = vector.broadcast %74 : vector<8x1xf32> to vector<8x8xf32>
    %76 = arith.subf %72, %75 : vector<8x8xf32>
    %77 = math.exp %76 : vector<8x8xf32>
    %cst_30 = arith.constant dense<0.000000e+00> : vector<8xf32>
    %78 = vector.multi_reduction <add>, %77, %cst_30 [1] : vector<8x8xf32> to vector<8xf32>
    %79 = vector.shape_cast %78 : vector<8xf32> to vector<8x1xf32>
    %80 = tpu.reciprocal %79 {approx = true} : vector<8x1xf32> -> vector<8x1xf32>
    %81 = arith.mulf %79, %80 : vector<8x1xf32>
    %cst_31 = arith.constant 2.000000e+00 : f32
    %82 = vector.broadcast %cst_31 : f32 to vector<8x1xf32>
    %83 = arith.subf %82, %81 : vector<8x1xf32>
    %84 = arith.mulf %80, %83 : vector<8x1xf32>
    %85 = vector.broadcast %84 : vector<8x1xf32> to vector<8x8xf32>
    %86 = arith.mulf %77, %85 : vector<8x8xf32>
    %87 = vector.shape_cast %86 : vector<8x8xf32> to vector<8x8x1xf32>
    %88 = vector.broadcast %87 : vector<8x8x1xf32> to vector<8x8x128xf32>
    %89 = arith.mulf %88, %0 : vector<8x8x128xf32>
    %cst_32 = arith.constant dense<0.000000e+00> : vector<8x128xf32>
    %90 = vector.multi_reduction <add>, %89, %cst_32 [1] : vector<8x8x128xf32> to vector<8x128xf32>
    %91 = arith.addf %90, %65 : vector<8x128xf32>
    %c0_33 = arith.constant 0 : index
    %92 = arith.index_cast %c1_i32 : i32 to index
    %93 = vector.load %arg4[%c0_33, %92] : memref<8x8xf32, #tpu.memory_space<vmem>>, vector<8x1xf32>
    %cst_34 = arith.constant 0.000000e+00 : f32
    %94 = vector.broadcast %cst_34 : f32 to vector<8x1xf32>
    %95 = arith.cmpf ogt, %93, %94 : vector<8x1xf32>
    %96 = vector.shape_cast %95 : vector<8x1xi1> to vector<8x1xi1>
    %97 = vector.broadcast %96 : vector<8x1xi1> to vector<8x128xi1>
    %98 = arith.select %97, %91, %57 : vector<8x128xi1>, vector<8x128xf32>
    %c2_i32 = arith.constant 2 : i32
    %99 = arith.index_cast %c2_i32 : i32 to index
    %c0_35 = arith.constant 0 : index
    %c0_36 = arith.constant 0 : index
    %100 = vector.load %arg3[%99, %c0_35, %c0_36] : memref<8x8x128xf32, #tpu.memory_space<vmem>>, vector<1x8x128xf32>
    %101 = vector.shape_cast %100 : vector<1x8x128xf32> to vector<8x128xf32>
    %102 = tpu.concatenate %101, %98 in 1 : vector<8x128xf32>, vector<8x128xf32> -> vector<8x256xf32>
    %cst_37 = arith.constant dense<0.000000e+00> : vector<8x256xf32>
    %103 = tpu.matmul %102, %3, %cst_37 {dimension_numbers = #tpu.dot_dimension_numbers<[1], [0], [0], [1], [0, 0, 1, 1], [], []>} : vector<8x256xf32>, vector<256x256xf32>, vector<8x256xf32> -> vector<8x256xf32>
    %104 = vector.extract_strided_slice %103 {offsets = [0, 0], sizes = [8, 128], strides = [1, 1]} : vector<8x256xf32> to vector<8x128xf32>
    %105 = vector.extract_strided_slice %103 {offsets = [0, 128], sizes = [8, 128], strides = [1, 1]} : vector<8x256xf32> to vector<8x128xf32>
    %106 = math.tanh %105 : vector<8x128xf32>
    %107 = vector.shape_cast %104 : vector<8x128xf32> to vector<8x1x128xf32>
    %108 = vector.broadcast %107 : vector<8x1x128xf32> to vector<8x8x128xf32>
    %109 = arith.addf %8, %108 : vector<8x8x128xf32>
    %110 = math.tanh %109 : vector<8x8x128xf32>
    %111 = arith.mulf %110, %15 : vector<8x8x128xf32>
    %cst_38 = arith.constant dense<0.000000e+00> : vector<8x8xf32>
    %112 = vector.multi_reduction <add>, %111, %cst_38 [2] : vector<8x8x128xf32> to vector<8x8xf32>
    %113 = arith.addf %112, %12 : vector<8x8xf32>
    %cst_39 = arith.constant dense<0xFF800000> : vector<8xf32>
    %114 = vector.multi_reduction <maximumf>, %113, %cst_39 [1] : vector<8x8xf32> to vector<8xf32>
    %115 = vector.shape_cast %114 : vector<8xf32> to vector<8x1xf32>
    %116 = vector.broadcast %115 : vector<8x1xf32> to vector<8x8xf32>
    %117 = arith.subf %113, %116 : vector<8x8xf32>
    %118 = math.exp %117 : vector<8x8xf32>
    %cst_40 = arith.constant dense<0.000000e+00> : vector<8xf32>
    %119 = vector.multi_reduction <add>, %118, %cst_40 [1] : vector<8x8xf32> to vector<8xf32>
    %120 = vector.shape_cast %119 : vector<8xf32> to vector<8x1xf32>
    %121 = tpu.reciprocal %120 {approx = true} : vector<8x1xf32> -> vector<8x1xf32>
    %122 = arith.mulf %120, %121 : vector<8x1xf32>
    %cst_41 = arith.constant 2.000000e+00 : f32
    %123 = vector.broadcast %cst_41 : f32 to vector<8x1xf32>
    %124 = arith.subf %123, %122 : vector<8x1xf32>
    %125 = arith.mulf %121, %124 : vector<8x1xf32>
    %126 = vector.broadcast %125 : vector<8x1xf32> to vector<8x8xf32>
    %127 = arith.mulf %118, %126 : vector<8x8xf32>
    %128 = vector.shape_cast %127 : vector<8x8xf32> to vector<8x8x1xf32>
    %129 = vector.broadcast %128 : vector<8x8x1xf32> to vector<8x8x128xf32>
    %130 = arith.mulf %129, %0 : vector<8x8x128xf32>
    %cst_42 = arith.constant dense<0.000000e+00> : vector<8x128xf32>
    %131 = vector.multi_reduction <add>, %130, %cst_42 [1] : vector<8x8x128xf32> to vector<8x128xf32>
    %132 = arith.addf %131, %106 : vector<8x128xf32>
    %c0_43 = arith.constant 0 : index
    %133 = arith.index_cast %c2_i32 : i32 to index
    %134 = vector.load %arg4[%c0_43, %133] : memref<8x8xf32, #tpu.memory_space<vmem>>, vector<8x1xf32>
    %cst_44 = arith.constant 0.000000e+00 : f32
    %135 = vector.broadcast %cst_44 : f32 to vector<8x1xf32>
    %136 = arith.cmpf ogt, %134, %135 : vector<8x1xf32>
    %137 = vector.shape_cast %136 : vector<8x1xi1> to vector<8x1xi1>
    %138 = vector.broadcast %137 : vector<8x1xi1> to vector<8x128xi1>
    %139 = arith.select %138, %132, %98 : vector<8x128xi1>, vector<8x128xf32>
    %c3_i32 = arith.constant 3 : i32
    %140 = arith.index_cast %c3_i32 : i32 to index
    %c0_45 = arith.constant 0 : index
    %c0_46 = arith.constant 0 : index
    %141 = vector.load %arg3[%140, %c0_45, %c0_46] : memref<8x8x128xf32, #tpu.memory_space<vmem>>, vector<1x8x128xf32>
    %142 = vector.shape_cast %141 : vector<1x8x128xf32> to vector<8x128xf32>
    %143 = tpu.concatenate %142, %139 in 1 : vector<8x128xf32>, vector<8x128xf32> -> vector<8x256xf32>
    %cst_47 = arith.constant dense<0.000000e+00> : vector<8x256xf32>
    %144 = tpu.matmul %143, %3, %cst_47 {dimension_numbers = #tpu.dot_dimension_numbers<[1], [0], [0], [1], [0, 0, 1, 1], [], []>} : vector<8x256xf32>, vector<256x256xf32>, vector<8x256xf32> -> vector<8x256xf32>
    %145 = vector.extract_strided_slice %144 {offsets = [0, 0], sizes = [8, 128], strides = [1, 1]} : vector<8x256xf32> to vector<8x128xf32>
    %146 = vector.extract_strided_slice %144 {offsets = [0, 128], sizes = [8, 128], strides = [1, 1]} : vector<8x256xf32> to vector<8x128xf32>
    %147 = math.tanh %146 : vector<8x128xf32>
    %148 = vector.shape_cast %145 : vector<8x128xf32> to vector<8x1x128xf32>
    %149 = vector.broadcast %148 : vector<8x1x128xf32> to vector<8x8x128xf32>
    %150 = arith.addf %8, %149 : vector<8x8x128xf32>
    %151 = math.tanh %150 : vector<8x8x128xf32>
    %152 = arith.mulf %151, %15 : vector<8x8x128xf32>
    %cst_48 = arith.constant dense<0.000000e+00> : vector<8x8xf32>
    %153 = vector.multi_reduction <add>, %152, %cst_48 [2] : vector<8x8x128xf32> to vector<8x8xf32>
    %154 = arith.addf %153, %12 : vector<8x8xf32>
    %cst_49 = arith.constant dense<0xFF800000> : vector<8xf32>
    %155 = vector.multi_reduction <maximumf>, %154, %cst_49 [1] : vector<8x8xf32> to vector<8xf32>
    %156 = vector.shape_cast %155 : vector<8xf32> to vector<8x1xf32>
    %157 = vector.broadcast %156 : vector<8x1xf32> to vector<8x8xf32>
    %158 = arith.subf %154, %157 : vector<8x8xf32>
    %159 = math.exp %158 : vector<8x8xf32>
    %cst_50 = arith.constant dense<0.000000e+00> : vector<8xf32>
    %160 = vector.multi_reduction <add>, %159, %cst_50 [1] : vector<8x8xf32> to vector<8xf32>
    %161 = vector.shape_cast %160 : vector<8xf32> to vector<8x1xf32>
    %162 = tpu.reciprocal %161 {approx = true} : vector<8x1xf32> -> vector<8x1xf32>
    %163 = arith.mulf %161, %162 : vector<8x1xf32>
    %cst_51 = arith.constant 2.000000e+00 : f32
    %164 = vector.broadcast %cst_51 : f32 to vector<8x1xf32>
    %165 = arith.subf %164, %163 : vector<8x1xf32>
    %166 = arith.mulf %162, %165 : vector<8x1xf32>
    %167 = vector.broadcast %166 : vector<8x1xf32> to vector<8x8xf32>
    %168 = arith.mulf %159, %167 : vector<8x8xf32>
    %169 = vector.shape_cast %168 : vector<8x8xf32> to vector<8x8x1xf32>
    %170 = vector.broadcast %169 : vector<8x8x1xf32> to vector<8x8x128xf32>
    %171 = arith.mulf %170, %0 : vector<8x8x128xf32>
    %cst_52 = arith.constant dense<0.000000e+00> : vector<8x128xf32>
    %172 = vector.multi_reduction <add>, %171, %cst_52 [1] : vector<8x8x128xf32> to vector<8x128xf32>
    %173 = arith.addf %172, %147 : vector<8x128xf32>
    %c0_53 = arith.constant 0 : index
    %174 = arith.index_cast %c3_i32 : i32 to index
    %175 = vector.load %arg4[%c0_53, %174] : memref<8x8xf32, #tpu.memory_space<vmem>>, vector<8x1xf32>
    %cst_54 = arith.constant 0.000000e+00 : f32
    %176 = vector.broadcast %cst_54 : f32 to vector<8x1xf32>
    %177 = arith.cmpf ogt, %175, %176 : vector<8x1xf32>
    %178 = vector.shape_cast %177 : vector<8x1xi1> to vector<8x1xi1>
    %179 = vector.broadcast %178 : vector<8x1xi1> to vector<8x128xi1>
    %180 = arith.select %179, %173, %139 : vector<8x128xi1>, vector<8x128xf32>
    %c4_i32 = arith.constant 4 : i32
    %181 = arith.index_cast %c4_i32 : i32 to index
    %c0_55 = arith.constant 0 : index
    %c0_56 = arith.constant 0 : index
    %182 = vector.load %arg3[%181, %c0_55, %c0_56] : memref<8x8x128xf32, #tpu.memory_space<vmem>>, vector<1x8x128xf32>
    %183 = vector.shape_cast %182 : vector<1x8x128xf32> to vector<8x128xf32>
    %184 = tpu.concatenate %183, %180 in 1 : vector<8x128xf32>, vector<8x128xf32> -> vector<8x256xf32>
    %cst_57 = arith.constant dense<0.000000e+00> : vector<8x256xf32>
    %185 = tpu.matmul %184, %3, %cst_57 {dimension_numbers = #tpu.dot_dimension_numbers<[1], [0], [0], [1], [0, 0, 1, 1], [], []>} : vector<8x256xf32>, vector<256x256xf32>, vector<8x256xf32> -> vector<8x256xf32>
    %186 = vector.extract_strided_slice %185 {offsets = [0, 0], sizes = [8, 128], strides = [1, 1]} : vector<8x256xf32> to vector<8x128xf32>
    %187 = vector.extract_strided_slice %185 {offsets = [0, 128], sizes = [8, 128], strides = [1, 1]} : vector<8x256xf32> to vector<8x128xf32>
    %188 = math.tanh %187 : vector<8x128xf32>
    %189 = vector.shape_cast %186 : vector<8x128xf32> to vector<8x1x128xf32>
    %190 = vector.broadcast %189 : vector<8x1x128xf32> to vector<8x8x128xf32>
    %191 = arith.addf %8, %190 : vector<8x8x128xf32>
    %192 = math.tanh %191 : vector<8x8x128xf32>
    %193 = arith.mulf %192, %15 : vector<8x8x128xf32>
    %cst_58 = arith.constant dense<0.000000e+00> : vector<8x8xf32>
    %194 = vector.multi_reduction <add>, %193, %cst_58 [2] : vector<8x8x128xf32> to vector<8x8xf32>
    %195 = arith.addf %194, %12 : vector<8x8xf32>
    %cst_59 = arith.constant dense<0xFF800000> : vector<8xf32>
    %196 = vector.multi_reduction <maximumf>, %195, %cst_59 [1] : vector<8x8xf32> to vector<8xf32>
    %197 = vector.shape_cast %196 : vector<8xf32> to vector<8x1xf32>
    %198 = vector.broadcast %197 : vector<8x1xf32> to vector<8x8xf32>
    %199 = arith.subf %195, %198 : vector<8x8xf32>
    %200 = math.exp %199 : vector<8x8xf32>
    %cst_60 = arith.constant dense<0.000000e+00> : vector<8xf32>
    %201 = vector.multi_reduction <add>, %200, %cst_60 [1] : vector<8x8xf32> to vector<8xf32>
    %202 = vector.shape_cast %201 : vector<8xf32> to vector<8x1xf32>
    %203 = tpu.reciprocal %202 {approx = true} : vector<8x1xf32> -> vector<8x1xf32>
    %204 = arith.mulf %202, %203 : vector<8x1xf32>
    %cst_61 = arith.constant 2.000000e+00 : f32
    %205 = vector.broadcast %cst_61 : f32 to vector<8x1xf32>
    %206 = arith.subf %205, %204 : vector<8x1xf32>
    %207 = arith.mulf %203, %206 : vector<8x1xf32>
    %208 = vector.broadcast %207 : vector<8x1xf32> to vector<8x8xf32>
    %209 = arith.mulf %200, %208 : vector<8x8xf32>
    %210 = vector.shape_cast %209 : vector<8x8xf32> to vector<8x8x1xf32>
    %211 = vector.broadcast %210 : vector<8x8x1xf32> to vector<8x8x128xf32>
    %212 = arith.mulf %211, %0 : vector<8x8x128xf32>
    %cst_62 = arith.constant dense<0.000000e+00> : vector<8x128xf32>
    %213 = vector.multi_reduction <add>, %212, %cst_62 [1] : vector<8x8x128xf32> to vector<8x128xf32>
    %214 = arith.addf %213, %188 : vector<8x128xf32>
    %c0_63 = arith.constant 0 : index
    %215 = arith.index_cast %c4_i32 : i32 to index
    %216 = vector.load %arg4[%c0_63, %215] : memref<8x8xf32, #tpu.memory_space<vmem>>, vector<8x1xf32>
    %cst_64 = arith.constant 0.000000e+00 : f32
    %217 = vector.broadcast %cst_64 : f32 to vector<8x1xf32>
    %218 = arith.cmpf ogt, %216, %217 : vector<8x1xf32>
    %219 = vector.shape_cast %218 : vector<8x1xi1> to vector<8x1xi1>
    %220 = vector.broadcast %219 : vector<8x1xi1> to vector<8x128xi1>
    %221 = arith.select %220, %214, %180 : vector<8x128xi1>, vector<8x128xf32>
    %c5_i32 = arith.constant 5 : i32
    %222 = arith.index_cast %c5_i32 : i32 to index
    %c0_65 = arith.constant 0 : index
    %c0_66 = arith.constant 0 : index
    %223 = vector.load %arg3[%222, %c0_65, %c0_66] : memref<8x8x128xf32, #tpu.memory_space<vmem>>, vector<1x8x128xf32>
    %224 = vector.shape_cast %223 : vector<1x8x128xf32> to vector<8x128xf32>
    %225 = tpu.concatenate %224, %221 in 1 : vector<8x128xf32>, vector<8x128xf32> -> vector<8x256xf32>
    %cst_67 = arith.constant dense<0.000000e+00> : vector<8x256xf32>
    %226 = tpu.matmul %225, %3, %cst_67 {dimension_numbers = #tpu.dot_dimension_numbers<[1], [0], [0], [1], [0, 0, 1, 1], [], []>} : vector<8x256xf32>, vector<256x256xf32>, vector<8x256xf32> -> vector<8x256xf32>
    %227 = vector.extract_strided_slice %226 {offsets = [0, 0], sizes = [8, 128], strides = [1, 1]} : vector<8x256xf32> to vector<8x128xf32>
    %228 = vector.extract_strided_slice %226 {offsets = [0, 128], sizes = [8, 128], strides = [1, 1]} : vector<8x256xf32> to vector<8x128xf32>
    %229 = math.tanh %228 : vector<8x128xf32>
    %230 = vector.shape_cast %227 : vector<8x128xf32> to vector<8x1x128xf32>
    %231 = vector.broadcast %230 : vector<8x1x128xf32> to vector<8x8x128xf32>
    %232 = arith.addf %8, %231 : vector<8x8x128xf32>
    %233 = math.tanh %232 : vector<8x8x128xf32>
    %234 = arith.mulf %233, %15 : vector<8x8x128xf32>
    %cst_68 = arith.constant dense<0.000000e+00> : vector<8x8xf32>
    %235 = vector.multi_reduction <add>, %234, %cst_68 [2] : vector<8x8x128xf32> to vector<8x8xf32>
    %236 = arith.addf %235, %12 : vector<8x8xf32>
    %cst_69 = arith.constant dense<0xFF800000> : vector<8xf32>
    %237 = vector.multi_reduction <maximumf>, %236, %cst_69 [1] : vector<8x8xf32> to vector<8xf32>
    %238 = vector.shape_cast %237 : vector<8xf32> to vector<8x1xf32>
    %239 = vector.broadcast %238 : vector<8x1xf32> to vector<8x8xf32>
    %240 = arith.subf %236, %239 : vector<8x8xf32>
    %241 = math.exp %240 : vector<8x8xf32>
    %cst_70 = arith.constant dense<0.000000e+00> : vector<8xf32>
    %242 = vector.multi_reduction <add>, %241, %cst_70 [1] : vector<8x8xf32> to vector<8xf32>
    %243 = vector.shape_cast %242 : vector<8xf32> to vector<8x1xf32>
    %244 = tpu.reciprocal %243 {approx = true} : vector<8x1xf32> -> vector<8x1xf32>
    %245 = arith.mulf %243, %244 : vector<8x1xf32>
    %cst_71 = arith.constant 2.000000e+00 : f32
    %246 = vector.broadcast %cst_71 : f32 to vector<8x1xf32>
    %247 = arith.subf %246, %245 : vector<8x1xf32>
    %248 = arith.mulf %244, %247 : vector<8x1xf32>
    %249 = vector.broadcast %248 : vector<8x1xf32> to vector<8x8xf32>
    %250 = arith.mulf %241, %249 : vector<8x8xf32>
    %251 = vector.shape_cast %250 : vector<8x8xf32> to vector<8x8x1xf32>
    %252 = vector.broadcast %251 : vector<8x8x1xf32> to vector<8x8x128xf32>
    %253 = arith.mulf %252, %0 : vector<8x8x128xf32>
    %cst_72 = arith.constant dense<0.000000e+00> : vector<8x128xf32>
    %254 = vector.multi_reduction <add>, %253, %cst_72 [1] : vector<8x8x128xf32> to vector<8x128xf32>
    %255 = arith.addf %254, %229 : vector<8x128xf32>
    %c0_73 = arith.constant 0 : index
    %256 = arith.index_cast %c5_i32 : i32 to index
    %257 = vector.load %arg4[%c0_73, %256] : memref<8x8xf32, #tpu.memory_space<vmem>>, vector<8x1xf32>
    %cst_74 = arith.constant 0.000000e+00 : f32
    %258 = vector.broadcast %cst_74 : f32 to vector<8x1xf32>
    %259 = arith.cmpf ogt, %257, %258 : vector<8x1xf32>
    %260 = vector.shape_cast %259 : vector<8x1xi1> to vector<8x1xi1>
    %261 = vector.broadcast %260 : vector<8x1xi1> to vector<8x128xi1>
    %262 = arith.select %261, %255, %221 : vector<8x128xi1>, vector<8x128xf32>
    %c6_i32 = arith.constant 6 : i32
    %263 = arith.index_cast %c6_i32 : i32 to index
    %c0_75 = arith.constant 0 : index
    %c0_76 = arith.constant 0 : index
    %264 = vector.load %arg3[%263, %c0_75, %c0_76] : memref<8x8x128xf32, #tpu.memory_space<vmem>>, vector<1x8x128xf32>
    %265 = vector.shape_cast %264 : vector<1x8x128xf32> to vector<8x128xf32>
    %266 = tpu.concatenate %265, %262 in 1 : vector<8x128xf32>, vector<8x128xf32> -> vector<8x256xf32>
    %cst_77 = arith.constant dense<0.000000e+00> : vector<8x256xf32>
    %267 = tpu.matmul %266, %3, %cst_77 {dimension_numbers = #tpu.dot_dimension_numbers<[1], [0], [0], [1], [0, 0, 1, 1], [], []>} : vector<8x256xf32>, vector<256x256xf32>, vector<8x256xf32> -> vector<8x256xf32>
    %268 = vector.extract_strided_slice %267 {offsets = [0, 0], sizes = [8, 128], strides = [1, 1]} : vector<8x256xf32> to vector<8x128xf32>
    %269 = vector.extract_strided_slice %267 {offsets = [0, 128], sizes = [8, 128], strides = [1, 1]} : vector<8x256xf32> to vector<8x128xf32>
    %270 = math.tanh %269 : vector<8x128xf32>
    %271 = vector.shape_cast %268 : vector<8x128xf32> to vector<8x1x128xf32>
    %272 = vector.broadcast %271 : vector<8x1x128xf32> to vector<8x8x128xf32>
    %273 = arith.addf %8, %272 : vector<8x8x128xf32>
    %274 = math.tanh %273 : vector<8x8x128xf32>
    %275 = arith.mulf %274, %15 : vector<8x8x128xf32>
    %cst_78 = arith.constant dense<0.000000e+00> : vector<8x8xf32>
    %276 = vector.multi_reduction <add>, %275, %cst_78 [2] : vector<8x8x128xf32> to vector<8x8xf32>
    %277 = arith.addf %276, %12 : vector<8x8xf32>
    %cst_79 = arith.constant dense<0xFF800000> : vector<8xf32>
    %278 = vector.multi_reduction <maximumf>, %277, %cst_79 [1] : vector<8x8xf32> to vector<8xf32>
    %279 = vector.shape_cast %278 : vector<8xf32> to vector<8x1xf32>
    %280 = vector.broadcast %279 : vector<8x1xf32> to vector<8x8xf32>
    %281 = arith.subf %277, %280 : vector<8x8xf32>
    %282 = math.exp %281 : vector<8x8xf32>
    %cst_80 = arith.constant dense<0.000000e+00> : vector<8xf32>
    %283 = vector.multi_reduction <add>, %282, %cst_80 [1] : vector<8x8xf32> to vector<8xf32>
    %284 = vector.shape_cast %283 : vector<8xf32> to vector<8x1xf32>
    %285 = tpu.reciprocal %284 {approx = true} : vector<8x1xf32> -> vector<8x1xf32>
    %286 = arith.mulf %284, %285 : vector<8x1xf32>
    %cst_81 = arith.constant 2.000000e+00 : f32
    %287 = vector.broadcast %cst_81 : f32 to vector<8x1xf32>
    %288 = arith.subf %287, %286 : vector<8x1xf32>
    %289 = arith.mulf %285, %288 : vector<8x1xf32>
    %290 = vector.broadcast %289 : vector<8x1xf32> to vector<8x8xf32>
    %291 = arith.mulf %282, %290 : vector<8x8xf32>
    %292 = vector.shape_cast %291 : vector<8x8xf32> to vector<8x8x1xf32>
    %293 = vector.broadcast %292 : vector<8x8x1xf32> to vector<8x8x128xf32>
    %294 = arith.mulf %293, %0 : vector<8x8x128xf32>
    %cst_82 = arith.constant dense<0.000000e+00> : vector<8x128xf32>
    %295 = vector.multi_reduction <add>, %294, %cst_82 [1] : vector<8x8x128xf32> to vector<8x128xf32>
    %296 = arith.addf %295, %270 : vector<8x128xf32>
    %c0_83 = arith.constant 0 : index
    %297 = arith.index_cast %c6_i32 : i32 to index
    %298 = vector.load %arg4[%c0_83, %297] : memref<8x8xf32, #tpu.memory_space<vmem>>, vector<8x1xf32>
    %cst_84 = arith.constant 0.000000e+00 : f32
    %299 = vector.broadcast %cst_84 : f32 to vector<8x1xf32>
    %300 = arith.cmpf ogt, %298, %299 : vector<8x1xf32>
    %301 = vector.shape_cast %300 : vector<8x1xi1> to vector<8x1xi1>
    %302 = vector.broadcast %301 : vector<8x1xi1> to vector<8x128xi1>
    %303 = arith.select %302, %296, %262 : vector<8x128xi1>, vector<8x128xf32>
    %c7_i32 = arith.constant 7 : i32
    %304 = arith.index_cast %c7_i32 : i32 to index
    %c0_85 = arith.constant 0 : index
    %c0_86 = arith.constant 0 : index
    %305 = vector.load %arg3[%304, %c0_85, %c0_86] : memref<8x8x128xf32, #tpu.memory_space<vmem>>, vector<1x8x128xf32>
    %306 = vector.shape_cast %305 : vector<1x8x128xf32> to vector<8x128xf32>
    %307 = tpu.concatenate %306, %303 in 1 : vector<8x128xf32>, vector<8x128xf32> -> vector<8x256xf32>
    %cst_87 = arith.constant dense<0.000000e+00> : vector<8x256xf32>
    %308 = tpu.matmul %307, %3, %cst_87 {dimension_numbers = #tpu.dot_dimension_numbers<[1], [0], [0], [1], [0, 0, 1, 1], [], []>} : vector<8x256xf32>, vector<256x256xf32>, vector<8x256xf32> -> vector<8x256xf32>
    %309 = vector.extract_strided_slice %308 {offsets = [0, 0], sizes = [8, 128], strides = [1, 1]} : vector<8x256xf32> to vector<8x128xf32>
    %310 = vector.extract_strided_slice %308 {offsets = [0, 128], sizes = [8, 128], strides = [1, 1]} : vector<8x256xf32> to vector<8x128xf32>
    %311 = math.tanh %310 : vector<8x128xf32>
    %312 = vector.shape_cast %309 : vector<8x128xf32> to vector<8x1x128xf32>
    %313 = vector.broadcast %312 : vector<8x1x128xf32> to vector<8x8x128xf32>
    %314 = arith.addf %8, %313 : vector<8x8x128xf32>
    %315 = math.tanh %314 : vector<8x8x128xf32>
    %316 = arith.mulf %315, %15 : vector<8x8x128xf32>
    %cst_88 = arith.constant dense<0.000000e+00> : vector<8x8xf32>
    %317 = vector.multi_reduction <add>, %316, %cst_88 [2] : vector<8x8x128xf32> to vector<8x8xf32>
    %318 = arith.addf %317, %12 : vector<8x8xf32>
    %cst_89 = arith.constant dense<0xFF800000> : vector<8xf32>
    %319 = vector.multi_reduction <maximumf>, %318, %cst_89 [1] : vector<8x8xf32> to vector<8xf32>
    %320 = vector.shape_cast %319 : vector<8xf32> to vector<8x1xf32>
    %321 = vector.broadcast %320 : vector<8x1xf32> to vector<8x8xf32>
    %322 = arith.subf %318, %321 : vector<8x8xf32>
    %323 = math.exp %322 : vector<8x8xf32>
    %cst_90 = arith.constant dense<0.000000e+00> : vector<8xf32>
    %324 = vector.multi_reduction <add>, %323, %cst_90 [1] : vector<8x8xf32> to vector<8xf32>
    %325 = vector.shape_cast %324 : vector<8xf32> to vector<8x1xf32>
    %326 = tpu.reciprocal %325 {approx = true} : vector<8x1xf32> -> vector<8x1xf32>
    %327 = arith.mulf %325, %326 : vector<8x1xf32>
    %cst_91 = arith.constant 2.000000e+00 : f32
    %328 = vector.broadcast %cst_91 : f32 to vector<8x1xf32>
    %329 = arith.subf %328, %327 : vector<8x1xf32>
    %330 = arith.mulf %326, %329 : vector<8x1xf32>
    %331 = vector.broadcast %330 : vector<8x1xf32> to vector<8x8xf32>
    %332 = arith.mulf %323, %331 : vector<8x8xf32>
    %333 = vector.shape_cast %332 : vector<8x8xf32> to vector<8x8x1xf32>
    %334 = vector.broadcast %333 : vector<8x8x1xf32> to vector<8x8x128xf32>
    %335 = arith.mulf %334, %0 : vector<8x8x128xf32>
    %cst_92 = arith.constant dense<0.000000e+00> : vector<8x128xf32>
    %336 = vector.multi_reduction <add>, %335, %cst_92 [1] : vector<8x8x128xf32> to vector<8x128xf32>
    %337 = arith.addf %336, %311 : vector<8x128xf32>
    %c0_93 = arith.constant 0 : index
    %338 = arith.index_cast %c7_i32 : i32 to index
    %339 = vector.load %arg4[%c0_93, %338] : memref<8x8xf32, #tpu.memory_space<vmem>>, vector<8x1xf32>
    %cst_94 = arith.constant 0.000000e+00 : f32
    %340 = vector.broadcast %cst_94 : f32 to vector<8x1xf32>
    %341 = arith.cmpf ogt, %339, %340 : vector<8x1xf32>
    %342 = vector.shape_cast %341 : vector<8x1xi1> to vector<8x1xi1>
    %343 = vector.broadcast %342 : vector<8x1xi1> to vector<8x128xi1>
    %344 = arith.select %343, %337, %303 : vector<8x128xi1>, vector<8x128xf32>
    %c8_i32 = arith.constant 8 : i32
    %c7 = arith.constant 7 : index
    %c0_95 = arith.constant 0 : index
    %c0_96 = arith.constant 0 : index
    %345 = vector.load %arg3[%c7, %c0_95, %c0_96] : memref<8x8x128xf32, #tpu.memory_space<vmem>>, vector<1x8x128xf32>
    %346 = vector.shape_cast %345 : vector<1x8x128xf32> to vector<8x128xf32>
    %347 = tpu.concatenate %344, %346 in 1 : vector<8x128xf32>, vector<8x128xf32> -> vector<8x256xf32>
    %cst_97 = arith.constant dense<0.000000e+00> : vector<8x128xf32>
    %348 = tpu.matmul %347, %4, %cst_97 {dimension_numbers = #tpu.dot_dimension_numbers<[1], [0], [0], [1], [0, 0, 1, 1], [], []>} : vector<8x256xf32>, vector<256x128xf32>, vector<8x128xf32> -> vector<8x128xf32>
    %349 = math.tanh %348 : vector<8x128xf32>
    %c0_98 = arith.constant 0 : index
    %c0_99 = arith.constant 0 : index
    %350 = vector.load %arg9[%c0_98, %c0_99] : memref<8x128xf32, #tpu.memory_space<vmem>>, vector<8x128xf32>
    tpu.vector_store %arg9[%c0_98, %c0_99], %349 {strides = array<i32>} : memref<8x128xf32, #tpu.memory_space<vmem>>, vector<8x128xf32>,
    return
  }
  func.func @transform_0(%arg0: i32) -> (i32, i32, i32) {
    %c0_i32 = arith.constant 0 : i32
    %c0_i32_0 = arith.constant 0 : i32
    %c0_i32_1 = arith.constant 0 : i32
    return %arg0, %c0_i32, %c0_i32_0 : i32, i32, i32
  }
  func.func @transform_1(%arg0: i32) -> (i32, i32) {
    %c0_i32 = arith.constant 0 : i32
    %c0_i32_0 = arith.constant 0 : i32
    return %arg0, %c0_i32 : i32, i32
  }
  func.func @transform_2(%arg0: i32) -> (i32, i32, i32) {
    %c0_i32 = arith.constant 0 : i32
    %c0_i32_0 = arith.constant 0 : i32
    %c0_i32_1 = arith.constant 0 : i32
    return %c0_i32, %arg0, %c0_i32_0 : i32, i32, i32
  }
  func.func @transform_3(%arg0: i32) -> (i32, i32) {
    %c0_i32 = arith.constant 0 : i32
    %c0_i32_0 = arith.constant 0 : i32
    return %arg0, %c0_i32 : i32, i32
  }
  func.func @transform_4(%arg0: i32) -> (i32, i32) {
    %c0_i32 = arith.constant 0 : i32
    %c0_i32_0 = arith.constant 0 : i32
    %c0_i32_1 = arith.constant 0 : i32
    return %c0_i32, %c0_i32_0 : i32, i32
  }
  func.func @transform_5(%arg0: i32) -> (i32, i32) {
    %c0_i32 = arith.constant 0 : i32
    %c0_i32_0 = arith.constant 0 : i32
    %c0_i32_1 = arith.constant 0 : i32
    return %c0_i32, %c0_i32_0 : i32, i32
  }
  func.func @transform_6(%arg0: i32) -> (i32, i32) {
    %c0_i32 = arith.constant 0 : i32
    %c0_i32_0 = arith.constant 0 : i32
    %c0_i32_1 = arith.constant 0 : i32
    return %c0_i32, %c0_i32_0 : i32, i32
  }
  func.func @transform_7(%arg0: i32) -> (i32, i32) {
    %c0_i32 = arith.constant 0 : i32
    %c0_i32_0 = arith.constant 0 : i32
    %c0_i32_1 = arith.constant 0 : i32
    return %c0_i32, %c0_i32_0 : i32, i32
  }
  func.func @transform_8(%arg0: i32) -> (i32, i32) {
    %c0_i32 = arith.constant 0 : i32
    %c0_i32_0 = arith.constant 0 : i32
    return %arg0, %c0_i32 : i32, i32
  }
}

</mosaic_0001>

<bundles_post_ra>
// kernel: tpu_custom_call.1
= control target key start
LH: loop header
LB: loop body
LE: loop exit
PB: predicated region body
PF: predicated region fallthrough
CT: control target
= control target key end

     0   :  { %13 = vsyncpa [#allocation3], 0  ;;  %s8428_s0 = inlined_call_operand.hbm [shape: f32[8,8,128], index: 0, kind: input, shape index: {}]   ;;  %s8429_s1 = inlined_call_operand.hbm [shape: f32[8,8], index: 1, kind: input, shape index: {}]   ;;  %s8430_s2 = inlined_call_operand.hbm [shape: f32[8,8,128], index: 2, kind: input, shape index: {}]   ;;  %s8431_s3 = inlined_call_operand.hbm [shape: f32[8,8], index: 3, kind: input, shape index: {}]   ;;  %s8432_s4 = inlined_call_operand.hbm [shape: f32[128,128], index: 4, kind: input, shape index: {}]   ;;  %s8433_s5 = inlined_call_operand.hbm [shape: f32[256,256], index: 5, kind: input, shape index: {}]   ;;  %s8434_s6 = inlined_call_operand.hbm [shape: f32[256,128], index: 6, kind: input, shape index: {}]   ;;  %s8435_s7 = inlined_call_operand.vmem [shape: f32[1,128], index: 7, kind: input, shape index: {}]   ;;  %s8436_s8 = inlined_call_operand.hbm [shape: f32[8,128], index: 8, kind: output, shape index: {}]  }
   0x1   :  { %14 = vsyncpa [#allocation6], 0 }
   0x2   :  { %15 = vsyncpa [#allocation9], 0 }
   0x3   :  { %16 = vsyncpa [#allocation12], 0 }
   0x4   :  { %17 = vsyncpa [#allocation4], 0  ;;  %s6396_s27 = smov [#allocation5]   ;;  %s6397_s29 = smov [#allocation8]  }
   0x5   :  { %s36_s28 = sshll.u32 %s6396_s27, 4  ;;  %s58_s30 = sshll.u32 %s6397_s29, 4  ;;  %s37_s28 = int_to_ptr.vmem [resolvable:$true] %s36_s28  ;;  %s59_s30 = int_to_ptr.vmem [resolvable:$true] %s58_s30 }
   0x6   :  { %s6234_s9 = scalar_lea.vmem %s37_s28, 128  ;;  %p6239_p1 = scmp.lt.s32.totalorder %s37_s28, %s37_s28 }
   0x7   :  { %p6235_p0 = scmp.ne.s32.totalorder %s37_s28, %s6234_s9  ;;  %p6240_p2 = scmp.lt.s32.totalorder %s6234_s9, %s6234_s9 }
   0x9   :  { %p6241_p3 = por %p6240_p2, %p6239_p1 }
   0xb   :  { %p6242_p4 = pnand %p6241_p3, %p6235_p0 }
   0xd   :  { %6245 = shalt.err (!%p6242_p4)
}
   0xe   :  { %39 = dma.hbm_to_vmem [thread:$0]  %s8429_s1, 128, %s37_s28, [#allocation6]  }
   0xf   :  { %s6254_s12 = scalar_lea.vmem %s59_s30, 128  ;;  %p6259_p6 = scmp.lt.s32.totalorder %s59_s30, %s59_s30 }
  0x10   :  { %p6255_p5 = scmp.ne.s32.totalorder %s59_s30, %s6254_s12  ;;  %p6260_p7 = scmp.lt.s32.totalorder %s6254_s12, %s6254_s12 }
  0x12   :  { %p6261_p8 = por %p6260_p7, %p6259_p6 }
  0x14   :  { %p6262_p9 = pnand %p6261_p8, %p6255_p5 }
  0x16   :  { %6265 = shalt.err (!%p6262_p9)
}
  0x17   :  { %61 = dma.hbm_to_vmem [thread:$0]  %s8431_s3, 128, %s59_s30, [#allocation9]  }
  0x18   :  { %s6398_s15 = smov [#allocation11]  }
  0x19   :  { %s79_s16 = sshll.u32 %s6398_s15, 4  ;;  %s80_s16 = int_to_ptr.vmem [resolvable:$true] %s79_s16 }
  0x1a   :  { %s6274_s17 = scalar_lea.vmem %s80_s16, 8192  ;;  %p6279_p11 = scmp.lt.s32.totalorder %s80_s16, %s80_s16 }
  0x1b   :  { %p6275_p10 = scmp.ne.s32.totalorder %s80_s16, %s6274_s17  ;;  %p6280_p12 = scmp.lt.s32.totalorder %s6274_s17, %s6274_s17 }
  0x1d   :  { %p6281_p13 = por %p6280_p12, %p6279_p11 }
  0x1f   :  { %p6282_p0 = pnand %p6281_p13, %p6275_p10 }
  0x21   :  { %6285 = shalt.err (!%p6282_p0)
}
  0x22   :  { %s6399_s1 = smov 256   ;;  %s6400_s18 = smov 16  }
  0x23   :  { %85 = dma.hbm_to_vmem [thread:$0]  %s8433_s5, 8192, %s80_s16, [#allocation12], %s6399_s1, %s6399_s1, %s6400_s18  }
  0x24   :  { %s6401_s21 = smov [#allocation2]  }
  0x25   :  { %s23_s22 = sshll.u32 %s6401_s21, 4  ;;  %s24_s22 = int_to_ptr.vmem [resolvable:$true] %s23_s22 }
  0x26   :  { %s6294_s3 = scalar_lea.vmem %s24_s22, 1024  ;;  %p6299_p2 = scmp.lt.s32.totalorder %s24_s22, %s24_s22 }
  0x27   :  { %p6295_p1 = scmp.ne.s32.totalorder %s24_s22, %s6294_s3  ;;  %p6300_p3 = scmp.lt.s32.totalorder %s6294_s3, %s6294_s3 }
  0x29   :  { %p6301_p4 = por %p6300_p3, %p6299_p2 }
  0x2b   :  { %p6302_p5 = pnand %p6301_p4, %p6295_p1 }
  0x2d   :  { %6305 = shalt.err (!%p6302_p5)
}
  0x2e   :  { %s6402_s23 = smov 128   ;;  %s6403_s24 = smov 8  }
  0x2f   :  { %29 = dma.hbm_to_vmem [thread:$0]  %s8428_s0, 1024, %s24_s22, [#allocation3], %s6402_s23, %s6402_s23, %s6403_s24  }
  0x30   :  { %s6404_s5 = smov [#allocation7]   ;;  %s6405_s28 = smov [#allocation10]  }
  0x31   :  { %s45_s27 = sshll.u32 %s6404_s5, 4  ;;  %s67_s29 = sshll.u32 %s6405_s28, 4  ;;  %s46_s27 = int_to_ptr.vmem [resolvable:$true] %s45_s27  ;;  %s68_s29 = int_to_ptr.vmem [resolvable:$true] %s67_s29 }
  0x32   :  { %s6314_s30 = scalar_lea.vmem %s46_s27, 1024  ;;  %p6319_p7 = scmp.lt.s32.totalorder %s46_s27, %s46_s27 }
  0x33   :  { %p6315_p6 = scmp.ne.s32.totalorder %s46_s27, %s6314_s30  ;;  %p6320_p8 = scmp.lt.s32.totalorder %s6314_s30, %s6314_s30 }
  0x35   :  { %p6321_p9 = por %p6320_p8, %p6319_p7 }
  0x37   :  { %p6322_p10 = pnand %p6321_p9, %p6315_p6 }
  0x39   :  { %6325 = shalt.err (!%p6322_p10)
}
  0x3a   :  { %51 = dma.hbm_to_vmem [thread:$0]  %s8430_s2, 1024, %s46_s27, [#allocation6], %s6402_s23, %s6402_s23, %s6403_s24  }
  0x3b   :  { %s6334_s0 = scalar_lea.vmem %s68_s29, 2048  ;;  %p6339_p12 = scmp.lt.s32.totalorder %s68_s29, %s68_s29 }
  0x3c   :  { %p6335_p11 = scmp.ne.s32.totalorder %s68_s29, %s6334_s0  ;;  %p6340_p13 = scmp.lt.s32.totalorder %s6334_s0, %s6334_s0 }
  0x3e   :  { %p6341_p0 = por %p6340_p13, %p6339_p12 }
  0x40   :  { %p6342_p1 = pnand %p6341_p0, %p6335_p11 }
  0x42   :  { %6345 = shalt.err (!%p6342_p1)
}
  0x43   :  { %73 = dma.hbm_to_vmem [thread:$0]  %s8432_s4, 2048, %s68_s29, [#allocation9], %s6402_s23, %s6402_s23, %s6403_s24  }
  0x44   :  { %s6406_s13 = smov [#allocation13]  }
  0x45   :  { %s91_s14 = sshll.u32 %s6406_s13, 4  ;;  %s92_s14 = int_to_ptr.vmem [resolvable:$true] %s91_s14 }
  0x46   :  { %s6354_s15 = scalar_lea.vmem %s92_s14, 4096  ;;  %p6359_p3 = scmp.lt.s32.totalorder %s92_s14, %s92_s14 }
  0x47   :  { %p6355_p2 = scmp.ne.s32.totalorder %s92_s14, %s6354_s15  ;;  %p6360_p4 = scmp.lt.s32.totalorder %s6354_s15, %s6354_s15 }
  0x49   :  { %p6361_p5 = por %p6360_p4, %p6359_p3 }
  0x4b   :  { %p6362_p6 = pnand %p6361_p5, %p6355_p2 }
  0x4d   :  { %6365 = shalt.err (!%p6362_p6)
}
  0x4e   :  { %97 = dma.hbm_to_vmem [thread:$0]  %s8434_s6, 4096, %s92_s14, [#allocation12], %s6402_s23, %s6402_s23, %s6403_s24  }
  0x4f   :  { %6386 = dma.done.wait [#allocation3], 1024  }
  0x50   :  { %6387 = vsyncadd [#allocation3], 4294966272 }
  0x51   :  { %6388 = dma.done.wait [#allocation6], 1152  }
  0x52   :  { %6389 = vsyncadd [#allocation6], 4294966144 }
  0x53   :  { %6390 = dma.done.wait [#allocation9], 2176  }
  0x54   :  { %6391 = vsyncadd [#allocation9], 4294965120 }
  0x55   :  { %6392 = dma.done.wait [#allocation12], 12288  }
  0x56   :  { %6393 = vsyncadd [#allocation12], 4294955008  ;;  %v6407_v0 = vmov 0.0   ;;  %v6496_v1 = vld [vmem:[#allocation11 + $0xf8] sm:$0xff]  ;;  %v6498_v2 = vld [vmem:[#allocation11 + $0xf0] sm:$0xff]  ;;  %v8437_v45 = vlaneseq  ;;  %vm698_vm0 = vcmask 1041409  }
  0x57   :  { %421 = vmatprep.mubr.f32.mxu1 %v6407_v0  ;;  %v6500_v3 = vld [vmem:[#allocation11 + $0xe8] sm:$0xff]  ;;  %357 = vmatprep.subr.mxu1 %v6496_v1  ;;  %v6503_v4 = vld [vmem:[#allocation11 + $0xe0] sm:$0xff]  ;;  %v6506_v5 = vld [vmem:[#allocation11 + $0xd8] sm:$0xff]  ;;  %vm700_vm1 = vcmask 1042434   ;;  %vm702_vm2 = vcmask 1043459   ;;  %vm704_vm3 = vcmask 1044484  }
  0x58   :  { %358 = vmatpush1.msra.mxu1 %v6498_v2  ;;  %v6509_v6 = vld [vmem:[#allocation11 + $0xd0] sm:$0xff]  ;;  %v6512_v7 = vld [vmem:[#allocation11 + $0xc8] sm:$0xff]  ;;  %v6515_v8 = vld [vmem:[#allocation11 + $0xc0] sm:$0xff]  ;;  %v6602_v54 = vshrl.u32 %v8437_v45, 7  ;;  %vm706_vm4 = vcmask 1045509   ;;  %vm708_vm5 = vcmask 1046534  }
  0x59   :  { %359 = vmatprep.subr.mxu1 %v6500_v3  ;;  %v6518_v9 = vld [vmem:[#allocation11 + $0xb8] sm:$0xff]  ;;  %v6521_v10 = vld [vmem:[#allocation11 + $0xb0] sm:$0xff]  ;;  %v6524_v11 = vld [vmem:[#allocation11 + $0xa8] sm:$0xff]  ;;  %vm710_vm6 = vcmask 1047559   ;;  %vm713_vm7 = vcmask 64512  }
  0x5a   :  { %360 = vmatpush1.msra.mxu1 %v6503_v4  ;;  %v6527_v12 = vld [vmem:[#allocation11 + $0xa0] sm:$0xff]  ;;  %v145_v13 = vld [vmem:[#allocation10 + $0x78] sm:$0xff]  ;;  %v144_v15 = vld [vmem:[#allocation10 + $0x70] sm:$0xff]  ;;  %8630 = vst [vmem:[#allocation20_spill] sm:$0xff] %v6602_v54  ;;  %v6619_v62 = vsub.s32 1, %v6602_v54  ;;  %v6625_v0 = vsub.s32 0, %v6602_v54 }
  0x5b   :  { %361 = vmatprep.subr.mxu1 %v6506_v5  ;;  %v6530_v14 = vld [vmem:[#allocation11 + $0x98] sm:$0xff]  ;;  %5629 = vmatprep.subr.mxu0 %v145_v13  ;;  %v6533_v16 = vld [vmem:[#allocation11 + $0x90] sm:$0xff]  ;;  %v143_v17 = vld [vmem:[#allocation10 + $0x68] sm:$0xff] }
  0x5c   :  { %362 = vmatpush1.msra.mxu1 %v6509_v6  ;;  %5630 = vmatpush3.msra.mxu0 %v145_v13  ;;  %v6536_v18 = vld [vmem:[#allocation11 + $0x88] sm:$0xff]  ;;  %v6539_v19 = vld [vmem:[#allocation11 + $0x80] sm:$0xff]  ;;  %v6542_v21 = vld [vmem:[#allocation11 + $0x78] sm:$0xff]  ;;  %8632 = vst [vmem:[#allocation22_spill] sm:$0xff] %v6619_v62 }
  0x5d   :  { %363 = vmatprep.subr.mxu1 %v6512_v7  ;;  %5631 = vmatprep.subr.mxu0 %v144_v15  ;;  %v142_v20 = vld [vmem:[#allocation10 + $0x60] sm:$0xff]  ;;  %v6545_v22 = vld [vmem:[#allocation11 + $0x70] sm:$0xff]  ;;  %v141_v23 = vld [vmem:[#allocation10 + $0x58] sm:$0xff]  ;;  %8633 = vst [vmem:[#allocation23_spill] sm:$0xff] %v6625_v0 }
  0x5e   :  { %364 = vmatpush1.msra.mxu1 %v6515_v8  ;;  %5632 = vmatpush3.msra.mxu0 %v144_v15  ;;  %v6548_v24 = vld [vmem:[#allocation11 + $0x68] sm:$0xff]  ;;  %v6551_v25 = vld [vmem:[#allocation11 + $0x60] sm:$0xff]  ;;  %v140_v26 = vld [vmem:[#allocation10 + $0x50] sm:$0xff] }
  0x5f   :  { %365 = vmatprep.subr.mxu1 %v6518_v9  ;;  %5633 = vmatprep.subr.mxu0 %v143_v17  ;;  %v6554_v27 = vld [vmem:[#allocation11 + $0x58] sm:$0xff]  ;;  %v6557_v28 = vld [vmem:[#allocation11 + $0x50] sm:$0xff]  ;;  %v139_v29 = vld [vmem:[#allocation10 + $0x48] sm:$0xff] }
  0x60   :  { %366 = vmatpush1.msra.mxu1 %v6521_v10  ;;  %5634 = vmatpush3.msra.mxu0 %v143_v17  ;;  %v6560_v30 = vld [vmem:[#allocation11 + $0x48] sm:$0xff]  ;;  %v6563_v31 = vld [vmem:[#allocation11 + $0x40] sm:$0xff]  ;;  %v6566_v33 = vld [vmem:[#allocation11 + $0x38] sm:$0xff] }
  0x61   :  { %367 = vmatprep.subr.mxu1 %v6524_v11  ;;  %5635 = vmatprep.subr.mxu0 %v142_v20  ;;  %v138_v32 = vld [vmem:[#allocation10 + $0x40] sm:$0xff]  ;;  %v6569_v34 = vld [vmem:[#allocation11 + $0x30] sm:$0xff]  ;;  %v137_v35 = vld [vmem:[#allocation10 + $0x38] sm:$0xff] }
  0x62   :  { %368 = vmatpush1.msra.mxu1 %v6527_v12  ;;  %5636 = vmatpush3.msra.mxu0 %v142_v20  ;;  %v6572_v36 = vld [vmem:[#allocation11 + $0x28] sm:$0xff]  ;;  %v6575_v37 = vld [vmem:[#allocation11 + $0x20] sm:$0xff]  ;;  %v136_v38 = vld [vmem:[#allocation10 + $0x30] sm:$0xff] }
  0x63   :  { %369 = vmatprep.subr.mxu1 %v6530_v14  ;;  %5637 = vmatprep.subr.mxu0 %v141_v23  ;;  %v6578_v39 = vld [vmem:[#allocation11 + $0x18] sm:$0xff]  ;;  %v6581_v40 = vld [vmem:[#allocation11 + $0x10] sm:$0xff]  ;;  %v135_v41 = vld [vmem:[#allocation10 + $0x28] sm:$0xff] }
  0x64   :  { %370 = vmatpush1.msra.mxu1 %v6533_v16  ;;  %5638 = vmatpush3.msra.mxu0 %v141_v23  ;;  %v6584_v42 = vld [vmem:[#allocation11 + $0x8] sm:$0xff]  ;;  %v6587_v43 = vld [vmem:[#allocation11] sm:$0xff]  ;;  %v6590_v46 = vld [vmem:[#allocation11 + $0x1f8] sm:$0xff] }
  0x65   :  { %371 = vmatprep.subr.mxu1 %v6536_v18  ;;  %5639 = vmatprep.subr.mxu0 %v140_v26  ;;  %v134_v44 = vld [vmem:[#allocation10 + $0x20] sm:$0xff]  ;;  %v129_v47 = vld [vmem:[#allocation5] sm:$0xff]  ;;  %v133_v49 = vld [vmem:[#allocation10 + $0x18] sm:$0xff] }
  0x66   :  { %372 = vmatpush1.msra.mxu1 %v6539_v19  ;;  %5640 = vmatpush3.msra.mxu0 %v140_v26  ;;  %v6593_v48 = vld [vmem:[#allocation11 + $0x1f0] sm:$0xff]  ;;  %v6596_v50 = vld [vmem:[#allocation11 + $0x1e8] sm:$0xff]  ;;  %v6599_v51 = vld [vmem:[#allocation11 + $0x1e0] sm:$0xff]  ;;  %v348_v53 = vsub.f32 1.0, %v129_v47 }
  0x67   :  { %373 = vmatprep.subr.mxu1 %v6542_v21  ;;  %5641 = vmatprep.subr.mxu0 %v139_v29  ;;  %v132_v52 = vld [vmem:[#allocation10 + $0x10] sm:$0xff]  ;;  %v6605_v55 = vld [vmem:[#allocation11 + $0x1d8] sm:$0xff]  ;;  %v131_v57 = vld [vmem:[#allocation10 + $0x8] sm:$0xff] }
  0x68   :  { %374 = vmatpush1.msra.mxu1 %v6545_v22  ;;  %5642 = vmatpush3.msra.mxu0 %v139_v29  ;;  %v6608_v56 = vld [vmem:[#allocation11 + $0x1d0] sm:$0xff]  ;;  %v6611_v58 = vld [vmem:[#allocation11 + $0x1c8] sm:$0xff]  ;;  %v6614_v59 = vld [vmem:[#allocation11 + $0x1c0] sm:$0xff]  ;;  %v6616_v61 = vmul.f32 -1000.0, %v348_v53 }
  0x69   :  { %375 = vmatprep.subr.mxu1 %v6548_v24  ;;  %5643 = vmatprep.subr.mxu0 %v138_v32  ;;  %v130_v60 = vld [vmem:[#allocation10] sm:$0xff]  ;;  %v6622_v63 = vld [vmem:[#allocation11 + $0x1b8] sm:$0xff]  ;;  %v6628_v13 = vld [vmem:[#allocation11 + $0x1b0] sm:$0xff] }
  0x6a   :  { %376 = vmatpush1.msra.mxu1 %v6551_v25  ;;  %5644 = vmatpush3.msra.mxu0 %v138_v32  ;;  %8631 = vst [vmem:[#allocation21_spill] sm:$0xff] %v6616_v61  ;;  %v6630_v15 = vld [vmem:[#allocation2] sm:$0xff]  ;;  %v6633_v17 = vld [vmem:[#allocation11 + $0x1a8] sm:$0xff]  ;;  %v6635_v20 = vld [vmem:[#allocation2 + $0x8] sm:$0xff]  ;;  %v570_v29 = vrot.slane %v6616_v61, %v6619_v62  ;;  %v6645_v32 = vsub.s32 2, %v6602_v54 }
  0x6b   :  { %377 = vmatprep.subr.mxu1 %v6554_v27  ;;  %5645 = vmatprep.subr.mxu0 %v137_v35  ;;  %8634 = vst [vmem:[#allocation24_spill] sm:$0xff] %v6630_v15  ;;  %8635 = vst [vmem:[#allocation25_spill] sm:$0xff] %v6635_v20  ;;  %v6638_v23 = vld [vmem:[#allocation11 + $0x1a0] sm:$0xff]  ;;  %v6661_v47 = vld [vmem:[#allocation11 + $0x188] sm:$0xff] }
  0x6c   :  { %378 = vmatpush1.msra.mxu1 %v6557_v28  ;;  %5646 = vmatpush3.msra.mxu0 %v137_v35  ;;  %v6640_v26 = vld [vmem:[#allocation2 + $0x10] sm:$0xff]  ;;  %8637 = vst [vmem:[#allocation27_spill] sm:$0xff] %v6645_v32  ;;  %v6648_v35 = vld [vmem:[#allocation11 + $0x198] sm:$0xff]  ;;  %v6669_v53 = vld [vmem:[#allocation2 + $0x20] sm:$0xff] }
  0x6d   :  { %379 = vmatprep.subr.mxu1 %v6560_v30  ;;  %5647 = vmatprep.subr.mxu0 %v136_v38  ;;  %8636 = vst [vmem:[#allocation26_spill] sm:$0xff] %v6640_v26  ;;  %8640 = vst [vmem:[#allocation30_spill] sm:$0xff] %v6669_v53  ;;  %v6677_v45 = vld [vmem:[#allocation11 + $0x178] sm:$0xff] }
  0x6e   :  { %380 = vmatpush1.msra.mxu1 %v6563_v31  ;;  %5648 = vmatpush3.msra.mxu0 %v136_v38  ;;  %v563_v38 = vrot.slane %v6616_v61, %v6625_v0  ;;  %v6702_v62 = vld [vmem:[#allocation11 + $0x158] sm:$0xff]  ;;  %v6715_v0 = vld [vmem:[#allocation11 + $0x140] sm:$0xff] }
  0x6f   :  { %381 = vmatprep.subr.mxu1 %v6566_v33  ;;  %5649 = vmatprep.subr.mxu0 %v135_v41 }
  0x70   :  { %382 = vmatpush1.msra.mxu1 %v6569_v34  ;;  %5650 = vmatpush3.msra.mxu0 %v135_v41  ;;  %v6654_v41 = vsub.s32 4, %v6602_v54 }
  0x71   :  { %383 = vmatprep.subr.mxu1 %v6572_v36  ;;  %5651 = vmatprep.subr.mxu0 %v134_v44 }
  0x72   :  { %384 = vmatpush1.msra.mxu1 %v6575_v37  ;;  %5652 = vmatpush3.msra.mxu0 %v134_v44  ;;  %8638 = vst [vmem:[#allocation28_spill] sm:$0xff] %v6654_v41  ;;  %v6657_v44 = vld [vmem:[#allocation11 + $0x190] sm:$0xff] }
  0x73   :  { %385 = vmatprep.subr.mxu1 %v6578_v39  ;;  %5653 = vmatprep.subr.mxu0 %v133_v49 }
  0x74   :  { %386 = vmatpush1.msra.mxu1 %v6581_v40  ;;  %5654 = vmatpush3.msra.mxu0 %v133_v49  ;;  %v6664_v49 = vld [vmem:[#allocation2 + $0x18] sm:$0xff] }
  0x75   :  { %387 = vmatprep.subr.mxu1 %v6584_v42  ;;  %5655 = vmatprep.subr.mxu0 %v132_v52  ;;  %8639 = vst [vmem:[#allocation29_spill] sm:$0xff] %v6664_v49 }
  0x76   :  { %388 = vmatpush1.msra.mxu1 %v6587_v43  ;;  %5656 = vmatpush3.msra.mxu0 %v132_v52  ;;  %v6667_v52 = vld [vmem:[#allocation11 + $0x180] sm:$0xff] }
  0x77   :  { %389 = vmatprep.subr.mxu1 %v6590_v46  ;;  %5657 = vmatprep.subr.mxu0 %v131_v57 }
  0x78   :  { %390 = vmatpush2.msra.mxu1 %v6593_v48  ;;  %5658 = vmatpush3.msra.mxu0 %v131_v57  ;;  %v577_v57 = vrot.slane %v6616_v61, %v6645_v32  ;;  %v6694_v32 = vld [vmem:[#allocation2 + $0x30] sm:$0xff] }
  0x79   :  { %391 = vmatprep.subr.mxu1 %v6596_v50  ;;  %5659 = vmatprep.subr.mxu0 %v130_v60  ;;  %8643 = vst [vmem:[#allocation33_spill] sm:$0xff] %v6694_v32 }
  0x7a   :  { %392 = vmatpush2.msra.mxu1 %v6599_v51  ;;  %5660 = vmatpush3.msra.mxu0 %v130_v60  ;;  %v6674_v60 = vsub.s32 3, %v6602_v54 }
  0x7b   :  { %393 = vmatprep.subr.mxu1 %v6605_v55  ;;  %5661 = vmatprep.mubr.f32.mxu0 %v6630_v15  ;;  %v591_v15 = vrot.slane %v6616_v61, %v6654_v41 }
  0x7c   :  { %394 = vmatpush2.msra.mxu1 %v6608_v56  ;;  %5662 = vmatmul.mubr.f32.vlgmr.msra.gmra.mxu0 %v6635_v20  ;;  %8641 = vst [vmem:[#allocation31_spill] sm:$0xff] %v6674_v60  ;;  %v6689_v20 = vld [vmem:[#allocation2 + $0x28] sm:$0xff]  ;;  %v584_v41 = vrot.slane %v6616_v61, %v6674_v60  ;;  %v6712_v60 = vld [vmem:[#allocation2 + $0x38] sm:$0xff] }
  0x7d   :  { %395 = vmatprep.subr.mxu1 %v6611_v58  ;;  %5664 = vmatprep.mubr.f32.mxu0 %v6640_v26  ;;  %v6682_v26 = vld [vmem:[#allocation11 + $0x170] sm:$0xff]  ;;  %8642 = vst [vmem:[#allocation32_spill] sm:$0xff] %v6689_v20  ;;  %8645 = vst [vmem:[#allocation35_spill] sm:$0xff] %v6712_v60 }
  0x7e   :  { %396 = vmatpush2.msra.mxu1 %v6614_v59  ;;  %572 = vbcast.lane.b32.xlu1 %v570_v29, 256  ;;  %v6686_v29 = vld [vmem:[#allocation11 + $0x168] sm:$0xff] }
  0x7f   :  { %397 = vmatprep.subr.mxu1 %v6622_v63  ;;  %565 = vbcast.lane.b32.xlu0 %v563_v38, 256  ;;  %v6692_v38 = vld [vmem:[#allocation11 + $0x160] sm:$0xff] }
  0x80   :  { %398 = vmatpush2.msra.mxu1 %v6628_v13  ;;  %5665 = vmatmul.mubr.f32.gmra.mxu0 %v6664_v49  ;;  %v6699_v49 = vsub.s32 5, %v6602_v54  ;;  %v6720_v54 = vld [vmem:[#allocation11 + $0x138] sm:$0xff] }
  0x81   :  { %399 = vmatprep.subr.mxu1 %v6633_v17  ;;  %5667 = vmatprep.mubr.f32.mxu0 %v6669_v53  ;;  %v6705_v53 = vld [vmem:[#allocation11 + $0x150] sm:$0xff] }
  0x82   :  { %400 = vmatpush2.msra.mxu1 %v6638_v23  ;;  %579 = vbcast.lane.b32.xlu1 %v577_v57, 256  ;;  %8644 = vst [vmem:[#allocation34_spill] sm:$0xff] %v6699_v49  ;;  %v6709_v57 = vld [vmem:[#allocation11 + $0x148] sm:$0xff] }
  0x83   :  { %401 = vmatprep.subr.mxu1 %v6648_v35  ;;  %593 = vbcast.lane.b32.xlu0 %v591_v15, 256  ;;  %v598_v15 = vrot.slane %v6616_v61, %v6699_v49  ;;  %v6735_v49 = vld [vmem:[#allocation11 + $0x118] sm:$0xff]  ;;  %v6743_v61 = vld [vmem:[#allocation11 + $0x108] sm:$0xff] }
  0x84   :  { %402 = vmatpush2.msra.mxu1 %v6657_v44  ;;  %5668 = vmatmul.mubr.f32.gmra.mxu0 %v6689_v20  ;;  %v6724_v20 = vld [vmem:[#allocation11 + $0x130] sm:$0xff] }
  0x85   :  { %403 = vmatprep.subr.mxu1 %v6661_v47  ;;  %5670 = vmatprep.mubr.f32.mxu0 %v6694_v32  ;;  %8646 = vst [vmem:[#allocation36_spill] sm:$0xff] %v6724_v20  ;;  %v6728_v32 = vld [vmem:[#allocation11 + $0x128] sm:$0xff] }
  0x86   :  { %404 = vmatpush2.msra.mxu1 %v6667_v52  ;;  %586 = vbcast.lane.b32.xlu1 %v584_v41, 256  ;;  %v6732_v41 = vld [vmem:[#allocation11 + $0x120] sm:$0xff] }
  0x87   :  { %405 = vmatprep.subr.mxu1 %v6677_v45  ;;  %1063 = vmatprep.subr.mxu0 %v6496_v1 }
  0x88   :  { %406 = vmatpush2.msra.mxu1 %v6682_v26  ;;  %5671 = vmatmul.mubr.f32.gmra.mxu0 %v6712_v60  ;;  %v6739_v60 = vld [vmem:[#allocation11 + $0x110] sm:$0xff] }
  0x89   :  { %407 = vmatprep.subr.mxu1 %v6686_v29  ;;  %1064 = vmatpush1.msra.mxu0 %v6498_v2 }
  0x8a   :  { %408 = vmatpush2.msra.mxu1 %v6692_v38  ;;  %600 = vbcast.lane.b32.xlu1 %v598_v15, 256  ;;  %v6747_v15 = vld [vmem:[#allocation11 + $0x100] sm:$0xff] }
  0x8b   :  { %409 = vmatprep.subr.mxu1 %v6702_v62  ;;  %1065 = vmatprep.subr.mxu0 %v6500_v3 }
  0x8c   :  { %410 = vmatpush2.msra.mxu1 %v6705_v53  ;;  %1066 = vmatpush1.msra.mxu0 %v6503_v4 }
  0x8d   :  { %411 = vmatprep.subr.mxu1 %v6709_v57  ;;  %1067 = vmatprep.subr.mxu0 %v6506_v5 }
  0x8e   :  { %412 = vmatpush2.msra.mxu1 %v6715_v0  ;;  %1068 = vmatpush1.msra.mxu0 %v6509_v6 }
  0x8f   :  { %413 = vmatprep.subr.mxu1 %v6720_v54  ;;  %1069 = vmatprep.subr.mxu0 %v6512_v7 }
  0x90   :  { %414 = vmatpush2.msra.mxu1 %v6724_v20  ;;  %v356_v20 = vld [vmem:[#allocation7] sm:$0xff]  ;;  %1070 = vmatpush1.msra.mxu0 %v6515_v8 }
  0x91   :  { %415 = vmatprep.subr.mxu1 %v6728_v32  ;;  %1071 = vmatprep.subr.mxu0 %v6518_v9 }
  0x92   :  { %416 = vmatpush2.msra.mxu1 %v6732_v41  ;;  %1072 = vmatpush1.msra.mxu0 %v6521_v10 }
  0x93   :  { %417 = vmatprep.subr.mxu1 %v6735_v49  ;;  %1073 = vmatprep.subr.mxu0 %v6524_v11 }
  0x94   :  { %418 = vmatpush2.msra.mxu1 %v6739_v60  ;;  %1074 = vmatpush1.msra.mxu0 %v6527_v12 }
  0x95   :  { %419 = vmatprep.subr.mxu1 %v6743_v61  ;;  %1075 = vmatprep.subr.mxu0 %v6530_v14 }
  0x96   :  { %420 = vmatpush2.msra.mxu1 %v6747_v15  ;;  %1076 = vmatpush1.msra.mxu0 %v6533_v16 }
  0x97   :  { %422 = vmatmul.mubr.f32.vlgmr.msra.gmra.mxu1 %v356_v20  ;;  %1694 = vmatprep.subr.mxu1 %v6496_v1 }
  0x98   :  { %1695 = vmatpush1.msra.mxu1 %v6498_v2  ;;  %1077 = vmatprep.subr.mxu0 %v6536_v18  ;;  %v8647_v2 = vld [vmem:[#allocation36_spill] sm:$0xff] }
  0x99   :  { %1696 = vmatprep.subr.mxu1 %v6500_v3  ;;  %1078 = vmatpush1.msra.mxu0 %v6539_v19 }
  0x9a   :  { %1697 = vmatpush1.msra.mxu1 %v6503_v4  ;;  %1079 = vmatprep.subr.mxu0 %v6542_v21  ;;  %v6408_v4 = vmov 1966171168  }
  0x9b   :  { %1698 = vmatprep.subr.mxu1 %v6506_v5  ;;  %1080 = vmatpush1.msra.mxu0 %v6545_v22  ;;  %v432_v5 = vunpack.c.l.s4 %v6408_v4  ;;  %v8654_v4 = vld [vmem:[#allocation21_spill] sm:$0xff] }
  0x9c   :  { %1699 = vmatpush1.msra.mxu1 %v6509_v6  ;;  %1081 = vmatprep.subr.mxu0 %v6548_v24 }
  0x9d   :  { %1700 = vmatprep.subr.mxu1 %v6512_v7  ;;  %1082 = vmatpush1.msra.mxu0 %v6551_v25  ;;  %v433_v7 = vunpack.c.0.s8 %v432_v5 }
  0x9e   :  { %1701 = vmatpush1.msra.mxu1 %v6515_v8  ;;  %1083 = vmatprep.subr.mxu0 %v6554_v27 }
  0x9f   :  { %1702 = vmatprep.subr.mxu1 %v6518_v9  ;;  %1084 = vmatpush1.msra.mxu0 %v6557_v28  ;;  %v8648_v9 = vld [vmem:[#allocation20_spill] sm:$0xff] }
  0xa0   :  { %1703 = vmatpush1.msra.mxu1 %v6521_v10  ;;  %1085 = vmatprep.subr.mxu0 %v6560_v30  ;;  %v6884_v10 = vsub.s32 %v433_v7, %v8648_v9 }
  0xa1   :  { %1704 = vmatprep.subr.mxu1 %v6524_v11  ;;  %1086 = vmatpush1.msra.mxu0 %v6563_v31 }
  0xa2   :  { %1705 = vmatpush1.msra.mxu1 %v6527_v12  ;;  %1087 = vmatprep.subr.mxu0 %v6566_v33 }
  0xa3   :  { %1706 = vmatprep.subr.mxu1 %v6530_v14  ;;  %1088 = vmatpush1.msra.mxu0 %v6569_v34 }
  0xa4   :  { %1707 = vmatpush1.msra.mxu1 %v6533_v16  ;;  %1089 = vmatprep.subr.mxu0 %v6572_v36 }
  0xa5   :  { %1708 = vmatprep.subr.mxu1 %v6536_v18  ;;  %1090 = vmatpush1.msra.mxu0 %v6575_v37 }
  0xa6   :  { %1709 = vmatpush1.msra.mxu1 %v6539_v19  ;;  %1091 = vmatprep.subr.mxu0 %v6578_v39 }
  0xa7   :  { %1710 = vmatprep.subr.mxu1 %v6542_v21  ;;  %1092 = vmatpush1.msra.mxu0 %v6581_v40 }
  0xa8   :  { %1711 = vmatpush1.msra.mxu1 %v6545_v22  ;;  %1093 = vmatprep.subr.mxu0 %v6584_v42 }
  0xa9   :  { %1712 = vmatprep.subr.mxu1 %v6548_v24  ;;  %1094 = vmatpush1.msra.mxu0 %v6587_v43 }
  0xaa   :  { %1713 = vmatpush1.msra.mxu1 %v6551_v25  ;;  %1095 = vmatprep.subr.mxu0 %v6590_v46 }
  0xab   :  { %1714 = vmatprep.subr.mxu1 %v6554_v27  ;;  %1096 = vmatpush2.msra.mxu0 %v6593_v48 }
  0xac   :  { %1715 = vmatpush1.msra.mxu1 %v6557_v28  ;;  %1097 = vmatprep.subr.mxu0 %v6596_v50 }
  0xad   :  { %1716 = vmatprep.subr.mxu1 %v6560_v30  ;;  %1098 = vmatpush2.msra.mxu0 %v6599_v51  ;;  %v8650_v30 = vld [vmem:[#allocation23_spill] sm:$0xff] }
  0xae   :  { %1717 = vmatpush1.msra.mxu1 %v6563_v31  ;;  %1099 = vmatprep.subr.mxu0 %v6605_v55 }
  0xaf   :  { %1718 = vmatprep.subr.mxu1 %v6566_v33  ;;  %1100 = vmatpush2.msra.mxu0 %v6608_v56 }
  0xb0   :  { %1719 = vmatpush1.msra.mxu1 %v6569_v34  ;;  %1101 = vmatprep.subr.mxu0 %v6611_v58 }
  0xb1   :  { %1720 = vmatprep.subr.mxu1 %v6572_v36  ;;  %1102 = vmatpush2.msra.mxu0 %v6614_v59 }
  0xb2   :  { %1721 = vmatpush1.msra.mxu1 %v6575_v37  ;;  %1103 = vmatprep.subr.mxu0 %v6622_v63 }
  0xb3   :  { %1722 = vmatprep.subr.mxu1 %v6578_v39  ;;  %1104 = vmatpush2.msra.mxu0 %v6628_v13 }
  0xb4   :  { %1723 = vmatpush1.msra.mxu1 %v6581_v40  ;;  %1105 = vmatprep.subr.mxu0 %v6633_v17 }
  0xb5   :  { %1724 = vmatprep.subr.mxu1 %v6584_v42  ;;  %1106 = vmatpush2.msra.mxu0 %v6638_v23 }
  0xb6   :  { %1725 = vmatpush1.msra.mxu1 %v6587_v43  ;;  %1107 = vmatprep.subr.mxu0 %v6648_v35 }
  0xb7   :  { %1726 = vmatprep.subr.mxu1 %v6590_v46  ;;  %1108 = vmatpush2.msra.mxu0 %v6657_v44 }
  0xb8   :  { %1727 = vmatpush2.msra.mxu1 %v6593_v48  ;;  %1109 = vmatprep.subr.mxu0 %v6661_v47 }
  0xb9   :  { %1728 = vmatprep.subr.mxu1 %v6596_v50  ;;  %1110 = vmatpush2.msra.mxu0 %v6667_v52 }
  0xba   :  { %1729 = vmatpush2.msra.mxu1 %v6599_v51  ;;  %1111 = vmatprep.subr.mxu0 %v6677_v45 }
  0xbb   :  { %1730 = vmatprep.subr.mxu1 %v6605_v55  ;;  %1112 = vmatpush2.msra.mxu0 %v6682_v26 }
  0xbc   :  { %1731 = vmatpush2.msra.mxu1 %v6608_v56  ;;  %1113 = vmatprep.subr.mxu0 %v6686_v29 }
  0xbd   :  { %1732 = vmatprep.subr.mxu1 %v6611_v58  ;;  %1114 = vmatpush2.msra.mxu0 %v6692_v38 }
  0xbe   :  { %1733 = vmatpush2.msra.mxu1 %v6614_v59  ;;  %1115 = vmatprep.subr.mxu0 %v6702_v62 }
  0xbf   :  { %1734 = vmatprep.subr.mxu1 %v6622_v63  ;;  %1116 = vmatpush2.msra.mxu0 %v6705_v53 }
  0xc0   :  { %1735 = vmatpush2.msra.mxu1 %v6628_v13  ;;  %1117 = vmatprep.subr.mxu0 %v6709_v57 }
  0xc1   :  { %1736 = vmatprep.subr.mxu1 %v6633_v17  ;;  %1118 = vmatpush2.msra.mxu0 %v6715_v0 }
  0xc2   :  { %1737 = vmatpush2.msra.mxu1 %v6638_v23  ;;  %1119 = vmatprep.subr.mxu0 %v6720_v54 }
  0xc3   :  { %1738 = vmatprep.subr.mxu1 %v6648_v35  ;;  %1120 = vmatpush2.msra.mxu0 %v8647_v2 }
  0xc4   :  { %1739 = vmatpush2.msra.mxu1 %v6657_v44  ;;  %1121 = vmatprep.subr.mxu0 %v6728_v32 }
  0xc5   :  { %1740 = vmatprep.subr.mxu1 %v6661_v47  ;;  %1122 = vmatpush2.msra.mxu0 %v6732_v41 }
  0xc6   :  { %1741 = vmatpush2.msra.mxu1 %v6667_v52  ;;  %1123 = vmatprep.subr.mxu0 %v6735_v49 }
  0xc7   :  { %1742 = vmatprep.subr.mxu1 %v6677_v45  ;;  %1124 = vmatpush2.msra.mxu0 %v6739_v60 }
  0xc8   :  { %1743 = vmatpush2.msra.mxu1 %v6682_v26  ;;  %1125 = vmatprep.subr.mxu0 %v6743_v61 }
  0xc9   :  { %1744 = vmatprep.subr.mxu1 %v6686_v29  ;;  %1126 = vmatpush2.msra.mxu0 %v6747_v15 }
  0xca   :  { %1745 = vmatpush2.msra.mxu1 %v6692_v38  ;;  %2325 = vmatprep.subr.mxu0 %v6496_v1 }
  0xcb   :  { %1746 = vmatprep.subr.mxu1 %v6702_v62 }
  0xcc   :  { %1747 = vmatpush2.msra.mxu1 %v6705_v53 }
  0xcd   :  { %1748 = vmatprep.subr.mxu1 %v6709_v57  ;;  %v8464_v57 = vmov 0  }
  0xce   :  { %1749 = vmatpush2.msra.mxu1 %v6715_v0  ;;  %v6921_v0 = vld [vmem:[%s8435_s7] ss:$0 sm:$0xff]  ;;  %5695 = vset.pattern.permute.xlu0 %v8464_v57 }
  0xcf   :  { %1750 = vmatprep.subr.mxu1 %v6720_v54  ;;  %5696 = vset.pattern.permute.xlu1 %v8464_v57 }
  0xd0   :  { %1751 = vmatpush2.msra.mxu1 %v8647_v2  ;;  %v6937_v2 = vsub.s32 6, %v8648_v9 }
  0xd1   :  { %1752 = vmatprep.subr.mxu1 %v6728_v32 }
  0xd2   :  { %1753 = vmatpush2.msra.mxu1 %v6732_v41  ;;  %8653 = vst [vmem:[#allocation37_spill] sm:$0xff] %v6937_v2  ;;  %v605_v7 = vrot.slane %v8654_v4, %v6937_v2 }
  0xd3   :  { %1754 = vmatprep.subr.mxu1 %v6735_v49 }
  0xd4   :  { %1755 = vmatpush2.msra.mxu1 %v6739_v60 }
  0xd5   :  { %1756 = vmatprep.subr.mxu1 %v6743_v61 }
  0xd6   :  { %1757 = vmatpush2.msra.mxu1 %v6747_v15  ;;  %v6934_v15 = vsub.s32 7, %v8648_v9 }
  0xd7   :  { %2956 = vmatprep.subr.mxu1 %v6496_v1 }
  0xd8   :  { %8652 = vst [vmem:[#allocation23_spill] sm:$0xff] %v6934_v15  ;;  %v612_v5 = vrot.slane %v8654_v4, %v6934_v15 }
 0x13c   :  { %v6877_v3 = vpop.f32.mrf.mxu0 }
 0x13e   :  { %v6879_v6 = vpop.f32.mrf.mxu0 }
 0x140   :  { %v6881_v8 = vpop.f32.mrf.mxu0 }
 0x142   :  { %v6886_v11 = vpop.f32.mrf.mxu0 }
 0x144   :  { %v6889_v18 = vpop.f32.mrf.mxu0 }
 0x145   :  { %8649 = vst [vmem:[#allocation36_spill] sm:$0xff] %v6889_v18 }
 0x146   :  { %v6895_v28 = vpop.f32.mrf.mxu0 }
 0x148   :  { %v6904_v45 = vpop.f32.mrf.mxu0 }
 0x149   :  { %8651 = vst [vmem:[#allocation20_spill] sm:$0xff] %v6904_v45 }
 0x14a   :  { %v6912_v58 = vpop.f32.mrf.mxu0 }
 0x157   :  { %v423_v12 = vpop.f32.mrf.mxu1 }
 0x158   :  { %v430_v14 = vcombine.high %v423_v12, %v423_v12  ;;  %v437_v16 = vrot.slane %v423_v12, %v6884_v10  ;;  %v6943_v12 = vpop.permute.xlu1 %572 }
 0x159   :  { %8655 = vst [vmem:[#allocation21_spill] sm:$0xff] %v6943_v12 }
 0x15a   :  { %v444_v1 = vrot.slane %v430_v14, %v6884_v10  ;;  %v445_v19 = vcombine.high %v437_v16, %v437_v16  ;;  %v453_v21 = vrot.slane %v437_v16, %v6884_v10  ;;  %v6947_v16 = vpop.permute.xlu0 %565 }
 0x15b   :  { %8657 = vst [vmem:[#allocation39_spill] sm:$0xff] %v6947_v16 }
 0x15c   :  { %v446_v22 = vcombine.high %v444_v1, %v444_v1  ;;  %v460_v24 = vrot.slane %v444_v1, %v6884_v10  ;;  %v467_v25 = vrot.slane %v445_v19, %v6884_v10  ;;  %v475_v27 = vcombine.high %v453_v21, %v453_v21  ;;  %v6945_v14 = vpop.permute.xlu1 %579 }
 0x15d   :  { %v482_v31 = vrot.slane %v453_v21, %v8650_v30  ;;  %8656 = vst [vmem:[#allocation38_spill] sm:$0xff] %v6945_v14 }
 0x15e   :  { %v474_v33 = vrot.slane %v446_v22, %v6884_v10  ;;  %v477_v34 = vcombine.high %v467_v25, %v467_v25  ;;  %v486_v36 = vrot.slane %v467_v25, %v8650_v30  ;;  %v476_v37 = vcombine.high %v460_v24, %v460_v24  ;;  %v6951_v19 = vpop.permute.xlu0 %593 }
 0x15f   :  { %v490_v39 = vrot.slane %v475_v27, %v8650_v30  ;;  %v498_v40 = vrot.slane %v460_v24, %v8650_v30  ;;  %v519_v42 = vadd.f32 %v482_v31, %v6879_v6  ;;  %8659 = vst [vmem:[#allocation41_spill] sm:$0xff] %v6951_v19 }
 0x160   :  { %v494_v43 = vrot.slane %v477_v34, %v8650_v30  ;;  %v520_v46 = vadd.f32 %v6877_v3, %v486_v36  ;;  %v502_v50 = vrot.slane %v474_v33, %v8650_v30  ;;  %v478_v54 = vcombine.high %v474_v33, %v474_v33  ;;  %v6949_v1 = vpop.permute.xlu1 %586 }
 0x161   :  { %5710 = vtanh.f32 %v519_v42  ;;  %v521_v48 = vadd.f32 %v490_v39, %v6886_v11  ;;  %v506_v55 = vrot.slane %v476_v37, %v8650_v30  ;;  %v523_v56 = vadd.f32 %v498_v40, %v6895_v28  ;;  %8658 = vst [vmem:[#allocation40_spill] sm:$0xff] %v6949_v1 }
 0x162   :  { %v522_v51 = vadd.f32 %v6881_v8, %v494_v43  ;;  %5712 = vtanh.f32 %v520_v46  ;;  %v524_v59 = vadd.f32 %v6889_v18, %v502_v50  ;;  %v510_v61 = vrot.slane %v478_v54, %v8650_v30 }
 0x163   :  { %5714 = vtanh.f32 %v521_v48  ;;  %v525_v62 = vadd.f32 %v506_v55, %v6912_v58  ;;  %v8663_v55 = vlaneseq }
 0x164   :  { %5716 = vtanh.f32 %v522_v51  ;;  %v526_v63 = vadd.f32 %v6904_v45, %v510_v61  ;;  %v6953_v21 = vpop.permute.xlu1 %600 }
 0x165   :  { %5718 = vtanh.f32 %v523_v56  ;;  %8660 = vst [vmem:[#allocation42_spill] sm:$0xff] %v6953_v21  ;;  %v665_v56 = vand.u32 127, %v8663_v55 }
 0x166   :  { %5720 = vtanh.f32 %v524_v59 }
 0x167   :  { %5722 = vtanh.f32 %v525_v62  ;;  %v6984_v62 = vsub.s32 %v665_v56, %v8648_v9 }
 0x168   :  { %5724 = vtanh.f32 %v526_v63 }
 0x169   :  { %8664 = vst [vmem:[#allocation45_spill] sm:$0xff] %v6984_v62 }
 0x16e   :  { %v5711_v13 = vpop.eup %5710 }
 0x16f   :  { %v535_v17 = vmul.f32 %v5711_v13, %v6921_v0  ;;  %v5713_v20 = vpop.eup %5712 }
 0x170   :  { %v5715_v23 = vpop.eup %5714  ;;  %v536_v35 = vmul.f32 %v5713_v20, %v6921_v0 }
 0x171   :  { %543 = vadd.xlane.f32.xlu0 %v535_v17  ;;  %v5717_v26 = vpop.eup %5716  ;;  %v537_v32 = vmul.f32 %v5715_v23, %v6921_v0 }
 0x172   :  { %v5719_v44 = vpop.eup %5718  ;;  %v538_v49 = vmul.f32 %v5717_v26, %v6921_v0 }
 0x173   :  { %547 = vadd.xlane.f32.xlu1 %v537_v32  ;;  %v5721_v47 = vpop.eup %5720  ;;  %v539_v52 = vmul.f32 %v5719_v44, %v6921_v0 }
 0x174   :  { %v5723_v53 = vpop.eup %5722  ;;  %v540_v60 = vmul.f32 %v5721_v47, %v6921_v0 }
 0x175   :  { %545 = vadd.xlane.f32.xlu0 %v536_v35  ;;  %v541_v29 = vmul.f32 %v5723_v53, %v6921_v0  ;;  %v5725_v38 = vpop.eup %5724 }
 0x176   :  { %v542_v41 = vmul.f32 %v5725_v38, %v6921_v0 }
 0x177   :  { %549 = vadd.xlane.f32.xlu1 %v538_v49 }
 0x179   :  { %551 = vadd.xlane.f32.xlu0 %v539_v52 }
 0x17b   :  { %553 = vadd.xlane.f32.xlu1 %v540_v60 }
 0x17d   :  { %555 = vadd.xlane.f32.xlu0 %v541_v29 }
 0x17f   :  { %557 = vadd.xlane.f32.xlu1 %v542_v41 }
 0x190   :  { %614 = vbcast.lane.b32.xlu1 %v612_v5, 256 }
 0x193   :  { %607 = vbcast.lane.b32.xlu0 %v605_v7, 256 }
 0x1fa   :  { %v544_v22 = vpop.xlane.xlu0 %543 }
 0x1fb   :  { %v6956_v24 = vadd.f32 %v6947_v16, %v544_v22 }
 0x1fc   :  { %v548_v25 = vpop.xlane.xlu1 %547 }
 0x1fd   :  { %641 = vperm.xlu0 %5695, %v6956_v24   ;;  %v626_v36 = vadd.f32 %v6945_v14, %v548_v25 }
 0x1fe   :  { %v546_v27 = vpop.xlane.xlu0 %545 }
 0x1ff   :  { %v625_v31 = vadd.f32 %v6943_v12, %v546_v27 }
 0x200   :  { %v550_v33 = vpop.xlane.xlu1 %549 }
 0x201   :  { %644 = vperm.xlu1 %5696, %v625_v31   ;;  %v6962_v37 = vadd.f32 %v6949_v1, %v550_v33  ;;  %v8665_v33 = vld [vmem:[#allocation22_spill] sm:$0xff] }
 0x202   :  { %v552_v34 = vpop.xlane.xlu0 %551 }
 0x203   :  { %650 = vperm.xlu0 %5695, %v6962_v37   ;;  %v628_v42 = vadd.f32 %v6951_v19, %v552_v34 }
 0x204   :  { %v554_v39 = vpop.xlane.xlu1 %553 }
 0x205   :  { %647 = vperm.xlu1 %5696, %v626_v36   ;;  %v6967_v43 = vadd.f32 %v6953_v21, %v554_v39  ;;  %v8666_v39 = vld [vmem:[#allocation27_spill] sm:$0xff] }
 0x206   :  { %v556_v40 = vpop.xlane.xlu0 %555 }
 0x207   :  { %656 = vperm.xlu0 %5695, %v6967_v43  }
 0x208   :  { %v558_v46 = vpop.xlane.xlu1 %557 }
 0x209   :  { %653 = vperm.xlu1 %5696, %v628_v42  }
 0x20a   :  { %v6970_v48 = vpop.permute.xlu0 %607 }
 0x20b   :  { %8661 = vst [vmem:[#allocation43_spill] sm:$0xff] %v6970_v48  ;;  %v6973_v50 = vadd.f32 %v6970_v48, %v556_v40 }
 0x20c   :  { %v6976_v51 = vpop.permute.xlu1 %614 }
 0x20d   :  { %659 = vperm.xlu1 %5696, %v6973_v50   ;;  %8662 = vst [vmem:[#allocation44_spill] sm:$0xff] %v6976_v51  ;;  %v6979_v54 = vadd.f32 %v6976_v51, %v558_v46 }
 0x20f   :  { %662 = vperm.xlu0 %5695, %v6979_v54  }
 0x278   :  { %v642_v59 = vpop.permute.xlu0 %641 }
 0x279   :  { %v669_v20 = vrot.slane %v642_v59, %v6984_v62  ;;  %v8667_v59 = vld [vmem:[#allocation31_spill] sm:$0xff] }
 0x27c   :  { %v645_v61 = vpop.permute.xlu1 %644 }
 0x27d   :  { %v673_v63 = vrot.slane %v645_v61, %v6984_v62 }
 0x27e   :  { %v651_v13 = vpop.permute.xlu0 %650 }
 0x27f   :  { %v699_v26 = vsel %vm698_vm0, %v673_v63, %v669_v20  ;;  %v681_v44 = vrot.slane %v651_v13, %v6984_v62 }
 0x280   :  { %v648_v17 = vpop.permute.xlu1 %647 }
 0x281   :  { %v677_v23 = vrot.slane %v648_v17, %v6984_v62  ;;  %v8668_v17 = vld [vmem:[#allocation28_spill] sm:$0xff] }
 0x282   :  { %v657_v47 = vpop.permute.xlu0 %656 }
 0x283   :  { %v701_v32 = vsel %vm700_vm1, %v677_v23, %v699_v26  ;;  %v689_v60 = vrot.slane %v657_v47, %v6984_v62 }
 0x284   :  { %v654_v35 = vpop.permute.xlu1 %653  ;;  %v703_v49 = vsel %vm702_vm2, %v681_v44, %v701_v32  ;;  %v8669_v32 = vld [vmem:[#allocation34_spill] sm:$0xff] }
 0x285   :  { %v685_v9 = vrot.slane %v654_v35, %v6984_v62 }
 0x287   :  { %v705_v52 = vsel %vm704_vm3, %v685_v9, %v703_v49 }
 0x288   :  { %v660_v53 = vpop.permute.xlu1 %659  ;;  %v707_v38 = vsel %vm706_vm4, %v689_v60, %v705_v52 }
 0x289   :  { %v693_v29 = vrot.slane %v660_v53, %v6984_v62 }
 0x28a   :  { %v663_v41 = vpop.permute.xlu0 %662 }
 0x28b   :  { %v709_v4 = vsel %vm708_vm5, %v693_v29, %v707_v38  ;;  %v697_v5 = vrot.slane %v663_v41, %v6984_v62 }
 0x28d   :  { %v711_v7 = vsel %vm710_vm6, %v697_v5, %v709_v4 }
 0x28e   :  { %v714_v22 = vsel %vm713_vm7, %v711_v7, -inf }
 0x28f   :  { %715 = vmax.xlane.f32.xlu1 %v714_v22 }
 0x318   :  { %v716_v25 = vpop.xlane.xlu1 %715 }
 0x319   :  { %v721_v27 = vrot.slane %v716_v25, %v8650_v30  ;;  %v725_v34 = vrot.slane %v716_v25, %v8665_v33  ;;  %v729_v40 = vrot.slane %v716_v25, %v8666_v39  ;;  %v733_v61 = vrot.slane %v716_v25, %v8667_v59 }
 0x31a   :  { %v737_v20 = vrot.slane %v716_v25, %v8668_v17  ;;  %v741_v35 = vrot.slane %v716_v25, %v8669_v32  ;;  %v749_v49 = vrot.slane %v716_v25, %v6934_v15 }
 0x31b   :  { %v758_v46 = vsub.f32 %v6956_v24, %v721_v27  ;;  %v759_v55 = vsub.f32 %v625_v31, %v725_v34  ;;  %v760_v63 = vsub.f32 %v626_v36, %v729_v40  ;;  %v761_v23 = vsub.f32 %v6962_v37, %v733_v61 }
 0x31c   :  { %v762_v44 = vsub.f32 %v628_v42, %v737_v20  ;;  %v745_v24 = vrot.slane %v716_v25, %v6937_v2  ;;  %v763_v31 = vsub.f32 %v6967_v43, %v741_v35  ;;  %v765_v42 = vsub.f32 %v6979_v54, %v749_v49 }
 0x31d   :  { %v766_v56 = vmul.f32 1.442695, %v758_v46  ;;  %v768_v13 = vmul.f32 1.442695, %v759_v55  ;;  %v770_v26 = vmul.f32 1.442695, %v760_v63 }
 0x31e   :  { %v772_v9 = vmul.f32 1.442695, %v761_v23  ;;  %v774_v47 = vmul.f32 1.442695, %v762_v44  ;;  %v764_v37 = vsub.f32 %v6973_v50, %v745_v24  ;;  %v776_v52 = vmul.f32 1.442695, %v763_v31 }
 0x31f   :  { %5726 = vpow2.f32 %v766_v56  ;;  %v780_v43 = vmul.f32 1.442695, %v765_v42 }
 0x320   :  { %5728 = vpow2.f32 %v768_v13  ;;  %v778_v60 = vmul.f32 1.442695, %v764_v37 }
 0x321   :  { %5730 = vpow2.f32 %v770_v26 }
 0x322   :  { %5732 = vpow2.f32 %v772_v9 }
 0x323   :  { %5734 = vpow2.f32 %v774_v47 }
 0x324   :  { %5736 = vpow2.f32 %v776_v52 }
 0x325   :  { %5738 = vpow2.f32 %v778_v60 }
 0x326   :  { %5740 = vpow2.f32 %v780_v43 }
 0x32c   :  { %v7012_v36 = vpop.eup %5726 }
 0x32d   :  { %791 = vperm.xlu0 %5695, %v7012_v36   ;;  %v5729_v53 = vpop.eup %5728 }
 0x32e   :  { %v5731_v29 = vpop.eup %5730 }
 0x32f   :  { %v5733_v38 = vpop.eup %5732 }
 0x330   :  { %v5735_v41 = vpop.eup %5734 }
 0x331   :  { %794 = vperm.xlu0 %5695, %v5729_v53   ;;  %v5737_v4 = vpop.eup %5736 }
 0x332   :  { %v5739_v50 = vpop.eup %5738 }
 0x333   :  { %v5741_v5 = vpop.eup %5740 }
 0x335   :  { %797 = vperm.xlu0 %5695, %v5731_v29  }
 0x339   :  { %800 = vperm.xlu0 %5695, %v5733_v38  }
 0x33d   :  { %803 = vperm.xlu0 %5695, %v5735_v41  }
 0x341   :  { %806 = vperm.xlu0 %5695, %v5737_v4  }
 0x345   :  { %809 = vperm.xlu0 %5695, %v5739_v50  }
 0x349   :  { %812 = vperm.xlu0 %5695, %v5741_v5  }
 0x3a8   :  { %v792_v7 = vpop.permute.xlu0 %791 }
 0x3a9   :  { %v817_v55 = vrot.slane %v792_v7, %v6984_v62 }
 0x3ac   :  { %v795_v22 = vpop.permute.xlu0 %794 }
 0x3ad   :  { %v821_v40 = vrot.slane %v795_v22, %v6984_v62 }
 0x3af   :  { %v846_v13 = vsel %vm698_vm0, %v821_v40, %v817_v55 }
 0x3b0   :  { %v798_v54 = vpop.permute.xlu0 %797 }
 0x3b1   :  { %v825_v46 = vrot.slane %v798_v54, %v6984_v62 }
 0x3b3   :  { %v847_v23 = vsel %vm700_vm1, %v825_v46, %v846_v13 }
 0x3b4   :  { %v801_v25 = vpop.permute.xlu0 %800 }
 0x3b5   :  { %v829_v56 = vrot.slane %v801_v25, %v6984_v62 }
 0x3b7   :  { %v848_v35 = vsel %vm702_vm2, %v829_v56, %v847_v23 }
 0x3b8   :  { %v804_v27 = vpop.permute.xlu0 %803 }
 0x3b9   :  { %v833_v61 = vrot.slane %v804_v27, %v6984_v62 }
 0x3bb   :  { %v849_v44 = vsel %vm704_vm3, %v833_v61, %v848_v35 }
 0x3bc   :  { %v807_v34 = vpop.permute.xlu0 %806 }
 0x3bd   :  { %v837_v20 = vrot.slane %v807_v34, %v6984_v62 }
 0x3bf   :  { %v850_v31 = vsel %vm706_vm4, %v837_v20, %v849_v44 }
 0x3c0   :  { %v810_v63 = vpop.permute.xlu0 %809 }
 0x3c1   :  { %v841_v26 = vrot.slane %v810_v63, %v6984_v62 }
 0x3c3   :  { %v851_v47 = vsel %vm708_vm5, %v841_v26, %v850_v31  ;;  %v8670_v26 = vld [vmem:[#allocation25_spill] sm:$0xff] }
 0x3c4   :  { %v813_v9 = vpop.permute.xlu0 %812 }
 0x3c5   :  { %v845_v24 = vrot.slane %v813_v9, %v6984_v62 }
 0x3c7   :  { %v852_v49 = vsel %vm710_vm6, %v845_v24, %v851_v47  ;;  %v425_v24 = vpop.f32.mrf.mxu1  ;;  %v8672_v47 = vld [vmem:[#allocation26_spill] sm:$0xff] }
 0x3c8   :  { %v854_v37 = vsel %vm713_vm7, %v852_v49, 0.0 }
 0x3c9   :  { %855 = vadd.xlane.f32.xlu0 %v854_v37 }
 0x452   :  { %v856_v52 = vpop.xlane.xlu0 %855 }
 0x453   :  { %5742 = vrcp.f32 %v856_v52 }
 0x454   :  { %5744 = vtanh.f32 %v425_v24 }
 0x460   :  { %v5743_v42 = vpop.eup %5742 }
 0x461   :  { %v858_v60 = vmul.f32 %v5743_v42, %v856_v52  ;;  %v5745_v24 = vpop.eup %5744 }
 0x463   :  { %v859_v43 = vsub.f32 2.0, %v858_v60  ;;  %v8673_v60 = vld [vmem:[#allocation24_spill] sm:$0xff] }
 0x465   :  { %v860_v7 = vmul.f32 %v5743_v42, %v859_v43 }
 0x467   :  { %v881_v22 = vrot.slane %v860_v7, %v8668_v17  ;;  %v869_v54 = vrot.slane %v860_v7, %v8665_v33  ;;  %v873_v34 = vrot.slane %v860_v7, %v8666_v39  ;;  %v865_v46 = vrot.slane %v860_v7, %v8650_v30 }
 0x468   :  { %v877_v56 = vrot.slane %v860_v7, %v8667_v59  ;;  %v885_v63 = vrot.slane %v860_v7, %v8669_v32  ;;  %v893_v20 = vrot.slane %v860_v7, %v6934_v15 }
 0x469   :  { %v906_v25 = vmul.f32 %v5735_v41, %v881_v22  ;;  %v903_v27 = vmul.f32 %v5729_v53, %v869_v54  ;;  %v904_v40 = vmul.f32 %v5731_v29, %v873_v34  ;;  %v902_v55 = vmul.f32 %v7012_v36, %v865_v46  ;;  %v1030_v29 = vld [vmem:[#allocation8] sm:$0xff] }
 0x46a   :  { %v905_v61 = vmul.f32 %v5733_v38, %v877_v56  ;;  %v907_v13 = vmul.f32 %v5737_v4, %v885_v63  ;;  %v889_v53 = vrot.slane %v860_v7, %v6937_v2  ;;  %v909_v23 = vmul.f32 %v5741_v5, %v893_v20 }
 0x46b   :  { %932 = vperm.xlu0 %5695, %v906_v25   ;;  %917 = vperm.xlu1 %5696, %v903_v27   ;;  %vm1031_vm8 = vcmp.gt.f32.partialorder %v1030_v29, 0.0 }
 0x46c   :  { %v908_v41 = vmul.f32 %v5739_v50, %v889_v53  ;;  %v7044_v36 = vsel %vm1031_vm8, 1, %v8464_v57  ;;  %v8671_v50 = vld [vmem:[#allocation30_spill] sm:$0xff]  ;;  %v7166_v57 = vld [vmem:[#allocation11 + $0x1e0] sm:$0xff] }
 0x46d   :  { %8694 = vst [vmem:[#allocation54_spill] sm:$0xff] %v7166_v57 }
 0x46f   :  { %922 = vperm.xlu1 %5696, %v904_v40  }
 0x473   :  { %912 = vperm.xlu1 %5696, %v902_v55   ;;  %v8674_v55 = vld [vmem:[#allocation29_spill] sm:$0xff] }
 0x477   :  { %927 = vperm.xlu1 %5696, %v905_v61  }
 0x47b   :  { %937 = vperm.xlu1 %5696, %v907_v13  }
 0x47f   :  { %942 = vperm.xlu1 %5696, %v908_v41  }
 0x483   :  { %947 = vperm.xlu1 %5696, %v909_v23  }
 0x487   :  { %1034 = vperm.xlu1 %5696, %v7044_v36  }
 0x4e6   :  { %v918_v38 = vpop.permute.xlu1 %917  ;;  %v933_v4 = vpop.permute.xlu0 %932 }
 0x4e7   :  { %v951_v35 = vmul.f32 %v918_v38, %v8670_v26  ;;  %v954_v31 = vmul.f32 %v933_v4, %v8671_v50  ;;  %v8675_v38 = vld [vmem:[#allocation32_spill] sm:$0xff] }
 0x4e9   :  { %v964_v44 = vrot.slane %v951_v35, 4  ;;  %v982_v42 = vrot.slane %v954_v31, 4 }
 0x4ea   :  { %v923_v9 = vpop.permute.xlu1 %922 }
 0x4eb   :  { %v952_v49 = vmul.f32 %v923_v9, %v8672_v47  ;;  %v965_v37 = vadd.f32 %v964_v44, %v951_v35  ;;  %v983_v27 = vadd.f32 %v982_v42, %v954_v31  ;;  %v8676_v31 = vld [vmem:[#allocation33_spill] sm:$0xff] }
 0x4ed   :  { %v970_v5 = vrot.slane %v952_v49, 4  ;;  %v966_v7 = vrot.slane %v965_v37, 2  ;;  %v984_v53 = vrot.slane %v983_v27, 2 }
 0x4ee   :  { %v913_v52 = vpop.permute.xlu1 %912 }
 0x4ef   :  { %v950_v43 = vmul.f32 %v913_v52, %v8673_v60  ;;  %v971_v22 = vadd.f32 %v970_v5, %v952_v49  ;;  %v967_v40 = vadd.f32 %v966_v7, %v965_v37  ;;  %v985_v50 = vadd.f32 %v984_v53, %v983_v27 }
 0x4f0   :  { %v1007_v60 = vrot.slane %v5745_v24, 1 }
 0x4f1   :  { %v958_v54 = vrot.slane %v950_v43, 4  ;;  %v972_v46 = vrot.slane %v971_v22, 2  ;;  %v968_v20 = vrot.slane %v967_v40, 1 }
 0x4f2   :  { %v928_v25 = vpop.permute.xlu1 %927 }
 0x4f3   :  { %v959_v34 = vadd.f32 %v958_v54, %v950_v43  ;;  %v953_v56 = vmul.f32 %v928_v25, %v8674_v55  ;;  %v973_v29 = vadd.f32 %v972_v46, %v971_v22  ;;  %v969_v49 = vadd.f32 %v968_v20, %v967_v40  ;;  %v8677_v46 = vld [vmem:[#allocation35_spill] sm:$0xff] }
 0x4f4   :  { %v986_v25 = vrot.slane %v985_v50, 1  ;;  %v1008_v20 = vrot.slane %v5745_v24, 2 }
 0x4f5   :  { %v960_v61 = vrot.slane %v959_v34, 2  ;;  %v976_v63 = vrot.slane %v953_v56, 4  ;;  %v974_v37 = vrot.slane %v973_v29, 1 }
 0x4f6   :  { %v938_v13 = vpop.permute.xlu1 %937 }
 0x4f7   :  { %v961_v41 = vadd.f32 %v960_v61, %v959_v34  ;;  %v977_v23 = vadd.f32 %v976_v63, %v953_v56  ;;  %v955_v26 = vmul.f32 %v938_v13, %v8675_v38  ;;  %v1023_v56 = vadd.f32 %v1007_v60, %v969_v49 }
 0x4f8   :  { %v975_v61 = vadd.f32 %v974_v37, %v973_v29  ;;  %v1009_v13 = vrot.slane %v5745_v24, 3  ;;  %v1010_v49 = vrot.slane %v5745_v24, 4  ;;  %v1012_v37 = vrot.slane %v5745_v24, 6 }
 0x4f9   :  { %v962_v35 = vrot.slane %v961_v41, 1  ;;  %v978_v4 = vrot.slane %v977_v23, 2  ;;  %v988_v44 = vrot.slane %v955_v26, 4 }
 0x4fa   :  { %v943_v9 = vpop.permute.xlu1 %942 }
 0x4fb   :  { %v956_v47 = vmul.f32 %v943_v9, %v8676_v31  ;;  %v979_v5 = vadd.f32 %v978_v4, %v977_v23  ;;  %v989_v52 = vadd.f32 %v988_v44, %v955_v26  ;;  %v963_v43 = vadd.f32 %v962_v35, %v961_v41 }
 0x4fc   :  { %v987_v35 = vadd.f32 %v986_v25, %v985_v50  ;;  %v1045_v44 = vrot.slane %v1023_v56, 7  ;;  %v1024_v9 = vadd.f32 %v1008_v20, %v975_v61  ;;  %v1013_v56 = vrot.slane %v5745_v24, 7 }
 0x4fd   :  { %v994_v42 = vrot.slane %v956_v47, 4  ;;  %v980_v7 = vrot.slane %v979_v5, 1  ;;  %v990_v22 = vrot.slane %v989_v52, 2  ;;  %v1022_v23 = vadd.f32 %v5745_v24, %v963_v43 }
 0x4fe   :  { %v948_v54 = vpop.permute.xlu1 %947  ;;  %v1026_v43 = vadd.f32 %v1010_v49, %v987_v35  ;;  %v7067_v35 = vld [vmem:[#allocation11 + $0xe8] sm:$0xff]  ;;  %v7088_v49 = vld [vmem:[#allocation11 + $0xb0] sm:$0xff] }
 0x4ff   :  { %v995_v34 = vadd.f32 %v994_v42, %v956_v47  ;;  %v957_v55 = vmul.f32 %v948_v54, %v8677_v46  ;;  %v981_v63 = vadd.f32 %v980_v7, %v979_v5  ;;  %v991_v27 = vadd.f32 %v990_v22, %v989_v52 }
 0x500   :  { %v1011_v47 = vrot.slane %v5745_v24, 5  ;;  %v1046_v29 = vsel %vm698_vm0, %v1045_v44, %v1022_v23  ;;  %v1047_v22 = vrot.slane %v1024_v9, 6  ;;  %v7064_v24 = vld [vmem:[#allocation11 + $0xf0] sm:$0xff]  ;;  %v7070_v44 = vld [vmem:[#allocation11 + $0xe0] sm:$0xff]  ;;  %v7073_v9 = vld [vmem:[#allocation11 + $0xd8] sm:$0xff] }
 0x501   :  { %v996_v53 = vrot.slane %v995_v34, 2  ;;  %v1000_v40 = vrot.slane %v957_v55, 4  ;;  %v992_v38 = vrot.slane %v991_v27, 1  ;;  %v1025_v26 = vadd.f32 %v1009_v13, %v981_v63 }
 0x502   :  { %v1048_v50 = vsel %vm700_vm1, %v1047_v22, %v1046_v29  ;;  %v1051_v63 = vrot.slane %v1026_v43, 4  ;;  %v7091_v29 = vld [vmem:[#allocation11 + $0xa8] sm:$0xff]  ;;  %v7109_v43 = vld [vmem:[#allocation11 + $0x78] sm:$0xff]  ;;  %v7112_v22 = vld [vmem:[#allocation11 + $0x70] sm:$0xff] }
 0x503   :  { %v997_v4 = vadd.f32 %v996_v53, %v995_v34  ;;  %v1001_v41 = vadd.f32 %v1000_v40, %v957_v55  ;;  %v993_v31 = vadd.f32 %v992_v38, %v991_v27  ;;  %v1049_v5 = vrot.slane %v1025_v26, 5  ;;  %v1035_v40 = vpop.permute.xlu1 %1034  ;;  %v1062_v26 = vld [vmem:[#allocation7 + $0x8] sm:$0xff] }
 0x504   :  { %vm1036_vm9 = vcmp.eq.s32.totalorder %v1035_v40, 1  ;;  %v7148_v40 = vld [vmem:[#allocation11 + $0x10] sm:$0xff] }
 0x505   :  { %v998_v42 = vrot.slane %v997_v4, 1  ;;  %v1002_v54 = vrot.slane %v1001_v41, 2  ;;  %v1027_v52 = vadd.f32 %v1011_v47, %v993_v31  ;;  %v1050_v61 = vsel %vm702_vm2, %v1049_v5, %v1048_v50  ;;  %v7076_v31 = vld [vmem:[#allocation11 + $0xd0] sm:$0xff]  ;;  %v7079_v47 = vld [vmem:[#allocation11 + $0xc8] sm:$0xff]  ;;  %v7097_v5 = vld [vmem:[#allocation11 + $0x98] sm:$0xff]  ;;  %8688 = vst [vmem:[#allocation48_spill] sm:$0xff] %v7148_v40 }
 0x506   :  { %v1052_v53 = vsel %vm704_vm3, %v1051_v63, %v1050_v61  ;;  %v7121_v50 = vld [vmem:[#allocation11 + $0x58] sm:$0xff]  ;;  %v7136_v63 = vld [vmem:[#allocation11 + $0x30] sm:$0xff] }
 0x507   :  { %v999_v60 = vadd.f32 %v998_v42, %v997_v4  ;;  %v1003_v7 = vadd.f32 %v1002_v54, %v1001_v41  ;;  %v1053_v25 = vrot.slane %v1027_v52, 3  ;;  %v7082_v42 = vld [vmem:[#allocation11 + $0xc0] sm:$0xff]  ;;  %v7085_v54 = vld [vmem:[#allocation11 + $0xb8] sm:$0xff]  ;;  %v7100_v52 = vld [vmem:[#allocation11 + $0x90] sm:$0xff]  ;;  %8679 = vst [vmem:[#allocation30_spill] sm:$0xff] %v7121_v50 }
 0x508   :  { %v7133_v61 = vld [vmem:[#allocation11 + $0x38] sm:$0xff]  ;;  %8684 = vst [vmem:[#allocation33_spill] sm:$0xff] %v7136_v63 }
 0x509   :  { %v1028_v46 = vadd.f32 %v1012_v37, %v999_v60  ;;  %v1004_v34 = vrot.slane %v1003_v7, 1  ;;  %v1054_v20 = vsel %vm706_vm4, %v1053_v25, %v1052_v53  ;;  %v7094_v37 = vld [vmem:[#allocation11 + $0xa0] sm:$0xff]  ;;  %v7103_v60 = vld [vmem:[#allocation11 + $0x88] sm:$0xff]  ;;  %v7124_v25 = vld [vmem:[#allocation11 + $0x50] sm:$0xff]  ;;  %8683 = vst [vmem:[#allocation32_spill] sm:$0xff] %v7133_v61 }
 0x50a   :  { %8680 = vst [vmem:[#allocation26_spill] sm:$0xff] %v7124_v25  ;;  %v7145_v53 = vld [vmem:[#allocation11 + $0x18] sm:$0xff] }
 0x50b   :  { %v1005_v55 = vadd.f32 %v1004_v34, %v1003_v7  ;;  %v1055_v27 = vrot.slane %v1028_v46, 2  ;;  %v7106_v7 = vld [vmem:[#allocation11 + $0x80] sm:$0xff]  ;;  %v7115_v46 = vld [vmem:[#allocation11 + $0x68] sm:$0xff]  ;;  %8687 = vst [vmem:[#allocation47_spill] sm:$0xff] %v7145_v53 }
 0x50c   :  { %v7118_v34 = vld [vmem:[#allocation11 + $0x60] sm:$0xff] }
 0x50d   :  { %v1029_v13 = vadd.f32 %v1013_v56, %v1005_v55  ;;  %v1056_v38 = vsel %vm708_vm5, %v1055_v27, %v1054_v20  ;;  %8678 = vst [vmem:[#allocation25_spill] sm:$0xff] %v7118_v34  ;;  %v7127_v55 = vld [vmem:[#allocation11 + $0x48] sm:$0xff]  ;;  %v7130_v56 = vld [vmem:[#allocation11 + $0x40] sm:$0xff] }
 0x50e   :  { %8681 = vst [vmem:[#allocation24_spill] sm:$0xff] %v7127_v55  ;;  %8682 = vst [vmem:[#allocation29_spill] sm:$0xff] %v7130_v56  ;;  %v7139_v27 = vld [vmem:[#allocation11 + $0x28] sm:$0xff] }
 0x50f   :  { %v1057_v23 = vrot.slane %v1029_v13, 1  ;;  %8685 = vst [vmem:[#allocation35_spill] sm:$0xff] %v7139_v27  ;;  %v7142_v13 = vld [vmem:[#allocation11 + $0x20] sm:$0xff]  ;;  %v7151_v20 = vld [vmem:[#allocation11 + $0x8] sm:$0xff] }
 0x510   :  { %8686 = vst [vmem:[#allocation46_spill] sm:$0xff] %v7142_v13  ;;  %8689 = vst [vmem:[#allocation49_spill] sm:$0xff] %v7151_v20 }
 0x511   :  { %v1058_v4 = vsel %vm710_vm6, %v1057_v23, %v1056_v38  ;;  %v7154_v23 = vld [vmem:[#allocation11] sm:$0xff]  ;;  %v7157_v38 = vld [vmem:[#allocation11 + $0x1f8] sm:$0xff] }
 0x512   :  { %v7062_v41 = vsel %vm1036_vm9, %v1058_v4, 0.0  ;;  %5569 = vmatprep.mubr.msk.f32.mxu0 %vm1036_vm9, %v1058_v4  ;;  %8690 = vst [vmem:[#allocation50_spill] sm:$0xff] %v7154_v23  ;;  %8691 = vst [vmem:[#allocation51_spill] sm:$0xff] %v7157_v38  ;;  %v7163_v4 = vld [vmem:[#allocation11 + $0x1e8] sm:$0xff] }
 0x513   :  { %1128 = vmatmul.mubr.f32.vlgmr.msra.gmra.mxu0 %v1062_v26  ;;  %v7160_v26 = vld [vmem:[#allocation11 + $0x1f0] sm:$0xff]  ;;  %8693 = vst [vmem:[#allocation53_spill] sm:$0xff] %v7163_v4 }
 0x514   :  { %2326 = vmatpush1.msra.mxu0 %v7064_v24  ;;  %8692 = vst [vmem:[#allocation52_spill] sm:$0xff] %v7160_v26 }
 0x515   :  { %2327 = vmatprep.subr.mxu0 %v7067_v35 }
 0x516   :  { %2328 = vmatpush1.msra.mxu0 %v7070_v44 }
 0x517   :  { %2329 = vmatprep.subr.mxu0 %v7073_v9 }
 0x518   :  { %2330 = vmatpush1.msra.mxu0 %v7076_v31 }
 0x519   :  { %2331 = vmatprep.subr.mxu0 %v7079_v47 }
 0x51a   :  { %2332 = vmatpush1.msra.mxu0 %v7082_v42 }
 0x51b   :  { %2333 = vmatprep.subr.mxu0 %v7085_v54 }
 0x51c   :  { %2334 = vmatpush1.msra.mxu0 %v7088_v49 }
 0x51d   :  { %2335 = vmatprep.subr.mxu0 %v7091_v29 }
 0x51e   :  { %2336 = vmatpush1.msra.mxu0 %v7094_v37 }
 0x51f   :  { %2337 = vmatprep.subr.mxu0 %v7097_v5 }
 0x520   :  { %2338 = vmatpush1.msra.mxu0 %v7100_v52 }
 0x521   :  { %2339 = vmatprep.subr.mxu0 %v7103_v60 }
 0x522   :  { %2340 = vmatpush1.msra.mxu0 %v7106_v7 }
 0x523   :  { %2341 = vmatprep.subr.mxu0 %v7109_v43 }
 0x524   :  { %2342 = vmatpush1.msra.mxu0 %v7112_v22 }
 0x525   :  { %2343 = vmatprep.subr.mxu0 %v7115_v46 }
 0x526   :  { %2344 = vmatpush1.msra.mxu0 %v7118_v34 }
 0x527   :  { %2345 = vmatprep.subr.mxu0 %v7121_v50 }
 0x528   :  { %2346 = vmatpush1.msra.mxu0 %v7124_v25 }
 0x529   :  { %2347 = vmatprep.subr.mxu0 %v7127_v55 }
 0x52a   :  { %2348 = vmatpush1.msra.mxu0 %v7130_v56 }
 0x52b   :  { %2349 = vmatprep.subr.mxu0 %v7133_v61 }
 0x52c   :  { %2350 = vmatpush1.msra.mxu0 %v7136_v63 }
 0x52d   :  { %2351 = vmatprep.subr.mxu0 %v7139_v27 }
 0x52e   :  { %2352 = vmatpush1.msra.mxu0 %v7142_v13 }
 0x52f   :  { %2353 = vmatprep.subr.mxu0 %v7145_v53 }
 0x530   :  { %2354 = vmatpush1.msra.mxu0 %v7148_v40 }
 0x531   :  { %2355 = vmatprep.subr.mxu0 %v7151_v20  ;;  %v7169_v20 = vld [vmem:[#allocation11 + $0x1d8] sm:$0xff] }
 0x532   :  { %2356 = vmatpush1.msra.mxu0 %v7154_v23  ;;  %8695 = vst [vmem:[#allocation55_spill] sm:$0xff] %v7169_v20  ;;  %v7172_v23 = vld [vmem:[#allocation11 + $0x1d0] sm:$0xff] }
 0x533   :  { %2357 = vmatprep.subr.mxu0 %v7157_v38  ;;  %8696 = vst [vmem:[#allocation56_spill] sm:$0xff] %v7172_v23  ;;  %v7175_v38 = vld [vmem:[#allocation11 + $0x1c8] sm:$0xff] }
 0x534   :  { %2358 = vmatpush2.msra.mxu0 %v7160_v26  ;;  %8697 = vst [vmem:[#allocation57_spill] sm:$0xff] %v7175_v38  ;;  %v7178_v26 = vld [vmem:[#allocation11 + $0x1c0] sm:$0xff] }
 0x535   :  { %2359 = vmatprep.subr.mxu0 %v7163_v4  ;;  %8698 = vst [vmem:[#allocation58_spill] sm:$0xff] %v7178_v26  ;;  %v7181_v4 = vld [vmem:[#allocation11 + $0x1b8] sm:$0xff] }
 0x536   :  { %2360 = vmatpush2.msra.mxu0 %v7166_v57  ;;  %8699 = vst [vmem:[#allocation59_spill] sm:$0xff] %v7181_v4  ;;  %v7184_v57 = vld [vmem:[#allocation11 + $0x1b0] sm:$0xff] }
 0x537   :  { %2361 = vmatprep.subr.mxu0 %v7169_v20  ;;  %8700 = vst [vmem:[#allocation60_spill] sm:$0xff] %v7184_v57  ;;  %v7187_v20 = vld [vmem:[#allocation11 + $0x1a8] sm:$0xff] }
 0x538   :  { %2362 = vmatpush2.msra.mxu0 %v7172_v23  ;;  %8701 = vst [vmem:[#allocation61_spill] sm:$0xff] %v7187_v20  ;;  %v7190_v23 = vld [vmem:[#allocation11 + $0x1a0] sm:$0xff] }
 0x539   :  { %2363 = vmatprep.subr.mxu0 %v7175_v38  ;;  %8702 = vst [vmem:[#allocation62_spill] sm:$0xff] %v7190_v23  ;;  %v7193_v38 = vld [vmem:[#allocation11 + $0x198] sm:$0xff] }
 0x53a   :  { %2364 = vmatpush2.msra.mxu0 %v7178_v26  ;;  %8703 = vst [vmem:[#allocation63_spill] sm:$0xff] %v7193_v38  ;;  %v7196_v26 = vld [vmem:[#allocation11 + $0x190] sm:$0xff] }
 0x53b   :  { %2365 = vmatprep.subr.mxu0 %v7181_v4  ;;  %8704 = vst [vmem:[#allocation64_spill] sm:$0xff] %v7196_v26  ;;  %v7199_v4 = vld [vmem:[#allocation11 + $0x188] sm:$0xff] }
 0x53c   :  { %2366 = vmatpush2.msra.mxu0 %v7184_v57  ;;  %8705 = vst [vmem:[#allocation65_spill] sm:$0xff] %v7199_v4  ;;  %v7202_v57 = vld [vmem:[#allocation11 + $0x180] sm:$0xff] }
 0x53d   :  { %2367 = vmatprep.subr.mxu0 %v7187_v20  ;;  %8706 = vst [vmem:[#allocation66_spill] sm:$0xff] %v7202_v57  ;;  %v7205_v20 = vld [vmem:[#allocation11 + $0x178] sm:$0xff] }
 0x53e   :  { %2368 = vmatpush2.msra.mxu0 %v7190_v23  ;;  %8707 = vst [vmem:[#allocation67_spill] sm:$0xff] %v7205_v20  ;;  %v7208_v23 = vld [vmem:[#allocation11 + $0x170] sm:$0xff] }
 0x53f   :  { %2369 = vmatprep.subr.mxu0 %v7193_v38  ;;  %8708 = vst [vmem:[#allocation68_spill] sm:$0xff] %v7208_v23  ;;  %v7211_v38 = vld [vmem:[#allocation11 + $0x168] sm:$0xff] }
 0x540   :  { %2370 = vmatpush2.msra.mxu0 %v7196_v26  ;;  %8709 = vst [vmem:[#allocation69_spill] sm:$0xff] %v7211_v38  ;;  %v7214_v26 = vld [vmem:[#allocation11 + $0x160] sm:$0xff] }
 0x541   :  { %2371 = vmatprep.subr.mxu0 %v7199_v4  ;;  %8710 = vst [vmem:[#allocation70_spill] sm:$0xff] %v7214_v26  ;;  %v7217_v4 = vld [vmem:[#allocation11 + $0x158] sm:$0xff] }
 0x542   :  { %2372 = vmatpush2.msra.mxu0 %v7202_v57  ;;  %8711 = vst [vmem:[#allocation71_spill] sm:$0xff] %v7217_v4  ;;  %v7220_v57 = vld [vmem:[#allocation11 + $0x150] sm:$0xff] }
 0x543   :  { %2373 = vmatprep.subr.mxu0 %v7205_v20  ;;  %8712 = vst [vmem:[#allocation72_spill] sm:$0xff] %v7220_v57  ;;  %v7223_v20 = vld [vmem:[#allocation11 + $0x148] sm:$0xff] }
 0x544   :  { %2374 = vmatpush2.msra.mxu0 %v7208_v23  ;;  %8713 = vst [vmem:[#allocation73_spill] sm:$0xff] %v7223_v20  ;;  %v7226_v23 = vld [vmem:[#allocation11 + $0x140] sm:$0xff] }
 0x545   :  { %2375 = vmatprep.subr.mxu0 %v7211_v38  ;;  %8714 = vst [vmem:[#allocation74_spill] sm:$0xff] %v7226_v23  ;;  %v7229_v38 = vld [vmem:[#allocation11 + $0x138] sm:$0xff] }
 0x546   :  { %2376 = vmatpush2.msra.mxu0 %v7214_v26  ;;  %8715 = vst [vmem:[#allocation75_spill] sm:$0xff] %v7229_v38  ;;  %v7232_v26 = vld [vmem:[#allocation11 + $0x130] sm:$0xff] }
 0x547   :  { %2377 = vmatprep.subr.mxu0 %v7217_v4  ;;  %8716 = vst [vmem:[#allocation76_spill] sm:$0xff] %v7232_v26  ;;  %v7235_v4 = vld [vmem:[#allocation11 + $0x128] sm:$0xff] }
 0x548   :  { %2378 = vmatpush2.msra.mxu0 %v7220_v57  ;;  %8717 = vst [vmem:[#allocation77_spill] sm:$0xff] %v7235_v4  ;;  %v7238_v57 = vld [vmem:[#allocation11 + $0x120] sm:$0xff] }
 0x549   :  { %2379 = vmatprep.subr.mxu0 %v7223_v20  ;;  %8718 = vst [vmem:[#allocation78_spill] sm:$0xff] %v7238_v57  ;;  %v7241_v20 = vld [vmem:[#allocation11 + $0x118] sm:$0xff] }
 0x54a   :  { %2380 = vmatpush2.msra.mxu0 %v7226_v23  ;;  %8719 = vst [vmem:[#allocation79_spill] sm:$0xff] %v7241_v20  ;;  %v7244_v23 = vld [vmem:[#allocation11 + $0x110] sm:$0xff] }
 0x54b   :  { %2381 = vmatprep.subr.mxu0 %v7229_v38  ;;  %8720 = vst [vmem:[#allocation80_spill] sm:$0xff] %v7244_v23  ;;  %v7247_v38 = vld [vmem:[#allocation11 + $0x108] sm:$0xff] }
 0x54c   :  { %2382 = vmatpush2.msra.mxu0 %v7232_v26  ;;  %8721 = vst [vmem:[#allocation81_spill] sm:$0xff] %v7247_v38  ;;  %v7250_v26 = vld [vmem:[#allocation11 + $0x100] sm:$0xff] }
 0x54d   :  { %2383 = vmatprep.subr.mxu0 %v7235_v4  ;;  %8722 = vst [vmem:[#allocation82_spill] sm:$0xff] %v7250_v26  ;;  %v7253_v4 = vld [vmem:[#allocation11 + $0xf8] sm:$0xff] }
 0x54e   :  { %2384 = vmatpush2.msra.mxu0 %v7238_v57  ;;  %8723 = vst [vmem:[#allocation83_spill] sm:$0xff] %v7253_v4 }
 0x54f   :  { %2385 = vmatprep.subr.mxu0 %v7241_v20 }
 0x550   :  { %2386 = vmatpush2.msra.mxu0 %v7244_v23 }
 0x551   :  { %2387 = vmatprep.subr.mxu0 %v7247_v38 }
 0x552   :  { %2388 = vmatpush2.msra.mxu0 %v7250_v26 }
 0x553   :  { %3587 = vmatprep.subr.mxu0 %v7253_v4 }
 0x5d3   :  { %v1129_v57 = vpop.f32.mrf.mxu0 }
 0x5d4   :  { %v1136_v40 = vcombine.high %v1129_v57, %v1129_v57  ;;  %v1143_v20 = vrot.slane %v1129_v57, %v6884_v10 }
 0x5d6   :  { %v1150_v53 = vrot.slane %v1136_v40, %v6884_v10  ;;  %v1151_v13 = vcombine.high %v1143_v20, %v1143_v20  ;;  %v1159_v23 = vrot.slane %v1143_v20, %v6884_v10 }
 0x5d8   :  { %v1152_v27 = vcombine.high %v1150_v53, %v1150_v53  ;;  %v1166_v38 = vrot.slane %v1150_v53, %v6884_v10  ;;  %v1173_v63 = vrot.slane %v1151_v13, %v6884_v10  ;;  %v1181_v61 = vcombine.high %v1159_v23, %v1159_v23 }
 0x5d9   :  { %v1188_v26 = vrot.slane %v1159_v23, %v8650_v30 }
 0x5da   :  { %v1180_v56 = vrot.slane %v1152_v27, %v6884_v10  ;;  %v1183_v4 = vcombine.high %v1173_v63, %v1173_v63  ;;  %v1192_v55 = vrot.slane %v1173_v63, %v8650_v30  ;;  %v1196_v57 = vrot.slane %v1181_v61, %v8650_v30 }
 0x5db   :  { %v1225_v40 = vadd.f32 %v1188_v26, %v6879_v6  ;;  %v1182_v25 = vcombine.high %v1166_v38, %v1166_v38  ;;  %v1204_v13 = vrot.slane %v1166_v38, %v8650_v30 }
 0x5dc   :  { %v1184_v50 = vcombine.high %v1180_v56, %v1180_v56  ;;  %v1200_v20 = vrot.slane %v1183_v4, %v8650_v30  ;;  %v1208_v53 = vrot.slane %v1180_v56, %v8650_v30  ;;  %v1226_v34 = vadd.f32 %v6877_v3, %v1192_v55 }
 0x5dd   :  { %v1227_v23 = vadd.f32 %v1196_v57, %v6886_v11  ;;  %5746 = vtanh.f32 %v1225_v40  ;;  %v1212_v26 = vrot.slane %v1182_v25, %v8650_v30  ;;  %v1229_v4 = vadd.f32 %v1204_v13, %v6895_v28 }
 0x5de   :  { %v1228_v27 = vadd.f32 %v6881_v8, %v1200_v20  ;;  %v1216_v63 = vrot.slane %v1184_v50, %v8650_v30  ;;  %v1230_v61 = vadd.f32 %v6889_v18, %v1208_v53  ;;  %5748 = vtanh.f32 %v1226_v34 }
 0x5df   :  { %5750 = vtanh.f32 %v1227_v23  ;;  %v1231_v55 = vadd.f32 %v1212_v26, %v6912_v58 }
 0x5e0   :  { %5752 = vtanh.f32 %v1228_v27  ;;  %v1232_v56 = vadd.f32 %v6904_v45, %v1216_v63 }
 0x5e1   :  { %5754 = vtanh.f32 %v1230_v61 }
 0x5e2   :  { %5756 = vtanh.f32 %v1229_v4 }
 0x5e3   :  { %5758 = vtanh.f32 %v1232_v56 }
 0x5e4   :  { %5760 = vtanh.f32 %v1231_v55 }
 0x5ea   :  { %v5747_v38 = vpop.eup %5746 }
 0x5eb   :  { %v1241_v50 = vmul.f32 %v5747_v38, %v6921_v0  ;;  %v5749_v57 = vpop.eup %5748 }
 0x5ec   :  { %v5751_v40 = vpop.eup %5750  ;;  %v1242_v34 = vmul.f32 %v5749_v57, %v6921_v0 }
 0x5ed   :  { %1249 = vadd.xlane.f32.xlu1 %v1241_v50  ;;  %v5753_v25 = vpop.eup %5752  ;;  %v1243_v13 = vmul.f32 %v5751_v40, %v6921_v0 }
 0x5ee   :  { %1251 = vadd.xlane.f32.xlu0 %v1242_v34  ;;  %v1244_v20 = vmul.f32 %v5753_v25, %v6921_v0  ;;  %v5755_v53 = vpop.eup %5754 }
 0x5ef   :  { %v5757_v23 = vpop.eup %5756  ;;  %v1246_v27 = vmul.f32 %v5755_v53, %v6921_v0 }
 0x5f0   :  { %v5759_v63 = vpop.eup %5758  ;;  %v1245_v61 = vmul.f32 %v5757_v23, %v6921_v0 }
 0x5f1   :  { %1255 = vadd.xlane.f32.xlu1 %v1244_v20  ;;  %v5761_v26 = vpop.eup %5760  ;;  %v1248_v4 = vmul.f32 %v5759_v63, %v6921_v0 }
 0x5f2   :  { %1253 = vadd.xlane.f32.xlu0 %v1243_v13  ;;  %v1247_v56 = vmul.f32 %v5761_v26, %v6921_v0 }
 0x5f5   :  { %1259 = vadd.xlane.f32.xlu1 %v1246_v27 }
 0x5f6   :  { %1257 = vadd.xlane.f32.xlu0 %v1245_v61 }
 0x5f9   :  { %1263 = vadd.xlane.f32.xlu1 %v1248_v4 }
 0x5fa   :  { %1261 = vadd.xlane.f32.xlu0 %v1247_v56 }
 0x676   :  { %v1250_v55 = vpop.xlane.xlu1 %1249 }
 0x677   :  { %v1265_v38 = vadd.f32 %v1250_v55, %v6947_v16  ;;  %v1252_v50 = vpop.xlane.xlu0 %1251 }
 0x678   :  { %v1266_v57 = vadd.f32 %v1252_v50, %v6943_v12 }
 0x679   :  { %1282 = vperm.xlu0 %5695, %v1265_v38  }
 0x67a   :  { %v1256_v40 = vpop.xlane.xlu1 %1255  ;;  %1285 = vperm.xlu1 %5696, %v1266_v57  }
 0x67b   :  { %v1254_v34 = vpop.xlane.xlu0 %1253  ;;  %v1268_v13 = vadd.f32 %v1256_v40, %v6949_v1 }
 0x67c   :  { %v1267_v25 = vadd.f32 %v1254_v34, %v6945_v14 }
 0x67e   :  { %1288 = vperm.xlu1 %5696, %v1267_v25   ;;  %v1260_v20 = vpop.xlane.xlu1 %1259 }
 0x67f   :  { %v1258_v53 = vpop.xlane.xlu0 %1257  ;;  %v1270_v27 = vadd.f32 %v1260_v20, %v6953_v21 }
 0x680   :  { %v1269_v0 = vadd.f32 %v1258_v53, %v6951_v19 }
 0x682   :  { %1294 = vperm.xlu0 %5695, %v1269_v0   ;;  %1291 = vperm.xlu1 %5696, %v1268_v13   ;;  %v1264_v61 = vpop.xlane.xlu1 %1263 }
 0x683   :  { %v1262_v23 = vpop.xlane.xlu0 %1261  ;;  %v1272_v26 = vadd.f32 %v1264_v61, %v6976_v51 }
 0x684   :  { %v1271_v63 = vadd.f32 %v1262_v23, %v6970_v48 }
 0x686   :  { %1300 = vperm.xlu0 %5695, %v1271_v63   ;;  %1297 = vperm.xlu1 %5696, %v1270_v27  }
 0x68a   :  { %1303 = vperm.xlu1 %5696, %v1272_v26  }
 0x6f4   :  { %v1283_v56 = vpop.permute.xlu0 %1282 }
 0x6f5   :  { %v1286_v4 = vpop.permute.xlu1 %1285  ;;  %v1308_v34 = vrot.slane %v1283_v56, %v6984_v62 }
 0x6f6   :  { %v1312_v50 = vrot.slane %v1286_v4, %v6984_v62 }
 0x6f8   :  { %v1337_v20 = vsel %vm698_vm0, %v1312_v50, %v1308_v34 }
 0x6f9   :  { %v1289_v55 = vpop.permute.xlu1 %1288 }
 0x6fa   :  { %v1316_v40 = vrot.slane %v1289_v55, %v6984_v62 }
 0x6fc   :  { %v1338_v48 = vsel %vm700_vm1, %v1316_v40, %v1337_v20 }
 0x6fd   :  { %v1295_v53 = vpop.permute.xlu0 %1294  ;;  %v1292_v1 = vpop.permute.xlu1 %1291 }
 0x6fe   :  { %v1320_v23 = vrot.slane %v1292_v1, %v6984_v62  ;;  %v1324_v61 = vrot.slane %v1295_v53, %v6984_v62 }
 0x700   :  { %v1339_v51 = vsel %vm702_vm2, %v1320_v23, %v1338_v48 }
 0x701   :  { %v1301_v21 = vpop.permute.xlu0 %1300  ;;  %v1298_v19 = vpop.permute.xlu1 %1297  ;;  %v1340_v56 = vsel %vm704_vm3, %v1324_v61, %v1339_v51 }
 0x702   :  { %v1328_v4 = vrot.slane %v1298_v19, %v6984_v62  ;;  %v1332_v55 = vrot.slane %v1301_v21, %v6984_v62 }
 0x704   :  { %v1341_v14 = vsel %vm706_vm4, %v1328_v4, %v1340_v56 }
 0x705   :  { %v1304_v12 = vpop.permute.xlu1 %1303  ;;  %v1342_v1 = vsel %vm708_vm5, %v1332_v55, %v1341_v14 }
 0x706   :  { %v1336_v50 = vrot.slane %v1304_v12, %v6984_v62 }
 0x708   :  { %v1343_v40 = vsel %vm710_vm6, %v1336_v50, %v1342_v1 }
 0x709   :  { %v1345_v34 = vsel %vm713_vm7, %v1343_v40, -inf }
 0x70a   :  { %1346 = vmax.xlane.f32.xlu0 %v1345_v34 }
 0x793   :  { %v1347_v48 = vpop.xlane.xlu0 %1346 }
 0x794   :  { %v1352_v53 = vrot.slane %v1347_v48, %v8650_v30  ;;  %v1356_v19 = vrot.slane %v1347_v48, %v8665_v33  ;;  %v1380_v21 = vrot.slane %v1347_v48, %v6934_v15  ;;  %v1360_v51 = vrot.slane %v1347_v48, %v8666_v39 }
 0x795   :  { %v1364_v14 = vrot.slane %v1347_v48, %v8667_v59  ;;  %v1368_v50 = vrot.slane %v1347_v48, %v8668_v17  ;;  %v1372_v34 = vrot.slane %v1347_v48, %v8669_v32 }
 0x796   :  { %v1389_v20 = vsub.f32 %v1265_v38, %v1352_v53  ;;  %v1390_v23 = vsub.f32 %v1266_v57, %v1356_v19  ;;  %v1396_v12 = vsub.f32 %v1272_v26, %v1380_v21  ;;  %v1391_v4 = vsub.f32 %v1267_v25, %v1360_v51 }
 0x797   :  { %v1392_v1 = vsub.f32 %v1268_v13, %v1364_v14  ;;  %v1393_v16 = vsub.f32 %v1269_v0, %v1368_v50  ;;  %v1376_v57 = vrot.slane %v1347_v48, %v6937_v2  ;;  %v1394_v26 = vsub.f32 %v1270_v27, %v1372_v34 }
 0x798   :  { %v1397_v61 = vmul.f32 1.442695, %v1389_v20  ;;  %v1399_v55 = vmul.f32 1.442695, %v1390_v23  ;;  %v1411_v56 = vmul.f32 1.442695, %v1396_v12 }
 0x799   :  { %v1401_v40 = vmul.f32 1.442695, %v1391_v4  ;;  %v1403_v38 = vmul.f32 1.442695, %v1392_v1  ;;  %v1405_v53 = vmul.f32 1.442695, %v1393_v16  ;;  %v1395_v19 = vsub.f32 %v1271_v63, %v1376_v57 }
 0x79a   :  { %5762 = vpow2.f32 %v1397_v61  ;;  %v1407_v13 = vmul.f32 1.442695, %v1394_v26 }
 0x79b   :  { %5764 = vpow2.f32 %v1399_v55  ;;  %v1409_v0 = vmul.f32 1.442695, %v1395_v19 }
 0x79c   :  { %5766 = vpow2.f32 %v1411_v56 }
 0x79d   :  { %5768 = vpow2.f32 %v1401_v40 }
 0x79e   :  { %5770 = vpow2.f32 %v1403_v38 }
 0x79f   :  { %5772 = vpow2.f32 %v1405_v53 }
 0x7a0   :  { %5774 = vpow2.f32 %v1407_v13 }
 0x7a1   :  { %5776 = vpow2.f32 %v1409_v0 }
 0x7a7   :  { %v7318_v25 = vpop.eup %5762 }
 0x7a8   :  { %1422 = vperm.xlu1 %5696, %v7318_v25   ;;  %v5765_v21 = vpop.eup %5764 }
 0x7a9   :  { %v7321_v51 = vpop.eup %5766 }
 0x7aa   :  { %v5769_v20 = vpop.eup %5768  ;;  %1443 = vperm.xlu0 %5695, %v7321_v51  }
 0x7ab   :  { %v5771_v27 = vpop.eup %5770 }
 0x7ac   :  { %1425 = vperm.xlu1 %5696, %v5765_v21   ;;  %v5773_v16 = vpop.eup %5772 }
 0x7ad   :  { %v5775_v48 = vpop.eup %5774 }
 0x7ae   :  { %v5777_v63 = vpop.eup %5776 }
 0x7b0   :  { %1428 = vperm.xlu1 %5696, %v5769_v20  }
 0x7b4   :  { %1431 = vperm.xlu1 %5696, %v5771_v27  }
 0x7b8   :  { %1434 = vperm.xlu1 %5696, %v5773_v16  }
 0x7bc   :  { %1437 = vperm.xlu1 %5696, %v5775_v48  }
 0x7c0   :  { %1440 = vperm.xlu1 %5696, %v5777_v63  }
 0x823   :  { %v1423_v23 = vpop.permute.xlu1 %1422 }
 0x824   :  { %v1448_v50 = vrot.slane %v1423_v23, %v6984_v62 }
 0x825   :  { %v1444_v26 = vpop.permute.xlu0 %1443 }
 0x826   :  { %v1476_v23 = vrot.slane %v1444_v26, %v6984_v62 }
 0x827   :  { %v1426_v61 = vpop.permute.xlu1 %1425 }
 0x828   :  { %v1452_v55 = vrot.slane %v1426_v61, %v6984_v62 }
 0x82a   :  { %v1477_v38 = vsel %vm698_vm0, %v1452_v55, %v1448_v50 }
 0x82b   :  { %v1429_v12 = vpop.permute.xlu1 %1428 }
 0x82c   :  { %v1456_v56 = vrot.slane %v1429_v12, %v6984_v62 }
 0x82e   :  { %v1478_v53 = vsel %vm700_vm1, %v1456_v56, %v1477_v38 }
 0x82f   :  { %v1432_v14 = vpop.permute.xlu1 %1431 }
 0x830   :  { %v1460_v1 = vrot.slane %v1432_v14, %v6984_v62 }
 0x832   :  { %v1479_v19 = vsel %vm702_vm2, %v1460_v1, %v1478_v53 }
 0x833   :  { %v1435_v4 = vpop.permute.xlu1 %1434 }
 0x834   :  { %v1464_v34 = vrot.slane %v1435_v4, %v6984_v62 }
 0x836   :  { %v1480_v0 = vsel %vm704_vm3, %v1464_v34, %v1479_v19 }
 0x837   :  { %v1438_v40 = vpop.permute.xlu1 %1437 }
 0x838   :  { %v1468_v57 = vrot.slane %v1438_v40, %v6984_v62 }
 0x83a   :  { %v1481_v12 = vsel %vm706_vm4, %v1468_v57, %v1480_v0 }
 0x83b   :  { %v1441_v13 = vpop.permute.xlu1 %1440 }
 0x83c   :  { %v1472_v61 = vrot.slane %v1441_v13, %v6984_v62 }
 0x83e   :  { %v1482_v14 = vsel %vm708_vm5, %v1472_v61, %v1481_v12 }
 0x83f   :  { %v1483_v4 = vsel %vm710_vm6, %v1476_v23, %v1482_v14 }
 0x840   :  { %v1485_v55 = vsel %vm713_vm7, %v1483_v4, 0.0 }
 0x841   :  { %1486 = vadd.xlane.f32.xlu1 %v1485_v55 }
 0x8ca   :  { %v1487_v50 = vpop.xlane.xlu1 %1486 }
 0x8cb   :  { %5778 = vrcp.f32 %v1487_v50 }
 0x8d8   :  { %v5779_v56 = vpop.eup %5778 }
 0x8d9   :  { %v1489_v1 = vmul.f32 %v5779_v56, %v1487_v50  ;;  %v6410_v50 = vmov 1  }
 0x8db   :  { %v1490_v40 = vsub.f32 2.0, %v1489_v1 }
 0x8dd   :  { %v1491_v38 = vmul.f32 %v5779_v56, %v1490_v40  ;;  %v7352_v56 = vld [vmem:[#allocation2 + $0x8] sm:$0xff] }
 0x8de   :  { %8725 = vst [vmem:[#allocation84_spill] sm:$0xff] %v7352_v56 }
 0x8df   :  { %v1512_v34 = vrot.slane %v1491_v38, %v8668_v17  ;;  %v1500_v53 = vrot.slane %v1491_v38, %v8665_v33  ;;  %v1504_v57 = vrot.slane %v1491_v38, %v8666_v39  ;;  %v1496_v0 = vrot.slane %v1491_v38, %v8650_v30 }
 0x8e0   :  { %v1508_v23 = vrot.slane %v1491_v38, %v8667_v59  ;;  %v1516_v14 = vrot.slane %v1491_v38, %v8669_v32  ;;  %v1524_v55 = vrot.slane %v1491_v38, %v6934_v15 }
 0x8e1   :  { %v1537_v26 = vmul.f32 %v5773_v16, %v1512_v34  ;;  %v1534_v19 = vmul.f32 %v5765_v21, %v1500_v53  ;;  %v1535_v13 = vmul.f32 %v5769_v20, %v1504_v57  ;;  %v1533_v61 = vmul.f32 %v7318_v25, %v1496_v0  ;;  %v1131_v34 = vpop.f32.mrf.mxu0  ;;  %v7358_v53 = vld [vmem:[#allocation2 + $0x10] sm:$0xff]  ;;  %v7361_v0 = vld [vmem:[#allocation2] sm:$0xff] }
 0x8e2   :  { %v1536_v12 = vmul.f32 %v5771_v27, %v1508_v23  ;;  %v1538_v4 = vmul.f32 %v5775_v48, %v1516_v14  ;;  %v1520_v21 = vrot.slane %v1491_v38, %v6937_v2  ;;  %v1540_v20 = vmul.f32 %v7321_v51, %v1524_v55  ;;  %v7355_v38 = vld [vmem:[#allocation2 + $0x20] sm:$0xff]  ;;  %8727 = vst [vmem:[#allocation86_spill] sm:$0xff] %v7358_v53  ;;  %v7373_v2 = vld [vmem:[#allocation2 + $0x38] sm:$0xff] }
 0x8e3   :  { %1563 = vperm.xlu1 %5696, %v1537_v26   ;;  %1548 = vperm.xlu0 %5695, %v1534_v19   ;;  %v8724_v25 = vmov 0   ;;  %8726 = vst [vmem:[#allocation85_spill] sm:$0xff] %v7355_v38  ;;  %5780 = vtanh.f32 %v1131_v34  ;;  %8728 = vst [vmem:[#allocation87_spill] sm:$0xff] %v7361_v0 }
 0x8e4   :  { %v1539_v16 = vmul.f32 %v5777_v63, %v1520_v21 }
 0x8e7   :  { %1553 = vperm.xlu0 %5695, %v1535_v13  }
 0x8eb   :  { %1543 = vperm.xlu0 %5695, %v1533_v61  }
 0x8ef   :  { %1558 = vperm.xlu0 %5695, %v1536_v12  }
 0x8f3   :  { %1568 = vperm.xlu0 %5695, %v1538_v4  }
 0x8f7   :  { %1573 = vperm.xlu0 %5695, %v1539_v16  }
 0x8fb   :  { %1578 = vperm.xlu0 %5695, %v1540_v20  }
 0x8ff   :  { %5697 = vset.pattern.permute.xlu0 %v6410_v50  ;;  %v7364_v50 = vld [vmem:[#allocation2 + $0x18] sm:$0xff] }
 0x900   :  { %1665 = vperm.xlu0 %5697, %v7044_v36   ;;  %8729 = vst [vmem:[#allocation88_spill] sm:$0xff] %v7364_v50 }
 0x904   :  { %5698 = vset.pattern.permute.xlu0 %v8724_v25 }
 0x95e   :  { %v1549_v27 = vpop.permute.xlu0 %1548  ;;  %v1564_v1 = vpop.permute.xlu1 %1563 }
 0x95f   :  { %v1582_v48 = vmul.f32 %v7352_v56, %v1549_v27  ;;  %v1585_v51 = vmul.f32 %v7355_v38, %v1564_v1 }
 0x961   :  { %v1595_v40 = vrot.slane %v1582_v48, 4  ;;  %v1613_v13 = vrot.slane %v1585_v51, 4 }
 0x962   :  { %v1554_v63 = vpop.permute.xlu0 %1553 }
 0x963   :  { %v1583_v26 = vmul.f32 %v7358_v53, %v1554_v63  ;;  %v1596_v36 = vadd.f32 %v1595_v40, %v1582_v48  ;;  %v1614_v21 = vadd.f32 %v1613_v13, %v1585_v51 }
 0x965   :  { %v1601_v19 = vrot.slane %v1583_v26, 4  ;;  %v1597_v23 = vrot.slane %v1596_v36, 2  ;;  %v1615_v63 = vrot.slane %v1614_v21, 2 }
 0x966   :  { %v1544_v57 = vpop.permute.xlu0 %1543 }
 0x967   :  { %v1581_v61 = vmul.f32 %v7361_v0, %v1544_v57  ;;  %v1602_v12 = vadd.f32 %v1601_v19, %v1583_v26  ;;  %v1598_v55 = vadd.f32 %v1597_v23, %v1596_v36  ;;  %v7367_v0 = vld [vmem:[#allocation2 + $0x28] sm:$0xff]  ;;  %v1616_v23 = vadd.f32 %v1615_v63, %v1614_v21 }
 0x968   :  { %8730 = vst [vmem:[#allocation89_spill] sm:$0xff] %v7367_v0 }
 0x969   :  { %v1589_v14 = vrot.slane %v1581_v61, 4  ;;  %v1603_v20 = vrot.slane %v1602_v12, 2  ;;  %v1599_v38 = vrot.slane %v1598_v55, 1 }
 0x96a   :  { %v1559_v4 = vpop.permute.xlu0 %1558 }
 0x96b   :  { %v1590_v16 = vadd.f32 %v1589_v14, %v1581_v61  ;;  %v1584_v27 = vmul.f32 %v7364_v50, %v1559_v4  ;;  %v1604_v53 = vadd.f32 %v1603_v20, %v1602_v12  ;;  %v5781_v61 = vpop.eup %5780  ;;  %v7370_v14 = vld [vmem:[#allocation2 + $0x30] sm:$0xff]  ;;  %v1600_v50 = vadd.f32 %v1599_v38, %v1598_v55 }
 0x96c   :  { %8731 = vst [vmem:[#allocation90_spill] sm:$0xff] %v7370_v14  ;;  %v1638_v20 = vrot.slane %v5781_v61, 1  ;;  %v1640_v38 = vrot.slane %v5781_v61, 3  ;;  %v1642_v33 = vrot.slane %v5781_v61, 5 }
 0x96d   :  { %v1591_v48 = vrot.slane %v1590_v16, 2  ;;  %v1607_v1 = vrot.slane %v1584_v27, 4  ;;  %v1605_v56 = vrot.slane %v1604_v53, 1 }
 0x96e   :  { %v1569_v40 = vpop.permute.xlu0 %1568  ;;  %v1654_v63 = vadd.f32 %v1638_v20, %v1600_v50  ;;  %v1641_v50 = vrot.slane %v5781_v61, 4 }
 0x96f   :  { %v1592_v34 = vadd.f32 %v1591_v48, %v1590_v16  ;;  %v1608_v57 = vadd.f32 %v1607_v1, %v1584_v27  ;;  %v1586_v26 = vmul.f32 %v7367_v0, %v1569_v40  ;;  %v1617_v0 = vrot.slane %v1616_v23, 1 }
 0x970   :  { %v1606_v32 = vadd.f32 %v1605_v56, %v1604_v53  ;;  %v1676_v39 = vrot.slane %v1654_v63, 7 }
 0x971   :  { %v1593_v51 = vrot.slane %v1592_v34, 1  ;;  %v1609_v19 = vrot.slane %v1608_v57, 2  ;;  %v1619_v36 = vrot.slane %v1586_v26, 4  ;;  %v1618_v59 = vadd.f32 %v1617_v0, %v1616_v23 }
 0x972   :  { %v1574_v13 = vpop.permute.xlu0 %1573 }
 0x973   :  { %v1587_v4 = vmul.f32 %v7370_v14, %v1574_v13  ;;  %v1610_v16 = vadd.f32 %v1609_v19, %v1608_v57  ;;  %v1620_v48 = vadd.f32 %v1619_v36, %v1586_v26  ;;  %v1594_v27 = vadd.f32 %v1593_v51, %v1592_v34 }
 0x974   :  { %v1639_v26 = vrot.slane %v5781_v61, 2 }
 0x975   :  { %v1625_v12 = vrot.slane %v1587_v4, 4  ;;  %v1611_v1 = vrot.slane %v1610_v16, 1  ;;  %v1621_v25 = vrot.slane %v1620_v48, 2  ;;  %v1653_v19 = vadd.f32 %v5781_v61, %v1594_v27 }
 0x976   :  { %v1579_v40 = vpop.permute.xlu0 %1578  ;;  %v1657_v27 = vadd.f32 %v1641_v50, %v1618_v59  ;;  %v8758_v50 = vld [vmem:[#allocation64_spill] sm:$0xff] }
 0x977   :  { %v1626_v15 = vadd.f32 %v1625_v12, %v1587_v4  ;;  %v1588_v21 = vmul.f32 %v7373_v2, %v1579_v40  ;;  %v1612_v17 = vadd.f32 %v1611_v1, %v1610_v16  ;;  %v1622_v13 = vadd.f32 %v1621_v25, %v1620_v48 }
 0x978   :  { %v1655_v4 = vadd.f32 %v1639_v26, %v1606_v32  ;;  %v1677_v56 = vsel %vm698_vm0, %v1676_v39, %v1653_v19  ;;  %v1643_v25 = vrot.slane %v5781_v61, 6  ;;  %v1693_v26 = vld [vmem:[#allocation7 + $0x10] sm:$0xff] }
 0x979   :  { %v1627_v55 = vrot.slane %v1626_v15, 2  ;;  %v1631_v57 = vrot.slane %v1588_v21, 4  ;;  %v1623_v36 = vrot.slane %v1622_v13, 1  ;;  %v1656_v34 = vadd.f32 %v1640_v38, %v1612_v17 }
 0x97a   :  { %v1678_v1 = vrot.slane %v1655_v4, 6  ;;  %v8755_v4 = vld [vmem:[#allocation61_spill] sm:$0xff] }
 0x97b   :  { %v1628_v51 = vadd.f32 %v1627_v55, %v1626_v15  ;;  %v1632_v14 = vadd.f32 %v1631_v57, %v1588_v21  ;;  %v1624_v12 = vadd.f32 %v1623_v36, %v1622_v13  ;;  %v1680_v53 = vrot.slane %v1656_v34, 5  ;;  %v1666_v55 = vpop.permute.xlu0 %1665  ;;  %v8752_v36 = vld [vmem:[#allocation58_spill] sm:$0xff]  ;;  %v8753_v34 = vld [vmem:[#allocation59_spill] sm:$0xff] }
 0x97c   :  { %v1679_v0 = vsel %vm700_vm1, %v1678_v1, %v1677_v56  ;;  %v1644_v21 = vrot.slane %v5781_v61, 7  ;;  %v1682_v13 = vrot.slane %v1657_v27, 4  ;;  %vm1667_vm10 = vcmp.eq.s32.totalorder %v1666_v55, 1  ;;  %v8751_v61 = vld [vmem:[#allocation57_spill] sm:$0xff]  ;;  %v8765_v27 = vld [vmem:[#allocation71_spill] sm:$0xff]  ;;  %v8766_v1 = vld [vmem:[#allocation72_spill] sm:$0xff] }
 0x97d   :  { %v1629_v62 = vrot.slane %v1628_v51, 1  ;;  %v1633_v40 = vrot.slane %v1632_v14, 2  ;;  %v1658_v16 = vadd.f32 %v1642_v33, %v1624_v12  ;;  %v1681_v63 = vsel %vm702_vm2, %v1680_v53, %v1679_v0  ;;  %v8756_v12 = vld [vmem:[#allocation62_spill] sm:$0xff]  ;;  %v8759_v56 = vld [vmem:[#allocation65_spill] sm:$0xff]  ;;  %v8761_v53 = vld [vmem:[#allocation67_spill] sm:$0xff] }
 0x97e   :  { %v1683_v57 = vsel %vm704_vm3, %v1682_v13, %v1681_v63  ;;  %v8769_v0 = vld [vmem:[#allocation75_spill] sm:$0xff]  ;;  %v8774_v13 = vld [vmem:[#allocation80_spill] sm:$0xff]  ;;  %v8776_v55 = vld [vmem:[#allocation82_spill] sm:$0xff] }
 0x97f   :  { %v1630_v48 = vadd.f32 %v1629_v62, %v1628_v51  ;;  %v1634_v20 = vadd.f32 %v1633_v40, %v1632_v14  ;;  %v1684_v23 = vrot.slane %v1658_v16, 3  ;;  %v8754_v51 = vld [vmem:[#allocation60_spill] sm:$0xff]  ;;  %v8757_v40 = vld [vmem:[#allocation63_spill] sm:$0xff] }
 0x980   :  { %v8762_v16 = vld [vmem:[#allocation68_spill] sm:$0xff]  ;;  %v8773_v63 = vld [vmem:[#allocation79_spill] sm:$0xff] }
 0x981   :  { %v1659_v17 = vadd.f32 %v1643_v25, %v1630_v48  ;;  %v1635_v15 = vrot.slane %v1634_v20, 1  ;;  %v1685_v62 = vsel %vm706_vm4, %v1684_v23, %v1683_v57  ;;  %v8760_v25 = vld [vmem:[#allocation66_spill] sm:$0xff]  ;;  %v8763_v48 = vld [vmem:[#allocation69_spill] sm:$0xff]  ;;  %v8770_v23 = vld [vmem:[#allocation76_spill] sm:$0xff] }
 0x983   :  { %v1636_v32 = vadd.f32 %v1635_v15, %v1634_v20  ;;  %v1686_v38 = vrot.slane %v1659_v17, 2  ;;  %v8764_v20 = vld [vmem:[#allocation70_spill] sm:$0xff]  ;;  %v8767_v17 = vld [vmem:[#allocation73_spill] sm:$0xff] }
 0x984   :  { %v8768_v15 = vld [vmem:[#allocation74_spill] sm:$0xff] }
 0x985   :  { %v1660_v39 = vadd.f32 %v1644_v21, %v1636_v32  ;;  %v1687_v59 = vsel %vm708_vm5, %v1686_v38, %v1685_v62  ;;  %v8771_v32 = vld [vmem:[#allocation77_spill] sm:$0xff]  ;;  %v8772_v21 = vld [vmem:[#allocation78_spill] sm:$0xff] }
 0x986   :  { %v8775_v38 = vld [vmem:[#allocation81_spill] sm:$0xff] }
 0x987   :  { %v1688_v33 = vrot.slane %v1660_v39, 1  ;;  %v8777_v39 = vld [vmem:[#allocation83_spill] sm:$0xff] }
 0x989   :  { %v1689_v14 = vsel %vm710_vm6, %v1688_v33, %v1687_v59 }
 0x98a   :  { %v7384_v19 = vsel %vm1667_vm10, %v1689_v14, %v7062_v41  ;;  %v8732_v41 = vld [vmem:[#allocation25_spill] sm:$0xff] }
 0x98b   :  { %1758 = vmatprep.mubr.f32.mxu1 %v7384_v19 }
 0x98c   :  { %1759 = vmatmul.mubr.f32.vlgmr.msra.gmra.mxu1 %v1693_v26 }
 0x98d   :  { %2957 = vmatpush1.msra.mxu1 %v7064_v24  ;;  %v8733_v24 = vld [vmem:[#allocation30_spill] sm:$0xff] }
 0x98e   :  { %2958 = vmatprep.subr.mxu1 %v7067_v35  ;;  %v8734_v35 = vld [vmem:[#allocation26_spill] sm:$0xff] }
 0x98f   :  { %2959 = vmatpush1.msra.mxu1 %v7070_v44  ;;  %v8735_v44 = vld [vmem:[#allocation24_spill] sm:$0xff] }
 0x990   :  { %2960 = vmatprep.subr.mxu1 %v7073_v9  ;;  %v8736_v9 = vld [vmem:[#allocation29_spill] sm:$0xff] }
 0x991   :  { %2961 = vmatpush1.msra.mxu1 %v7076_v31  ;;  %v8737_v31 = vld [vmem:[#allocation32_spill] sm:$0xff] }
 0x992   :  { %2962 = vmatprep.subr.mxu1 %v7079_v47  ;;  %v8738_v47 = vld [vmem:[#allocation33_spill] sm:$0xff] }
 0x993   :  { %2963 = vmatpush1.msra.mxu1 %v7082_v42  ;;  %v8739_v42 = vld [vmem:[#allocation35_spill] sm:$0xff] }
 0x994   :  { %2964 = vmatprep.subr.mxu1 %v7085_v54  ;;  %v8740_v54 = vld [vmem:[#allocation46_spill] sm:$0xff] }
 0x995   :  { %2965 = vmatpush1.msra.mxu1 %v7088_v49  ;;  %v8741_v49 = vld [vmem:[#allocation47_spill] sm:$0xff] }
 0x996   :  { %2966 = vmatprep.subr.mxu1 %v7091_v29  ;;  %v8742_v29 = vld [vmem:[#allocation48_spill] sm:$0xff] }
 0x997   :  { %2967 = vmatpush1.msra.mxu1 %v7094_v37  ;;  %v8743_v37 = vld [vmem:[#allocation49_spill] sm:$0xff] }
 0x998   :  { %2968 = vmatprep.subr.mxu1 %v7097_v5  ;;  %v8744_v5 = vld [vmem:[#allocation50_spill] sm:$0xff] }
 0x999   :  { %2969 = vmatpush1.msra.mxu1 %v7100_v52  ;;  %v8745_v52 = vld [vmem:[#allocation51_spill] sm:$0xff] }
 0x99a   :  { %2970 = vmatprep.subr.mxu1 %v7103_v60  ;;  %v8746_v60 = vld [vmem:[#allocation52_spill] sm:$0xff] }
 0x99b   :  { %2971 = vmatpush1.msra.mxu1 %v7106_v7  ;;  %v8747_v7 = vld [vmem:[#allocation53_spill] sm:$0xff] }
 0x99c   :  { %2972 = vmatprep.subr.mxu1 %v7109_v43  ;;  %v8748_v43 = vld [vmem:[#allocation54_spill] sm:$0xff] }
 0x99d   :  { %2973 = vmatpush1.msra.mxu1 %v7112_v22  ;;  %v8749_v22 = vld [vmem:[#allocation55_spill] sm:$0xff] }
 0x99e   :  { %2974 = vmatprep.subr.mxu1 %v7115_v46  ;;  %v8750_v46 = vld [vmem:[#allocation56_spill] sm:$0xff] }
 0x99f   :  { %2975 = vmatpush1.msra.mxu1 %v8732_v41 }
 0x9a0   :  { %2976 = vmatprep.subr.mxu1 %v8733_v24 }
 0x9a1   :  { %2977 = vmatpush1.msra.mxu1 %v8734_v35 }
 0x9a2   :  { %2978 = vmatprep.subr.mxu1 %v8735_v44 }
 0x9a3   :  { %2979 = vmatpush1.msra.mxu1 %v8736_v9 }
 0x9a4   :  { %2980 = vmatprep.subr.mxu1 %v8737_v31 }
 0x9a5   :  { %2981 = vmatpush1.msra.mxu1 %v8738_v47 }
 0x9a6   :  { %2982 = vmatprep.subr.mxu1 %v8739_v42 }
 0x9a7   :  { %2983 = vmatpush1.msra.mxu1 %v8740_v54 }
 0x9a8   :  { %2984 = vmatprep.subr.mxu1 %v8741_v49 }
 0x9a9   :  { %2985 = vmatpush1.msra.mxu1 %v8742_v29 }
 0x9aa   :  { %2986 = vmatprep.subr.mxu1 %v8743_v37 }
 0x9ab   :  { %2987 = vmatpush1.msra.mxu1 %v8744_v5 }
 0x9ac   :  { %2988 = vmatprep.subr.mxu1 %v8745_v52 }
 0x9ad   :  { %2989 = vmatpush2.msra.mxu1 %v8746_v60 }
 0x9ae   :  { %2990 = vmatprep.subr.mxu1 %v8747_v7 }
 0x9af   :  { %2991 = vmatpush2.msra.mxu1 %v8748_v43 }
 0x9b0   :  { %2992 = vmatprep.subr.mxu1 %v8749_v22 }
 0x9b1   :  { %2993 = vmatpush2.msra.mxu1 %v8750_v46 }
 0x9b2   :  { %2994 = vmatprep.subr.mxu1 %v8751_v61 }
 0x9b3   :  { %2995 = vmatpush2.msra.mxu1 %v8752_v36 }
 0x9b4   :  { %2996 = vmatprep.subr.mxu1 %v8753_v34 }
 0x9b5   :  { %2997 = vmatpush2.msra.mxu1 %v8754_v51 }
 0x9b6   :  { %2998 = vmatprep.subr.mxu1 %v8755_v4 }
 0x9b7   :  { %2999 = vmatpush2.msra.mxu1 %v8756_v12 }
 0x9b8   :  { %3000 = vmatprep.subr.mxu1 %v8757_v40  ;;  %v7476_v40 = vld [vmem:[%s8435_s7] ss:$0 sm:$0xff] }
 0x9b9   :  { %3001 = vmatpush2.msra.mxu1 %v8758_v50 }
 0x9ba   :  { %3002 = vmatprep.subr.mxu1 %v8759_v56 }
 0x9bb   :  { %3003 = vmatpush2.msra.mxu1 %v8760_v25 }
 0x9bc   :  { %3004 = vmatprep.subr.mxu1 %v8761_v53 }
 0x9bd   :  { %3005 = vmatpush2.msra.mxu1 %v8762_v16 }
 0x9be   :  { %3006 = vmatprep.subr.mxu1 %v8763_v48 }
 0x9bf   :  { %3007 = vmatpush2.msra.mxu1 %v8764_v20 }
 0x9c0   :  { %3008 = vmatprep.subr.mxu1 %v8765_v27 }
 0x9c1   :  { %3009 = vmatpush2.msra.mxu1 %v8766_v1 }
 0x9c2   :  { %3010 = vmatprep.subr.mxu1 %v8767_v17 }
 0x9c3   :  { %3011 = vmatpush2.msra.mxu1 %v8768_v15 }
 0x9c4   :  { %3012 = vmatprep.subr.mxu1 %v8769_v0 }
 0x9c5   :  { %3013 = vmatpush2.msra.mxu1 %v8770_v23 }
 0x9c6   :  { %3014 = vmatprep.subr.mxu1 %v8771_v32 }
 0x9c7   :  { %3015 = vmatpush2.msra.mxu1 %v8772_v21 }
 0x9c8   :  { %3016 = vmatprep.subr.mxu1 %v8773_v63 }
 0x9c9   :  { %3017 = vmatpush2.msra.mxu1 %v8774_v13  ;;  %v8778_v13 = vld [vmem:[#allocation39_spill] sm:$0xff] }
 0x9ca   :  { %3018 = vmatprep.subr.mxu1 %v8775_v38 }
 0x9cb   :  { %3019 = vmatpush2.msra.mxu1 %v8776_v55 }
 0x9cc   :  { %4218 = vmatprep.subr.mxu1 %v8777_v39  ;;  %v8779_v39 = vld [vmem:[#allocation21_spill] sm:$0xff] }
 0xa4c   :  { %v1760_v57 = vpop.f32.mrf.mxu1 }
 0xa4d   :  { %v1767_v62 = vcombine.high %v1760_v57, %v1760_v57  ;;  %v1774_v33 = vrot.slane %v1760_v57, %v6884_v10 }
 0xa4f   :  { %v1781_v59 = vrot.slane %v1767_v62, %v6884_v10  ;;  %v1782_v14 = vcombine.high %v1774_v33, %v1774_v33  ;;  %v1790_v26 = vrot.slane %v1774_v33, %v6884_v10  ;;  %v8780_v33 = vld [vmem:[#allocation38_spill] sm:$0xff] }
 0xa51   :  { %v1783_v41 = vcombine.high %v1781_v59, %v1781_v59  ;;  %v1797_v24 = vrot.slane %v1781_v59, %v6884_v10  ;;  %v1804_v35 = vrot.slane %v1782_v14, %v6884_v10  ;;  %v1812_v44 = vcombine.high %v1790_v26, %v1790_v26 }
 0xa52   :  { %v1819_v9 = vrot.slane %v1790_v26, %v8650_v30 }
 0xa53   :  { %v1811_v31 = vrot.slane %v1783_v41, %v6884_v10  ;;  %v1814_v47 = vcombine.high %v1804_v35, %v1804_v35  ;;  %v1823_v42 = vrot.slane %v1804_v35, %v8650_v30  ;;  %v1827_v54 = vrot.slane %v1812_v44, %v8650_v30  ;;  %v8781_v41 = vld [vmem:[#allocation41_spill] sm:$0xff]  ;;  %v8782_v35 = vld [vmem:[#allocation40_spill] sm:$0xff] }
 0xa54   :  { %v1856_v49 = vadd.f32 %v1819_v9, %v6879_v6  ;;  %v1813_v29 = vcombine.high %v1797_v24, %v1797_v24  ;;  %v1835_v60 = vrot.slane %v1797_v24, %v8650_v30 }
 0xa55   :  { %v1815_v37 = vcombine.high %v1811_v31, %v1811_v31  ;;  %v1831_v5 = vrot.slane %v1814_v47, %v8650_v30  ;;  %v1839_v52 = vrot.slane %v1811_v31, %v8650_v30  ;;  %v1857_v7 = vadd.f32 %v6877_v3, %v1823_v42  ;;  %v8783_v31 = vld [vmem:[#allocation42_spill] sm:$0xff] }
 0xa56   :  { %v1858_v43 = vadd.f32 %v1827_v54, %v6886_v11  ;;  %5782 = vtanh.f32 %v1856_v49  ;;  %v1843_v36 = vrot.slane %v1813_v29, %v8650_v30  ;;  %v1860_v34 = vadd.f32 %v1835_v60, %v6895_v28  ;;  %v8784_v54 = vld [vmem:[#allocation43_spill] sm:$0xff] }
 0xa57   :  { %v1859_v22 = vadd.f32 %v6881_v8, %v1831_v5  ;;  %v1847_v46 = vrot.slane %v1815_v37, %v8650_v30  ;;  %v1861_v61 = vadd.f32 %v6889_v18, %v1839_v52  ;;  %5784 = vtanh.f32 %v1857_v7  ;;  %v8785_v37 = vld [vmem:[#allocation44_spill] sm:$0xff] }
 0xa58   :  { %5786 = vtanh.f32 %v1858_v43  ;;  %v1862_v4 = vadd.f32 %v1843_v36, %v6912_v58 }
 0xa59   :  { %5788 = vtanh.f32 %v1859_v22  ;;  %v1863_v51 = vadd.f32 %v6904_v45, %v1847_v46  ;;  %v8786_v46 = vld [vmem:[#allocation45_spill] sm:$0xff] }
 0xa5a   :  { %5790 = vtanh.f32 %v1861_v61 }
 0xa5b   :  { %5792 = vtanh.f32 %v1860_v34 }
 0xa5c   :  { %5794 = vtanh.f32 %v1863_v51 }
 0xa5d   :  { %5796 = vtanh.f32 %v1862_v4 }
 0xa63   :  { %v5783_v12 = vpop.eup %5782 }
 0xa64   :  { %v1872_v50 = vmul.f32 %v7476_v40, %v5783_v12  ;;  %v5785_v56 = vpop.eup %5784 }
 0xa65   :  { %v5787_v25 = vpop.eup %5786  ;;  %v1873_v53 = vmul.f32 %v7476_v40, %v5785_v56 }
 0xa66   :  { %1880 = vadd.xlane.f32.xlu1 %v1872_v50  ;;  %v5789_v16 = vpop.eup %5788  ;;  %v1874_v27 = vmul.f32 %v7476_v40, %v5787_v25 }
 0xa67   :  { %1882 = vadd.xlane.f32.xlu0 %v1873_v53  ;;  %v1875_v48 = vmul.f32 %v7476_v40, %v5789_v16  ;;  %v5791_v20 = vpop.eup %5790 }
 0xa68   :  { %v5793_v1 = vpop.eup %5792  ;;  %v1877_v17 = vmul.f32 %v7476_v40, %v5791_v20 }
 0xa69   :  { %v5795_v15 = vpop.eup %5794  ;;  %v1876_v0 = vmul.f32 %v7476_v40, %v5793_v1 }
 0xa6a   :  { %1886 = vadd.xlane.f32.xlu1 %v1875_v48  ;;  %v5797_v23 = vpop.eup %5796  ;;  %v1879_v32 = vmul.f32 %v7476_v40, %v5795_v15 }
 0xa6b   :  { %1884 = vadd.xlane.f32.xlu0 %v1874_v27  ;;  %v1878_v21 = vmul.f32 %v7476_v40, %v5797_v23 }
 0xa6e   :  { %1890 = vadd.xlane.f32.xlu1 %v1877_v17 }
 0xa6f   :  { %1888 = vadd.xlane.f32.xlu0 %v1876_v0 }
 0xa72   :  { %1894 = vadd.xlane.f32.xlu1 %v1879_v32 }
 0xa73   :  { %1892 = vadd.xlane.f32.xlu0 %v1878_v21 }
 0xaef   :  { %v1881_v63 = vpop.xlane.xlu1 %1880 }
 0xaf0   :  { %v1896_v38 = vadd.f32 %v1881_v63, %v8778_v13  ;;  %v1883_v55 = vpop.xlane.xlu0 %1882  ;;  %v8787_v63 = vld [vmem:[#allocation22_spill] sm:$0xff] }
 0xaf1   :  { %v1897_v57 = vadd.f32 %v1883_v55, %v8779_v39 }
 0xaf2   :  { %1913 = vperm.xlu0 %5698, %v1896_v38  }
 0xaf3   :  { %1916 = vperm.xlu1 %5696, %v1897_v57   ;;  %v1887_v14 = vpop.xlane.xlu1 %1886 }
 0xaf4   :  { %v1885_v62 = vpop.xlane.xlu0 %1884  ;;  %v1899_v44 = vadd.f32 %v1887_v14, %v8782_v35 }
 0xaf5   :  { %v1898_v59 = vadd.f32 %v1885_v62, %v8780_v33  ;;  %v8788_v62 = vld [vmem:[#allocation27_spill] sm:$0xff] }
 0xaf7   :  { %1919 = vperm.xlu1 %5696, %v1898_v59   ;;  %v1891_v9 = vpop.xlane.xlu1 %1890 }
 0xaf8   :  { %v1889_v26 = vpop.xlane.xlu0 %1888  ;;  %v1901_v47 = vadd.f32 %v1891_v9, %v8783_v31 }
 0xaf9   :  { %v1900_v24 = vadd.f32 %v1889_v26, %v8781_v41 }
 0xafb   :  { %1925 = vperm.xlu1 %5696, %v1900_v24   ;;  %v1895_v29 = vpop.xlane.xlu1 %1894 }
 0xafc   :  { %v1893_v42 = vpop.xlane.xlu0 %1892  ;;  %v1903_v5 = vadd.f32 %v1895_v29, %v8785_v37  ;;  %v8789_v29 = vld [vmem:[#allocation31_spill] sm:$0xff] }
 0xafd   :  { %v1902_v49 = vadd.f32 %v1893_v42, %v8784_v54 }
 0xaff   :  { %1922 = vperm.xlu1 %5696, %v1899_v44  }
 0xb03   :  { %1928 = vperm.xlu1 %5696, %v1901_v47  }
 0xb07   :  { %1931 = vperm.xlu1 %5696, %v1902_v49  }
 0xb0b   :  { %1934 = vperm.xlu1 %5696, %v1903_v5  }
 0xb6d   :  { %v1914_v22 = vpop.permute.xlu0 %1913 }
 0xb6e   :  { %v1917_v52 = vpop.permute.xlu1 %1916  ;;  %v1939_v51 = vrot.slane %v1914_v22, %v8786_v46 }
 0xb6f   :  { %v1943_v61 = vrot.slane %v1917_v52, %v8786_v46 }
 0xb71   :  { %v1968_v12 = vsel %vm698_vm0, %v1943_v61, %v1939_v51 }
 0xb72   :  { %v1920_v60 = vpop.permute.xlu1 %1919 }
 0xb73   :  { %v1947_v36 = vrot.slane %v1920_v60, %v8786_v46 }
 0xb75   :  { %v1969_v50 = vsel %vm700_vm1, %v1947_v36, %v1968_v12 }
 0xb76   :  { %v1926_v7 = vpop.permute.xlu1 %1925 }
 0xb77   :  { %v1955_v16 = vrot.slane %v1926_v7, %v8786_v46 }
 0xb7a   :  { %v1923_v43 = vpop.permute.xlu1 %1922 }
 0xb7b   :  { %v1951_v4 = vrot.slane %v1923_v43, %v8786_v46  ;;  %v8790_v43 = vld [vmem:[#allocation28_spill] sm:$0xff] }
 0xb7d   :  { %v1970_v25 = vsel %vm702_vm2, %v1951_v4, %v1969_v50  ;;  %v8792_v50 = vld [vmem:[#allocation37_spill] sm:$0xff] }
 0xb7e   :  { %v1929_v34 = vpop.permute.xlu1 %1928  ;;  %v1971_v20 = vsel %vm704_vm3, %v1955_v16, %v1970_v25 }
 0xb7f   :  { %v1959_v53 = vrot.slane %v1929_v34, %v8786_v46  ;;  %v8791_v34 = vld [vmem:[#allocation34_spill] sm:$0xff] }
 0xb81   :  { %v1972_v1 = vsel %vm706_vm4, %v1959_v53, %v1971_v20 }
 0xb82   :  { %v1932_v56 = vpop.permute.xlu1 %1931 }
 0xb83   :  { %v1963_v48 = vrot.slane %v1932_v56, %v8786_v46 }
 0xb85   :  { %v1973_v15 = vsel %vm708_vm5, %v1963_v48, %v1972_v1 }
 0xb86   :  { %v1935_v27 = vpop.permute.xlu1 %1934 }
 0xb87   :  { %v1967_v17 = vrot.slane %v1935_v27, %v8786_v46 }
 0xb89   :  { %v1974_v0 = vsel %vm710_vm6, %v1967_v17, %v1973_v15 }
 0xb8a   :  { %v1976_v23 = vsel %vm713_vm7, %v1974_v0, -inf }
 0xb8b   :  { %1977 = vmax.xlane.f32.xlu1 %v1976_v23 }
 0xc14   :  { %v1978_v32 = vpop.xlane.xlu1 %1977 }
 0xc15   :  { %v1983_v21 = vrot.slane %v1978_v32, %v8650_v30  ;;  %v1987_v55 = vrot.slane %v1978_v32, %v8787_v63  ;;  %v1991_v14 = vrot.slane %v1978_v32, %v8788_v62  ;;  %v1995_v52 = vrot.slane %v1978_v32, %v8789_v29 }
 0xc16   :  { %v1999_v22 = vrot.slane %v1978_v32, %v8790_v43  ;;  %v2003_v51 = vrot.slane %v1978_v32, %v8791_v34  ;;  %v2007_v56 = vrot.slane %v1978_v32, %v8792_v50 }
 0xc17   :  { %v2020_v26 = vsub.f32 %v1896_v38, %v1983_v21  ;;  %v2021_v9 = vsub.f32 %v1897_v57, %v1987_v55  ;;  %v2022_v60 = vsub.f32 %v1898_v59, %v1991_v14  ;;  %v2023_v61 = vsub.f32 %v1899_v44, %v1995_v52  ;;  %v8793_v59 = vld [vmem:[#allocation23_spill] sm:$0xff] }
 0xc18   :  { %v2024_v4 = vsub.f32 %v1900_v24, %v1999_v22  ;;  %v2025_v38 = vsub.f32 %v1901_v47, %v2003_v51  ;;  %v2011_v53 = vrot.slane %v1978_v32, %v8793_v59  ;;  %v2026_v16 = vsub.f32 %v1902_v49, %v2007_v56 }
 0xc19   :  { %v2028_v42 = vmul.f32 1.442695, %v2020_v26  ;;  %v2030_v7 = vmul.f32 1.442695, %v2021_v9  ;;  %v2032_v36 = vmul.f32 1.442695, %v2022_v60 }
 0xc1a   :  { %v2034_v12 = vmul.f32 1.442695, %v2023_v61  ;;  %v2036_v57 = vmul.f32 1.442695, %v2024_v4  ;;  %v2038_v44 = vmul.f32 1.442695, %v2025_v38  ;;  %v2027_v20 = vsub.f32 %v1903_v5, %v2011_v53 }
 0xc1b   :  { %5798 = vpow2.f32 %v2028_v42  ;;  %v2040_v24 = vmul.f32 1.442695, %v2026_v16 }
 0xc1c   :  { %5800 = vpow2.f32 %v2030_v7  ;;  %v2042_v47 = vmul.f32 1.442695, %v2027_v20 }
 0xc1d   :  { %5802 = vpow2.f32 %v2032_v36 }
 0xc1e   :  { %5804 = vpow2.f32 %v2034_v12 }
 0xc1f   :  { %5806 = vpow2.f32 %v2036_v57 }
 0xc20   :  { %5808 = vpow2.f32 %v2038_v44 }
 0xc21   :  { %5810 = vpow2.f32 %v2040_v24 }
 0xc22   :  { %5812 = vpow2.f32 %v2042_v47 }
 0xc28   :  { %v7517_v25 = vpop.eup %5798 }
 0xc29   :  { %2053 = vperm.xlu0 %5698, %v7517_v25   ;;  %v5801_v48 = vpop.eup %5800 }
 0xc2a   :  { %v5803_v27 = vpop.eup %5802 }
 0xc2b   :  { %v5805_v1 = vpop.eup %5804 }
 0xc2c   :  { %v5807_v17 = vpop.eup %5806 }
 0xc2d   :  { %2056 = vperm.xlu0 %5698, %v5801_v48   ;;  %v5809_v15 = vpop.eup %5808 }
 0xc2e   :  { %v5811_v0 = vpop.eup %5810 }
 0xc2f   :  { %v5813_v49 = vpop.eup %5812 }
 0xc31   :  { %2059 = vperm.xlu0 %5698, %v5803_v27  }
 0xc35   :  { %2062 = vperm.xlu0 %5698, %v5805_v1  }
 0xc39   :  { %2065 = vperm.xlu0 %5698, %v5807_v17  }
 0xc3d   :  { %2068 = vperm.xlu0 %5698, %v5809_v15  }
 0xc41   :  { %2071 = vperm.xlu0 %5698, %v5811_v0  }
 0xc45   :  { %2074 = vperm.xlu0 %5698, %v5813_v49  }
 0xca4   :  { %v2054_v23 = vpop.permute.xlu0 %2053 }
 0xca5   :  { %v2079_v42 = vrot.slane %v2054_v23, %v8786_v46 }
 0xca8   :  { %v2057_v32 = vpop.permute.xlu0 %2056 }
 0xca9   :  { %v2083_v26 = vrot.slane %v2057_v32, %v8786_v46 }
 0xcab   :  { %v2108_v22 = vsel %vm698_vm0, %v2083_v26, %v2079_v42 }
 0xcac   :  { %v2060_v5 = vpop.permute.xlu0 %2059 }
 0xcad   :  { %v2087_v9 = vrot.slane %v2060_v5, %v8786_v46 }
 0xcaf   :  { %v2109_v36 = vsel %vm700_vm1, %v2087_v9, %v2108_v22 }
 0xcb0   :  { %v2063_v21 = vpop.permute.xlu0 %2062 }
 0xcb1   :  { %v2091_v52 = vrot.slane %v2063_v21, %v8786_v46 }
 0xcb3   :  { %v2110_v4 = vsel %vm702_vm2, %v2091_v52, %v2109_v36 }
 0xcb4   :  { %v2066_v55 = vpop.permute.xlu0 %2065 }
 0xcb5   :  { %v2095_v60 = vrot.slane %v2066_v55, %v8786_v46 }
 0xcb7   :  { %v2111_v12 = vsel %vm704_vm3, %v2095_v60, %v2110_v4 }
 0xcb8   :  { %v2069_v14 = vpop.permute.xlu0 %2068 }
 0xcb9   :  { %v2099_v61 = vrot.slane %v2069_v14, %v8786_v46 }
 0xcbb   :  { %v2112_v38 = vsel %vm706_vm4, %v2099_v61, %v2111_v12  ;;  %v6411_v12 = vmov 2  }
 0xcbc   :  { %v2072_v7 = vpop.permute.xlu0 %2071 }
 0xcbd   :  { %v2103_v51 = vrot.slane %v2072_v7, %v8786_v46 }
 0xcbf   :  { %v2113_v53 = vsel %vm708_vm5, %v2103_v51, %v2112_v38 }
 0xcc0   :  { %v2075_v56 = vpop.permute.xlu0 %2074 }
 0xcc1   :  { %v2107_v57 = vrot.slane %v2075_v56, %v8786_v46 }
 0xcc3   :  { %v2114_v16 = vsel %vm710_vm6, %v2107_v57, %v2113_v53  ;;  %v8796_v53 = vld [vmem:[#allocation86_spill] sm:$0xff] }
 0xcc4   :  { %v2116_v44 = vsel %vm713_vm7, %v2114_v16, 0.0 }
 0xcc5   :  { %2117 = vadd.xlane.f32.xlu0 %v2116_v44  ;;  %v8797_v44 = vld [vmem:[#allocation89_spill] sm:$0xff] }
 0xd4e   :  { %v2118_v20 = vpop.xlane.xlu0 %2117 }
 0xd4f   :  { %5814 = vrcp.f32 %v2118_v20 }
 0xd5c   :  { %v5815_v24 = vpop.eup %5814 }
 0xd5d   :  { %v2120_v47 = vmul.f32 %v5815_v24, %v2118_v20 }
 0xd5f   :  { %v2121_v23 = vsub.f32 2.0, %v2120_v47 }
 0xd61   :  { %v2122_v32 = vmul.f32 %v5815_v24, %v2121_v23 }
 0xd63   :  { %v2147_v5 = vrot.slane %v2122_v32, %v8791_v34  ;;  %v2131_v21 = vrot.slane %v2122_v32, %v8787_v63  ;;  %v2135_v26 = vrot.slane %v2122_v32, %v8788_v62  ;;  %v2127_v42 = vrot.slane %v2122_v32, %v8650_v30 }
 0xd64   :  { %v2139_v60 = vrot.slane %v2122_v32, %v8789_v29  ;;  %v2143_v22 = vrot.slane %v2122_v32, %v8790_v43  ;;  %v2155_v36 = vrot.slane %v2122_v32, %v8793_v59 }
 0xd65   :  { %v2169_v55 = vmul.f32 %v5809_v15, %v2147_v5  ;;  %v2165_v14 = vmul.f32 %v5801_v48, %v2131_v21  ;;  %v2166_v9 = vmul.f32 %v5803_v27, %v2135_v26  ;;  %v2164_v52 = vmul.f32 %v7517_v25, %v2127_v42  ;;  %v2292_v27 = vld [vmem:[#allocation8] sm:$0xff] }
 0xd66   :  { %v2167_v7 = vmul.f32 %v5805_v1, %v2139_v60  ;;  %v2168_v61 = vmul.f32 %v5807_v17, %v2143_v22  ;;  %v2151_v48 = vrot.slane %v2122_v32, %v8792_v50  ;;  %v2171_v51 = vmul.f32 %v5813_v49, %v2155_v36  ;;  %v8795_v17 = vld [vmem:[#allocation84_spill] sm:$0xff]  ;;  %v1762_v49 = vpop.f32.mrf.mxu1  ;;  %v8798_v32 = vld [vmem:[#allocation87_spill] sm:$0xff] }
 0xd67   :  { %2199 = vperm.xlu0 %5698, %v2169_v55   ;;  %2179 = vperm.xlu1 %5696, %v2165_v14   ;;  %vm2293_vm11 = vcmp.gt.f32.partialorder %v2292_v27, 0.0  ;;  %v8794_v25 = vmov 0   ;;  %5816 = vtanh.f32 %v1762_v49  ;;  %v8799_v60 = vld [vmem:[#allocation88_spill] sm:$0xff]  ;;  %v8801_v49 = vld [vmem:[#allocation90_spill] sm:$0xff] }
 0xd68   :  { %v2170_v15 = vmul.f32 %v5811_v0, %v2151_v48  ;;  %v7547_v4 = vsel %vm2293_vm11, 1, %v8794_v25 }
 0xd6b   :  { %2184 = vperm.xlu1 %5696, %v2166_v9  }
 0xd6f   :  { %2174 = vperm.xlu1 %5696, %v2164_v52  }
 0xd73   :  { %2189 = vperm.xlu1 %5696, %v2167_v7  }
 0xd77   :  { %2194 = vperm.xlu1 %5696, %v2168_v61  }
 0xd7b   :  { %2204 = vperm.xlu1 %5696, %v2170_v15  }
 0xd7f   :  { %2209 = vperm.xlu1 %5696, %v2171_v51  }
 0xd83   :  { %5699 = vset.pattern.permute.xlu1 %v6411_v12 }
 0xd84   :  { %2296 = vperm.xlu1 %5699, %v7547_v4  }
 0xd88   :  { %5700 = vset.pattern.permute.xlu1 %v8794_v25 }
 0xde2   :  { %v2180_v1 = vpop.permute.xlu1 %2179  ;;  %v2200_v38 = vpop.permute.xlu0 %2199 }
 0xde3   :  { %v2213_v56 = vmul.f32 %v8795_v17, %v2180_v1  ;;  %v2217_v20 = vmul.f32 %v8797_v44, %v2200_v38  ;;  %v8800_v1 = vld [vmem:[#allocation85_spill] sm:$0xff] }
 0xde5   :  { %v2226_v0 = vrot.slane %v2213_v56, 4  ;;  %v2250_v55 = vrot.slane %v2217_v20, 4 }
 0xde6   :  { %v2185_v57 = vpop.permute.xlu1 %2184 }
 0xde7   :  { %v2214_v16 = vmul.f32 %v8796_v53, %v2185_v57  ;;  %v2227_v24 = vadd.f32 %v2226_v0, %v2213_v56  ;;  %v2251_v22 = vadd.f32 %v2250_v55, %v2217_v20 }
 0xde9   :  { %v2232_v47 = vrot.slane %v2214_v16, 4  ;;  %v2228_v14 = vrot.slane %v2227_v24, 2  ;;  %v2252_v56 = vrot.slane %v2251_v22, 2 }
 0xdea   :  { %v2175_v23 = vpop.permute.xlu1 %2174 }
 0xdeb   :  { %v2212_v5 = vmul.f32 %v8798_v32, %v2175_v23  ;;  %v2233_v21 = vadd.f32 %v2232_v47, %v2214_v16  ;;  %v2229_v61 = vadd.f32 %v2228_v14, %v2227_v24  ;;  %v5817_v47 = vpop.eup %5816  ;;  %v2253_v32 = vadd.f32 %v2252_v56, %v2251_v22 }
 0xded   :  { %v2220_v26 = vrot.slane %v2212_v5, 4  ;;  %v2234_v52 = vrot.slane %v2233_v21, 2  ;;  %v2230_v0 = vrot.slane %v2229_v61, 1 }
 0xdee   :  { %v2190_v9 = vpop.permute.xlu1 %2189 }
 0xdef   :  { %v2221_v42 = vadd.f32 %v2220_v26, %v2212_v5  ;;  %v2215_v7 = vmul.f32 %v8799_v60, %v2190_v9  ;;  %v2235_v51 = vadd.f32 %v2234_v52, %v2233_v21  ;;  %v2231_v5 = vadd.f32 %v2230_v0, %v2229_v61 }
 0xdf0   :  { %v2269_v9 = vrot.slane %v5817_v47, 1 }
 0xdf1   :  { %v2222_v48 = vrot.slane %v2221_v42, 2  ;;  %v2238_v15 = vrot.slane %v2215_v7, 4  ;;  %v2236_v23 = vrot.slane %v2235_v51, 1 }
 0xdf2   :  { %v2195_v36 = vpop.permute.xlu1 %2194 }
 0xdf3   :  { %v2223_v27 = vadd.f32 %v2222_v48, %v2221_v42  ;;  %v2239_v12 = vadd.f32 %v2238_v15, %v2215_v7  ;;  %v2216_v17 = vmul.f32 %v8800_v1, %v2195_v36  ;;  %v2237_v7 = vadd.f32 %v2236_v23, %v2235_v51 }
 0xdf4   :  { %v2271_v15 = vrot.slane %v5817_v47, 3  ;;  %v2254_v1 = vrot.slane %v2253_v32, 1  ;;  %v2273_v23 = vrot.slane %v5817_v47, 5 }
 0xdf5   :  { %v2240_v38 = vrot.slane %v2239_v12, 2  ;;  %v2244_v57 = vrot.slane %v2216_v17, 4  ;;  %v2224_v16 = vrot.slane %v2223_v27, 1 }
 0xdf6   :  { %v2205_v53 = vpop.permute.xlu1 %2204 }
 0xdf7   :  { %v2218_v44 = vmul.f32 %v8801_v49, %v2205_v53  ;;  %v2241_v20 = vadd.f32 %v2240_v38, %v2239_v12  ;;  %v2245_v24 = vadd.f32 %v2244_v57, %v2216_v17  ;;  %v2225_v42 = vadd.f32 %v2224_v16, %v2223_v27 }
 0xdf8   :  { %v2285_v53 = vadd.f32 %v2269_v9, %v2231_v5  ;;  %v2270_v17 = vrot.slane %v5817_v47, 2  ;;  %v2272_v27 = vrot.slane %v5817_v47, 4  ;;  %v2255_v16 = vadd.f32 %v2254_v1, %v2253_v32 }
 0xdf9   :  { %v2256_v55 = vrot.slane %v2218_v44, 4  ;;  %v2242_v14 = vrot.slane %v2241_v20, 1  ;;  %v2246_v21 = vrot.slane %v2245_v24, 2  ;;  %v2284_v61 = vadd.f32 %v5817_v47, %v2225_v42 }
 0xdfa   :  { %v2210_v26 = vpop.permute.xlu1 %2209  ;;  %v2286_v57 = vadd.f32 %v2270_v17, %v2237_v7  ;;  %v2289_v42 = vadd.f32 %v2273_v23, %v2255_v16  ;;  %v2275_v32 = vrot.slane %v5817_v47, 7  ;;  %v7585_v16 = vld [vmem:[#allocation11 + $0xc8] sm:$0xff] }
 0xdfb   :  { %v2257_v52 = vadd.f32 %v2256_v55, %v2218_v44  ;;  %v2219_v60 = vmul.f32 %v7373_v2, %v2210_v26  ;;  %v2243_v48 = vadd.f32 %v2242_v14, %v2241_v20  ;;  %v2247_v36 = vadd.f32 %v2246_v21, %v2245_v24  ;;  %v7597_v23 = vld [vmem:[#allocation11 + $0xa8] sm:$0xff] }
 0xdfc   :  { %v2307_v44 = vrot.slane %v2285_v53, 7  ;;  %v2274_v24 = vrot.slane %v5817_v47, 6  ;;  %v2309_v26 = vrot.slane %v2286_v57, 6  ;;  %v2315_v53 = vrot.slane %v2289_v42, 3  ;;  %v7570_v47 = vld [vmem:[#allocation11 + $0xf0] sm:$0xff]  ;;  %v7576_v57 = vld [vmem:[#allocation11 + $0xe0] sm:$0xff] }
 0xdfd   :  { %v2258_v49 = vrot.slane %v2257_v52, 2  ;;  %v2262_v12 = vrot.slane %v2219_v60, 4  ;;  %v2248_v22 = vrot.slane %v2247_v36, 1  ;;  %v2287_v56 = vadd.f32 %v2271_v15, %v2243_v48  ;;  %v7624_v42 = vld [vmem:[#allocation11 + $0x60] sm:$0xff] }
 0xdfe   :  { %v2308_v5 = vsel %vm698_vm0, %v2307_v44, %v2284_v61  ;;  %v7588_v44 = vld [vmem:[#allocation11 + $0xc0] sm:$0xff]  ;;  %8802 = vst [vmem:[#allocation25_spill] sm:$0xff] %v7624_v42 }
 0xdff   :  { %v2259_v0 = vadd.f32 %v2258_v49, %v2257_v52  ;;  %v2263_v38 = vadd.f32 %v2262_v12, %v2219_v60  ;;  %v2249_v25 = vadd.f32 %v2248_v22, %v2247_v36  ;;  %v2311_v55 = vrot.slane %v2287_v56, 5  ;;  %v2297_v1 = vpop.permute.xlu1 %2296  ;;  %v2324_v56 = vld [vmem:[#allocation7 + $0x18] sm:$0xff] }
 0xe00   :  { %v2310_v7 = vsel %vm700_vm1, %v2309_v26, %v2308_v5  ;;  %vm2298_vm12 = vcmp.eq.s32.totalorder %v2297_v1, 1  ;;  %v7606_v5 = vld [vmem:[#allocation11 + $0x90] sm:$0xff]  ;;  %v7648_v1 = vld [vmem:[#allocation11 + $0x20] sm:$0xff] }
 0xe01   :  { %v2260_v2 = vrot.slane %v2259_v0, 1  ;;  %v2264_v51 = vrot.slane %v2263_v38, 2  ;;  %v2288_v20 = vadd.f32 %v2272_v27, %v2249_v25  ;;  %v2312_v15 = vsel %vm702_vm2, %v2311_v55, %v2310_v7  ;;  %v7579_v27 = vld [vmem:[#allocation11 + $0xd8] sm:$0xff]  ;;  %v7609_v55 = vld [vmem:[#allocation11 + $0x88] sm:$0xff]  ;;  %v7618_v26 = vld [vmem:[#allocation11 + $0x70] sm:$0xff]  ;;  %8810 = vst [vmem:[#allocation46_spill] sm:$0xff] %v7648_v1 }
 0xe02   :  { %v7633_v7 = vld [vmem:[#allocation11 + $0x48] sm:$0xff] }
 0xe03   :  { %v2261_v14 = vadd.f32 %v2260_v2, %v2259_v0  ;;  %v2265_v21 = vadd.f32 %v2264_v51, %v2263_v38  ;;  %v2313_v9 = vrot.slane %v2288_v20, 4  ;;  %v7573_v38 = vld [vmem:[#allocation11 + $0xe8] sm:$0xff]  ;;  %v7591_v2 = vld [vmem:[#allocation11 + $0xb8] sm:$0xff]  ;;  %v7594_v51 = vld [vmem:[#allocation11 + $0xb0] sm:$0xff]  ;;  %8805 = vst [vmem:[#allocation24_spill] sm:$0xff] %v7633_v7 }
 0xe04   :  { %v7600_v20 = vld [vmem:[#allocation11 + $0xa0] sm:$0xff] }
 0xe05   :  { %v2290_v52 = vadd.f32 %v2274_v24, %v2261_v14  ;;  %v2266_v60 = vrot.slane %v2265_v21, 1  ;;  %v2314_v25 = vsel %vm704_vm3, %v2313_v9, %v2312_v15  ;;  %v7603_v24 = vld [vmem:[#allocation11 + $0x98] sm:$0xff]  ;;  %v7612_v14 = vld [vmem:[#allocation11 + $0x80] sm:$0xff]  ;;  %v7621_v9 = vld [vmem:[#allocation11 + $0x68] sm:$0xff] }
 0xe06   :  { %v2316_v12 = vsel %vm706_vm4, %v2315_v53, %v2314_v25  ;;  %v7642_v15 = vld [vmem:[#allocation11 + $0x30] sm:$0xff]  ;;  %v7651_v25 = vld [vmem:[#allocation11 + $0x18] sm:$0xff] }
 0xe07   :  { %v2267_v48 = vadd.f32 %v2266_v60, %v2265_v21  ;;  %v2317_v36 = vrot.slane %v2290_v52, 2  ;;  %v7615_v21 = vld [vmem:[#allocation11 + $0x78] sm:$0xff]  ;;  %v7630_v60 = vld [vmem:[#allocation11 + $0x50] sm:$0xff]  ;;  %8808 = vst [vmem:[#allocation33_spill] sm:$0xff] %v7642_v15  ;;  %8811 = vst [vmem:[#allocation47_spill] sm:$0xff] %v7651_v25 }
 0xe08   :  { %v7627_v52 = vld [vmem:[#allocation11 + $0x58] sm:$0xff]  ;;  %8804 = vst [vmem:[#allocation26_spill] sm:$0xff] %v7630_v60  ;;  %v7654_v53 = vld [vmem:[#allocation11 + $0x10] sm:$0xff] }
 0xe09   :  { %v2291_v49 = vadd.f32 %v2275_v32, %v2267_v48  ;;  %v2318_v22 = vsel %vm708_vm5, %v2317_v36, %v2316_v12  ;;  %8803 = vst [vmem:[#allocation30_spill] sm:$0xff] %v7627_v52  ;;  %v7636_v48 = vld [vmem:[#allocation11 + $0x40] sm:$0xff]  ;;  %v7639_v32 = vld [vmem:[#allocation11 + $0x38] sm:$0xff]  ;;  %v7645_v36 = vld [vmem:[#allocation11 + $0x28] sm:$0xff] }
 0xe0a   :  { %8806 = vst [vmem:[#allocation29_spill] sm:$0xff] %v7636_v48  ;;  %8807 = vst [vmem:[#allocation32_spill] sm:$0xff] %v7639_v32  ;;  %v7660_v12 = vld [vmem:[#allocation11] sm:$0xff] }
 0xe0b   :  { %v2319_v17 = vrot.slane %v2291_v49, 1  ;;  %8809 = vst [vmem:[#allocation35_spill] sm:$0xff] %v7645_v36  ;;  %8812 = vst [vmem:[#allocation48_spill] sm:$0xff] %v7654_v53  ;;  %v7657_v49 = vld [vmem:[#allocation11 + $0x8] sm:$0xff] }
 0xe0c   :  { %8813 = vst [vmem:[#allocation49_spill] sm:$0xff] %v7657_v49  ;;  %8814 = vst [vmem:[#allocation50_spill] sm:$0xff] %v7660_v12 }
 0xe0d   :  { %v2320_v61 = vsel %vm710_vm6, %v2319_v17, %v2318_v22  ;;  %v7663_v17 = vld [vmem:[#allocation11 + $0x1f8] sm:$0xff]  ;;  %v7666_v22 = vld [vmem:[#allocation11 + $0x1f0] sm:$0xff] }
 0xe0e   :  { %v7567_v0 = vsel %vm2298_vm12, %v2320_v61, %v7384_v19  ;;  %v7582_v19 = vld [vmem:[#allocation11 + $0xd0] sm:$0xff]  ;;  %8815 = vst [vmem:[#allocation51_spill] sm:$0xff] %v7663_v17  ;;  %8816 = vst [vmem:[#allocation52_spill] sm:$0xff] %v7666_v22  ;;  %v7669_v61 = vld [vmem:[#allocation11 + $0x1e8] sm:$0xff] }
 0xe0f   :  { %2389 = vmatprep.mubr.f32.mxu0 %v7567_v0  ;;  %8817 = vst [vmem:[#allocation53_spill] sm:$0xff] %v7669_v61 }
 0xe10   :  { %2390 = vmatmul.mubr.f32.vlgmr.msra.gmra.mxu0 %v2324_v56  ;;  %v7672_v56 = vld [vmem:[#allocation11 + $0x1e0] sm:$0xff] }
 0xe11   :  { %3588 = vmatpush1.msra.mxu0 %v7570_v47  ;;  %8818 = vst [vmem:[#allocation54_spill] sm:$0xff] %v7672_v56 }
 0xe12   :  { %3589 = vmatprep.subr.mxu0 %v7573_v38 }
 0xe13   :  { %3590 = vmatpush1.msra.mxu0 %v7576_v57 }
 0xe14   :  { %3591 = vmatprep.subr.mxu0 %v7579_v27 }
 0xe15   :  { %3592 = vmatpush1.msra.mxu0 %v7582_v19 }
 0xe16   :  { %3593 = vmatprep.subr.mxu0 %v7585_v16 }
 0xe17   :  { %3594 = vmatpush1.msra.mxu0 %v7588_v44 }
 0xe18   :  { %3595 = vmatprep.subr.mxu0 %v7591_v2 }
 0xe19   :  { %3596 = vmatpush1.msra.mxu0 %v7594_v51 }
 0xe1a   :  { %3597 = vmatprep.subr.mxu0 %v7597_v23 }
 0xe1b   :  { %3598 = vmatpush1.msra.mxu0 %v7600_v20 }
 0xe1c   :  { %3599 = vmatprep.subr.mxu0 %v7603_v24 }
 0xe1d   :  { %3600 = vmatpush1.msra.mxu0 %v7606_v5 }
 0xe1e   :  { %3601 = vmatprep.subr.mxu0 %v7609_v55 }
 0xe1f   :  { %3602 = vmatpush1.msra.mxu0 %v7612_v14 }
 0xe20   :  { %3603 = vmatprep.subr.mxu0 %v7615_v21 }
 0xe21   :  { %3604 = vmatpush1.msra.mxu0 %v7618_v26 }
 0xe22   :  { %3605 = vmatprep.subr.mxu0 %v7621_v9 }
 0xe23   :  { %3606 = vmatpush1.msra.mxu0 %v7624_v42 }
 0xe24   :  { %3607 = vmatprep.subr.mxu0 %v7627_v52 }
 0xe25   :  { %3608 = vmatpush1.msra.mxu0 %v7630_v60 }
 0xe26   :  { %3609 = vmatprep.subr.mxu0 %v7633_v7 }
 0xe27   :  { %3610 = vmatpush1.msra.mxu0 %v7636_v48 }
 0xe28   :  { %3611 = vmatprep.subr.mxu0 %v7639_v32 }
 0xe29   :  { %3612 = vmatpush1.msra.mxu0 %v7642_v15 }
 0xe2a   :  { %3613 = vmatprep.subr.mxu0 %v7645_v36 }
 0xe2b   :  { %3614 = vmatpush1.msra.mxu0 %v7648_v1 }
 0xe2c   :  { %3615 = vmatprep.subr.mxu0 %v7651_v25 }
 0xe2d   :  { %3616 = vmatpush1.msra.mxu0 %v7654_v53 }
 0xe2e   :  { %3617 = vmatprep.subr.mxu0 %v7657_v49  ;;  %v7675_v49 = vld [vmem:[#allocation11 + $0x1d8] sm:$0xff] }
 0xe2f   :  { %3618 = vmatpush1.msra.mxu0 %v7660_v12  ;;  %8819 = vst [vmem:[#allocation55_spill] sm:$0xff] %v7675_v49  ;;  %v7678_v12 = vld [vmem:[#allocation11 + $0x1d0] sm:$0xff] }
 0xe30   :  { %3619 = vmatprep.subr.mxu0 %v7663_v17  ;;  %8820 = vst [vmem:[#allocation56_spill] sm:$0xff] %v7678_v12  ;;  %v7681_v17 = vld [vmem:[#allocation11 + $0x1c8] sm:$0xff] }
 0xe31   :  { %3620 = vmatpush2.msra.mxu0 %v7666_v22  ;;  %8821 = vst [vmem:[#allocation57_spill] sm:$0xff] %v7681_v17  ;;  %v7684_v22 = vld [vmem:[#allocation11 + $0x1c0] sm:$0xff] }
 0xe32   :  { %3621 = vmatprep.subr.mxu0 %v7669_v61  ;;  %8822 = vst [vmem:[#allocation58_spill] sm:$0xff] %v7684_v22  ;;  %v7687_v61 = vld [vmem:[#allocation11 + $0x1b8] sm:$0xff] }
 0xe33   :  { %3622 = vmatpush2.msra.mxu0 %v7672_v56  ;;  %8823 = vst [vmem:[#allocation59_spill] sm:$0xff] %v7687_v61  ;;  %v7690_v56 = vld [vmem:[#allocation11 + $0x1b0] sm:$0xff] }
 0xe34   :  { %3623 = vmatprep.subr.mxu0 %v7675_v49  ;;  %8824 = vst [vmem:[#allocation60_spill] sm:$0xff] %v7690_v56  ;;  %v7693_v49 = vld [vmem:[#allocation11 + $0x1a8] sm:$0xff] }
 0xe35   :  { %3624 = vmatpush2.msra.mxu0 %v7678_v12  ;;  %8825 = vst [vmem:[#allocation61_spill] sm:$0xff] %v7693_v49  ;;  %v7696_v12 = vld [vmem:[#allocation11 + $0x1a0] sm:$0xff] }
 0xe36   :  { %3625 = vmatprep.subr.mxu0 %v7681_v17  ;;  %8826 = vst [vmem:[#allocation62_spill] sm:$0xff] %v7696_v12  ;;  %v7699_v17 = vld [vmem:[#allocation11 + $0x198] sm:$0xff] }
 0xe37   :  { %3626 = vmatpush2.msra.mxu0 %v7684_v22  ;;  %8827 = vst [vmem:[#allocation63_spill] sm:$0xff] %v7699_v17  ;;  %v7702_v22 = vld [vmem:[#allocation11 + $0x190] sm:$0xff] }
 0xe38   :  { %3627 = vmatprep.subr.mxu0 %v7687_v61  ;;  %8828 = vst [vmem:[#allocation64_spill] sm:$0xff] %v7702_v22  ;;  %v7705_v61 = vld [vmem:[#allocation11 + $0x188] sm:$0xff] }
 0xe39   :  { %3628 = vmatpush2.msra.mxu0 %v7690_v56  ;;  %8829 = vst [vmem:[#allocation65_spill] sm:$0xff] %v7705_v61  ;;  %v7708_v56 = vld [vmem:[#allocation11 + $0x180] sm:$0xff] }
 0xe3a   :  { %3629 = vmatprep.subr.mxu0 %v7693_v49  ;;  %8830 = vst [vmem:[#allocation66_spill] sm:$0xff] %v7708_v56  ;;  %v7711_v49 = vld [vmem:[#allocation11 + $0x178] sm:$0xff] }
 0xe3b   :  { %3630 = vmatpush2.msra.mxu0 %v7696_v12  ;;  %8831 = vst [vmem:[#allocation67_spill] sm:$0xff] %v7711_v49  ;;  %v7714_v12 = vld [vmem:[#allocation11 + $0x170] sm:$0xff] }
 0xe3c   :  { %3631 = vmatprep.subr.mxu0 %v7699_v17  ;;  %8832 = vst [vmem:[#allocation68_spill] sm:$0xff] %v7714_v12  ;;  %v7717_v17 = vld [vmem:[#allocation11 + $0x168] sm:$0xff] }
 0xe3d   :  { %3632 = vmatpush2.msra.mxu0 %v7702_v22  ;;  %8833 = vst [vmem:[#allocation69_spill] sm:$0xff] %v7717_v17  ;;  %v7720_v22 = vld [vmem:[#allocation11 + $0x160] sm:$0xff] }
 0xe3e   :  { %3633 = vmatprep.subr.mxu0 %v7705_v61  ;;  %8834 = vst [vmem:[#allocation70_spill] sm:$0xff] %v7720_v22  ;;  %v7723_v61 = vld [vmem:[#allocation11 + $0x158] sm:$0xff] }
 0xe3f   :  { %3634 = vmatpush2.msra.mxu0 %v7708_v56  ;;  %8835 = vst [vmem:[#allocation71_spill] sm:$0xff] %v7723_v61  ;;  %v7726_v56 = vld [vmem:[#allocation11 + $0x150] sm:$0xff] }
 0xe40   :  { %3635 = vmatprep.subr.mxu0 %v7711_v49  ;;  %8836 = vst [vmem:[#allocation72_spill] sm:$0xff] %v7726_v56  ;;  %v7729_v49 = vld [vmem:[#allocation11 + $0x148] sm:$0xff] }
 0xe41   :  { %3636 = vmatpush2.msra.mxu0 %v7714_v12  ;;  %8837 = vst [vmem:[#allocation73_spill] sm:$0xff] %v7729_v49  ;;  %v7732_v12 = vld [vmem:[#allocation11 + $0x140] sm:$0xff] }
 0xe42   :  { %3637 = vmatprep.subr.mxu0 %v7717_v17  ;;  %8838 = vst [vmem:[#allocation74_spill] sm:$0xff] %v7732_v12  ;;  %v7735_v17 = vld [vmem:[#allocation11 + $0x138] sm:$0xff] }
 0xe43   :  { %3638 = vmatpush2.msra.mxu0 %v7720_v22  ;;  %8839 = vst [vmem:[#allocation75_spill] sm:$0xff] %v7735_v17  ;;  %v7738_v22 = vld [vmem:[#allocation11 + $0x130] sm:$0xff] }
 0xe44   :  { %3639 = vmatprep.subr.mxu0 %v7723_v61  ;;  %8840 = vst [vmem:[#allocation76_spill] sm:$0xff] %v7738_v22  ;;  %v7741_v61 = vld [vmem:[#allocation11 + $0x128] sm:$0xff] }
 0xe45   :  { %3640 = vmatpush2.msra.mxu0 %v7726_v56  ;;  %8841 = vst [vmem:[#allocation77_spill] sm:$0xff] %v7741_v61  ;;  %v7744_v56 = vld [vmem:[#allocation11 + $0x120] sm:$0xff] }
 0xe46   :  { %3641 = vmatprep.subr.mxu0 %v7729_v49  ;;  %8842 = vst [vmem:[#allocation78_spill] sm:$0xff] %v7744_v56  ;;  %v7747_v49 = vld [vmem:[#allocation11 + $0x118] sm:$0xff] }
 0xe47   :  { %3642 = vmatpush2.msra.mxu0 %v7732_v12  ;;  %8843 = vst [vmem:[#allocation79_spill] sm:$0xff] %v7747_v49  ;;  %v7750_v12 = vld [vmem:[#allocation11 + $0x110] sm:$0xff] }
 0xe48   :  { %3643 = vmatprep.subr.mxu0 %v7735_v17  ;;  %8844 = vst [vmem:[#allocation80_spill] sm:$0xff] %v7750_v12  ;;  %v7753_v17 = vld [vmem:[#allocation11 + $0x108] sm:$0xff] }
 0xe49   :  { %3644 = vmatpush2.msra.mxu0 %v7738_v22  ;;  %8845 = vst [vmem:[#allocation81_spill] sm:$0xff] %v7753_v17  ;;  %v7756_v22 = vld [vmem:[#allocation11 + $0x100] sm:$0xff] }
 0xe4a   :  { %3645 = vmatprep.subr.mxu0 %v7741_v61  ;;  %8846 = vst [vmem:[#allocation82_spill] sm:$0xff] %v7756_v22  ;;  %v6136_v61 = vld [vmem:[#allocation11 + $0xf8] sm:$0xff] }
 0xe4b   :  { %3646 = vmatpush2.msra.mxu0 %v7744_v56 }
 0xe4c   :  { %3647 = vmatprep.subr.mxu0 %v7747_v49 }
 0xe4d   :  { %3648 = vmatpush2.msra.mxu0 %v7750_v12 }
 0xe4e   :  { %3649 = vmatprep.subr.mxu0 %v7753_v17 }
 0xe4f   :  { %3650 = vmatpush2.msra.mxu0 %v7756_v22 }
 0xe50   :  { %4849 = vmatprep.subr.mxu0 %v6136_v61 }
 0xed0   :  { %v2391_v53 = vpop.f32.mrf.mxu0 }
 0xed1   :  { %v2398_v56 = vcombine.high %v2391_v53, %v2391_v53  ;;  %v2405_v25 = vrot.slane %v2391_v53, %v6884_v10 }
 0xed3   :  { %v2412_v49 = vrot.slane %v2398_v56, %v6884_v10  ;;  %v2413_v1 = vcombine.high %v2405_v25, %v2405_v25  ;;  %v2421_v36 = vrot.slane %v2405_v25, %v6884_v10 }
 0xed5   :  { %v2414_v12 = vcombine.high %v2412_v49, %v2412_v49  ;;  %v2428_v15 = vrot.slane %v2412_v49, %v6884_v10  ;;  %v2435_v17 = vrot.slane %v2413_v1, %v6884_v10  ;;  %v2443_v32 = vcombine.high %v2421_v36, %v2421_v36 }
 0xed6   :  { %v2450_v48 = vrot.slane %v2421_v36, %v8650_v30 }
 0xed7   :  { %v2442_v22 = vrot.slane %v2414_v12, %v6884_v10  ;;  %v2445_v61 = vcombine.high %v2435_v17, %v2435_v17  ;;  %v2454_v7 = vrot.slane %v2435_v17, %v8650_v30  ;;  %v2444_v60 = vcombine.high %v2428_v15, %v2428_v15 }
 0xed8   :  { %v2458_v53 = vrot.slane %v2443_v32, %v8650_v30  ;;  %v2466_v56 = vrot.slane %v2428_v15, %v8650_v30  ;;  %v2487_v25 = vadd.f32 %v2450_v48, %v6879_v6 }
 0xed9   :  { %v2446_v52 = vcombine.high %v2442_v22, %v2442_v22  ;;  %v2462_v49 = vrot.slane %v2445_v61, %v8650_v30  ;;  %v2470_v1 = vrot.slane %v2442_v22, %v8650_v30  ;;  %v2488_v42 = vadd.f32 %v6877_v3, %v2454_v7 }
 0xeda   :  { %v2489_v36 = vadd.f32 %v2458_v53, %v6886_v11  ;;  %5818 = vtanh.f32 %v2487_v25  ;;  %v2474_v17 = vrot.slane %v2444_v60, %v8650_v30  ;;  %v2491_v32 = vadd.f32 %v2466_v56, %v6895_v28 }
 0xedb   :  { %v2490_v12 = vadd.f32 %v6881_v8, %v2462_v49  ;;  %5820 = vtanh.f32 %v2488_v42  ;;  %v2478_v48 = vrot.slane %v2446_v52, %v8650_v30  ;;  %v2492_v15 = vadd.f32 %v6889_v18, %v2470_v1 }
 0xedc   :  { %5822 = vtanh.f32 %v2489_v36  ;;  %v2493_v22 = vadd.f32 %v2474_v17, %v6912_v58 }
 0xedd   :  { %5824 = vtanh.f32 %v2490_v12  ;;  %v2494_v7 = vadd.f32 %v6904_v45, %v2478_v48 }
 0xede   :  { %5826 = vtanh.f32 %v2491_v32 }
 0xedf   :  { %5828 = vtanh.f32 %v2492_v15 }
 0xee0   :  { %5830 = vtanh.f32 %v2493_v22 }
 0xee1   :  { %5832 = vtanh.f32 %v2494_v7 }
 0xee7   :  { %v5819_v61 = vpop.eup %5818 }
 0xee8   :  { %v2503_v60 = vmul.f32 %v7476_v40, %v5819_v61  ;;  %v5821_v53 = vpop.eup %5820 }
 0xee9   :  { %v5823_v56 = vpop.eup %5822  ;;  %v2504_v42 = vmul.f32 %v7476_v40, %v5821_v53 }
 0xeea   :  { %2511 = vadd.xlane.f32.xlu1 %v2503_v60  ;;  %v5825_v52 = vpop.eup %5824  ;;  %v2505_v25 = vmul.f32 %v7476_v40, %v5823_v56 }
 0xeeb   :  { %2513 = vadd.xlane.f32.xlu0 %v2504_v42  ;;  %v5827_v49 = vpop.eup %5826  ;;  %v2506_v1 = vmul.f32 %v7476_v40, %v5825_v52 }
 0xeec   :  { %v5829_v36 = vpop.eup %5828  ;;  %v2507_v12 = vmul.f32 %v7476_v40, %v5827_v49 }
 0xeed   :  { %v5831_v17 = vpop.eup %5830  ;;  %v2508_v32 = vmul.f32 %v7476_v40, %v5829_v36 }
 0xeee   :  { %2515 = vadd.xlane.f32.xlu1 %v2505_v25  ;;  %v5833_v48 = vpop.eup %5832  ;;  %v2509_v15 = vmul.f32 %v7476_v40, %v5831_v17 }
 0xeef   :  { %2517 = vadd.xlane.f32.xlu0 %v2506_v1  ;;  %v2510_v22 = vmul.f32 %v7476_v40, %v5833_v48 }
 0xef2   :  { %2519 = vadd.xlane.f32.xlu1 %v2507_v12 }
 0xef3   :  { %2521 = vadd.xlane.f32.xlu0 %v2508_v32 }
 0xef6   :  { %2523 = vadd.xlane.f32.xlu1 %v2509_v15 }
 0xef7   :  { %2525 = vadd.xlane.f32.xlu0 %v2510_v22 }
 0xf73   :  { %v2512_v7 = vpop.xlane.xlu1 %2511 }
 0xf74   :  { %v2527_v61 = vadd.f32 %v2512_v7, %v8778_v13  ;;  %v2514_v60 = vpop.xlane.xlu0 %2513 }
 0xf75   :  { %v2528_v53 = vadd.f32 %v2514_v60, %v8779_v39 }
 0xf76   :  { %2544 = vperm.xlu1 %5700, %v2527_v61  }
 0xf77   :  { %v2516_v56 = vpop.xlane.xlu1 %2515  ;;  %2547 = vperm.xlu0 %5698, %v2528_v53  }
 0xf78   :  { %v2529_v42 = vadd.f32 %v2516_v56, %v8780_v33  ;;  %v2518_v52 = vpop.xlane.xlu0 %2517 }
 0xf79   :  { %v2530_v49 = vadd.f32 %v2518_v52, %v8782_v35 }
 0xf7a   :  { %2550 = vperm.xlu1 %5700, %v2529_v42  }
 0xf7b   :  { %v2520_v25 = vpop.xlane.xlu1 %2519 }
 0xf7c   :  { %v2531_v1 = vadd.f32 %v2520_v25, %v8781_v41  ;;  %v2522_v40 = vpop.xlane.xlu0 %2521 }
 0xf7d   :  { %v2532_v12 = vadd.f32 %v2522_v40, %v8783_v31 }
 0xf7e   :  { %2553 = vperm.xlu1 %5700, %v2530_v49   ;;  %2556 = vperm.xlu0 %5698, %v2531_v1  }
 0xf7f   :  { %v2524_v36 = vpop.xlane.xlu1 %2523 }
 0xf80   :  { %v2533_v17 = vadd.f32 %v2524_v36, %v8784_v54  ;;  %v2526_v32 = vpop.xlane.xlu0 %2525 }
 0xf81   :  { %v2534_v48 = vadd.f32 %v2526_v32, %v8785_v37 }
 0xf82   :  { %2559 = vperm.xlu1 %5700, %v2532_v12   ;;  %2562 = vperm.xlu0 %5698, %v2533_v17  }
 0xf86   :  { %2565 = vperm.xlu1 %5700, %v2534_v48  }
 0xff1   :  { %v2545_v15 = vpop.permute.xlu1 %2544 }
 0xff2   :  { %v2548_v22 = vpop.permute.xlu0 %2547  ;;  %v2570_v56 = vrot.slane %v2545_v15, %v8786_v46 }
 0xff3   :  { %v2574_v7 = vrot.slane %v2548_v22, %v8786_v46 }
 0xff5   :  { %v2551_v60 = vpop.permute.xlu1 %2550  ;;  %v2599_v25 = vsel %vm698_vm0, %v2574_v7, %v2570_v56 }
 0xff6   :  { %v2578_v52 = vrot.slane %v2551_v60, %v8786_v46 }
 0xff8   :  { %v2600_v54 = vsel %vm700_vm1, %v2578_v52, %v2599_v25 }
 0xff9   :  { %v2554_v40 = vpop.permute.xlu1 %2553  ;;  %v2557_v31 = vpop.permute.xlu0 %2556 }
 0xffa   :  { %v2582_v36 = vrot.slane %v2554_v40, %v8786_v46  ;;  %v2586_v32 = vrot.slane %v2557_v31, %v8786_v46 }
 0xffc   :  { %v2601_v37 = vsel %vm702_vm2, %v2582_v36, %v2600_v54 }
 0xffd   :  { %v2560_v35 = vpop.permute.xlu1 %2559  ;;  %v2563_v41 = vpop.permute.xlu0 %2562  ;;  %v2602_v15 = vsel %vm704_vm3, %v2586_v32, %v2601_v37 }
 0xffe   :  { %v2590_v22 = vrot.slane %v2560_v35, %v8786_v46  ;;  %v2594_v60 = vrot.slane %v2563_v41, %v8786_v46 }
0x1000   :  { %v2603_v7 = vsel %vm706_vm4, %v2590_v22, %v2602_v15 }
0x1001   :  { %v2566_v56 = vpop.permute.xlu1 %2565  ;;  %v2604_v40 = vsel %vm708_vm5, %v2594_v60, %v2603_v7 }
0x1002   :  { %v2598_v33 = vrot.slane %v2566_v56, %v8786_v46 }
0x1004   :  { %v2605_v52 = vsel %vm710_vm6, %v2598_v33, %v2604_v40 }
0x1005   :  { %v2607_v31 = vsel %vm713_vm7, %v2605_v52, -inf }
0x1006   :  { %2608 = vmax.xlane.f32.xlu0 %v2607_v31 }
0x108f   :  { %v2609_v54 = vpop.xlane.xlu0 %2608 }
0x1090   :  { %v2614_v25 = vrot.slane %v2609_v54, %v8650_v30  ;;  %v2618_v35 = vrot.slane %v2609_v54, %v8787_v63  ;;  %v2622_v37 = vrot.slane %v2609_v54, %v8788_v62  ;;  %v2626_v22 = vrot.slane %v2609_v54, %v8789_v29 }
0x1091   :  { %v2630_v33 = vrot.slane %v2609_v54, %v8790_v43  ;;  %v2634_v40 = vrot.slane %v2609_v54, %v8791_v34  ;;  %v2638_v39 = vrot.slane %v2609_v54, %v8792_v50 }
0x1092   :  { %v2651_v41 = vsub.f32 %v2527_v61, %v2614_v25  ;;  %v2652_v36 = vsub.f32 %v2528_v53, %v2618_v35  ;;  %v2653_v15 = vsub.f32 %v2529_v42, %v2622_v37  ;;  %v2654_v7 = vsub.f32 %v2530_v49, %v2626_v22 }
0x1093   :  { %v2655_v52 = vsub.f32 %v2531_v1, %v2630_v33  ;;  %v2656_v61 = vsub.f32 %v2532_v12, %v2634_v40  ;;  %v2642_v42 = vrot.slane %v2609_v54, %v8793_v59  ;;  %v2657_v35 = vsub.f32 %v2533_v17, %v2638_v39 }
0x1094   :  { %v2659_v32 = vmul.f32 1.442695, %v2651_v41  ;;  %v2661_v60 = vmul.f32 1.442695, %v2652_v36  ;;  %v2663_v56 = vmul.f32 1.442695, %v2653_v15 }
0x1095   :  { %v2665_v31 = vmul.f32 1.442695, %v2654_v7  ;;  %v2667_v53 = vmul.f32 1.442695, %v2655_v52  ;;  %v2669_v49 = vmul.f32 1.442695, %v2656_v61  ;;  %v2658_v41 = vsub.f32 %v2534_v48, %v2642_v42 }
0x1096   :  { %5834 = vpow2.f32 %v2659_v32  ;;  %v2671_v1 = vmul.f32 1.442695, %v2657_v35 }
0x1097   :  { %5836 = vpow2.f32 %v2661_v60  ;;  %v2673_v12 = vmul.f32 1.442695, %v2658_v41 }
0x1098   :  { %5838 = vpow2.f32 %v2663_v56 }
0x1099   :  { %5840 = vpow2.f32 %v2665_v31 }
0x109a   :  { %5842 = vpow2.f32 %v2667_v53 }
0x109b   :  { %5844 = vpow2.f32 %v2669_v49 }
0x109c   :  { %5846 = vpow2.f32 %v2671_v1 }
0x109d   :  { %5848 = vpow2.f32 %v2673_v12 }
0x10a3   :  { %v7820_v25 = vpop.eup %5834 }
0x10a4   :  { %2684 = vperm.xlu1 %5700, %v7820_v25   ;;  %v5837_v37 = vpop.eup %5836 }
0x10a5   :  { %v5839_v36 = vpop.eup %5838 }
0x10a6   :  { %v5841_v32 = vpop.eup %5840 }
0x10a7   :  { %v5843_v22 = vpop.eup %5842 }
0x10a8   :  { %2687 = vperm.xlu1 %5700, %v5837_v37   ;;  %v5845_v15 = vpop.eup %5844 }
0x10a9   :  { %v5847_v54 = vpop.eup %5846 }
0x10aa   :  { %v5849_v39 = vpop.eup %5848 }
0x10ac   :  { %2690 = vperm.xlu1 %5700, %v5839_v36  }
0x10b0   :  { %2693 = vperm.xlu1 %5700, %v5841_v32  }
0x10b4   :  { %2696 = vperm.xlu1 %5700, %v5843_v22  }
0x10b8   :  { %2699 = vperm.xlu1 %5700, %v5845_v15  }
0x10bc   :  { %2702 = vperm.xlu1 %5700, %v5847_v54  }
0x10c0   :  { %2705 = vperm.xlu1 %5700, %v5849_v39  }
0x111f   :  { %v2685_v17 = vpop.permute.xlu1 %2684 }
0x1120   :  { %v2710_v31 = vrot.slane %v2685_v17, %v8786_v46 }
0x1123   :  { %v2688_v60 = vpop.permute.xlu1 %2687 }
0x1124   :  { %v2714_v40 = vrot.slane %v2688_v60, %v8786_v46 }
0x1126   :  { %v2739_v35 = vsel %vm698_vm0, %v2714_v40, %v2710_v31 }
0x1127   :  { %v2691_v48 = vpop.permute.xlu1 %2690 }
0x1128   :  { %v2718_v52 = vrot.slane %v2691_v48, %v8786_v46 }
0x112a   :  { %v2740_v41 = vsel %vm700_vm1, %v2718_v52, %v2739_v35 }
0x112b   :  { %v2694_v33 = vpop.permute.xlu1 %2693 }
0x112c   :  { %v2722_v61 = vrot.slane %v2694_v33, %v8786_v46 }
0x112e   :  { %v2741_v12 = vsel %vm702_vm2, %v2722_v61, %v2740_v41 }
0x112f   :  { %v2697_v7 = vpop.permute.xlu1 %2696 }
0x1130   :  { %v2726_v53 = vrot.slane %v2697_v7, %v8786_v46 }
0x1132   :  { %v2742_v60 = vsel %vm704_vm3, %v2726_v53, %v2741_v12 }
0x1133   :  { %v2700_v56 = vpop.permute.xlu1 %2699 }
0x1134   :  { %v2730_v49 = vrot.slane %v2700_v56, %v8786_v46 }
0x1136   :  { %v2743_v17 = vsel %vm706_vm4, %v2730_v49, %v2742_v60 }
0x1137   :  { %v2703_v42 = vpop.permute.xlu1 %2702 }
0x1138   :  { %v2734_v1 = vrot.slane %v2703_v42, %v8786_v46 }
0x113a   :  { %v2744_v7 = vsel %vm708_vm5, %v2734_v1, %v2743_v17 }
0x113b   :  { %v2706_v48 = vpop.permute.xlu1 %2705 }
0x113c   :  { %v2738_v33 = vrot.slane %v2706_v48, %v8786_v46 }
0x113e   :  { %v2745_v13 = vsel %vm710_vm6, %v2738_v33, %v2744_v7 }
0x113f   :  { %v2747_v40 = vsel %vm713_vm7, %v2745_v13, 0.0 }
0x1140   :  { %2748 = vadd.xlane.f32.xlu0 %v2747_v40 }
0x11c9   :  { %v2749_v56 = vpop.xlane.xlu0 %2748 }
0x11ca   :  { %5850 = vrcp.f32 %v2749_v56 }
0x11d7   :  { %v5851_v52 = vpop.eup %5850 }
0x11d8   :  { %v2751_v31 = vmul.f32 %v5851_v52, %v2749_v56 }
0x11da   :  { %v2752_v42 = vsub.f32 2.0, %v2751_v31  ;;  %v7851_v31 = vld [vmem:[#allocation2 + $0x10] sm:$0xff] }
0x11db   :  { %8848 = vst [vmem:[#allocation83_spill] sm:$0xff] %v7851_v31 }
0x11dc   :  { %v2753_v61 = vmul.f32 %v5851_v52, %v2752_v42  ;;  %v7854_v42 = vld [vmem:[#allocation2 + $0x8] sm:$0xff] }
0x11dd   :  { %8849 = vst [vmem:[#allocation84_spill] sm:$0xff] %v7854_v42 }
0x11de   :  { %v2766_v53 = vrot.slane %v2753_v61, %v8788_v62  ;;  %v2762_v35 = vrot.slane %v2753_v61, %v8787_v63  ;;  %v2786_v12 = vrot.slane %v2753_v61, %v8793_v59  ;;  %v2758_v1 = vrot.slane %v2753_v61, %v8650_v30 }
0x11df   :  { %v2770_v48 = vrot.slane %v2753_v61, %v8789_v29  ;;  %v2774_v33 = vrot.slane %v2753_v61, %v8790_v43  ;;  %v2782_v40 = vrot.slane %v2753_v61, %v8792_v50 }
0x11e0   :  { %v2797_v49 = vmul.f32 %v5839_v36, %v2766_v53  ;;  %v2796_v41 = vmul.f32 %v5837_v37, %v2762_v35  ;;  %v2802_v13 = vmul.f32 %v5849_v39, %v2786_v12  ;;  %v2795_v60 = vmul.f32 %v7820_v25, %v2758_v1  ;;  %v7857_v12 = vld [vmem:[#allocation2] sm:$0xff]  ;;  %v7860_v1 = vld [vmem:[#allocation2 + $0x38] sm:$0xff] }
0x11e1   :  { %v2798_v17 = vmul.f32 %v5841_v32, %v2770_v48  ;;  %v2799_v7 = vmul.f32 %v5843_v22, %v2774_v33  ;;  %v2778_v37 = vrot.slane %v2753_v61, %v8791_v34  ;;  %v2801_v56 = vmul.f32 %v5847_v54, %v2782_v40  ;;  %v2393_v61 = vpop.f32.mrf.mxu0  ;;  %8850 = vst [vmem:[#allocation86_spill] sm:$0xff] %v7857_v12 }
0x11e2   :  { %2815 = vperm.xlu0 %5698, %v2797_v49   ;;  %2810 = vperm.xlu1 %5700, %v2796_v41   ;;  %v6412_v39 = vmov 3   ;;  %v8847_v25 = vmov 0   ;;  %8851 = vst [vmem:[#allocation89_spill] sm:$0xff] %v7860_v1  ;;  %5852 = vtanh.f32 %v2393_v61 }
0x11e3   :  { %v2800_v36 = vmul.f32 %v5845_v15, %v2778_v37 }
0x11e6   :  { %2840 = vperm.xlu0 %5698, %v2802_v13   ;;  %2805 = vperm.xlu1 %5700, %v2795_v60  }
0x11ea   :  { %2820 = vperm.xlu1 %5700, %v2798_v17  }
0x11ee   :  { %2825 = vperm.xlu1 %5700, %v2799_v7  }
0x11f2   :  { %2830 = vperm.xlu1 %5700, %v2800_v36   ;;  %v7863_v36 = vld [vmem:[#allocation2 + $0x18] sm:$0xff] }
0x11f3   :  { %8852 = vst [vmem:[#allocation87_spill] sm:$0xff] %v7863_v36 }
0x11f6   :  { %2835 = vperm.xlu1 %5700, %v2801_v56  }
0x11fa   :  { %5701 = vset.pattern.permute.xlu1 %v6412_v39 }
0x11fb   :  { %2927 = vperm.xlu1 %5701, %v7547_v4  }
0x11ff   :  { %5702 = vset.pattern.permute.xlu1 %v8847_v25 }
0x125d   :  { %v2816_v32 = vpop.permute.xlu0 %2815  ;;  %v2811_v52 = vpop.permute.xlu1 %2810 }
0x125e   :  { %v2845_v22 = vmul.f32 %v7851_v31, %v2816_v32  ;;  %v2844_v15 = vmul.f32 %v7854_v42, %v2811_v52 }
0x1260   :  { %v2857_v53 = vrot.slane %v2844_v15, 4  ;;  %v2863_v49 = vrot.slane %v2845_v22, 4 }
0x1261   :  { %v2841_v54 = vpop.permute.xlu0 %2840  ;;  %v2806_v35 = vpop.permute.xlu1 %2805 }
0x1262   :  { %v2858_v41 = vadd.f32 %v2857_v53, %v2844_v15  ;;  %v2843_v4 = vmul.f32 %v7857_v12, %v2806_v35  ;;  %v2850_v13 = vmul.f32 %v7860_v1, %v2841_v54  ;;  %v2864_v17 = vadd.f32 %v2863_v49, %v2845_v22  ;;  %v7866_v12 = vld [vmem:[#allocation2 + $0x20] sm:$0xff] }
0x1263   :  { %8853 = vst [vmem:[#allocation88_spill] sm:$0xff] %v7866_v12 }
0x1264   :  { %v2851_v60 = vrot.slane %v2843_v4, 4  ;;  %v2859_v33 = vrot.slane %v2858_v41, 2  ;;  %v2893_v37 = vrot.slane %v2850_v13, 4  ;;  %v2865_v52 = vrot.slane %v2864_v17, 2 }
0x1265   :  { %v2821_v48 = vpop.permute.xlu1 %2820 }
0x1266   :  { %v2852_v7 = vadd.f32 %v2851_v60, %v2843_v4  ;;  %v2846_v40 = vmul.f32 %v7863_v36, %v2821_v48  ;;  %v2860_v15 = vadd.f32 %v2859_v33, %v2858_v41  ;;  %v2894_v53 = vadd.f32 %v2893_v37, %v2850_v13  ;;  %v7869_v36 = vld [vmem:[#allocation2 + $0x28] sm:$0xff]  ;;  %v5853_v41 = vpop.eup %5852 }
0x1267   :  { %v2866_v60 = vadd.f32 %v2865_v52, %v2864_v17  ;;  %8854 = vst [vmem:[#allocation85_spill] sm:$0xff] %v7869_v36  ;;  %v2902_v34 = vrot.slane %v5853_v41, 3  ;;  %v2901_v45 = vrot.slane %v5853_v41, 2  ;;  %v2903_v18 = vrot.slane %v5853_v41, 4 }
0x1268   :  { %v2853_v56 = vrot.slane %v2852_v7, 2  ;;  %v2869_v39 = vrot.slane %v2846_v40, 4  ;;  %v2861_v1 = vrot.slane %v2860_v15, 1  ;;  %v2895_v31 = vrot.slane %v2894_v53, 2 }
0x1269   :  { %v2826_v32 = vpop.permute.xlu1 %2825 }
0x126a   :  { %v2870_v35 = vadd.f32 %v2869_v39, %v2846_v40  ;;  %v2847_v61 = vmul.f32 %v7866_v12, %v2826_v32  ;;  %v2854_v54 = vadd.f32 %v2853_v56, %v2852_v7  ;;  %v2867_v32 = vrot.slane %v2866_v60, 1  ;;  %v7872_v7 = vld [vmem:[#allocation2 + $0x30] sm:$0xff] }
0x126b   :  { %v2862_v17 = vadd.f32 %v2861_v1, %v2860_v15  ;;  %v2896_v52 = vadd.f32 %v2895_v31, %v2894_v53 }
0x126c   :  { %v2871_v22 = vrot.slane %v2870_v35, 2  ;;  %v2875_v49 = vrot.slane %v2847_v61, 4  ;;  %v2855_v13 = vrot.slane %v2854_v54, 1  ;;  %v2868_v50 = vadd.f32 %v2867_v32, %v2866_v60 }
0x126d   :  { %v2831_v4 = vpop.permute.xlu1 %2830  ;;  %v2897_v62 = vrot.slane %v2896_v52, 1 }
0x126e   :  { %v2872_v42 = vadd.f32 %v2871_v22, %v2870_v35  ;;  %v2876_v48 = vadd.f32 %v2875_v49, %v2847_v61  ;;  %v2848_v25 = vmul.f32 %v7869_v36, %v2831_v4  ;;  %v2900_v61 = vrot.slane %v5853_v41, 1 }
0x126f   :  { %v2856_v49 = vadd.f32 %v2855_v13, %v2854_v54 }
0x1270   :  { %v2873_v33 = vrot.slane %v2872_v42, 1  ;;  %v2877_v37 = vrot.slane %v2876_v48, 2  ;;  %v2881_v40 = vrot.slane %v2848_v25, 4  ;;  %v2916_v29 = vadd.f32 %v2900_v61, %v2862_v17 }
0x1271   :  { %v2836_v39 = vpop.permute.xlu1 %2835  ;;  %v2915_v1 = vadd.f32 %v5853_v41, %v2856_v49  ;;  %v8874_v49 = vld [vmem:[#allocation57_spill] sm:$0xff] }
0x1272   :  { %v2849_v56 = vmul.f32 %v7872_v7, %v2836_v39  ;;  %v2878_v12 = vadd.f32 %v2877_v37, %v2876_v48  ;;  %v2882_v35 = vadd.f32 %v2881_v40, %v2848_v25  ;;  %v2874_v59 = vadd.f32 %v2873_v33, %v2872_v42 }
0x1273   :  { %v2917_v25 = vadd.f32 %v2901_v45, %v2868_v50  ;;  %v2938_v54 = vrot.slane %v2916_v29, 7  ;;  %v2898_v42 = vadd.f32 %v2897_v62, %v2896_v52  ;;  %v2904_v33 = vrot.slane %v5853_v41, 5 }
0x1274   :  { %v2887_v22 = vrot.slane %v2849_v56, 4  ;;  %v2879_v4 = vrot.slane %v2878_v12, 1  ;;  %v2883_v36 = vrot.slane %v2882_v35, 2  ;;  %v2918_v31 = vadd.f32 %v2902_v34, %v2874_v59 }
0x1275   :  { %v2939_v37 = vsel %vm698_vm0, %v2938_v54, %v2915_v1  ;;  %v8877_v1 = vld [vmem:[#allocation60_spill] sm:$0xff]  ;;  %v8883_v54 = vld [vmem:[#allocation66_spill] sm:$0xff] }
0x1276   :  { %v2888_v43 = vadd.f32 %v2887_v22, %v2849_v56  ;;  %v2880_v63 = vadd.f32 %v2879_v4, %v2878_v12  ;;  %v2884_v46 = vadd.f32 %v2883_v36, %v2882_v35  ;;  %v2942_v40 = vrot.slane %v2918_v31, 5  ;;  %v2928_v45 = vpop.permute.xlu1 %2927  ;;  %v8875_v4 = vld [vmem:[#allocation58_spill] sm:$0xff]  ;;  %v8878_v31 = vld [vmem:[#allocation61_spill] sm:$0xff] }
0x1277   :  { %v2906_v12 = vrot.slane %v5853_v41, 7  ;;  %v2940_v36 = vrot.slane %v2917_v25, 6  ;;  %v2905_v35 = vrot.slane %v5853_v41, 6  ;;  %vm2929_vm13 = vcmp.eq.s32.totalorder %v2928_v45, 1  ;;  %v2955_v41 = vld [vmem:[#allocation7 + $0x20] sm:$0xff]  ;;  %v8880_v25 = vld [vmem:[#allocation63_spill] sm:$0xff] }
0x1278   :  { %v2889_v39 = vrot.slane %v2888_v43, 2  ;;  %v2885_v15 = vrot.slane %v2884_v46, 1  ;;  %v2919_v53 = vadd.f32 %v2903_v18, %v2880_v63  ;;  %v8899_v45 = vld [vmem:[#allocation82_spill] sm:$0xff] }
0x1279   :  { %v2922_v34 = vadd.f32 %v2906_v12, %v2898_v42  ;;  %v2941_v18 = vsel %vm700_vm1, %v2940_v36, %v2939_v37  ;;  %v8884_v42 = vld [vmem:[#allocation67_spill] sm:$0xff]  ;;  %v8891_v12 = vld [vmem:[#allocation74_spill] sm:$0xff] }
0x127a   :  { %v2890_v48 = vadd.f32 %v2889_v39, %v2888_v43  ;;  %v2886_v13 = vadd.f32 %v2885_v15, %v2884_v46  ;;  %v2944_v56 = vrot.slane %v2919_v53, 4  ;;  %v2943_v63 = vsel %vm702_vm2, %v2942_v40, %v2941_v18  ;;  %v8876_v39 = vld [vmem:[#allocation59_spill] sm:$0xff]  ;;  %v8879_v15 = vld [vmem:[#allocation62_spill] sm:$0xff]  ;;  %v8881_v53 = vld [vmem:[#allocation64_spill] sm:$0xff] }
0x127b   :  { %v2950_v43 = vrot.slane %v2922_v34, 1  ;;  %v8888_v37 = vld [vmem:[#allocation71_spill] sm:$0xff]  ;;  %v8889_v40 = vld [vmem:[#allocation72_spill] sm:$0xff] }
0x127c   :  { %v2891_v60 = vrot.slane %v2890_v48, 1  ;;  %v2920_v32 = vadd.f32 %v2904_v33, %v2886_v13  ;;  %v2945_v62 = vsel %vm704_vm3, %v2944_v56, %v2943_v63  ;;  %v8885_v13 = vld [vmem:[#allocation68_spill] sm:$0xff]  ;;  %v8886_v33 = vld [vmem:[#allocation69_spill] sm:$0xff]  ;;  %v8892_v36 = vld [vmem:[#allocation75_spill] sm:$0xff] }
0x127d   :  { %v8893_v56 = vld [vmem:[#allocation76_spill] sm:$0xff] }
0x127e   :  { %v2892_v17 = vadd.f32 %v2891_v60, %v2890_v48  ;;  %v2946_v61 = vrot.slane %v2920_v32, 3  ;;  %v8882_v48 = vld [vmem:[#allocation65_spill] sm:$0xff]  ;;  %v8887_v60 = vld [vmem:[#allocation70_spill] sm:$0xff]  ;;  %v8897_v34 = vld [vmem:[#allocation80_spill] sm:$0xff] }
0x127f   :  { %v8890_v32 = vld [vmem:[#allocation73_spill] sm:$0xff] }
0x1280   :  { %v2921_v59 = vadd.f32 %v2905_v35, %v2892_v17  ;;  %v2947_v29 = vsel %vm706_vm4, %v2946_v61, %v2945_v62  ;;  %v8894_v17 = vld [vmem:[#allocation77_spill] sm:$0xff]  ;;  %v8895_v35 = vld [vmem:[#allocation78_spill] sm:$0xff]  ;;  %v8896_v61 = vld [vmem:[#allocation79_spill] sm:$0xff] }
0x1282   :  { %v2948_v46 = vrot.slane %v2921_v59, 2  ;;  %v8898_v59 = vld [vmem:[#allocation81_spill] sm:$0xff] }
0x1284   :  { %v2949_v50 = vsel %vm708_vm5, %v2948_v46, %v2947_v29 }
0x1285   :  { %v2951_v52 = vsel %vm710_vm6, %v2950_v43, %v2949_v50 }
0x1286   :  { %v7883_v22 = vsel %vm2929_vm13, %v2951_v52, %v7567_v0  ;;  %v8855_v0 = vld [vmem:[#allocation25_spill] sm:$0xff] }
0x1287   :  { %3020 = vmatprep.mubr.f32.mxu1 %v7883_v22 }
0x1288   :  { %3021 = vmatmul.mubr.f32.vlgmr.msra.gmra.mxu1 %v2955_v41 }
0x1289   :  { %4219 = vmatpush1.msra.mxu1 %v7570_v47  ;;  %v8856_v47 = vld [vmem:[#allocation30_spill] sm:$0xff] }
0x128a   :  { %4220 = vmatprep.subr.mxu1 %v7573_v38  ;;  %v8857_v38 = vld [vmem:[#allocation26_spill] sm:$0xff] }
0x128b   :  { %4221 = vmatpush1.msra.mxu1 %v7576_v57  ;;  %v8858_v57 = vld [vmem:[#allocation24_spill] sm:$0xff] }
0x128c   :  { %4222 = vmatprep.subr.mxu1 %v7579_v27  ;;  %v8859_v27 = vld [vmem:[#allocation29_spill] sm:$0xff] }
0x128d   :  { %4223 = vmatpush1.msra.mxu1 %v7582_v19  ;;  %v8860_v19 = vld [vmem:[#allocation32_spill] sm:$0xff] }
0x128e   :  { %4224 = vmatprep.subr.mxu1 %v7585_v16  ;;  %v8861_v16 = vld [vmem:[#allocation33_spill] sm:$0xff] }
0x128f   :  { %4225 = vmatpush1.msra.mxu1 %v7588_v44  ;;  %v8862_v44 = vld [vmem:[#allocation35_spill] sm:$0xff] }
0x1290   :  { %4226 = vmatprep.subr.mxu1 %v7591_v2  ;;  %v8863_v2 = vld [vmem:[#allocation46_spill] sm:$0xff] }
0x1291   :  { %4227 = vmatpush1.msra.mxu1 %v7594_v51  ;;  %v8864_v51 = vld [vmem:[#allocation47_spill] sm:$0xff] }
0x1292   :  { %4228 = vmatprep.subr.mxu1 %v7597_v23  ;;  %v8865_v23 = vld [vmem:[#allocation48_spill] sm:$0xff] }
0x1293   :  { %4229 = vmatpush1.msra.mxu1 %v7600_v20  ;;  %v8866_v20 = vld [vmem:[#allocation49_spill] sm:$0xff] }
0x1294   :  { %4230 = vmatprep.subr.mxu1 %v7603_v24  ;;  %v8867_v24 = vld [vmem:[#allocation50_spill] sm:$0xff] }
0x1295   :  { %4231 = vmatpush1.msra.mxu1 %v7606_v5  ;;  %v8868_v5 = vld [vmem:[#allocation51_spill] sm:$0xff] }
0x1296   :  { %4232 = vmatprep.subr.mxu1 %v7609_v55  ;;  %v8869_v55 = vld [vmem:[#allocation52_spill] sm:$0xff] }
0x1297   :  { %4233 = vmatpush1.msra.mxu1 %v7612_v14  ;;  %v8870_v14 = vld [vmem:[#allocation53_spill] sm:$0xff] }
0x1298   :  { %4234 = vmatprep.subr.mxu1 %v7615_v21  ;;  %v8871_v21 = vld [vmem:[#allocation54_spill] sm:$0xff] }
0x1299   :  { %4235 = vmatpush1.msra.mxu1 %v7618_v26  ;;  %v8872_v26 = vld [vmem:[#allocation55_spill] sm:$0xff] }
0x129a   :  { %4236 = vmatprep.subr.mxu1 %v7621_v9  ;;  %v8873_v9 = vld [vmem:[#allocation56_spill] sm:$0xff] }
0x129b   :  { %4237 = vmatpush1.msra.mxu1 %v8855_v0 }
0x129c   :  { %4238 = vmatprep.subr.mxu1 %v8856_v47 }
0x129d   :  { %4239 = vmatpush1.msra.mxu1 %v8857_v38 }
0x129e   :  { %4240 = vmatprep.subr.mxu1 %v8858_v57 }
0x129f   :  { %4241 = vmatpush1.msra.mxu1 %v8859_v27 }
0x12a0   :  { %4242 = vmatprep.subr.mxu1 %v8860_v19 }
0x12a1   :  { %4243 = vmatpush1.msra.mxu1 %v8861_v16 }
0x12a2   :  { %4244 = vmatprep.subr.mxu1 %v8862_v44 }
0x12a3   :  { %4245 = vmatpush1.msra.mxu1 %v8863_v2 }
0x12a4   :  { %4246 = vmatprep.subr.mxu1 %v8864_v51 }
0x12a5   :  { %4247 = vmatpush1.msra.mxu1 %v8865_v23 }
0x12a6   :  { %4248 = vmatprep.subr.mxu1 %v8866_v20 }
0x12a7   :  { %4249 = vmatpush1.msra.mxu1 %v8867_v24 }
0x12a8   :  { %4250 = vmatprep.subr.mxu1 %v8868_v5 }
0x12a9   :  { %4251 = vmatpush2.msra.mxu1 %v8869_v55 }
0x12aa   :  { %4252 = vmatprep.subr.mxu1 %v8870_v14 }
0x12ab   :  { %4253 = vmatpush2.msra.mxu1 %v8871_v21 }
0x12ac   :  { %4254 = vmatprep.subr.mxu1 %v8872_v26 }
0x12ad   :  { %4255 = vmatpush2.msra.mxu1 %v8873_v9 }
0x12ae   :  { %4256 = vmatprep.subr.mxu1 %v8874_v49  ;;  %v8900_v49 = vld [vmem:[#allocation36_spill] sm:$0xff] }
0x12af   :  { %4257 = vmatpush2.msra.mxu1 %v8875_v4 }
0x12b0   :  { %4258 = vmatprep.subr.mxu1 %v8876_v39  ;;  %v8901_v39 = vld [vmem:[#allocation20_spill] sm:$0xff] }
0x12b1   :  { %4259 = vmatpush2.msra.mxu1 %v8877_v1 }
0x12b2   :  { %4260 = vmatprep.subr.mxu1 %v8878_v31 }
0x12b3   :  { %4261 = vmatpush2.msra.mxu1 %v8879_v15  ;;  %v7974_v15 = vld [vmem:[%s8435_s7] ss:$0 sm:$0xff] }
0x12b4   :  { %4262 = vmatprep.subr.mxu1 %v8880_v25 }
0x12b5   :  { %4263 = vmatpush2.msra.mxu1 %v8881_v53 }
0x12b6   :  { %4264 = vmatprep.subr.mxu1 %v8882_v48 }
0x12b7   :  { %4265 = vmatpush2.msra.mxu1 %v8883_v54 }
0x12b8   :  { %4266 = vmatprep.subr.mxu1 %v8884_v42 }
0x12b9   :  { %4267 = vmatpush2.msra.mxu1 %v8885_v13 }
0x12ba   :  { %4268 = vmatprep.subr.mxu1 %v8886_v33 }
0x12bb   :  { %4269 = vmatpush2.msra.mxu1 %v8887_v60 }
0x12bc   :  { %4270 = vmatprep.subr.mxu1 %v8888_v37 }
0x12bd   :  { %4271 = vmatpush2.msra.mxu1 %v8889_v40 }
0x12be   :  { %4272 = vmatprep.subr.mxu1 %v8890_v32 }
0x12bf   :  { %4273 = vmatpush2.msra.mxu1 %v8891_v12 }
0x12c0   :  { %4274 = vmatprep.subr.mxu1 %v8892_v36 }
0x12c1   :  { %4275 = vmatpush2.msra.mxu1 %v8893_v56 }
0x12c2   :  { %4276 = vmatprep.subr.mxu1 %v8894_v17 }
0x12c3   :  { %4277 = vmatpush2.msra.mxu1 %v8895_v35 }
0x12c4   :  { %4278 = vmatprep.subr.mxu1 %v8896_v61  ;;  %v8902_v61 = vld [vmem:[#allocation39_spill] sm:$0xff] }
0x12c5   :  { %4279 = vmatpush2.msra.mxu1 %v8897_v34 }
0x12c6   :  { %4280 = vmatprep.subr.mxu1 %v8898_v59 }
0x12c7   :  { %4281 = vmatpush2.msra.mxu1 %v8899_v45  ;;  %v8903_v45 = vld [vmem:[#allocation21_spill] sm:$0xff] }
0x1348   :  { %v3022_v18 = vpop.f32.mrf.mxu1 }
0x1349   :  { %v3029_v63 = vcombine.high %v3022_v18, %v3022_v18  ;;  %v3036_v46 = vrot.slane %v3022_v18, %v6884_v10 }
0x134b   :  { %v3043_v62 = vrot.slane %v3029_v63, %v6884_v10  ;;  %v3044_v29 = vcombine.high %v3036_v46, %v3036_v46  ;;  %v3052_v43 = vrot.slane %v3036_v46, %v6884_v10  ;;  %v8904_v46 = vld [vmem:[#allocation38_spill] sm:$0xff] }
0x134d   :  { %v3045_v50 = vcombine.high %v3043_v62, %v3043_v62  ;;  %v3059_v52 = vrot.slane %v3043_v62, %v6884_v10  ;;  %v3066_v41 = vrot.slane %v3044_v29, %v6884_v10  ;;  %v3074_v0 = vcombine.high %v3052_v43, %v3052_v43 }
0x134e   :  { %v3081_v47 = vrot.slane %v3052_v43, %v8650_v30  ;;  %v8905_v43 = vld [vmem:[#allocation41_spill] sm:$0xff] }
0x134f   :  { %v3075_v38 = vcombine.high %v3059_v52, %v3059_v52  ;;  %v3076_v57 = vcombine.high %v3066_v41, %v3066_v41  ;;  %v3085_v27 = vrot.slane %v3066_v41, %v8650_v30  ;;  %v3073_v19 = vrot.slane %v3045_v50, %v6884_v10  ;;  %v8906_v41 = vld [vmem:[#allocation40_spill] sm:$0xff] }
0x1350   :  { %v3089_v16 = vrot.slane %v3074_v0, %v8650_v30  ;;  %v3097_v44 = vrot.slane %v3059_v52, %v8650_v30  ;;  %v3118_v2 = vadd.f32 %v3081_v47, %v6879_v6 }
0x1351   :  { %v3093_v51 = vrot.slane %v3076_v57, %v8650_v30  ;;  %v3105_v23 = vrot.slane %v3075_v38, %v8650_v30  ;;  %v3119_v20 = vadd.f32 %v6877_v3, %v3085_v27  ;;  %v3077_v55 = vcombine.high %v3073_v19, %v3073_v19  ;;  %v8907_v38 = vld [vmem:[#allocation43_spill] sm:$0xff] }
0x1352   :  { %v3120_v24 = vadd.f32 %v3089_v16, %v6886_v11  ;;  %5854 = vtanh.f32 %v3118_v2  ;;  %v3122_v5 = vadd.f32 %v3097_v44, %v6895_v28  ;;  %v3101_v14 = vrot.slane %v3073_v19, %v8650_v30  ;;  %v8908_v19 = vld [vmem:[#allocation42_spill] sm:$0xff]  ;;  %v8909_v2 = vld [vmem:[#allocation44_spill] sm:$0xff] }
0x1353   :  { %v3121_v21 = vadd.f32 %v6881_v8, %v3093_v51  ;;  %5856 = vtanh.f32 %v3119_v20  ;;  %v3124_v26 = vadd.f32 %v3105_v23, %v6912_v58  ;;  %v3109_v9 = vrot.slane %v3077_v55, %v8650_v30 }
0x1354   :  { %5858 = vtanh.f32 %v3120_v24  ;;  %v3123_v4 = vadd.f32 %v8900_v49, %v3101_v14  ;;  %v8910_v24 = vld [vmem:[#allocation45_spill] sm:$0xff] }
0x1355   :  { %5860 = vtanh.f32 %v3122_v5  ;;  %v3125_v1 = vadd.f32 %v8901_v39, %v3109_v9 }
0x1356   :  { %5862 = vtanh.f32 %v3121_v21 }
0x1357   :  { %5864 = vtanh.f32 %v3124_v26 }
0x1358   :  { %5866 = vtanh.f32 %v3123_v4 }
0x1359   :  { %5868 = vtanh.f32 %v3125_v1 }
0x135f   :  { %v5855_v31 = vpop.eup %5854 }
0x1360   :  { %v3134_v25 = vmul.f32 %v7974_v15, %v5855_v31  ;;  %v5857_v53 = vpop.eup %5856 }
0x1361   :  { %v5859_v48 = vpop.eup %5858  ;;  %v3135_v54 = vmul.f32 %v7974_v15, %v5857_v53 }
0x1362   :  { %3142 = vadd.xlane.f32.xlu0 %v3134_v25  ;;  %v5861_v42 = vpop.eup %5860  ;;  %v3136_v13 = vmul.f32 %v7974_v15, %v5859_v48 }
0x1363   :  { %3144 = vadd.xlane.f32.xlu1 %v3135_v54  ;;  %v5863_v33 = vpop.eup %5862  ;;  %v3138_v60 = vmul.f32 %v7974_v15, %v5861_v42 }
0x1364   :  { %v5865_v37 = vpop.eup %5864  ;;  %v3137_v40 = vmul.f32 %v7974_v15, %v5863_v33 }
0x1365   :  { %v5867_v32 = vpop.eup %5866  ;;  %v3140_v12 = vmul.f32 %v7974_v15, %v5865_v37 }
0x1366   :  { %3146 = vadd.xlane.f32.xlu0 %v3136_v13  ;;  %v3139_v36 = vmul.f32 %v7974_v15, %v5867_v32  ;;  %v5869_v56 = vpop.eup %5868 }
0x1367   :  { %3150 = vadd.xlane.f32.xlu1 %v3138_v60  ;;  %v3141_v17 = vmul.f32 %v7974_v15, %v5869_v56 }
0x136a   :  { %3148 = vadd.xlane.f32.xlu0 %v3137_v40 }
0x136b   :  { %3154 = vadd.xlane.f32.xlu1 %v3140_v12 }
0x136e   :  { %3152 = vadd.xlane.f32.xlu0 %v3139_v36 }
0x1372   :  { %3156 = vadd.xlane.f32.xlu0 %v3141_v17 }
0x13eb   :  { %v3143_v35 = vpop.xlane.xlu0 %3142 }
0x13ec   :  { %v3158_v34 = vadd.f32 %v3143_v35, %v8902_v61  ;;  %v3145_v59 = vpop.xlane.xlu1 %3144  ;;  %v8911_v35 = vld [vmem:[#allocation22_spill] sm:$0xff] }
0x13ed   :  { %v3159_v18 = vadd.f32 %v3145_v59, %v8903_v45 }
0x13ee   :  { %3175 = vperm.xlu1 %5702, %v3158_v34  }
0x13ef   :  { %v3147_v63 = vpop.xlane.xlu0 %3146  ;;  %3178 = vperm.xlu0 %5698, %v3159_v18  }
0x13f0   :  { %v3160_v62 = vadd.f32 %v3147_v63, %v8904_v46  ;;  %v3151_v29 = vpop.xlane.xlu1 %3150  ;;  %v8912_v63 = vld [vmem:[#allocation27_spill] sm:$0xff] }
0x13f1   :  { %v3162_v50 = vadd.f32 %v3151_v29, %v8905_v43 }
0x13f2   :  { %3181 = vperm.xlu1 %5702, %v3160_v62  }
0x13f3   :  { %v3149_v52 = vpop.xlane.xlu0 %3148  ;;  %3187 = vperm.xlu0 %5698, %v3162_v50  }
0x13f4   :  { %v3161_v0 = vadd.f32 %v3149_v52, %v8906_v41  ;;  %v3155_v47 = vpop.xlane.xlu1 %3154 }
0x13f5   :  { %v3164_v57 = vadd.f32 %v3155_v47, %v8907_v38 }
0x13f6   :  { %3184 = vperm.xlu1 %5702, %v3161_v0  }
0x13f7   :  { %v3153_v27 = vpop.xlane.xlu0 %3152  ;;  %3193 = vperm.xlu0 %5698, %v3164_v57  }
0x13f8   :  { %v3163_v16 = vadd.f32 %v3153_v27, %v8908_v19 }
0x13fa   :  { %3190 = vperm.xlu1 %5702, %v3163_v16  }
0x13fb   :  { %v3157_v44 = vpop.xlane.xlu0 %3156 }
0x13fc   :  { %v3165_v51 = vadd.f32 %v3157_v44, %v8909_v2  ;;  %v8913_v44 = vld [vmem:[#allocation31_spill] sm:$0xff] }
0x13fe   :  { %3196 = vperm.xlu1 %5702, %v3165_v51  }
0x1469   :  { %v3176_v23 = vpop.permute.xlu1 %3175 }
0x146a   :  { %v3179_v20 = vpop.permute.xlu0 %3178  ;;  %v3201_v14 = vrot.slane %v3176_v23, %v8910_v24 }
0x146b   :  { %v3205_v5 = vrot.slane %v3179_v20, %v8910_v24 }
0x146d   :  { %v3182_v55 = vpop.permute.xlu1 %3181  ;;  %v3230_v26 = vsel %vm698_vm0, %v3205_v5, %v3201_v14 }
0x146e   :  { %v3209_v21 = vrot.slane %v3182_v55, %v8910_v24  ;;  %v3188_v9 = vpop.permute.xlu0 %3187  ;;  %v8914_v55 = vld [vmem:[#allocation28_spill] sm:$0xff] }
0x146f   :  { %v3217_v53 = vrot.slane %v3188_v9, %v8910_v24  ;;  %v8915_v9 = vld [vmem:[#allocation34_spill] sm:$0xff] }
0x1470   :  { %v3231_v31 = vsel %vm700_vm1, %v3209_v21, %v3230_v26 }
0x1471   :  { %v3185_v4 = vpop.permute.xlu1 %3184 }
0x1472   :  { %v3213_v1 = vrot.slane %v3185_v4, %v8910_v24  ;;  %v3194_v54 = vpop.permute.xlu0 %3193 }
0x1473   :  { %v3225_v60 = vrot.slane %v3194_v54, %v8910_v24 }
0x1474   :  { %v3232_v25 = vsel %vm702_vm2, %v3213_v1, %v3231_v31 }
0x1475   :  { %v3191_v48 = vpop.permute.xlu1 %3190  ;;  %v3233_v13 = vsel %vm704_vm3, %v3217_v53, %v3232_v25  ;;  %v8916_v25 = vld [vmem:[#allocation37_spill] sm:$0xff] }
0x1476   :  { %v3221_v42 = vrot.slane %v3191_v48, %v8910_v24 }
0x1478   :  { %v3234_v33 = vsel %vm706_vm4, %v3221_v42, %v3233_v13 }
0x1479   :  { %v3197_v37 = vpop.permute.xlu1 %3196  ;;  %v3235_v32 = vsel %vm708_vm5, %v3225_v60, %v3234_v33 }
0x147a   :  { %v3229_v40 = vrot.slane %v3197_v37, %v8910_v24 }
0x147c   :  { %v3236_v12 = vsel %vm710_vm6, %v3229_v40, %v3235_v32 }
0x147d   :  { %v3238_v36 = vsel %vm713_vm7, %v3236_v12, -inf }
0x147e   :  { %3239 = vmax.xlane.f32.xlu0 %v3238_v36 }
0x1507   :  { %v3240_v56 = vpop.xlane.xlu0 %3239 }
0x1508   :  { %v3245_v17 = vrot.slane %v3240_v56, %v8650_v30  ;;  %v3249_v59 = vrot.slane %v3240_v56, %v8911_v35  ;;  %v3253_v29 = vrot.slane %v3240_v56, %v8912_v63  ;;  %v3257_v23 = vrot.slane %v3240_v56, %v8913_v44 }
0x1509   :  { %v3261_v14 = vrot.slane %v3240_v56, %v8914_v55  ;;  %v3265_v4 = vrot.slane %v3240_v56, %v8915_v9  ;;  %v3269_v53 = vrot.slane %v3240_v56, %v8916_v25 }
0x150a   :  { %v3282_v52 = vsub.f32 %v3158_v34, %v3245_v17  ;;  %v3283_v47 = vsub.f32 %v3159_v18, %v3249_v59  ;;  %v3284_v20 = vsub.f32 %v3160_v62, %v3253_v29  ;;  %v3285_v21 = vsub.f32 %v3161_v0, %v3257_v23  ;;  %v8917_v62 = vld [vmem:[#allocation23_spill] sm:$0xff] }
0x150b   :  { %v3286_v1 = vsub.f32 %v3162_v50, %v3261_v14  ;;  %v3287_v34 = vsub.f32 %v3163_v16, %v3265_v4  ;;  %v3273_v54 = vrot.slane %v3240_v56, %v8917_v62  ;;  %v3288_v42 = vsub.f32 %v3164_v57, %v3269_v53 }
0x150c   :  { %v3290_v27 = vmul.f32 1.442695, %v3282_v52  ;;  %v3292_v5 = vmul.f32 1.442695, %v3283_v47  ;;  %v3294_v26 = vmul.f32 1.442695, %v3284_v20 }
0x150d   :  { %v3296_v31 = vmul.f32 1.442695, %v3285_v21  ;;  %v3298_v18 = vmul.f32 1.442695, %v3286_v1  ;;  %v3300_v0 = vmul.f32 1.442695, %v3287_v34  ;;  %v3289_v33 = vsub.f32 %v3165_v51, %v3273_v54 }
0x150e   :  { %5870 = vpow2.f32 %v3290_v27  ;;  %v3302_v50 = vmul.f32 1.442695, %v3288_v42 }
0x150f   :  { %5872 = vpow2.f32 %v3292_v5  ;;  %v3304_v16 = vmul.f32 1.442695, %v3289_v33 }
0x1510   :  { %5874 = vpow2.f32 %v3294_v26 }
0x1511   :  { %5876 = vpow2.f32 %v3296_v31 }
0x1512   :  { %5878 = vpow2.f32 %v3298_v18 }
0x1513   :  { %5880 = vpow2.f32 %v3300_v0 }
0x1514   :  { %5882 = vpow2.f32 %v3302_v50 }
0x1515   :  { %5884 = vpow2.f32 %v3304_v16 }
0x151b   :  { %v8015_v48 = vpop.eup %5870 }
0x151c   :  { %3315 = vperm.xlu1 %5702, %v8015_v48   ;;  %v5873_v13 = vpop.eup %5872 }
0x151d   :  { %v5875_v60 = vpop.eup %5874 }
0x151e   :  { %v5877_v37 = vpop.eup %5876 }
0x151f   :  { %v5879_v40 = vpop.eup %5878 }
0x1520   :  { %3318 = vperm.xlu1 %5702, %v5873_v13   ;;  %v5881_v32 = vpop.eup %5880 }
0x1521   :  { %v5883_v12 = vpop.eup %5882 }
0x1522   :  { %v5885_v57 = vpop.eup %5884 }
0x1524   :  { %3321 = vperm.xlu1 %5702, %v5875_v60  }
0x1528   :  { %3324 = vperm.xlu1 %5702, %v5877_v37  }
0x152c   :  { %3327 = vperm.xlu1 %5702, %v5879_v40  }
0x1530   :  { %3330 = vperm.xlu1 %5702, %v5881_v32  }
0x1534   :  { %3333 = vperm.xlu1 %5702, %v5883_v12  }
0x1538   :  { %3336 = vperm.xlu1 %5702, %v5885_v57  }
0x1597   :  { %v3316_v36 = vpop.permute.xlu1 %3315 }
0x1598   :  { %v3341_v27 = vrot.slane %v3316_v36, %v8910_v24 }
0x159b   :  { %v3319_v56 = vpop.permute.xlu1 %3318 }
0x159c   :  { %v3345_v52 = vrot.slane %v3319_v56, %v8910_v24 }
0x159e   :  { %v3370_v14 = vsel %vm698_vm0, %v3345_v52, %v3341_v27 }
0x159f   :  { %v3322_v51 = vpop.permute.xlu1 %3321 }
0x15a0   :  { %v3349_v47 = vrot.slane %v3322_v51, %v8910_v24 }
0x15a2   :  { %v3371_v26 = vsel %vm700_vm1, %v3349_v47, %v3370_v14  ;;  %v6413_v14 = vmov 4  }
0x15a3   :  { %v3325_v17 = vpop.permute.xlu1 %3324 }
0x15a4   :  { %v3353_v23 = vrot.slane %v3325_v17, %v8910_v24 }
0x15a6   :  { %v3372_v1 = vsel %vm702_vm2, %v3353_v23, %v3371_v26 }
0x15a7   :  { %v3328_v59 = vpop.permute.xlu1 %3327 }
0x15a8   :  { %v3357_v20 = vrot.slane %v3328_v59, %v8910_v24  ;;  %v3554_v59 = vld [vmem:[#allocation8] sm:$0xff] }
0x15a9   :  { %vm3555_vm14 = vcmp.gt.f32.partialorder %v3554_v59, 0.0  ;;  %v8923_v59 = vld [vmem:[#allocation87_spill] sm:$0xff] }
0x15aa   :  { %v3373_v31 = vsel %vm704_vm3, %v3357_v20, %v3372_v1  ;;  %v8918_v20 = vmov 0  }
0x15ab   :  { %v3331_v29 = vpop.permute.xlu1 %3330 }
0x15ac   :  { %v3361_v21 = vrot.slane %v3331_v29, %v8910_v24 }
0x15ae   :  { %v3374_v34 = vsel %vm706_vm4, %v3361_v21, %v3373_v31 }
0x15af   :  { %v3334_v5 = vpop.permute.xlu1 %3333 }
0x15b0   :  { %v3365_v4 = vrot.slane %v3334_v5, %v8910_v24  ;;  %v8041_v5 = vsel %vm3555_vm14, 1, %v8918_v20 }
0x15b1   :  { %8919 = vst [vmem:[#allocation90_spill] sm:$0xff] %v8041_v5 }
0x15b2   :  { %v3375_v54 = vsel %vm708_vm5, %v3365_v4, %v3374_v34 }
0x15b3   :  { %v3337_v53 = vpop.permute.xlu1 %3336 }
0x15b4   :  { %v3369_v18 = vrot.slane %v3337_v53, %v8910_v24 }
0x15b6   :  { %v3376_v42 = vsel %vm710_vm6, %v3369_v18, %v3375_v54  ;;  %v8920_v18 = vld [vmem:[#allocation84_spill] sm:$0xff] }
0x15b7   :  { %v3378_v0 = vsel %vm713_vm7, %v3376_v42, 0.0  ;;  %v8921_v42 = vld [vmem:[#allocation83_spill] sm:$0xff] }
0x15b8   :  { %3379 = vadd.xlane.f32.xlu0 %v3378_v0 }
0x1641   :  { %v3380_v33 = vpop.xlane.xlu0 %3379 }
0x1642   :  { %5886 = vrcp.f32 %v3380_v33 }
0x164f   :  { %v5887_v50 = vpop.eup %5886 }
0x1650   :  { %v3382_v16 = vmul.f32 %v5887_v50, %v3380_v33 }
0x1652   :  { %v3383_v36 = vsub.f32 2.0, %v3382_v16 }
0x1654   :  { %v3384_v56 = vmul.f32 %v5887_v50, %v3383_v36  ;;  %v8922_v50 = vld [vmem:[#allocation86_spill] sm:$0xff] }
0x1656   :  { %v3397_v51 = vrot.slane %v3384_v56, %v8912_v63  ;;  %v3393_v17 = vrot.slane %v3384_v56, %v8911_v35  ;;  %v3389_v47 = vrot.slane %v3384_v56, %v8650_v30  ;;  %v3401_v23 = vrot.slane %v3384_v56, %v8913_v44 }
0x1657   :  { %v3409_v26 = vrot.slane %v3384_v56, %v8915_v9  ;;  %v3413_v4 = vrot.slane %v3384_v56, %v8916_v25  ;;  %v3417_v31 = vrot.slane %v3384_v56, %v8917_v62 }
0x1658   :  { %v3428_v29 = vmul.f32 %v5875_v60, %v3397_v51  ;;  %v3427_v52 = vmul.f32 %v5873_v13, %v3393_v17  ;;  %v3426_v27 = vmul.f32 %v8015_v48, %v3389_v47  ;;  %v3429_v21 = vmul.f32 %v5877_v37, %v3401_v23 }
0x1659   :  { %v3405_v13 = vrot.slane %v3384_v56, %v8914_v55  ;;  %v3431_v48 = vmul.f32 %v5881_v32, %v3409_v26  ;;  %v3432_v1 = vmul.f32 %v5883_v12, %v3413_v4  ;;  %v3433_v53 = vmul.f32 %v5885_v57, %v3417_v31  ;;  %v3024_v32 = vpop.f32.mrf.mxu1 }
0x165a   :  { %3446 = vperm.xlu0 %5698, %v3428_v29   ;;  %3441 = vperm.xlu1 %5702, %v3427_v52   ;;  %5888 = vtanh.f32 %v3024_v32 }
0x165b   :  { %v3430_v60 = vmul.f32 %v5879_v40, %v3405_v13 }
0x165e   :  { %3436 = vperm.xlu1 %5702, %v3426_v27   ;;  %5703 = vset.pattern.permute.xlu0 %v6413_v14  ;;  %v8924_v14 = vld [vmem:[#allocation88_spill] sm:$0xff] }
0x165f   :  { %3558 = vperm.xlu0 %5703, %v8041_v5  }
0x1662   :  { %3451 = vperm.xlu1 %5702, %v3429_v21  }
0x1663   :  { %5704 = vset.pattern.permute.xlu0 %v8918_v20 }
0x1666   :  { %3456 = vperm.xlu1 %5702, %v3430_v60  }
0x166a   :  { %3461 = vperm.xlu1 %5702, %v3431_v48  }
0x166e   :  { %3466 = vperm.xlu1 %5702, %v3432_v1  }
0x1672   :  { %3471 = vperm.xlu1 %5702, %v3433_v53   ;;  %v8925_v53 = vld [vmem:[#allocation85_spill] sm:$0xff] }
0x16d5   :  { %v3442_v37 = vpop.permute.xlu1 %3441  ;;  %v3447_v34 = vpop.permute.xlu0 %3446 }
0x16d6   :  { %v3475_v54 = vmul.f32 %v8920_v18, %v3442_v37  ;;  %v3476_v0 = vmul.f32 %v8921_v42, %v3447_v34 }
0x16d8   :  { %v3488_v33 = vrot.slane %v3475_v54, 4  ;;  %v3494_v51 = vrot.slane %v3476_v0, 4 }
0x16d9   :  { %v3437_v40 = vpop.permute.xlu1 %3436 }
0x16da   :  { %v3474_v16 = vmul.f32 %v8922_v50, %v3437_v40  ;;  %v3489_v12 = vadd.f32 %v3488_v33, %v3475_v54  ;;  %v3495_v52 = vadd.f32 %v3494_v51, %v3476_v0 }
0x16dc   :  { %v3482_v36 = vrot.slane %v3474_v16, 4  ;;  %v3490_v27 = vrot.slane %v3489_v12, 2  ;;  %v3496_v26 = vrot.slane %v3495_v52, 2 }
0x16dd   :  { %v3452_v17 = vpop.permute.xlu1 %3451 }
0x16de   :  { %v3477_v56 = vmul.f32 %v8923_v59, %v3452_v17  ;;  %v3483_v57 = vadd.f32 %v3482_v36, %v3474_v16  ;;  %v3491_v1 = vadd.f32 %v3490_v27, %v3489_v12  ;;  %v3497_v54 = vadd.f32 %v3496_v26, %v3495_v52  ;;  %v5889_v36 = vpop.eup %5888 }
0x16df   :  { %v3534_v20 = vrot.slane %v5889_v36, 4 }
0x16e0   :  { %v3500_v29 = vrot.slane %v3477_v56, 4  ;;  %v3484_v13 = vrot.slane %v3483_v57, 2  ;;  %v3492_v33 = vrot.slane %v3491_v1, 1 }
0x16e1   :  { %v3457_v47 = vpop.permute.xlu1 %3456 }
0x16e2   :  { %v3501_v23 = vadd.f32 %v3500_v29, %v3477_v56  ;;  %v3478_v21 = vmul.f32 %v8924_v14, %v3457_v47  ;;  %v3485_v34 = vadd.f32 %v3484_v13, %v3483_v57  ;;  %v3498_v56 = vrot.slane %v3497_v54, 1 }
0x16e3   :  { %v3493_v27 = vadd.f32 %v3492_v33, %v3491_v1  ;;  %v3531_v14 = vrot.slane %v5889_v36, 1  ;;  %v3535_v1 = vrot.slane %v5889_v36, 5 }
0x16e4   :  { %v3502_v60 = vrot.slane %v3501_v23, 2  ;;  %v3506_v48 = vrot.slane %v3478_v21, 4  ;;  %v3486_v51 = vrot.slane %v3485_v34, 1 }
0x16e5   :  { %v3462_v4 = vpop.permute.xlu1 %3461 }
0x16e6   :  { %v3507_v31 = vadd.f32 %v3506_v48, %v3478_v21  ;;  %v3479_v37 = vmul.f32 %v8925_v53, %v3462_v4  ;;  %v3503_v18 = vadd.f32 %v3502_v60, %v3501_v23  ;;  %v8926_v23 = vld [vmem:[#allocation89_spill] sm:$0xff]  ;;  %v3487_v13 = vadd.f32 %v3486_v51, %v3485_v34 }
0x16e7   :  { %v3499_v48 = vadd.f32 %v3498_v56, %v3497_v54  ;;  %v3547_v53 = vadd.f32 %v3531_v14, %v3493_v27 }
0x16e8   :  { %v3508_v42 = vrot.slane %v3507_v31, 2  ;;  %v3512_v40 = vrot.slane %v3479_v37, 4  ;;  %v3504_v17 = vrot.slane %v3503_v18, 1  ;;  %v3546_v33 = vadd.f32 %v5889_v36, %v3487_v13 }
0x16e9   :  { %v3467_v0 = vpop.permute.xlu1 %3466  ;;  %v3569_v51 = vrot.slane %v3547_v53, 7 }
0x16ea   :  { %v3480_v50 = vmul.f32 %v7872_v7, %v3467_v0  ;;  %v3509_v16 = vadd.f32 %v3508_v42, %v3507_v31  ;;  %v3513_v32 = vadd.f32 %v3512_v40, %v3479_v37  ;;  %v3505_v60 = vadd.f32 %v3504_v17, %v3503_v18 }
0x16eb   :  { %v3533_v37 = vrot.slane %v5889_v36, 3  ;;  %v3532_v0 = vrot.slane %v5889_v36, 2  ;;  %v3536_v18 = vrot.slane %v5889_v36, 6  ;;  %v3570_v56 = vsel %vm698_vm0, %v3569_v51, %v3546_v33  ;;  %v6150_v33 = vld [vmem:[#allocation11 + $0xd0] sm:$0xff] }
0x16ec   :  { %v3518_v59 = vrot.slane %v3480_v50, 4  ;;  %v3510_v12 = vrot.slane %v3509_v16, 1  ;;  %v3514_v29 = vrot.slane %v3513_v32, 2  ;;  %v6158_v51 = vld [vmem:[#allocation11 + $0x90] sm:$0xff] }
0x16ed   :  { %v3472_v47 = vpop.permute.xlu1 %3471 }
0x16ee   :  { %v3519_v57 = vadd.f32 %v3518_v59, %v3480_v50  ;;  %v3481_v52 = vmul.f32 %v8926_v23, %v3472_v47  ;;  %v3515_v21 = vadd.f32 %v3514_v29, %v3513_v32  ;;  %v3511_v4 = vadd.f32 %v3510_v12, %v3509_v16 }
0x16ef   :  { %v3549_v50 = vadd.f32 %v3533_v37, %v3505_v60  ;;  %v3548_v32 = vadd.f32 %v3532_v0, %v3499_v48  ;;  %v3559_v60 = vpop.permute.xlu0 %3558  ;;  %v3586_v37 = vld [vmem:[#allocation7 + $0x28] sm:$0xff] }
0x16f0   :  { %v3520_v26 = vrot.slane %v3519_v57, 2  ;;  %v3524_v7 = vrot.slane %v3481_v52, 4  ;;  %v3516_v31 = vrot.slane %v3515_v21, 1  ;;  %v3550_v34 = vadd.f32 %v3534_v20, %v3511_v4  ;;  %v6148_v0 = vld [vmem:[#allocation11 + $0xe0] sm:$0xff] }
0x16f1   :  { %v3573_v12 = vrot.slane %v3549_v50, 5  ;;  %vm3560_vm15 = vcmp.eq.s32.totalorder %v3559_v60, 1  ;;  %v6151_v50 = vld [vmem:[#allocation11 + $0xc8] sm:$0xff]  ;;  %v6172_v60 = vld [vmem:[#allocation11 + $0x20] sm:$0xff] }
0x16f2   :  { %v3521_v42 = vadd.f32 %v3520_v26, %v3519_v57  ;;  %v3525_v40 = vadd.f32 %v3524_v7, %v3481_v52  ;;  %v3517_v5 = vadd.f32 %v3516_v31, %v3515_v21  ;;  %v3571_v57 = vrot.slane %v3548_v32, 6  ;;  %v6155_v32 = vld [vmem:[#allocation11 + $0xa8] sm:$0xff] }
0x16f3   :  { %v3575_v23 = vrot.slane %v3550_v34, 4  ;;  %v3537_v21 = vrot.slane %v5889_v36, 7  ;;  %v6156_v34 = vld [vmem:[#allocation11 + $0xa0] sm:$0xff] }
0x16f4   :  { %v3522_v59 = vrot.slane %v3521_v42, 1  ;;  %v3526_v47 = vrot.slane %v3525_v40, 2  ;;  %v3551_v17 = vadd.f32 %v3535_v1, %v3517_v5  ;;  %v3572_v26 = vsel %vm700_vm1, %v3571_v57, %v3570_v56  ;;  %v6149_v1 = vld [vmem:[#allocation11 + $0xd8] sm:$0xff]  ;;  %v6162_v56 = vld [vmem:[#allocation11 + $0x70] sm:$0xff] }
0x16f5   :  { %v3574_v7 = vsel %vm702_vm2, %v3573_v12, %v3572_v26  ;;  %v6163_v12 = vld [vmem:[#allocation11 + $0x68] sm:$0xff]  ;;  %v6166_v57 = vld [vmem:[#allocation11 + $0x50] sm:$0xff]  ;;  %v6173_v26 = vld [vmem:[#allocation11 + $0x18] sm:$0xff] }
0x16f6   :  { %v3523_v54 = vadd.f32 %v3522_v59, %v3521_v42  ;;  %v3527_v16 = vadd.f32 %v3526_v47, %v3525_v40  ;;  %v3577_v52 = vrot.slane %v3551_v17, 3  ;;  %v3576_v5 = vsel %vm704_vm3, %v3575_v23, %v3574_v7  ;;  %v6146_v42 = vld [vmem:[#allocation11 + $0xf0] sm:$0xff]  ;;  %v6147_v40 = vld [vmem:[#allocation11 + $0xe8] sm:$0xff]  ;;  %v6152_v59 = vld [vmem:[#allocation11 + $0xc0] sm:$0xff] }
0x16f7   :  { %v6153_v47 = vld [vmem:[#allocation11 + $0xb8] sm:$0xff]  ;;  %v6159_v17 = vld [vmem:[#allocation11 + $0x88] sm:$0xff] }
0x16f8   :  { %v3552_v29 = vadd.f32 %v3536_v18, %v3523_v54  ;;  %v3528_v27 = vrot.slane %v3527_v16, 1  ;;  %v3578_v48 = vsel %vm706_vm4, %v3577_v52, %v3576_v5  ;;  %v6157_v18 = vld [vmem:[#allocation11 + $0x98] sm:$0xff]  ;;  %v6160_v54 = vld [vmem:[#allocation11 + $0x80] sm:$0xff]  ;;  %v6167_v23 = vld [vmem:[#allocation11 + $0x48] sm:$0xff] }
0x16f9   :  { %v6168_v52 = vld [vmem:[#allocation11 + $0x40] sm:$0xff]  ;;  %v6175_v7 = vld [vmem:[#allocation11 + $0x8] sm:$0xff] }
0x16fa   :  { %v3529_v14 = vadd.f32 %v3528_v27, %v3527_v16  ;;  %v3579_v13 = vrot.slane %v3552_v29, 2  ;;  %v6161_v16 = vld [vmem:[#allocation11 + $0x78] sm:$0xff]  ;;  %v6164_v29 = vld [vmem:[#allocation11 + $0x60] sm:$0xff] }
0x16fb   :  { %v6165_v27 = vld [vmem:[#allocation11 + $0x58] sm:$0xff]  ;;  %v6176_v5 = vld [vmem:[#allocation11] sm:$0xff] }
0x16fc   :  { %v3553_v20 = vadd.f32 %v3537_v21, %v3529_v14  ;;  %v3580_v31 = vsel %vm708_vm5, %v3579_v13, %v3578_v48  ;;  %v6169_v14 = vld [vmem:[#allocation11 + $0x38] sm:$0xff]  ;;  %v6170_v21 = vld [vmem:[#allocation11 + $0x30] sm:$0xff]  ;;  %v6171_v13 = vld [vmem:[#allocation11 + $0x28] sm:$0xff] }
0x16fd   :  { %v6177_v48 = vld [vmem:[#allocation11 + $0x1f8] sm:$0xff] }
0x16fe   :  { %v3581_v4 = vrot.slane %v3553_v20, 1  ;;  %v6174_v20 = vld [vmem:[#allocation11 + $0x10] sm:$0xff] }
0x1700   :  { %v3582_v53 = vsel %vm710_vm6, %v3581_v4, %v3580_v31  ;;  %v6178_v4 = vld [vmem:[#allocation11 + $0x1f0] sm:$0xff]  ;;  %v6179_v31 = vld [vmem:[#allocation11 + $0x1e8] sm:$0xff] }
0x1701   :  { %v8065_v36 = vsel %vm3560_vm15, %v3582_v53, %v7883_v22  ;;  %v6154_v22 = vld [vmem:[#allocation11 + $0xb0] sm:$0xff]  ;;  %v6180_v53 = vld [vmem:[#allocation11 + $0x1e0] sm:$0xff] }
0x1702   :  { %3651 = vmatprep.mubr.f32.mxu0 %v8065_v36 }
0x1703   :  { %3652 = vmatmul.mubr.f32.vlgmr.msra.gmra.mxu0 %v3586_v37  ;;  %v6181_v37 = vld [vmem:[#allocation11 + $0x1d8] sm:$0xff] }
0x1704   :  { %4850 = vmatpush1.msra.mxu0 %v6146_v42  ;;  %v6182_v42 = vld [vmem:[#allocation11 + $0x1d0] sm:$0xff] }
0x1705   :  { %4851 = vmatprep.subr.mxu0 %v6147_v40  ;;  %v6183_v40 = vld [vmem:[#allocation11 + $0x1c8] sm:$0xff] }
0x1706   :  { %4852 = vmatpush1.msra.mxu0 %v6148_v0  ;;  %v6184_v0 = vld [vmem:[#allocation11 + $0x1c0] sm:$0xff] }
0x1707   :  { %4853 = vmatprep.subr.mxu0 %v6149_v1  ;;  %v6185_v1 = vld [vmem:[#allocation11 + $0x1b8] sm:$0xff] }
0x1708   :  { %4854 = vmatpush1.msra.mxu0 %v6150_v33  ;;  %v6186_v33 = vld [vmem:[#allocation11 + $0x1b0] sm:$0xff] }
0x1709   :  { %4855 = vmatprep.subr.mxu0 %v6151_v50  ;;  %v6187_v50 = vld [vmem:[#allocation11 + $0x1a8] sm:$0xff] }
0x170a   :  { %4856 = vmatpush1.msra.mxu0 %v6152_v59  ;;  %v6188_v59 = vld [vmem:[#allocation11 + $0x1a0] sm:$0xff] }
0x170b   :  { %4857 = vmatprep.subr.mxu0 %v6153_v47  ;;  %v6189_v47 = vld [vmem:[#allocation11 + $0x198] sm:$0xff] }
0x170c   :  { %4858 = vmatpush1.msra.mxu0 %v6154_v22  ;;  %v6190_v22 = vld [vmem:[#allocation11 + $0x190] sm:$0xff] }
0x170d   :  { %4859 = vmatprep.subr.mxu0 %v6155_v32  ;;  %v6191_v32 = vld [vmem:[#allocation11 + $0x188] sm:$0xff] }
0x170e   :  { %4860 = vmatpush1.msra.mxu0 %v6156_v34  ;;  %v6192_v34 = vld [vmem:[#allocation11 + $0x180] sm:$0xff] }
0x170f   :  { %4861 = vmatprep.subr.mxu0 %v6157_v18  ;;  %v6193_v18 = vld [vmem:[#allocation11 + $0x178] sm:$0xff] }
0x1710   :  { %4862 = vmatpush1.msra.mxu0 %v6158_v51  ;;  %v6194_v51 = vld [vmem:[#allocation11 + $0x170] sm:$0xff] }
0x1711   :  { %4863 = vmatprep.subr.mxu0 %v6159_v17  ;;  %v6195_v17 = vld [vmem:[#allocation11 + $0x168] sm:$0xff] }
0x1712   :  { %4864 = vmatpush1.msra.mxu0 %v6160_v54  ;;  %v6196_v54 = vld [vmem:[#allocation11 + $0x160] sm:$0xff] }
0x1713   :  { %4865 = vmatprep.subr.mxu0 %v6161_v16  ;;  %v6197_v16 = vld [vmem:[#allocation11 + $0x158] sm:$0xff] }
0x1714   :  { %4866 = vmatpush1.msra.mxu0 %v6162_v56  ;;  %v6198_v56 = vld [vmem:[#allocation11 + $0x150] sm:$0xff] }
0x1715   :  { %4867 = vmatprep.subr.mxu0 %v6163_v12  ;;  %v6199_v12 = vld [vmem:[#allocation11 + $0x148] sm:$0xff] }
0x1716   :  { %4868 = vmatpush1.msra.mxu0 %v6164_v29  ;;  %v6200_v29 = vld [vmem:[#allocation11 + $0x140] sm:$0xff] }
0x1717   :  { %4869 = vmatprep.subr.mxu0 %v6165_v27  ;;  %v6201_v27 = vld [vmem:[#allocation11 + $0x138] sm:$0xff] }
0x1718   :  { %4870 = vmatpush1.msra.mxu0 %v6166_v57  ;;  %v6202_v57 = vld [vmem:[#allocation11 + $0x130] sm:$0xff] }
0x1719   :  { %4871 = vmatprep.subr.mxu0 %v6167_v23  ;;  %v6203_v23 = vld [vmem:[#allocation11 + $0x128] sm:$0xff] }
0x171a   :  { %4872 = vmatpush1.msra.mxu0 %v6168_v52  ;;  %v6204_v52 = vld [vmem:[#allocation11 + $0x120] sm:$0xff] }
0x171b   :  { %4873 = vmatprep.subr.mxu0 %v6169_v14  ;;  %v6205_v14 = vld [vmem:[#allocation11 + $0x118] sm:$0xff] }
0x171c   :  { %4874 = vmatpush1.msra.mxu0 %v6170_v21  ;;  %v6206_v21 = vld [vmem:[#allocation11 + $0x110] sm:$0xff] }
0x171d   :  { %4875 = vmatprep.subr.mxu0 %v6171_v13  ;;  %v6207_v13 = vld [vmem:[#allocation11 + $0x108] sm:$0xff] }
0x171e   :  { %4876 = vmatpush1.msra.mxu0 %v6172_v60  ;;  %v6208_v60 = vld [vmem:[#allocation11 + $0x100] sm:$0xff] }
0x171f   :  { %4877 = vmatprep.subr.mxu0 %v6173_v26 }
0x1720   :  { %4878 = vmatpush1.msra.mxu0 %v6174_v20 }
0x1721   :  { %4879 = vmatprep.subr.mxu0 %v6175_v7 }
0x1722   :  { %4880 = vmatpush1.msra.mxu0 %v6176_v5 }
0x1723   :  { %4881 = vmatprep.subr.mxu0 %v6177_v48 }
0x1724   :  { %4882 = vmatpush2.msra.mxu0 %v6178_v4 }
0x1725   :  { %4883 = vmatprep.subr.mxu0 %v6179_v31 }
0x1726   :  { %4884 = vmatpush2.msra.mxu0 %v6180_v53 }
0x1727   :  { %4885 = vmatprep.subr.mxu0 %v6181_v37 }
0x1728   :  { %4886 = vmatpush2.msra.mxu0 %v6182_v42 }
0x1729   :  { %4887 = vmatprep.subr.mxu0 %v6183_v40 }
0x172a   :  { %4888 = vmatpush2.msra.mxu0 %v6184_v0 }
0x172b   :  { %4889 = vmatprep.subr.mxu0 %v6185_v1 }
0x172c   :  { %4890 = vmatpush2.msra.mxu0 %v6186_v33 }
0x172d   :  { %4891 = vmatprep.subr.mxu0 %v6187_v50 }
0x172e   :  { %4892 = vmatpush2.msra.mxu0 %v6188_v59 }
0x172f   :  { %4893 = vmatprep.subr.mxu0 %v6189_v47 }
0x1730   :  { %4894 = vmatpush2.msra.mxu0 %v6190_v22 }
0x1731   :  { %4895 = vmatprep.subr.mxu0 %v6191_v32 }
0x1732   :  { %4896 = vmatpush2.msra.mxu0 %v6192_v34 }
0x1733   :  { %4897 = vmatprep.subr.mxu0 %v6193_v18 }
0x1734   :  { %4898 = vmatpush2.msra.mxu0 %v6194_v51 }
0x1735   :  { %4899 = vmatprep.subr.mxu0 %v6195_v17 }
0x1736   :  { %4900 = vmatpush2.msra.mxu0 %v6196_v54 }
0x1737   :  { %4901 = vmatprep.subr.mxu0 %v6197_v16 }
0x1738   :  { %4902 = vmatpush2.msra.mxu0 %v6198_v56 }
0x1739   :  { %4903 = vmatprep.subr.mxu0 %v6199_v12 }
0x173a   :  { %4904 = vmatpush2.msra.mxu0 %v6200_v29 }
0x173b   :  { %4905 = vmatprep.subr.mxu0 %v6201_v27 }
0x173c   :  { %4906 = vmatpush2.msra.mxu0 %v6202_v57 }
0x173d   :  { %4907 = vmatprep.subr.mxu0 %v6203_v23 }
0x173e   :  { %4908 = vmatpush2.msra.mxu0 %v6204_v52 }
0x173f   :  { %4909 = vmatprep.subr.mxu0 %v6205_v14 }
0x1740   :  { %4910 = vmatpush2.msra.mxu0 %v6206_v21 }
0x1741   :  { %4911 = vmatprep.subr.mxu0 %v6207_v13 }
0x1742   :  { %4912 = vmatpush2.msra.mxu0 %v6208_v60 }
0x17c3   :  { %v3653_v26 = vpop.f32.mrf.mxu0 }
0x17c4   :  { %v3660_v20 = vcombine.high %v3653_v26, %v3653_v26  ;;  %v3667_v7 = vrot.slane %v3653_v26, %v6884_v10 }
0x17c6   :  { %v3674_v5 = vrot.slane %v3660_v20, %v6884_v10  ;;  %v3675_v48 = vcombine.high %v3667_v7, %v3667_v7  ;;  %v3683_v4 = vrot.slane %v3667_v7, %v6884_v10 }
0x17c8   :  { %v3676_v31 = vcombine.high %v3674_v5, %v3674_v5  ;;  %v3690_v53 = vrot.slane %v3674_v5, %v6884_v10  ;;  %v3697_v37 = vrot.slane %v3675_v48, %v6884_v10  ;;  %v3705_v42 = vcombine.high %v3683_v4, %v3683_v4 }
0x17c9   :  { %v3712_v40 = vrot.slane %v3683_v4, %v8650_v30 }
0x17ca   :  { %v3704_v0 = vrot.slane %v3676_v31, %v6884_v10  ;;  %v3707_v1 = vcombine.high %v3697_v37, %v3697_v37  ;;  %v3716_v33 = vrot.slane %v3697_v37, %v8650_v30  ;;  %v3720_v50 = vrot.slane %v3705_v42, %v8650_v30 }
0x17cb   :  { %v3749_v59 = vadd.f32 %v3712_v40, %v6879_v6  ;;  %v3706_v47 = vcombine.high %v3690_v53, %v3690_v53  ;;  %v3728_v18 = vrot.slane %v3690_v53, %v8650_v30 }
0x17cc   :  { %v3708_v22 = vcombine.high %v3704_v0, %v3704_v0  ;;  %v3724_v32 = vrot.slane %v3707_v1, %v8650_v30  ;;  %v3732_v34 = vrot.slane %v3704_v0, %v8650_v30  ;;  %v3750_v51 = vadd.f32 %v6877_v3, %v3716_v33 }
0x17cd   :  { %v3751_v17 = vadd.f32 %v3720_v50, %v6886_v11  ;;  %5890 = vtanh.f32 %v3749_v59  ;;  %v3736_v12 = vrot.slane %v3706_v47, %v8650_v30  ;;  %v3753_v29 = vadd.f32 %v3728_v18, %v6895_v28 }
0x17ce   :  { %v3752_v54 = vadd.f32 %v6881_v8, %v3724_v32  ;;  %v3740_v16 = vrot.slane %v3708_v22, %v8650_v30  ;;  %v3754_v56 = vadd.f32 %v8900_v49, %v3732_v34  ;;  %5892 = vtanh.f32 %v3750_v51 }
0x17cf   :  { %5894 = vtanh.f32 %v3751_v17  ;;  %v3755_v57 = vadd.f32 %v3736_v12, %v6912_v58 }
0x17d0   :  { %5896 = vtanh.f32 %v3752_v54  ;;  %v3756_v27 = vadd.f32 %v8901_v39, %v3740_v16 }
0x17d1   :  { %5898 = vtanh.f32 %v3754_v56 }
0x17d2   :  { %5900 = vtanh.f32 %v3753_v29 }
0x17d3   :  { %5902 = vtanh.f32 %v3756_v27 }
0x17d4   :  { %5904 = vtanh.f32 %v3755_v57 }
0x17da   :  { %v5891_v23 = vpop.eup %5890 }
0x17db   :  { %v3765_v52 = vmul.f32 %v7974_v15, %v5891_v23  ;;  %v5893_v14 = vpop.eup %5892 }
0x17dc   :  { %v5895_v21 = vpop.eup %5894  ;;  %v3766_v13 = vmul.f32 %v7974_v15, %v5893_v14 }
0x17dd   :  { %3773 = vadd.xlane.f32.xlu1 %v3765_v52  ;;  %v5897_v60 = vpop.eup %5896  ;;  %v3767_v7 = vmul.f32 %v7974_v15, %v5895_v21 }
0x17de   :  { %3775 = vadd.xlane.f32.xlu0 %v3766_v13  ;;  %v3768_v26 = vmul.f32 %v7974_v15, %v5897_v60  ;;  %v5899_v20 = vpop.eup %5898 }
0x17df   :  { %v5901_v5 = vpop.eup %5900  ;;  %v3770_v48 = vmul.f32 %v7974_v15, %v5899_v20 }
0x17e0   :  { %v5903_v4 = vpop.eup %5902  ;;  %v3769_v31 = vmul.f32 %v7974_v15, %v5901_v5 }
0x17e1   :  { %3779 = vadd.xlane.f32.xlu1 %v3768_v26  ;;  %v5905_v53 = vpop.eup %5904  ;;  %v3772_v37 = vmul.f32 %v7974_v15, %v5903_v4 }
0x17e2   :  { %3777 = vadd.xlane.f32.xlu0 %v3767_v7  ;;  %v3771_v42 = vmul.f32 %v7974_v15, %v5905_v53 }
0x17e5   :  { %3783 = vadd.xlane.f32.xlu1 %v3770_v48 }
0x17e6   :  { %3781 = vadd.xlane.f32.xlu0 %v3769_v31 }
0x17e9   :  { %3787 = vadd.xlane.f32.xlu1 %v3772_v37 }
0x17ea   :  { %3785 = vadd.xlane.f32.xlu0 %v3771_v42 }
0x1866   :  { %v3774_v40 = vpop.xlane.xlu1 %3773 }
0x1867   :  { %v3789_v0 = vadd.f32 %v3774_v40, %v8902_v61  ;;  %v3776_v1 = vpop.xlane.xlu0 %3775 }
0x1868   :  { %v3790_v33 = vadd.f32 %v3776_v1, %v8903_v45 }
0x1869   :  { %3806 = vperm.xlu0 %5704, %v3789_v0  }
0x186a   :  { %3809 = vperm.xlu1 %5702, %v3790_v33   ;;  %v3780_v47 = vpop.xlane.xlu1 %3779 }
0x186b   :  { %v3778_v50 = vpop.xlane.xlu0 %3777  ;;  %v3792_v15 = vadd.f32 %v3780_v47, %v8906_v41 }
0x186c   :  { %v3791_v59 = vadd.f32 %v3778_v50, %v8904_v46 }
0x186e   :  { %3812 = vperm.xlu1 %5702, %v3791_v59   ;;  %v3784_v34 = vpop.xlane.xlu1 %3783 }
0x186f   :  { %v3782_v22 = vpop.xlane.xlu0 %3781  ;;  %v3794_v18 = vadd.f32 %v3784_v34, %v8908_v19 }
0x1870   :  { %v3793_v32 = vadd.f32 %v3782_v22, %v8905_v43 }
0x1872   :  { %3818 = vperm.xlu1 %5702, %v3793_v32   ;;  %v3788_v54 = vpop.xlane.xlu1 %3787 }
0x1873   :  { %v3786_v51 = vpop.xlane.xlu0 %3785  ;;  %v3796_v16 = vadd.f32 %v3788_v54, %v8909_v2 }
0x1874   :  { %v3795_v17 = vadd.f32 %v3786_v51, %v8907_v38 }
0x1876   :  { %3815 = vperm.xlu1 %5702, %v3792_v15  }
0x187a   :  { %3821 = vperm.xlu1 %5702, %v3794_v18  }
0x187e   :  { %3824 = vperm.xlu1 %5702, %v3795_v17  }
0x1882   :  { %3827 = vperm.xlu1 %5702, %v3796_v16  }
0x18e4   :  { %v3807_v57 = vpop.permute.xlu0 %3806 }
0x18e5   :  { %v3810_v56 = vpop.permute.xlu1 %3809  ;;  %v3832_v21 = vrot.slane %v3807_v57, %v8910_v24 }
0x18e6   :  { %v3836_v23 = vrot.slane %v3810_v56, %v8910_v24 }
0x18e8   :  { %v3861_v60 = vsel %vm698_vm0, %v3836_v23, %v3832_v21 }
0x18e9   :  { %v3813_v12 = vpop.permute.xlu1 %3812 }
0x18ea   :  { %v3840_v52 = vrot.slane %v3813_v12, %v8910_v24 }
0x18ec   :  { %v3862_v26 = vsel %vm700_vm1, %v3840_v52, %v3861_v60 }
0x18ed   :  { %v3819_v29 = vpop.permute.xlu1 %3818 }
0x18ee   :  { %v3848_v48 = vrot.slane %v3819_v29, %v8910_v24 }
0x18f1   :  { %v3816_v27 = vpop.permute.xlu1 %3815 }
0x18f2   :  { %v3844_v13 = vrot.slane %v3816_v27, %v8910_v24 }
0x18f4   :  { %v3863_v7 = vsel %vm702_vm2, %v3844_v13, %v3862_v26 }
0x18f5   :  { %v3822_v14 = vpop.permute.xlu1 %3821  ;;  %v3864_v31 = vsel %vm704_vm3, %v3848_v48, %v3863_v7 }
0x18f6   :  { %v3852_v5 = vrot.slane %v3822_v14, %v8910_v24 }
0x18f8   :  { %v3865_v37 = vsel %vm706_vm4, %v3852_v5, %v3864_v31 }
0x18f9   :  { %v3825_v20 = vpop.permute.xlu1 %3824 }
0x18fa   :  { %v3856_v4 = vrot.slane %v3825_v20, %v8910_v24 }
0x18fc   :  { %v3866_v40 = vsel %vm708_vm5, %v3856_v4, %v3865_v37 }
0x18fd   :  { %v3828_v53 = vpop.permute.xlu1 %3827 }
0x18fe   :  { %v3860_v42 = vrot.slane %v3828_v53, %v8910_v24 }
0x1900   :  { %v3867_v1 = vsel %vm710_vm6, %v3860_v42, %v3866_v40 }
0x1901   :  { %v3869_v50 = vsel %vm713_vm7, %v3867_v1, -inf }
0x1902   :  { %3870 = vmax.xlane.f32.xlu1 %v3869_v50 }
0x198b   :  { %v3871_v47 = vpop.xlane.xlu1 %3870 }
0x198c   :  { %v3876_v22 = vrot.slane %v3871_v47, %v8650_v30  ;;  %v3880_v34 = vrot.slane %v3871_v47, %v8911_v35  ;;  %v3884_v51 = vrot.slane %v3871_v47, %v8912_v63  ;;  %v3888_v29 = vrot.slane %v3871_v47, %v8913_v44 }
0x198d   :  { %v3892_v23 = vrot.slane %v3871_v47, %v8914_v55  ;;  %v3896_v21 = vrot.slane %v3871_v47, %v8915_v9  ;;  %v3900_v26 = vrot.slane %v3871_v47, %v8916_v25 }
0x198e   :  { %v3913_v54 = vsub.f32 %v3789_v0, %v3876_v22  ;;  %v3914_v56 = vsub.f32 %v3790_v33, %v3880_v34  ;;  %v3915_v27 = vsub.f32 %v3791_v59, %v3884_v51  ;;  %v3916_v52 = vsub.f32 %v3792_v15, %v3888_v29 }
0x198f   :  { %v3917_v13 = vsub.f32 %v3793_v32, %v3892_v23  ;;  %v3918_v0 = vsub.f32 %v3794_v18, %v3896_v21  ;;  %v3904_v59 = vrot.slane %v3871_v47, %v8917_v62  ;;  %v3919_v7 = vsub.f32 %v3795_v17, %v3900_v26 }
0x1990   :  { %v3921_v12 = vmul.f32 1.442695, %v3913_v54  ;;  %v3923_v57 = vmul.f32 1.442695, %v3914_v56  ;;  %v3925_v14 = vmul.f32 1.442695, %v3915_v27 }
0x1991   :  { %v3927_v60 = vmul.f32 1.442695, %v3916_v52  ;;  %v3929_v33 = vmul.f32 1.442695, %v3917_v13  ;;  %v3931_v15 = vmul.f32 1.442695, %v3918_v0  ;;  %v3920_v48 = vsub.f32 %v3796_v16, %v3904_v59 }
0x1992   :  { %5906 = vpow2.f32 %v3921_v12  ;;  %v3933_v32 = vmul.f32 1.442695, %v3919_v7 }
0x1993   :  { %5908 = vpow2.f32 %v3923_v57  ;;  %v3935_v18 = vmul.f32 1.442695, %v3920_v48 }
0x1994   :  { %5910 = vpow2.f32 %v3925_v14 }
0x1995   :  { %5912 = vpow2.f32 %v3927_v60 }
0x1996   :  { %5914 = vpow2.f32 %v3929_v33 }
0x1997   :  { %5916 = vpow2.f32 %v3931_v15 }
0x1998   :  { %5918 = vpow2.f32 %v3933_v32 }
0x1999   :  { %5920 = vpow2.f32 %v3935_v18 }
0x199f   :  { %v8129_v20 = vpop.eup %5906 }
0x19a0   :  { %3946 = vperm.xlu0 %5704, %v8129_v20   ;;  %v5909_v5 = vpop.eup %5908 }
0x19a1   :  { %v5911_v4 = vpop.eup %5910 }
0x19a2   :  { %v5913_v31 = vpop.eup %5912 }
0x19a3   :  { %v5915_v53 = vpop.eup %5914 }
0x19a4   :  { %3949 = vperm.xlu0 %5704, %v5909_v5   ;;  %v5917_v37 = vpop.eup %5916 }
0x19a5   :  { %v5919_v42 = vpop.eup %5918 }
0x19a6   :  { %v5921_v17 = vpop.eup %5920 }
0x19a8   :  { %3952 = vperm.xlu0 %5704, %v5911_v4  }
0x19ac   :  { %3955 = vperm.xlu0 %5704, %v5913_v31  }
0x19b0   :  { %3958 = vperm.xlu0 %5704, %v5915_v53  }
0x19b4   :  { %3961 = vperm.xlu0 %5704, %v5917_v37  }
0x19b8   :  { %3964 = vperm.xlu0 %5704, %v5919_v42  }
0x19bc   :  { %3967 = vperm.xlu0 %5704, %v5921_v17  }
0x1a1b   :  { %v3947_v40 = vpop.permute.xlu0 %3946 }
0x1a1c   :  { %v3972_v54 = vrot.slane %v3947_v40, %v8910_v24 }
0x1a1f   :  { %v3950_v1 = vpop.permute.xlu0 %3949 }
0x1a20   :  { %v3976_v34 = vrot.slane %v3950_v1, %v8910_v24 }
0x1a22   :  { %v4001_v27 = vsel %vm698_vm0, %v3976_v34, %v3972_v54 }
0x1a23   :  { %v3953_v16 = vpop.permute.xlu0 %3952 }
0x1a24   :  { %v3980_v51 = vrot.slane %v3953_v16, %v8910_v24 }
0x1a26   :  { %v4002_v23 = vsel %vm700_vm1, %v3980_v51, %v4001_v27 }
0x1a27   :  { %v3956_v50 = vpop.permute.xlu0 %3955 }
0x1a28   :  { %v3984_v56 = vrot.slane %v3956_v50, %v8910_v24 }
0x1a2a   :  { %v4003_v14 = vsel %vm702_vm2, %v3984_v56, %v4002_v23  ;;  %v8928_v23 = vmov 0  }
0x1a2b   :  { %v3959_v47 = vpop.permute.xlu0 %3958 }
0x1a2c   :  { %v3988_v12 = vrot.slane %v3959_v47, %v8910_v24 }
0x1a2e   :  { %v4004_v21 = vsel %vm704_vm3, %v3988_v12, %v4003_v14 }
0x1a2f   :  { %v3962_v22 = vpop.permute.xlu0 %3961 }
0x1a30   :  { %v3992_v57 = vrot.slane %v3962_v22, %v8910_v24 }
0x1a32   :  { %v4005_v60 = vsel %vm706_vm4, %v3992_v57, %v4004_v21  ;;  %v6414_v57 = vmov 5  }
0x1a33   :  { %v3965_v29 = vpop.permute.xlu0 %3964 }
0x1a34   :  { %v3996_v52 = vrot.slane %v3965_v29, %v8910_v24 }
0x1a36   :  { %v4006_v0 = vsel %vm708_vm5, %v3996_v52, %v4005_v60  ;;  %v8160_v52 = vld [vmem:[#allocation2 + $0x8] sm:$0xff] }
0x1a37   :  { %v3968_v13 = vpop.permute.xlu0 %3967 }
0x1a38   :  { %v4000_v26 = vrot.slane %v3968_v13, %v8910_v24 }
0x1a3a   :  { %v4007_v33 = vsel %vm710_vm6, %v4000_v26, %v4006_v0  ;;  %v8166_v26 = vld [vmem:[#allocation2 + $0x28] sm:$0xff] }
0x1a3b   :  { %v4009_v59 = vsel %vm713_vm7, %v4007_v33, 0.0  ;;  %8929 = vst [vmem:[#allocation25_spill] sm:$0xff] %v8166_v26 }
0x1a3c   :  { %4010 = vadd.xlane.f32.xlu0 %v4009_v59 }
0x1ac5   :  { %v4011_v7 = vpop.xlane.xlu0 %4010 }
0x1ac6   :  { %5922 = vrcp.f32 %v4011_v7 }
0x1ad3   :  { %v5923_v15 = vpop.eup %5922 }
0x1ad4   :  { %v4013_v48 = vmul.f32 %v5923_v15, %v4011_v7 }
0x1ad6   :  { %v4014_v32 = vsub.f32 2.0, %v4013_v48 }
0x1ad8   :  { %v4015_v18 = vmul.f32 %v5923_v15, %v4014_v32  ;;  %v8169_v15 = vld [vmem:[#allocation2] sm:$0xff] }
0x1ad9   :  { %8930 = vst [vmem:[#allocation30_spill] sm:$0xff] %v8169_v15 }
0x1ada   :  { %v4040_v40 = vrot.slane %v4015_v18, %v8915_v9  ;;  %v4024_v1 = vrot.slane %v4015_v18, %v8911_v35  ;;  %v4028_v47 = vrot.slane %v4015_v18, %v8912_v63  ;;  %v4020_v34 = vrot.slane %v4015_v18, %v8650_v30 }
0x1adb   :  { %v4032_v54 = vrot.slane %v4015_v18, %v8913_v44  ;;  %v4036_v12 = vrot.slane %v4015_v18, %v8914_v55  ;;  %v4048_v27 = vrot.slane %v4015_v18, %v8917_v62 }
0x1adc   :  { %v4062_v16 = vmul.f32 %v5917_v37, %v4040_v40  ;;  %v4058_v50 = vmul.f32 %v5909_v5, %v4024_v1  ;;  %v4059_v22 = vmul.f32 %v5911_v4, %v4028_v47  ;;  %v4057_v51 = vmul.f32 %v8129_v20, %v4020_v34  ;;  %v8927_v20 = vld [vmem:[#allocation90_spill] sm:$0xff] }
0x1add   :  { %v4060_v56 = vmul.f32 %v5913_v31, %v4032_v54  ;;  %v4061_v29 = vmul.f32 %v5915_v53, %v4036_v12  ;;  %v4044_v5 = vrot.slane %v4015_v18, %v8916_v25  ;;  %v4064_v4 = vmul.f32 %v5921_v17, %v4048_v27  ;;  %v3655_v17 = vpop.f32.mrf.mxu0 }
0x1ade   :  { %4092 = vperm.xlu0 %5704, %v4062_v16   ;;  %4072 = vperm.xlu1 %5702, %v4058_v50   ;;  %5924 = vtanh.f32 %v3655_v17 }
0x1adf   :  { %v4063_v37 = vmul.f32 %v5919_v42, %v4044_v5  ;;  %v8163_v42 = vld [vmem:[#allocation2 + $0x10] sm:$0xff] }
0x1ae2   :  { %4077 = vperm.xlu1 %5702, %v4059_v22   ;;  %v8172_v22 = vld [vmem:[#allocation2 + $0x18] sm:$0xff] }
0x1ae3   :  { %8931 = vst [vmem:[#allocation26_spill] sm:$0xff] %v8172_v22 }
0x1ae6   :  { %4067 = vperm.xlu1 %5702, %v4057_v51  }
0x1aea   :  { %4082 = vperm.xlu1 %5702, %v4060_v56  }
0x1aee   :  { %4087 = vperm.xlu1 %5702, %v4061_v29  }
0x1af2   :  { %4097 = vperm.xlu1 %5702, %v4063_v37  }
0x1af6   :  { %4102 = vperm.xlu1 %5702, %v4064_v4   ;;  %v8175_v4 = vld [vmem:[#allocation2 + $0x20] sm:$0xff] }
0x1af7   :  { %8932 = vst [vmem:[#allocation24_spill] sm:$0xff] %v8175_v4 }
0x1afa   :  { %5705 = vset.pattern.permute.xlu1 %v6414_v57 }
0x1afb   :  { %4189 = vperm.xlu1 %5705, %v8927_v20  }
0x1aff   :  { %5706 = vset.pattern.permute.xlu1 %v8928_v23 }
0x1b59   :  { %v4073_v31 = vpop.permute.xlu1 %4072  ;;  %v4093_v21 = vpop.permute.xlu0 %4092 }
0x1b5a   :  { %v4106_v53 = vmul.f32 %v8160_v52, %v4073_v31  ;;  %v4110_v0 = vmul.f32 %v8166_v26, %v4093_v21 }
0x1b5c   :  { %v4119_v14 = vrot.slane %v4106_v53, 4  ;;  %v4143_v18 = vrot.slane %v4110_v0, 4 }
0x1b5d   :  { %v4078_v13 = vpop.permute.xlu1 %4077 }
0x1b5e   :  { %v4107_v60 = vmul.f32 %v8163_v42, %v4078_v13  ;;  %v4120_v33 = vadd.f32 %v4119_v14, %v4106_v53  ;;  %v4144_v51 = vadd.f32 %v4143_v18, %v4110_v0  ;;  %v5925_v0 = vpop.eup %5924 }
0x1b60   :  { %v4125_v59 = vrot.slane %v4107_v60, 4  ;;  %v4121_v40 = vrot.slane %v4120_v33, 2  ;;  %v4145_v20 = vrot.slane %v4144_v51, 2 }
0x1b61   :  { %v4068_v7 = vpop.permute.xlu1 %4067 }
0x1b62   :  { %v4105_v48 = vmul.f32 %v8169_v15, %v4068_v7  ;;  %v4126_v32 = vadd.f32 %v4125_v59, %v4107_v60  ;;  %v4122_v54 = vadd.f32 %v4121_v40, %v4120_v33  ;;  %v8178_v60 = vld [vmem:[#allocation2 + $0x30] sm:$0xff] }
0x1b63   :  { %8933 = vst [vmem:[#allocation29_spill] sm:$0xff] %v8178_v60 }
0x1b64   :  { %v4113_v1 = vrot.slane %v4105_v48, 4  ;;  %v4127_v47 = vrot.slane %v4126_v32, 2  ;;  %v4123_v31 = vrot.slane %v4122_v54, 1 }
0x1b65   :  { %v4083_v16 = vpop.permute.xlu1 %4082 }
0x1b66   :  { %v4114_v50 = vadd.f32 %v4113_v1, %v4105_v48  ;;  %v4108_v34 = vmul.f32 %v8172_v22, %v4083_v16  ;;  %v4128_v37 = vadd.f32 %v4127_v47, %v4126_v32  ;;  %v4146_v48 = vadd.f32 %v4145_v20, %v4144_v51 }
0x1b67   :  { %v4124_v32 = vadd.f32 %v4123_v31, %v4122_v54  ;;  %v4163_v54 = vrot.slane %v5925_v0, 2 }
0x1b68   :  { %v4115_v56 = vrot.slane %v4114_v50, 2  ;;  %v4131_v12 = vrot.slane %v4108_v34, 4  ;;  %v4129_v33 = vrot.slane %v4128_v37, 1 }
0x1b69   :  { %v4088_v29 = vpop.permute.xlu1 %4087 }
0x1b6a   :  { %v4116_v5 = vadd.f32 %v4115_v56, %v4114_v50  ;;  %v4132_v27 = vadd.f32 %v4131_v12, %v4108_v34  ;;  %v4109_v57 = vmul.f32 %v8175_v4, %v4088_v29  ;;  %v4162_v50 = vrot.slane %v5925_v0, 1  ;;  %v8181_v56 = vld [vmem:[#allocation2 + $0x38] sm:$0xff] }
0x1b6b   :  { %8934 = vst [vmem:[#allocation32_spill] sm:$0xff] %v8181_v56  ;;  %v4130_v29 = vadd.f32 %v4129_v33, %v4128_v37  ;;  %v4147_v4 = vrot.slane %v4146_v48, 1  ;;  %v4166_v33 = vrot.slane %v5925_v0, 5 }
0x1b6c   :  { %v4133_v53 = vrot.slane %v4132_v27, 2  ;;  %v4137_v14 = vrot.slane %v4109_v57, 4  ;;  %v4117_v13 = vrot.slane %v4116_v5, 1 }
0x1b6d   :  { %v4098_v21 = vpop.permute.xlu1 %4097 }
0x1b6e   :  { %v4111_v17 = vmul.f32 %v8178_v60, %v4098_v21  ;;  %v4134_v59 = vadd.f32 %v4133_v53, %v4132_v27  ;;  %v4138_v7 = vadd.f32 %v4137_v14, %v4109_v57  ;;  %v4118_v47 = vadd.f32 %v4117_v13, %v4116_v5 }
0x1b6f   :  { %v4164_v21 = vrot.slane %v5925_v0, 3  ;;  %v4178_v27 = vadd.f32 %v4162_v50, %v4124_v32  ;;  %v4179_v5 = vadd.f32 %v4163_v54, %v4130_v29 }
0x1b70   :  { %v4149_v18 = vrot.slane %v4111_v17, 4  ;;  %v4135_v40 = vrot.slane %v4134_v59, 1  ;;  %v4139_v1 = vrot.slane %v4138_v7, 2  ;;  %v4177_v31 = vadd.f32 %v5925_v0, %v4118_v47 }
0x1b71   :  { %v4103_v16 = vpop.permute.xlu1 %4102  ;;  %v4200_v15 = vrot.slane %v4178_v27, 7 }
0x1b72   :  { %v4150_v34 = vadd.f32 %v4149_v18, %v4111_v17  ;;  %v4112_v12 = vmul.f32 %v8181_v56, %v4103_v16  ;;  %v4136_v26 = vadd.f32 %v4135_v40, %v4134_v59  ;;  %v4140_v60 = vadd.f32 %v4139_v1, %v4138_v7 }
0x1b73   :  { %v4165_v17 = vrot.slane %v5925_v0, 4  ;;  %v4148_v18 = vadd.f32 %v4147_v4, %v4146_v48  ;;  %v4167_v7 = vrot.slane %v5925_v0, 6  ;;  %v4201_v32 = vsel %vm698_vm0, %v4200_v15, %v4177_v31 }
0x1b74   :  { %v4151_v57 = vrot.slane %v4150_v34, 2  ;;  %v4155_v51 = vrot.slane %v4112_v12, 4  ;;  %v4141_v20 = vrot.slane %v4140_v60, 1  ;;  %v4180_v53 = vadd.f32 %v4164_v21, %v4136_v26 }
0x1b75   :  { %v4202_v56 = vrot.slane %v4179_v5, 6  ;;  %v4182_v26 = vadd.f32 %v4166_v33, %v4148_v18  ;;  %v4168_v4 = vrot.slane %v5925_v0, 7 }
0x1b76   :  { %v4152_v14 = vadd.f32 %v4151_v57, %v4150_v34  ;;  %v4156_v22 = vadd.f32 %v4155_v51, %v4112_v12  ;;  %v4142_v13 = vadd.f32 %v4141_v20, %v4140_v60  ;;  %v4204_v40 = vrot.slane %v4180_v53, 5  ;;  %v4190_v27 = vpop.permute.xlu1 %4189  ;;  %v4217_v53 = vld [vmem:[#allocation7 + $0x30] sm:$0xff] }
0x1b77   :  { %v4203_v60 = vsel %vm700_vm1, %v4202_v56, %v4201_v32  ;;  %v4208_v51 = vrot.slane %v4182_v26, 3  ;;  %vm4191_vm8 = vcmp.eq.s32.totalorder %v4190_v27, 1 }
0x1b78   :  { %v4153_v16 = vrot.slane %v4152_v14, 1  ;;  %v4157_v37 = vrot.slane %v4156_v22, 2  ;;  %v4181_v59 = vadd.f32 %v4165_v17, %v4142_v13  ;;  %v4205_v48 = vsel %vm702_vm2, %v4204_v40, %v4203_v60 }
0x1b7a   :  { %v4154_v1 = vadd.f32 %v4153_v16, %v4152_v14  ;;  %v4158_v50 = vadd.f32 %v4157_v37, %v4156_v22  ;;  %v4206_v47 = vrot.slane %v4181_v59, 4 }
0x1b7c   :  { %v4183_v34 = vadd.f32 %v4167_v7, %v4154_v1  ;;  %v4159_v12 = vrot.slane %v4158_v50, 1  ;;  %v4207_v57 = vsel %vm704_vm3, %v4206_v47, %v4205_v48 }
0x1b7d   :  { %v4209_v22 = vsel %vm706_vm4, %v4208_v51, %v4207_v57 }
0x1b7e   :  { %v4160_v29 = vadd.f32 %v4159_v12, %v4158_v50  ;;  %v4210_v21 = vrot.slane %v4183_v34, 2 }
0x1b80   :  { %v4184_v15 = vadd.f32 %v4168_v4, %v4160_v29  ;;  %v4211_v20 = vsel %vm708_vm5, %v4210_v21, %v4209_v22 }
0x1b82   :  { %v4212_v54 = vrot.slane %v4184_v15, 1 }
0x1b84   :  { %v4213_v31 = vsel %vm710_vm6, %v4212_v54, %v4211_v20  ;;  %v8220_v20 = vld [vmem:[%s8435_s7] ss:$0 sm:$0xff]  ;;  %s6417_s7 = smov [#allocation14]  }
0x1b85   :  { %v8192_v56 = vsel %vm4191_vm8, %v4213_v31, %v8065_v36  ;;  %s5556_s22 = sshll.u32 %s6417_s7, 4  ;;  %s5557_s22 = int_to_ptr.vmem [resolvable:$true] %s5556_s22 }
0x1b86   :  { %4282 = vmatprep.mubr.f32.mxu1 %v8192_v56  ;;  %s6366_s3 = scalar_lea.vmem %s5557_s22, 128  ;;  %p6371_p8 = scmp.lt.s32.totalorder %s5557_s22, %s5557_s22 }
0x1b87   :  { %4283 = vmatmul.mubr.f32.vlgmr.msra.gmra.mxu1 %v4217_v53  ;;  %p6367_p7 = scmp.ne.s32.totalorder %s5557_s22, %s6366_s3  ;;  %p6372_p9 = scmp.lt.s32.totalorder %s6366_s3, %s6366_s3 }
0x1b89   :  { %p6373_p10 = por %p6372_p9, %p6371_p8 }
0x1b8b   :  { %p6374_p11 = pnand %p6373_p10, %p6367_p7 }
0x1c47   :  { %v4284_v0 = vpop.f32.mrf.mxu1 }
0x1c48   :  { %v4291_v14 = vcombine.high %v4284_v0, %v4284_v0  ;;  %v4298_v5 = vrot.slane %v4284_v0, %v6884_v10 }
0x1c4a   :  { %v4305_v13 = vrot.slane %v4291_v14, %v6884_v10  ;;  %v4306_v17 = vcombine.high %v4298_v5, %v4298_v5  ;;  %v4314_v18 = vrot.slane %v4298_v5, %v6884_v10 }
0x1c4c   :  { %v4307_v16 = vcombine.high %v4305_v13, %v4305_v13  ;;  %v4321_v37 = vrot.slane %v4305_v13, %v6884_v10  ;;  %v4328_v33 = vrot.slane %v4306_v17, %v6884_v10  ;;  %v4336_v59 = vcombine.high %v4314_v18, %v4314_v18 }
0x1c4d   :  { %v4343_v36 = vrot.slane %v4314_v18, %v8650_v30 }
0x1c4e   :  { %v4335_v7 = vrot.slane %v4307_v16, %v6884_v10  ;;  %v4338_v32 = vcombine.high %v4328_v33, %v4328_v33  ;;  %v4347_v40 = vrot.slane %v4328_v33, %v8650_v30  ;;  %v4337_v1 = vcombine.high %v4321_v37, %v4321_v37 }
0x1c4f   :  { %v4351_v50 = vrot.slane %v4336_v59, %v8650_v30  ;;  %v4359_v47 = vrot.slane %v4321_v37, %v8650_v30  ;;  %v4380_v26 = vadd.f32 %v4343_v36, %v6879_v6 }
0x1c50   :  { %v4339_v34 = vcombine.high %v4335_v7, %v4335_v7  ;;  %v4355_v12 = vrot.slane %v4338_v32, %v8650_v30  ;;  %v4363_v60 = vrot.slane %v4335_v7, %v8650_v30  ;;  %v4381_v29 = vadd.f32 %v6877_v3, %v4347_v40 }
0x1c51   :  { %v4382_v4 = vadd.f32 %v4351_v50, %v6886_v11  ;;  %5926 = vtanh.f32 %v4380_v26  ;;  %v4367_v21 = vrot.slane %v4337_v1, %v8650_v30  ;;  %v4384_v27 = vadd.f32 %v4359_v47, %v6895_v28 }
0x1c52   :  { %v4383_v48 = vadd.f32 %v6881_v8, %v4355_v12  ;;  %5928 = vtanh.f32 %v4381_v29  ;;  %v4371_v57 = vrot.slane %v4339_v34, %v8650_v30  ;;  %v4385_v51 = vadd.f32 %v8900_v49, %v4363_v60 }
0x1c53   :  { %5930 = vtanh.f32 %v4382_v4  ;;  %v4386_v15 = vadd.f32 %v4367_v21, %v6912_v58 }
0x1c54   :  { %5932 = vtanh.f32 %v4383_v48  ;;  %v4387_v22 = vadd.f32 %v8901_v39, %v4371_v57 }
0x1c55   :  { %5934 = vtanh.f32 %v4384_v27 }
0x1c56   :  { %5936 = vtanh.f32 %v4385_v51 }
0x1c57   :  { %5938 = vtanh.f32 %v4386_v15 }
0x1c58   :  { %5940 = vtanh.f32 %v4387_v22 }
0x1c5e   :  { %v5927_v54 = vpop.eup %5926 }
0x1c5f   :  { %v4396_v31 = vmul.f32 %v8220_v20, %v5927_v54  ;;  %v5929_v53 = vpop.eup %5928 }
0x1c60   :  { %v5931_v0 = vpop.eup %5930  ;;  %v4397_v14 = vmul.f32 %v8220_v20, %v5929_v53 }
0x1c61   :  { %4404 = vadd.xlane.f32.xlu1 %v4396_v31  ;;  %v5933_v5 = vpop.eup %5932  ;;  %v4398_v13 = vmul.f32 %v8220_v20, %v5931_v0 }
0x1c62   :  { %4406 = vadd.xlane.f32.xlu0 %v4397_v14  ;;  %v5935_v17 = vpop.eup %5934  ;;  %v4399_v18 = vmul.f32 %v8220_v20, %v5933_v5 }
0x1c63   :  { %v5937_v16 = vpop.eup %5936  ;;  %v4400_v37 = vmul.f32 %v8220_v20, %v5935_v17 }
0x1c64   :  { %v5939_v33 = vpop.eup %5938  ;;  %v4401_v59 = vmul.f32 %v8220_v20, %v5937_v16 }
0x1c65   :  { %4408 = vadd.xlane.f32.xlu1 %v4398_v13  ;;  %v5941_v36 = vpop.eup %5940  ;;  %v4402_v7 = vmul.f32 %v8220_v20, %v5939_v33 }
0x1c66   :  { %4410 = vadd.xlane.f32.xlu0 %v4399_v18  ;;  %v4403_v32 = vmul.f32 %v8220_v20, %v5941_v36 }
0x1c69   :  { %4412 = vadd.xlane.f32.xlu1 %v4400_v37 }
0x1c6a   :  { %4414 = vadd.xlane.f32.xlu0 %v4401_v59 }
0x1c6d   :  { %4416 = vadd.xlane.f32.xlu1 %v4402_v7 }
0x1c6e   :  { %4418 = vadd.xlane.f32.xlu0 %v4403_v32 }
0x1cea   :  { %v4405_v40 = vpop.xlane.xlu1 %4404 }
0x1ceb   :  { %v4420_v1 = vadd.f32 %v4405_v40, %v8902_v61  ;;  %v4407_v50 = vpop.xlane.xlu0 %4406 }
0x1cec   :  { %v4421_v47 = vadd.f32 %v4407_v50, %v8903_v45 }
0x1ced   :  { %4437 = vperm.xlu1 %5706, %v4420_v1  }
0x1cee   :  { %v4409_v26 = vpop.xlane.xlu1 %4408  ;;  %4440 = vperm.xlu0 %5704, %v4421_v47  }
0x1cef   :  { %v4422_v34 = vadd.f32 %v4409_v26, %v8904_v46  ;;  %v4411_v12 = vpop.xlane.xlu0 %4410 }
0x1cf0   :  { %v4423_v29 = vadd.f32 %v4411_v12, %v8906_v41 }
0x1cf1   :  { %4443 = vperm.xlu1 %5706, %v4422_v34  }
0x1cf2   :  { %v4413_v60 = vpop.xlane.xlu1 %4412 }
0x1cf3   :  { %v4424_v4 = vadd.f32 %v4413_v60, %v8905_v43  ;;  %v4415_v48 = vpop.xlane.xlu0 %4414 }
0x1cf4   :  { %v4425_v27 = vadd.f32 %v4415_v48, %v8908_v19 }
0x1cf5   :  { %4446 = vperm.xlu1 %5706, %v4423_v29   ;;  %4449 = vperm.xlu0 %5704, %v4424_v4  }
0x1cf6   :  { %v4417_v21 = vpop.xlane.xlu1 %4416 }
0x1cf7   :  { %v4426_v57 = vadd.f32 %v4417_v21, %v8907_v38  ;;  %v4419_v51 = vpop.xlane.xlu0 %4418 }
0x1cf8   :  { %v4427_v15 = vadd.f32 %v4419_v51, %v8909_v2 }
0x1cf9   :  { %4452 = vperm.xlu1 %5706, %v4425_v27   ;;  %4455 = vperm.xlu0 %5704, %v4426_v57  }
0x1cfd   :  { %4458 = vperm.xlu1 %5706, %v4427_v15  }
0x1d68   :  { %v4438_v22 = vpop.permute.xlu1 %4437 }
0x1d69   :  { %v4441_v54 = vpop.permute.xlu0 %4440  ;;  %v4463_v0 = vrot.slane %v4438_v22, %v8910_v24 }
0x1d6a   :  { %v4467_v31 = vrot.slane %v4441_v54, %v8910_v24 }
0x1d6c   :  { %v4444_v53 = vpop.permute.xlu1 %4443  ;;  %v4492_v5 = vsel %vm698_vm0, %v4467_v31, %v4463_v0 }
0x1d6d   :  { %v4471_v14 = vrot.slane %v4444_v53, %v8910_v24 }
0x1d6f   :  { %v4493_v16 = vsel %vm700_vm1, %v4471_v14, %v4492_v5 }
0x1d70   :  { %v4447_v13 = vpop.permute.xlu1 %4446  ;;  %v4450_v17 = vpop.permute.xlu0 %4449 }
0x1d71   :  { %v4475_v18 = vrot.slane %v4447_v13, %v8910_v24  ;;  %v4479_v37 = vrot.slane %v4450_v17, %v8910_v24 }
0x1d73   :  { %v4494_v33 = vsel %vm702_vm2, %v4475_v18, %v4493_v16 }
0x1d74   :  { %v4453_v59 = vpop.permute.xlu1 %4452  ;;  %v4456_v36 = vpop.permute.xlu0 %4455  ;;  %v4495_v32 = vsel %vm704_vm3, %v4479_v37, %v4494_v33 }
0x1d75   :  { %v4483_v7 = vrot.slane %v4453_v59, %v8910_v24  ;;  %v4487_v40 = vrot.slane %v4456_v36, %v8910_v24 }
0x1d77   :  { %v4496_v50 = vsel %vm706_vm4, %v4483_v7, %v4495_v32 }
0x1d78   :  { %v4459_v26 = vpop.permute.xlu1 %4458  ;;  %v4497_v60 = vsel %vm708_vm5, %v4487_v40, %v4496_v50 }
0x1d79   :  { %v4491_v12 = vrot.slane %v4459_v26, %v8910_v24 }
0x1d7b   :  { %v4498_v48 = vsel %vm710_vm6, %v4491_v12, %v4497_v60 }
0x1d7c   :  { %v4500_v21 = vsel %vm713_vm7, %v4498_v48, -inf }
0x1d7d   :  { %4501 = vmax.xlane.f32.xlu0 %v4500_v21 }
0x1e06   :  { %v4502_v51 = vpop.xlane.xlu0 %4501 }
0x1e07   :  { %v4507_v22 = vrot.slane %v4502_v51, %v8650_v30  ;;  %v4511_v54 = vrot.slane %v4502_v51, %v8911_v35  ;;  %v4515_v31 = vrot.slane %v4502_v51, %v8912_v63  ;;  %v4519_v5 = vrot.slane %v4502_v51, %v8913_v44 }
0x1e08   :  { %v4523_v18 = vrot.slane %v4502_v51, %v8914_v55  ;;  %v4527_v33 = vrot.slane %v4502_v51, %v8915_v9  ;;  %v4531_v7 = vrot.slane %v4502_v51, %v8916_v25 }
0x1e09   :  { %v4544_v53 = vsub.f32 %v4420_v1, %v4507_v22  ;;  %v4545_v0 = vsub.f32 %v4421_v47, %v4511_v54  ;;  %v4546_v13 = vsub.f32 %v4422_v34, %v4515_v31  ;;  %v4547_v16 = vsub.f32 %v4423_v29, %v4519_v5 }
0x1e0a   :  { %v4548_v59 = vsub.f32 %v4424_v4, %v4523_v18  ;;  %v4549_v1 = vsub.f32 %v4425_v27, %v4527_v33  ;;  %v4535_v34 = vrot.slane %v4502_v51, %v8917_v62  ;;  %v4550_v40 = vsub.f32 %v4426_v57, %v4531_v7 }
0x1e0b   :  { %v4552_v14 = vmul.f32 1.442695, %v4544_v53  ;;  %v4554_v17 = vmul.f32 1.442695, %v4545_v0  ;;  %v4556_v37 = vmul.f32 1.442695, %v4546_v13 }
0x1e0c   :  { %v4558_v36 = vmul.f32 1.442695, %v4547_v16  ;;  %v4560_v47 = vmul.f32 1.442695, %v4548_v59  ;;  %v4562_v29 = vmul.f32 1.442695, %v4549_v1  ;;  %v4551_v26 = vsub.f32 %v4427_v15, %v4535_v34 }
0x1e0d   :  { %5942 = vpow2.f32 %v4552_v14  ;;  %v4564_v4 = vmul.f32 1.442695, %v4550_v40 }
0x1e0e   :  { %5944 = vpow2.f32 %v4554_v17  ;;  %v4566_v27 = vmul.f32 1.442695, %v4551_v26 }
0x1e0f   :  { %5946 = vpow2.f32 %v4556_v37 }
0x1e10   :  { %5948 = vpow2.f32 %v4558_v36 }
0x1e11   :  { %5950 = vpow2.f32 %v4560_v47 }
0x1e12   :  { %5952 = vpow2.f32 %v4562_v29 }
0x1e13   :  { %5954 = vpow2.f32 %v4564_v4 }
0x1e14   :  { %5956 = vpow2.f32 %v4566_v27 }
0x1e1a   :  { %v8261_v32 = vpop.eup %5942 }
0x1e1b   :  { %4577 = vperm.xlu1 %5706, %v8261_v32   ;;  %v5945_v50 = vpop.eup %5944 }
0x1e1c   :  { %v5947_v12 = vpop.eup %5946 }
0x1e1d   :  { %v5949_v60 = vpop.eup %5948 }
0x1e1e   :  { %v5951_v48 = vpop.eup %5950 }
0x1e1f   :  { %4580 = vperm.xlu1 %5706, %v5945_v50   ;;  %v5953_v21 = vpop.eup %5952 }
0x1e20   :  { %v5955_v51 = vpop.eup %5954 }
0x1e21   :  { %v5957_v57 = vpop.eup %5956 }
0x1e23   :  { %4583 = vperm.xlu1 %5706, %v5947_v12  }
0x1e27   :  { %4586 = vperm.xlu1 %5706, %v5949_v60  }
0x1e2b   :  { %4589 = vperm.xlu1 %5706, %v5951_v48  }
0x1e2f   :  { %4592 = vperm.xlu1 %5706, %v5953_v21  }
0x1e33   :  { %4595 = vperm.xlu1 %5706, %v5955_v51  }
0x1e37   :  { %4598 = vperm.xlu1 %5706, %v5957_v57  }
0x1e96   :  { %v4578_v22 = vpop.permute.xlu1 %4577 }
0x1e97   :  { %v4603_v13 = vrot.slane %v4578_v22, %v8910_v24 }
0x1e9a   :  { %v4581_v54 = vpop.permute.xlu1 %4580 }
0x1e9b   :  { %v4607_v14 = vrot.slane %v4581_v54, %v8910_v24 }
0x1e9d   :  { %v4632_v37 = vsel %vm698_vm0, %v4607_v14, %v4603_v13 }
0x1e9e   :  { %v4584_v15 = vpop.permute.xlu1 %4583 }
0x1e9f   :  { %v4611_v5 = vrot.slane %v4584_v15, %v8910_v24 }
0x1ea1   :  { %v4633_v59 = vsel %vm700_vm1, %v4611_v5, %v4632_v37 }
0x1ea2   :  { %v4587_v31 = vpop.permute.xlu1 %4586 }
0x1ea3   :  { %v4615_v17 = vrot.slane %v4587_v31, %v8910_v24 }
0x1ea5   :  { %v4634_v7 = vsel %vm702_vm2, %v4615_v17, %v4633_v59 }
0x1ea6   :  { %v4590_v53 = vpop.permute.xlu1 %4589 }
0x1ea7   :  { %v4619_v18 = vrot.slane %v4590_v53, %v8910_v24 }
0x1ea9   :  { %v4635_v1 = vsel %vm704_vm3, %v4619_v18, %v4634_v7 }
0x1eaa   :  { %v4593_v0 = vpop.permute.xlu1 %4592 }
0x1eab   :  { %v4623_v33 = vrot.slane %v4593_v0, %v8910_v24 }
0x1ead   :  { %v4636_v34 = vsel %vm706_vm4, %v4623_v33, %v4635_v1  ;;  %v4816_v1 = vld [vmem:[#allocation8] sm:$0xff] }
0x1eae   :  { %v4596_v16 = vpop.permute.xlu1 %4595  ;;  %vm4817_vm9 = vcmp.gt.f32.partialorder %v4816_v1, 0.0 }
0x1eaf   :  { %v4627_v36 = vrot.slane %v4596_v16, %v8910_v24 }
0x1eb1   :  { %v4637_v29 = vsel %vm708_vm5, %v4627_v36, %v4636_v34 }
0x1eb2   :  { %v4599_v47 = vpop.permute.xlu1 %4598 }
0x1eb3   :  { %v4631_v40 = vrot.slane %v4599_v47, %v8910_v24  ;;  %v6415_v47 = vmov 6  }
0x1eb5   :  { %v4638_v26 = vsel %vm710_vm6, %v4631_v40, %v4637_v29  ;;  %v4286_v40 = vpop.f32.mrf.mxu1 }
0x1eb6   :  { %v4640_v4 = vsel %vm713_vm7, %v4638_v26, 0.0 }
0x1eb7   :  { %4641 = vadd.xlane.f32.xlu0 %v4640_v4 }
0x1f40   :  { %v4642_v27 = vpop.xlane.xlu0 %4641 }
0x1f41   :  { %5958 = vrcp.f32 %v4642_v27 }
0x1f42   :  { %5960 = vtanh.f32 %v4286_v40 }
0x1f4e   :  { %v5959_v22 = vpop.eup %5958 }
0x1f4f   :  { %v4644_v54 = vmul.f32 %v5959_v22, %v4642_v27 }
0x1f51   :  { %v4645_v15 = vsub.f32 2.0, %v4644_v54  ;;  %v8936_v54 = vld [vmem:[#allocation30_spill] sm:$0xff] }
0x1f53   :  { %v4646_v31 = vmul.f32 %v5959_v22, %v4645_v15 }
0x1f55   :  { %v4659_v53 = vrot.slane %v4646_v31, %v8912_v63  ;;  %v4655_v0 = vrot.slane %v4646_v31, %v8911_v35  ;;  %v4679_v13 = vrot.slane %v4646_v31, %v8917_v62  ;;  %v4651_v17 = vrot.slane %v4646_v31, %v8650_v30 }
0x1f56   :  { %v4663_v37 = vrot.slane %v4646_v31, %v8913_v44  ;;  %v4667_v59 = vrot.slane %v4646_v31, %v8914_v55  ;;  %v4675_v7 = vrot.slane %v4646_v31, %v8916_v25 }
0x1f57   :  { %v4690_v14 = vmul.f32 %v5947_v12, %v4659_v53  ;;  %v4689_v5 = vmul.f32 %v5945_v50, %v4655_v0  ;;  %v4695_v18 = vmul.f32 %v5957_v57, %v4679_v13  ;;  %v4688_v16 = vmul.f32 %v8261_v32, %v4651_v17 }
0x1f58   :  { %v4691_v33 = vmul.f32 %v5949_v60, %v4663_v37  ;;  %v4692_v36 = vmul.f32 %v5951_v48, %v4667_v59  ;;  %v4671_v50 = vrot.slane %v4646_v31, %v8915_v9  ;;  %v4694_v57 = vmul.f32 %v5955_v51, %v4675_v7  ;;  %v8295_v60 = vld [vmem:[#allocation7 + $0x38] sm:$0xff]  ;;  %v8937_v31 = vld [vmem:[#allocation32_spill] sm:$0xff] }
0x1f59   :  { %4708 = vperm.xlu0 %5704, %v4690_v14   ;;  %4703 = vperm.xlu1 %5706, %v4689_v5   ;;  %v8291_v32 = vsel %vm4817_vm9, 1, %v8928_v23 }
0x1f5a   :  { %v4693_v12 = vmul.f32 %v5953_v21, %v4671_v50  ;;  %8935 = vst [vmem:[#allocation33_spill] sm:$0xff] %v8291_v32  ;;  %5542 = vmatprep.mubr.f32.mxu1 %v8295_v60 }
0x1f5d   :  { %4733 = vperm.xlu0 %5704, %v4695_v18   ;;  %4698 = vperm.xlu1 %5706, %v4688_v16  }
0x1f61   :  { %4713 = vperm.xlu1 %5706, %v4691_v33  }
0x1f65   :  { %4718 = vperm.xlu1 %5706, %v4692_v36  }
0x1f69   :  { %4723 = vperm.xlu1 %5706, %v4693_v12   ;;  %v8939_v12 = vld [vmem:[#allocation24_spill] sm:$0xff] }
0x1f6d   :  { %4728 = vperm.xlu1 %5706, %v4694_v57  }
0x1f71   :  { %5707 = vset.pattern.permute.xlu1 %v6415_v47 }
0x1f72   :  { %4820 = vperm.xlu1 %5707, %v8291_v32  }
0x1f76   :  { %5708 = vset.pattern.permute.xlu1 %v8928_v23 }
0x1fd4   :  { %v4709_v48 = vpop.permute.xlu0 %4708  ;;  %v4704_v21 = vpop.permute.xlu1 %4703 }
0x1fd5   :  { %v4738_v34 = vmul.f32 %v8163_v42, %v4709_v48  ;;  %v4737_v51 = vmul.f32 %v8160_v52, %v4704_v21  ;;  %v8938_v42 = vld [vmem:[#allocation26_spill] sm:$0xff] }
0x1fd7   :  { %v4750_v29 = vrot.slane %v4737_v51, 4  ;;  %v4756_v27 = vrot.slane %v4738_v34, 4 }
0x1fd8   :  { %v4734_v26 = vpop.permute.xlu0 %4733  ;;  %v4699_v4 = vpop.permute.xlu1 %4698 }
0x1fd9   :  { %v4751_v22 = vadd.f32 %v4750_v29, %v4737_v51  ;;  %v4736_v15 = vmul.f32 %v8936_v54, %v4699_v4  ;;  %v4743_v23 = vmul.f32 %v8937_v31, %v4734_v26  ;;  %v4757_v14 = vadd.f32 %v4756_v27, %v4738_v34  ;;  %v8940_v26 = vld [vmem:[#allocation25_spill] sm:$0xff]  ;;  %v5961_v27 = vpop.eup %5960 }
0x1fda   :  { %v4794_v62 = vrot.slane %v5961_v27, 2  ;;  %v4796_v25 = vrot.slane %v5961_v27, 4 }
0x1fdb   :  { %v4744_v53 = vrot.slane %v4736_v15, 4  ;;  %v4752_v5 = vrot.slane %v4751_v22, 2  ;;  %v4786_v17 = vrot.slane %v4743_v23, 4  ;;  %v4758_v33 = vrot.slane %v4757_v14, 2 }
0x1fdc   :  { %v4714_v0 = vpop.permute.xlu1 %4713 }
0x1fdd   :  { %v4745_v13 = vadd.f32 %v4744_v53, %v4736_v15  ;;  %v4739_v18 = vmul.f32 %v8938_v42, %v4714_v0  ;;  %v4753_v59 = vadd.f32 %v4752_v5, %v4751_v22  ;;  %v4787_v36 = vadd.f32 %v4786_v17, %v4743_v23  ;;  %v8941_v0 = vld [vmem:[#allocation29_spill] sm:$0xff] }
0x1fde   :  { %v4759_v21 = vadd.f32 %v4758_v33, %v4757_v14  ;;  %v4793_v14 = vrot.slane %v5961_v27, 1 }
0x1fdf   :  { %v4746_v52 = vrot.slane %v4745_v13, 2  ;;  %v4762_v16 = vrot.slane %v4739_v18, 4  ;;  %v4754_v34 = vrot.slane %v4753_v59, 1  ;;  %v4788_v51 = vrot.slane %v4787_v36, 2 }
0x1fe0   :  { %v4719_v37 = vpop.permute.xlu1 %4718  ;;  %v4760_v53 = vrot.slane %v4759_v21, 1 }
0x1fe1   :  { %v4763_v50 = vadd.f32 %v4762_v16, %v4739_v18  ;;  %v4740_v7 = vmul.f32 %v8939_v12, %v4719_v37  ;;  %v4747_v1 = vadd.f32 %v4746_v52, %v4745_v13  ;;  %v4755_v13 = vadd.f32 %v4754_v34, %v4753_v59 }
0x1fe2   :  { %v4789_v17 = vadd.f32 %v4788_v51, %v4787_v36  ;;  %v4761_v12 = vadd.f32 %v4760_v53, %v4759_v21 }
0x1fe3   :  { %v4764_v57 = vrot.slane %v4763_v50, 2  ;;  %v4768_v47 = vrot.slane %v4740_v7, 4  ;;  %v4748_v54 = vrot.slane %v4747_v1, 1 }
0x1fe4   :  { %v4724_v48 = vpop.permute.xlu1 %4723  ;;  %v4810_v51 = vadd.f32 %v4794_v62, %v4761_v12 }
0x1fe5   :  { %v4765_v40 = vadd.f32 %v4764_v57, %v4763_v50  ;;  %v4769_v29 = vadd.f32 %v4768_v47, %v4740_v7  ;;  %v4741_v4 = vmul.f32 %v8940_v26, %v4724_v48  ;;  %v4749_v16 = vadd.f32 %v4748_v54, %v4747_v1 }
0x1fe6   :  { %v4795_v7 = vrot.slane %v5961_v27, 3  ;;  %v4809_v47 = vadd.f32 %v4793_v14, %v4755_v13  ;;  %v4790_v48 = vrot.slane %v4789_v17, 1 }
0x1fe7   :  { %v4766_v15 = vrot.slane %v4765_v40, 1  ;;  %v4770_v31 = vrot.slane %v4769_v29, 2  ;;  %v4774_v22 = vrot.slane %v4741_v4, 4  ;;  %v4808_v59 = vadd.f32 %v5961_v27, %v4749_v16 }
0x1fe8   :  { %v4729_v23 = vpop.permute.xlu1 %4728  ;;  %v4831_v1 = vrot.slane %v4809_v47, 7 }
0x1fe9   :  { %v4742_v5 = vmul.f32 %v8941_v0, %v4729_v23  ;;  %v4771_v42 = vadd.f32 %v4770_v31, %v4769_v29  ;;  %v4775_v18 = vadd.f32 %v4774_v22, %v4741_v4  ;;  %v4767_v37 = vadd.f32 %v4766_v15, %v4765_v40 }
0x1fea   :  { %v4791_v40 = vadd.f32 %v4790_v48, %v4789_v17  ;;  %v4797_v15 = vrot.slane %v5961_v27, 5  ;;  %v4799_v31 = vrot.slane %v5961_v27, 7  ;;  %v4832_v22 = vsel %vm698_vm0, %v4831_v1, %v4808_v59 }
0x1feb   :  { %v4780_v52 = vrot.slane %v4742_v5, 4  ;;  %v4772_v33 = vrot.slane %v4771_v42, 1  ;;  %v4776_v50 = vrot.slane %v4775_v18, 2  ;;  %v4811_v36 = vadd.f32 %v4795_v7, %v4767_v37 }
0x1fec   :  { %v4815_v14 = vadd.f32 %v4799_v31, %v4791_v40 }
0x1fed   :  { %v4781_v57 = vadd.f32 %v4780_v52, %v4742_v5  ;;  %v4773_v26 = vadd.f32 %v4772_v33, %v4771_v42  ;;  %v4777_v32 = vadd.f32 %v4776_v50, %v4775_v18  ;;  %v4835_v53 = vrot.slane %v4811_v36, 5  ;;  %v4821_v62 = vpop.permute.xlu1 %4820 }
0x1fee   :  { %v4833_v5 = vrot.slane %v4810_v51, 6  ;;  %v4798_v18 = vrot.slane %v5961_v27, 6  ;;  %vm4822_vm10 = vcmp.eq.s32.totalorder %v4821_v62, 1  ;;  %v4843_v50 = vrot.slane %v4815_v14, 1 }
0x1fef   :  { %v4782_v23 = vrot.slane %v4781_v57, 2  ;;  %v4778_v34 = vrot.slane %v4777_v32, 1  ;;  %v4812_v29 = vadd.f32 %v4796_v25, %v4773_v26 }
0x1ff0   :  { %v4834_v25 = vsel %vm700_vm1, %v4833_v5, %v4832_v22 }
0x1ff1   :  { %v4783_v4 = vadd.f32 %v4782_v23, %v4781_v57  ;;  %v4779_v54 = vadd.f32 %v4778_v34, %v4777_v32  ;;  %v4837_v13 = vrot.slane %v4812_v29, 4  ;;  %v4836_v17 = vsel %vm702_vm2, %v4835_v53, %v4834_v25 }
0x1ff3   :  { %v4784_v21 = vrot.slane %v4783_v4, 1  ;;  %v4813_v0 = vadd.f32 %v4797_v15, %v4779_v54  ;;  %v4838_v37 = vsel %vm704_vm3, %v4837_v13, %v4836_v17 }
0x1ff5   :  { %v4785_v42 = vadd.f32 %v4784_v21, %v4783_v4  ;;  %v4839_v52 = vrot.slane %v4813_v0, 3 }
0x1ff7   :  { %v4814_v16 = vadd.f32 %v4798_v18, %v4785_v42  ;;  %v4840_v33 = vsel %vm706_vm4, %v4839_v52, %v4838_v37 }
0x1ff9   :  { %v4841_v32 = vrot.slane %v4814_v16, 2 }
0x1ffb   :  { %v4842_v12 = vsel %vm708_vm5, %v4841_v32, %v4840_v33 }
0x1ffc   :  { %v4844_v7 = vsel %vm710_vm6, %v4843_v50, %v4842_v12 }
0x1ffd   :  { %v8314_v27 = vsel %vm4822_vm10, %v4844_v7, %v8192_v56 }
0x1ffe   :  { %4913 = vmatprep.mubr.f32.mxu0 %v8314_v27 }
0x1fff   :  { %4914 = vmatmul.mubr.f32.vlgmr.msra.gmra.mxu0 %v8295_v60 }
0x20bf   :  { %v4915_v57 = vpop.f32.mrf.mxu0 }
0x20c0   :  { %v4922_v47 = vcombine.high %v4915_v57, %v4915_v57  ;;  %v4929_v48 = vrot.slane %v4915_v57, %v6884_v10 }
0x20c2   :  { %v4936_v26 = vrot.slane %v4922_v47, %v6884_v10  ;;  %v4937_v23 = vcombine.high %v4929_v48, %v4929_v48  ;;  %v4945_v59 = vrot.slane %v4929_v48, %v6884_v10 }
0x20c4   :  { %v4938_v36 = vcombine.high %v4936_v26, %v4936_v26  ;;  %v4952_v34 = vrot.slane %v4936_v26, %v6884_v10  ;;  %v4959_v51 = vrot.slane %v4937_v23, %v6884_v10  ;;  %v4967_v56 = vcombine.high %v4945_v59, %v4945_v59 }
0x20c5   :  { %v4974_v29 = vrot.slane %v4945_v59, %v8650_v30 }
0x20c6   :  { %v4968_v4 = vcombine.high %v4952_v34, %v4952_v34  ;;  %v4969_v1 = vcombine.high %v4959_v51, %v4959_v51  ;;  %v4978_v60 = vrot.slane %v4959_v51, %v8650_v30  ;;  %v4966_v40 = vrot.slane %v4938_v36, %v6884_v10 }
0x20c7   :  { %v4982_v54 = vrot.slane %v4967_v56, %v8650_v30  ;;  %v4990_v15 = vrot.slane %v4952_v34, %v8650_v30  ;;  %v5011_v21 = vadd.f32 %v4974_v29, %v6879_v6 }
0x20c8   :  { %v4986_v31 = vrot.slane %v4969_v1, %v8650_v30  ;;  %v4998_v22 = vrot.slane %v4968_v4, %v8650_v30  ;;  %v5012_v53 = vadd.f32 %v6877_v3, %v4978_v60  ;;  %v4970_v13 = vcombine.high %v4966_v40, %v4966_v40 }
0x20c9   :  { %v5013_v0 = vadd.f32 %v4982_v54, %v6886_v11  ;;  %5962 = vtanh.f32 %v5011_v21  ;;  %v5015_v5 = vadd.f32 %v4990_v15, %v6895_v28  ;;  %v4994_v10 = vrot.slane %v4966_v40, %v8650_v30 }
0x20ca   :  { %v5014_v42 = vadd.f32 %v6881_v8, %v4986_v31  ;;  %5964 = vtanh.f32 %v5012_v53  ;;  %v5017_v6 = vadd.f32 %v4998_v22, %v6912_v58  ;;  %v5002_v18 = vrot.slane %v4970_v13, %v8650_v30 }
0x20cb   :  { %5966 = vtanh.f32 %v5013_v0  ;;  %v5016_v14 = vadd.f32 %v8900_v49, %v4994_v10 }
0x20cc   :  { %5968 = vtanh.f32 %v5015_v5  ;;  %v5018_v3 = vadd.f32 %v8901_v39, %v5002_v18 }
0x20cd   :  { %5970 = vtanh.f32 %v5014_v42 }
0x20ce   :  { %5972 = vtanh.f32 %v5017_v6 }
0x20cf   :  { %5974 = vtanh.f32 %v5016_v14 }
0x20d0   :  { %5976 = vtanh.f32 %v5018_v3 }
0x20d6   :  { %v5963_v11 = vpop.eup %5962 }
0x20d7   :  { %v5027_v28 = vmul.f32 %v8220_v20, %v5963_v11  ;;  %v5965_v52 = vpop.eup %5964 }
0x20d8   :  { %v5967_v8 = vpop.eup %5966  ;;  %v5028_v16 = vmul.f32 %v8220_v20, %v5965_v52 }
0x20d9   :  { %5035 = vadd.xlane.f32.xlu0 %v5027_v28  ;;  %v5969_v58 = vpop.eup %5968  ;;  %v5029_v62 = vmul.f32 %v8220_v20, %v5967_v8 }
0x20da   :  { %5037 = vadd.xlane.f32.xlu1 %v5028_v16  ;;  %v5971_v25 = vpop.eup %5970  ;;  %v5031_v49 = vmul.f32 %v8220_v20, %v5969_v58 }
0x20db   :  { %v5973_v17 = vpop.eup %5972  ;;  %v5030_v39 = vmul.f32 %v8220_v20, %v5971_v25 }
0x20dc   :  { %v5975_v32 = vpop.eup %5974  ;;  %v5033_v37 = vmul.f32 %v8220_v20, %v5973_v17 }
0x20dd   :  { %5039 = vadd.xlane.f32.xlu0 %v5029_v62  ;;  %v5032_v33 = vmul.f32 %v8220_v20, %v5975_v32  ;;  %v5977_v50 = vpop.eup %5976 }
0x20de   :  { %5043 = vadd.xlane.f32.xlu1 %v5031_v49  ;;  %v5034_v12 = vmul.f32 %v8220_v20, %v5977_v50 }
0x20e1   :  { %5041 = vadd.xlane.f32.xlu0 %v5030_v39 }
0x20e2   :  { %5047 = vadd.xlane.f32.xlu1 %v5033_v37 }
0x20e5   :  { %5045 = vadd.xlane.f32.xlu0 %v5032_v33 }
0x20e9   :  { %5049 = vadd.xlane.f32.xlu0 %v5034_v12 }
0x2162   :  { %v5036_v7 = vpop.xlane.xlu0 %5035 }
0x2163   :  { %v5051_v57 = vadd.f32 %v5036_v7, %v8902_v61  ;;  %v5038_v47 = vpop.xlane.xlu1 %5037  ;;  %v8942_v7 = vld [vmem:[#allocation37_spill] sm:$0xff] }
0x2164   :  { %v5052_v48 = vadd.f32 %v5038_v47, %v8903_v45 }
0x2165   :  { %5068 = vperm.xlu1 %5708, %v5051_v57  }
0x2166   :  { %v5040_v26 = vpop.xlane.xlu0 %5039  ;;  %5071 = vperm.xlu0 %5704, %v5052_v48  }
0x2167   :  { %v5053_v23 = vadd.f32 %v5040_v26, %v8904_v46  ;;  %v5044_v59 = vpop.xlane.xlu1 %5043 }
0x2168   :  { %v5055_v36 = vadd.f32 %v5044_v59, %v8905_v43 }
0x2169   :  { %5074 = vperm.xlu1 %5708, %v5053_v23  }
0x216a   :  { %v5042_v34 = vpop.xlane.xlu0 %5041  ;;  %5080 = vperm.xlu0 %5704, %v5055_v36  }
0x216b   :  { %v5054_v51 = vadd.f32 %v5042_v34, %v8906_v41  ;;  %v5048_v20 = vpop.xlane.xlu1 %5047 }
0x216c   :  { %v5057_v56 = vadd.f32 %v5048_v20, %v8907_v38 }
0x216d   :  { %5077 = vperm.xlu1 %5708, %v5054_v51  }
0x216e   :  { %v5046_v61 = vpop.xlane.xlu0 %5045  ;;  %5086 = vperm.xlu0 %5704, %v5057_v56  }
0x216f   :  { %v5056_v45 = vadd.f32 %v5046_v61, %v8908_v19 }
0x2171   :  { %5083 = vperm.xlu1 %5708, %v5056_v45  }
0x2172   :  { %v5050_v29 = vpop.xlane.xlu0 %5049 }
0x2173   :  { %v5058_v46 = vadd.f32 %v5050_v29, %v8909_v2 }
0x2175   :  { %5089 = vperm.xlu1 %5708, %v5058_v46  }
0x21e0   :  { %v5069_v4 = vpop.permute.xlu1 %5068 }
0x21e1   :  { %v5072_v43 = vpop.permute.xlu0 %5071  ;;  %v5094_v41 = vrot.slane %v5069_v4, %v8910_v24 }
0x21e2   :  { %v5098_v1 = vrot.slane %v5072_v43, %v8910_v24 }
0x21e4   :  { %v5075_v60 = vpop.permute.xlu1 %5074  ;;  %v5123_v38 = vsel %vm698_vm0, %v5098_v1, %v5094_v41 }
0x21e5   :  { %v5102_v40 = vrot.slane %v5075_v60, %v8910_v24  ;;  %v5081_v54 = vpop.permute.xlu0 %5080 }
0x21e6   :  { %v5110_v31 = vrot.slane %v5081_v54, %v8910_v24 }
0x21e7   :  { %v5124_v21 = vsel %vm700_vm1, %v5102_v40, %v5123_v38 }
0x21e8   :  { %v5078_v15 = vpop.permute.xlu1 %5077 }
0x21e9   :  { %v5106_v19 = vrot.slane %v5078_v15, %v8910_v24  ;;  %v5087_v53 = vpop.permute.xlu0 %5086 }
0x21ea   :  { %v5118_v10 = vrot.slane %v5087_v53, %v8910_v24 }
0x21eb   :  { %v5125_v2 = vsel %vm702_vm2, %v5106_v19, %v5124_v21 }
0x21ec   :  { %v5084_v22 = vpop.permute.xlu1 %5083  ;;  %v5126_v5 = vsel %vm704_vm3, %v5110_v31, %v5125_v2 }
0x21ed   :  { %v5114_v0 = vrot.slane %v5084_v22, %v8910_v24 }
0x21ef   :  { %v5127_v13 = vsel %vm706_vm4, %v5114_v0, %v5126_v5 }
0x21f0   :  { %v5090_v42 = vpop.permute.xlu1 %5089  ;;  %v5128_v18 = vsel %vm708_vm5, %v5118_v10, %v5127_v13 }
0x21f1   :  { %v5122_v6 = vrot.slane %v5090_v42, %v8910_v24 }
0x21f3   :  { %v5129_v14 = vsel %vm710_vm6, %v5122_v6, %v5128_v18 }
0x21f4   :  { %v5131_v3 = vsel %vm713_vm7, %v5129_v14, -inf }
0x21f5   :  { %5132 = vmax.xlane.f32.xlu0 %v5131_v3 }
0x227e   :  { %v5133_v11 = vpop.xlane.xlu0 %5132 }
0x227f   :  { %v5138_v28 = vrot.slane %v5133_v11, %v8650_v30  ;;  %v5142_v52 = vrot.slane %v5133_v11, %v8911_v35  ;;  %v5146_v8 = vrot.slane %v5133_v11, %v8912_v63  ;;  %v5150_v25 = vrot.slane %v5133_v11, %v8913_v44 }
0x2280   :  { %v5154_v39 = vrot.slane %v5133_v11, %v8914_v55  ;;  %v5158_v33 = vrot.slane %v5133_v11, %v8915_v9  ;;  %v5162_v47 = vrot.slane %v5133_v11, %v8942_v7 }
0x2281   :  { %v5175_v16 = vsub.f32 %v5051_v57, %v5138_v28  ;;  %v5176_v58 = vsub.f32 %v5052_v48, %v5142_v52  ;;  %v5177_v49 = vsub.f32 %v5053_v23, %v5146_v8  ;;  %v5178_v32 = vsub.f32 %v5054_v51, %v5150_v25  ;;  %v8943_v23 = vld [vmem:[#allocation23_spill] sm:$0xff] }
0x2282   :  { %v5179_v50 = vsub.f32 %v5055_v36, %v5154_v39  ;;  %v5180_v57 = vsub.f32 %v5056_v45, %v5158_v33  ;;  %v5166_v59 = vrot.slane %v5133_v11, %v8943_v23  ;;  %v5181_v34 = vsub.f32 %v5057_v56, %v5162_v47 }
0x2283   :  { %v5183_v62 = vmul.f32 1.442695, %v5175_v16  ;;  %v5185_v17 = vmul.f32 1.442695, %v5176_v58  ;;  %v5187_v37 = vmul.f32 1.442695, %v5177_v49 }
0x2284   :  { %v5189_v12 = vmul.f32 1.442695, %v5178_v32  ;;  %v5191_v48 = vmul.f32 1.442695, %v5179_v50  ;;  %v5193_v51 = vmul.f32 1.442695, %v5180_v57  ;;  %v5182_v61 = vsub.f32 %v5058_v46, %v5166_v59 }
0x2285   :  { %5978 = vpow2.f32 %v5183_v62  ;;  %v5195_v36 = vmul.f32 1.442695, %v5181_v34  ;;  %v6416_v50 = vmov 7   ;;  %v241_v59 = vld [vmem:[#allocation13 + $0xf8] sm:$0xff]  ;;  %v224_v34 = vld [vmem:[#allocation13 + $0x70] sm:$0xff] }
0x2286   :  { %5980 = vpow2.f32 %v5185_v17  ;;  %v5197_v45 = vmul.f32 1.442695, %v5182_v61  ;;  %5594 = vmatprep.subr.mxu1 %v241_v59  ;;  %v238_v61 = vld [vmem:[#allocation13 + $0xe0] sm:$0xff] }
0x2287   :  { %5982 = vpow2.f32 %v5187_v37 }
0x2288   :  { %5984 = vpow2.f32 %v5189_v12  ;;  %v8944_v12 = vld [vmem:[#allocation33_spill] sm:$0xff] }
0x2289   :  { %5986 = vpow2.f32 %v5191_v48 }
0x228a   :  { %5988 = vpow2.f32 %v5193_v51 }
0x228b   :  { %5990 = vpow2.f32 %v5195_v36 }
0x228c   :  { %5992 = vpow2.f32 %v5197_v45  ;;  %v221_v45 = vld [vmem:[#allocation13 + $0x58] sm:$0xff] }
0x2292   :  { %v8379_v26 = vpop.eup %5978 }
0x2293   :  { %5208 = vperm.xlu1 %5708, %v8379_v26   ;;  %v5981_v20 = vpop.eup %5980 }
0x2294   :  { %v5983_v29 = vpop.eup %5982 }
0x2295   :  { %v5985_v4 = vpop.eup %5984 }
0x2296   :  { %v5987_v43 = vpop.eup %5986 }
0x2297   :  { %5211 = vperm.xlu1 %5708, %v5981_v20   ;;  %v5989_v1 = vpop.eup %5988 }
0x2298   :  { %v8383_v60 = vpop.eup %5990 }
0x2299   :  { %v8386_v56 = vpop.eup %5992 }
0x229b   :  { %5214 = vperm.xlu1 %5708, %v5983_v29  }
0x229f   :  { %5217 = vperm.xlu1 %5708, %v5985_v4  }
0x22a3   :  { %5220 = vperm.xlu1 %5708, %v5987_v43  }
0x22a7   :  { %5223 = vperm.xlu1 %5708, %v5989_v1  }
0x22ab   :  { %5226 = vperm.xlu1 %5708, %v8383_v60  }
0x22af   :  { %5229 = vperm.xlu1 %5708, %v8386_v56  }
0x230e   :  { %v5209_v46 = vpop.permute.xlu1 %5208 }
0x230f   :  { %v5234_v2 = vrot.slane %v5209_v46, %v8910_v24  ;;  %v218_v46 = vld [vmem:[#allocation13 + $0x40] sm:$0xff] }
0x2312   :  { %v5212_v41 = vpop.permute.xlu1 %5211 }
0x2313   :  { %v5238_v19 = vrot.slane %v5212_v41, %v8910_v24  ;;  %v233_v41 = vld [vmem:[#allocation13 + $0xb8] sm:$0xff] }
0x2315   :  { %v5263_v0 = vsel %vm698_vm0, %v5238_v19, %v5234_v2  ;;  %v230_v19 = vld [vmem:[#allocation13 + $0xa0] sm:$0xff]  ;;  %v229_v2 = vld [vmem:[#allocation13 + $0x98] sm:$0xff] }
0x2316   :  { %v5215_v40 = vpop.permute.xlu1 %5214 }
0x2317   :  { %v5242_v21 = vrot.slane %v5215_v40, %v8910_v24  ;;  %v232_v40 = vld [vmem:[#allocation13 + $0xb0] sm:$0xff] }
0x2319   :  { %v5264_v13 = vsel %vm700_vm1, %v5242_v21, %v5263_v0  ;;  %v214_v21 = vld [vmem:[#allocation13 + $0x20] sm:$0xff]  ;;  %v227_v0 = vld [vmem:[#allocation13 + $0x88] sm:$0xff] }
0x231a   :  { %v5218_v38 = vpop.permute.xlu1 %5217 }
0x231b   :  { %v5246_v31 = vrot.slane %v5218_v38, %v8910_v24  ;;  %v216_v38 = vld [vmem:[#allocation13 + $0x30] sm:$0xff] }
0x231d   :  { %v5265_v42 = vsel %vm702_vm2, %v5246_v31, %v5264_v13  ;;  %v213_v31 = vld [vmem:[#allocation13 + $0x18] sm:$0xff]  ;;  %v226_v13 = vld [vmem:[#allocation13 + $0x80] sm:$0xff] }
0x231e   :  { %v5221_v54 = vpop.permute.xlu1 %5220 }
0x231f   :  { %v5250_v22 = vrot.slane %v5221_v54, %v8910_v24  ;;  %v231_v54 = vld [vmem:[#allocation13 + $0xa8] sm:$0xff] }
0x2321   :  { %v5266_v6 = vsel %vm704_vm3, %v5250_v22, %v5265_v42  ;;  %v228_v22 = vld [vmem:[#allocation13 + $0x90] sm:$0xff] }
0x2322   :  { %v5224_v15 = vpop.permute.xlu1 %5223 }
0x2323   :  { %v5254_v5 = vrot.slane %v5224_v15, %v8910_v24  ;;  %v215_v15 = vld [vmem:[#allocation13 + $0x28] sm:$0xff] }
0x2325   :  { %v5267_v14 = vsel %vm706_vm4, %v5254_v5, %v5266_v6  ;;  %v211_v5 = vld [vmem:[#allocation13 + $0x8] sm:$0xff] }
0x2326   :  { %v5227_v53 = vpop.permute.xlu1 %5226 }
0x2327   :  { %v5258_v10 = vrot.slane %v5227_v53, %v8910_v24  ;;  %v212_v53 = vld [vmem:[#allocation13 + $0x10] sm:$0xff] }
0x2329   :  { %v5268_v11 = vsel %vm708_vm5, %v5258_v10, %v5267_v14  ;;  %v210_v10 = vld [vmem:[#allocation13] sm:$0xff] }
0x232a   :  { %v5230_v18 = vpop.permute.xlu1 %5229 }
0x232b   :  { %v5262_v3 = vrot.slane %v5230_v18, %v8910_v24  ;;  %v6218_v18 = vld [vmem:[#allocation2 + $0x8] sm:$0xff] }
0x232d   :  { %v5269_v28 = vsel %vm710_vm6, %v5262_v3, %v5268_v11  ;;  %v6219_v3 = vld [vmem:[#allocation2 + $0x10] sm:$0xff] }
0x232e   :  { %v5271_v52 = vsel %vm713_vm7, %v5269_v28, 0.0 }
0x232f   :  { %5272 = vadd.xlane.f32.xlu0 %v5271_v52 }
0x23b8   :  { %v5273_v8 = vpop.xlane.xlu0 %5272 }
0x23b9   :  { %5994 = vrcp.f32 %v5273_v8 }
0x23c6   :  { %v5995_v16 = vpop.eup %5994 }
0x23c7   :  { %v5275_v58 = vmul.f32 %v5995_v16, %v5273_v8  ;;  %v6220_v8 = vld [vmem:[#allocation2] sm:$0xff] }
0x23c9   :  { %v5276_v62 = vsub.f32 2.0, %v5275_v58  ;;  %v4917_v58 = vpop.f32.mrf.mxu0 }
0x23ca   :  { %5996 = vtanh.f32 %v4917_v58 }
0x23cb   :  { %v5277_v25 = vmul.f32 %v5995_v16, %v5276_v62 }
0x23cd   :  { %v5290_v49 = vrot.slane %v5277_v25, %v8912_v63  ;;  %v5286_v17 = vrot.slane %v5277_v25, %v8911_v35  ;;  %v5282_v24 = vrot.slane %v5277_v25, %v8650_v30  ;;  %v5294_v33 = vrot.slane %v5277_v25, %v8913_v44  ;;  %v240_v44 = vld [vmem:[#allocation13 + $0xf0] sm:$0xff] }
0x23ce   :  { %v5298_v63 = vrot.slane %v5277_v25, %v8914_v55  ;;  %v5302_v57 = vrot.slane %v5277_v25, %v8915_v9  ;;  %v5306_v48 = vrot.slane %v5277_v25, %v8942_v7  ;;  %v5310_v55 = vrot.slane %v5277_v25, %v8943_v23  ;;  %v223_v9 = vld [vmem:[#allocation13 + $0x68] sm:$0xff]  ;;  %v222_v7 = vld [vmem:[#allocation13 + $0x60] sm:$0xff]  ;;  %v220_v23 = vld [vmem:[#allocation13 + $0x50] sm:$0xff] }
0x23cf   :  { %v5321_v39 = vmul.f32 %v5983_v29, %v5290_v49  ;;  %v5320_v32 = vmul.f32 %v5981_v20, %v5286_v17  ;;  %v5319_v37 = vmul.f32 %v8379_v26, %v5282_v24  ;;  %v5322_v47 = vmul.f32 %v5985_v4, %v5294_v33  ;;  %v225_v26 = vld [vmem:[#allocation13 + $0x78] sm:$0xff]  ;;  %v239_v20 = vld [vmem:[#allocation13 + $0xe8] sm:$0xff]  ;;  %v236_v4 = vld [vmem:[#allocation13 + $0xd0] sm:$0xff] }
0x23d0   :  { %v5323_v35 = vmul.f32 %v5987_v43, %v5298_v63  ;;  %v5324_v30 = vmul.f32 %v5989_v1, %v5302_v57  ;;  %5595 = vmatpush3.msra.mxu1 %v225_v26  ;;  %v5325_v51 = vmul.f32 %v8383_v60, %v5306_v48  ;;  %v5326_v36 = vmul.f32 %v8386_v56, %v5310_v55  ;;  %v237_v29 = vld [vmem:[#allocation13 + $0xd8] sm:$0xff]  ;;  %v235_v43 = vld [vmem:[#allocation13 + $0xc8] sm:$0xff]  ;;  %v234_v60 = vld [vmem:[#allocation13 + $0xc0] sm:$0xff] }
0x23d1   :  { %5339 = vperm.xlu0 %5704, %v5321_v39   ;;  %5334 = vperm.xlu1 %5708, %v5320_v32   ;;  %v219_v1 = vld [vmem:[#allocation13 + $0x48] sm:$0xff]  ;;  %v217_v56 = vld [vmem:[#allocation13 + $0x38] sm:$0xff]  ;;  %v6222_v63 = vld [vmem:[#allocation2 + $0x20] sm:$0xff] }
0x23d2   :  { %5596 = vmatprep.subr.mxu1 %v240_v44  ;;  %v6221_v39 = vld [vmem:[#allocation2 + $0x18] sm:$0xff] }
0x23d3   :  { %5597 = vmatpush3.msra.mxu1 %v224_v34 }
0x23d4   :  { %5598 = vmatprep.subr.mxu1 %v239_v20 }
0x23d5   :  { %5329 = vperm.xlu1 %5708, %v5319_v37   ;;  %5709 = vset.pattern.permute.xlu0 %v6416_v50 }
0x23d6   :  { %5451 = vperm.xlu0 %5709, %v8944_v12   ;;  %5599 = vmatpush3.msra.mxu1 %v223_v9 }
0x23d7   :  { %5600 = vmatprep.subr.mxu1 %v238_v61 }
0x23d8   :  { %5601 = vmatpush3.msra.mxu1 %v222_v7 }
0x23d9   :  { %5344 = vperm.xlu1 %5708, %v5322_v47   ;;  %5602 = vmatprep.subr.mxu1 %v237_v29 }
0x23da   :  { %5603 = vmatpush3.msra.mxu1 %v221_v45 }
0x23db   :  { %5604 = vmatprep.subr.mxu1 %v236_v4  ;;  %v6224_v4 = vld [vmem:[#allocation2 + $0x30] sm:$0xff] }
0x23dc   :  { %5605 = vmatpush3.msra.mxu1 %v220_v23 }
0x23dd   :  { %5349 = vperm.xlu1 %5708, %v5323_v35   ;;  %5606 = vmatprep.subr.mxu1 %v235_v43 }
0x23de   :  { %5607 = vmatpush3.msra.mxu1 %v219_v1 }
0x23df   :  { %5608 = vmatprep.subr.mxu1 %v234_v60  ;;  %v5997_v60 = vpop.eup %5996 }
0x23e0   :  { %5609 = vmatpush3.msra.mxu1 %v218_v46  ;;  %v5428_v58 = vrot.slane %v5997_v60, 5 }
0x23e1   :  { %5354 = vperm.xlu1 %5708, %v5324_v30   ;;  %5610 = vmatprep.subr.mxu1 %v233_v41 }
0x23e2   :  { %5611 = vmatpush3.msra.mxu1 %v217_v56 }
0x23e3   :  { %5612 = vmatprep.subr.mxu1 %v232_v40 }
0x23e4   :  { %5613 = vmatpush3.msra.mxu1 %v216_v38 }
0x23e5   :  { %5359 = vperm.xlu1 %5708, %v5325_v51   ;;  %5614 = vmatprep.subr.mxu1 %v231_v54  ;;  %v6223_v51 = vld [vmem:[#allocation2 + $0x28] sm:$0xff] }
0x23e6   :  { %5615 = vmatpush3.msra.mxu1 %v215_v15 }
0x23e7   :  { %5616 = vmatprep.subr.mxu1 %v230_v19 }
0x23e8   :  { %5617 = vmatpush3.msra.mxu1 %v214_v21 }
0x23e9   :  { %5364 = vperm.xlu1 %5708, %v5326_v36   ;;  %5618 = vmatprep.subr.mxu1 %v229_v2  ;;  %v6225_v2 = vld [vmem:[#allocation2 + $0x38] sm:$0xff] }
0x23ea   :  { %5619 = vmatpush3.msra.mxu1 %v213_v31 }
0x23eb   :  { %5620 = vmatprep.subr.mxu1 %v228_v22  ;;  %v5424_v22 = vrot.slane %v5997_v60, 1 }
0x23ec   :  { %5621 = vmatpush3.msra.mxu1 %v212_v53 }
0x23ed   :  { %5622 = vmatprep.subr.mxu1 %v227_v0 }
0x23ee   :  { %5623 = vmatpush3.msra.mxu1 %v211_v5 }
0x23ef   :  { %5624 = vmatprep.subr.mxu1 %v226_v13 }
0x23f0   :  { %5625 = vmatpush3.msra.mxu1 %v210_v10 }
0x244c   :  { %v5335_v42 = vpop.permute.xlu1 %5334  ;;  %v5340_v6 = vpop.permute.xlu0 %5339 }
0x244d   :  { %v5368_v14 = vmul.f32 %v6218_v18, %v5335_v42  ;;  %v5369_v11 = vmul.f32 %v6219_v3, %v5340_v6  ;;  %v5426_v3 = vrot.slane %v5997_v60, 3 }
0x244f   :  { %v5381_v52 = vrot.slane %v5368_v14, 4  ;;  %v5387_v25 = vrot.slane %v5369_v11, 4 }
0x2450   :  { %v5330_v28 = vpop.permute.xlu1 %5329 }
0x2451   :  { %v5367_v16 = vmul.f32 %v6220_v8, %v5330_v28  ;;  %v5382_v17 = vadd.f32 %v5381_v52, %v5368_v14  ;;  %v5388_v33 = vadd.f32 %v5387_v25, %v5369_v11  ;;  %v5425_v52 = vrot.slane %v5997_v60, 2 }
0x2452   :  { %v5427_v8 = vrot.slane %v5997_v60, 4 }
0x2453   :  { %v5375_v62 = vrot.slane %v5367_v16, 4  ;;  %v5383_v12 = vrot.slane %v5382_v17, 2  ;;  %v5389_v48 = vrot.slane %v5388_v33, 2 }
0x2454   :  { %v5345_v49 = vpop.permute.xlu1 %5344 }
0x2455   :  { %v5370_v32 = vmul.f32 %v6221_v39, %v5345_v49  ;;  %v5376_v24 = vadd.f32 %v5375_v62, %v5367_v16  ;;  %v5384_v44 = vadd.f32 %v5383_v12, %v5382_v17  ;;  %v5390_v61 = vadd.f32 %v5389_v48, %v5388_v33 }
0x2457   :  { %v5393_v37 = vrot.slane %v5370_v32, 4  ;;  %v5377_v57 = vrot.slane %v5376_v24, 2  ;;  %v5385_v45 = vrot.slane %v5384_v44, 1  ;;  %v5391_v40 = vrot.slane %v5390_v61, 1 }
0x2458   :  { %v5350_v50 = vpop.permute.xlu1 %5349 }
0x2459   :  { %v5394_v47 = vadd.f32 %v5393_v37, %v5370_v32  ;;  %v5371_v35 = vmul.f32 %v6222_v63, %v5350_v50  ;;  %v5378_v20 = vadd.f32 %v5377_v57, %v5376_v24  ;;  %v5386_v19 = vadd.f32 %v5385_v45, %v5384_v44 }
0x245a   :  { %v5392_v42 = vadd.f32 %v5391_v40, %v5390_v61  ;;  %v5429_v24 = vrot.slane %v5997_v60, 6  ;;  %v5430_v44 = vrot.slane %v5997_v60, 7 }
0x245b   :  { %v5395_v30 = vrot.slane %v5394_v47, 2  ;;  %v5399_v59 = vrot.slane %v5371_v35, 4  ;;  %v5379_v46 = vrot.slane %v5378_v20, 1  ;;  %v5440_v14 = vadd.f32 %v5424_v22, %v5386_v19 }
0x245c   :  { %v5355_v26 = vpop.permute.xlu1 %5354  ;;  %v5441_v39 = vadd.f32 %v5425_v52, %v5392_v42 }
0x245d   :  { %v5400_v34 = vadd.f32 %v5399_v59, %v5371_v35  ;;  %v5372_v55 = vmul.f32 %v6223_v51, %v5355_v26  ;;  %v5396_v9 = vadd.f32 %v5395_v30, %v5394_v47  ;;  %v5380_v0 = vadd.f32 %v5379_v46, %v5378_v20 }
0x245e   :  { %v5462_v37 = vrot.slane %v5440_v14, 7  ;;  %v5464_v30 = vrot.slane %v5441_v39, 6 }
0x245f   :  { %v5401_v7 = vrot.slane %v5400_v34, 2  ;;  %v5405_v36 = vrot.slane %v5372_v55, 4  ;;  %v5397_v41 = vrot.slane %v5396_v9, 1  ;;  %v5439_v62 = vadd.f32 %v5997_v60, %v5380_v0 }
0x2460   :  { %v5360_v29 = vpop.permute.xlu1 %5359 }
0x2461   :  { %v5373_v23 = vmul.f32 %v6224_v4, %v5360_v29  ;;  %v5402_v43 = vadd.f32 %v5401_v7, %v5400_v34  ;;  %v5406_v1 = vadd.f32 %v5405_v36, %v5372_v55  ;;  %v5398_v5 = vadd.f32 %v5397_v41, %v5396_v9  ;;  %v5452_v55 = vpop.permute.xlu0 %5451 }
0x2462   :  { %v5463_v47 = vsel %vm698_vm0, %v5462_v37, %v5439_v62  ;;  %vm5453_vm7 = vcmp.eq.s32.totalorder %v5452_v55, 1 }
0x2463   :  { %v5411_v56 = vrot.slane %v5373_v23, 4  ;;  %v5403_v38 = vrot.slane %v5402_v43, 1  ;;  %v5407_v54 = vrot.slane %v5406_v1, 2  ;;  %v5442_v25 = vadd.f32 %v5426_v3, %v5398_v5 }
0x2464   :  { %v5365_v15 = vpop.permute.xlu1 %5364  ;;  %v5465_v34 = vsel %vm700_vm1, %v5464_v30, %v5463_v47 }
0x2465   :  { %v5412_v21 = vadd.f32 %v5411_v56, %v5373_v23  ;;  %v5374_v31 = vmul.f32 %v6225_v2, %v5365_v15  ;;  %v5408_v53 = vadd.f32 %v5407_v54, %v5406_v1  ;;  %v5404_v6 = vadd.f32 %v5403_v38, %v5402_v43 }
0x2466   :  { %v5466_v63 = vrot.slane %v5442_v25, 5 }
0x2467   :  { %v5413_v13 = vrot.slane %v5412_v21, 2  ;;  %v5417_v10 = vrot.slane %v5374_v31, 4  ;;  %v5409_v18 = vrot.slane %v5408_v53, 1  ;;  %v5443_v32 = vadd.f32 %v5427_v8, %v5404_v6 }
0x2468   :  { %v5467_v9 = vsel %vm702_vm2, %v5466_v63, %v5465_v34 }
0x2469   :  { %v5414_v11 = vadd.f32 %v5413_v13, %v5412_v21  ;;  %v5418_v28 = vadd.f32 %v5417_v10, %v5374_v31  ;;  %v5410_v16 = vadd.f32 %v5409_v18, %v5408_v53  ;;  %v5468_v48 = vrot.slane %v5443_v32, 4 }
0x246b   :  { %v5415_v49 = vrot.slane %v5414_v11, 1  ;;  %v5419_v17 = vrot.slane %v5418_v28, 2  ;;  %v5444_v33 = vadd.f32 %v5428_v58, %v5410_v16  ;;  %v5469_v61 = vsel %vm704_vm3, %v5468_v48, %v5467_v9 }
0x246d   :  { %v5416_v50 = vadd.f32 %v5415_v49, %v5414_v11  ;;  %v5420_v12 = vadd.f32 %v5419_v17, %v5418_v28  ;;  %v5470_v59 = vrot.slane %v5444_v33, 3 }
0x246f   :  { %v5445_v35 = vadd.f32 %v5429_v24, %v5416_v50  ;;  %v5421_v57 = vrot.slane %v5420_v12, 1  ;;  %v5471_v7 = vsel %vm706_vm4, %v5470_v59, %v5469_v61 }
0x2471   :  { %v5422_v26 = vadd.f32 %v5421_v57, %v5420_v12  ;;  %v5472_v51 = vrot.slane %v5445_v35, 2 }
0x2473   :  { %v5446_v20 = vadd.f32 %v5430_v44, %v5422_v26  ;;  %v5473_v29 = vsel %vm708_vm5, %v5472_v51, %v5471_v7 }
0x2475   :  { %v5474_v36 = vrot.slane %v5446_v20, 1 }
0x2477   :  { %v5475_v45 = vsel %vm710_vm6, %v5474_v36, %v5473_v29 }
0x2478   :  { %v5477_v4 = vsel %vm5453_vm7, %v5475_v45, %v8314_v27 }
0x2479   :  { %5543 = vmatmul.mubr.f32.vlgmr.msra.gmra.mxu1 %v5477_v4 }
0x2539   :  { %v5626_v23 = vpop.f32.mrf.mxu1 }
0x253b   :  { %v5627_v43 = vpop.f32.mrf.mxu1 }
0x253c   :  { %v5628_v1 = vadd.f32 %v5627_v43, %v5626_v23 }
0x253e   :  { %5998 = vtanh.f32 %v5628_v1 }
0x254b   :  { %v5999_v60 = vpop.eup %5998 }
0x254c   :  { %5549 = vst [vmem:[#allocation14] sm:$0xff] %v5999_v60 }
0x254d   :  { %6377 = shalt.err (!%p6374_p11)
}
0x254e   :  { %5559 = dma.vmem_to_hbm [thread:$0]  %s5557_s22, 128, %s8436_s8, [#allocation4]  }
0x254f   :  { %6394 = dma.done.wait [#allocation4], 128  }
0x2550   :  { %6395 = vsyncadd [#allocation4], 4294967168 }
0x2551   :  { %5563 = vsyncpa [#allocation3], 1 }
0x2552   :  { %5564 = vsyncpa [#allocation6], 1 }
0x2553   :  { %5565 = vsyncpa [#allocation9], 1 }
0x2554   :  { %5566 = vsyncpa [#allocation12], 1 }
0x2555   :  { %5567 = vsyncpa [#allocation4], 1 }

</bundles_post_ra>
